<compile_context>
chip_gen: v6e
topology: v6e:2x2x1
jax: 0.10.0
libtpu: 0.0.40
codegen_flags: <defaults>
</compile_context>

<pallas_src>
import math

import jax
import jax.numpy as jnp
from jax.experimental import pallas as pl
from jax.experimental.pallas import tpu as pltpu

# ----------------------------- model hyper-params (small, consistent) --------
B = 2                      # batch
E = 32                     # embedding_dim / hidden_dim
H = 4                      # nhead
HD = E // H                # head dim
FF = 64                    # transformer feed-forward dim
IMG_DIM = 64               # IMAGE_FEATURE_DIM (small synthetic)
T_IMG = 8                  # num image tokens (stands in for 14*14)
Q_LEN = 6                  # question length (<= MAX_QUESTION_LEN)
S_ENC = 1 + T_IMG + Q_LEN  # encoder sequence length (CLS + image + question)
VOCAB_SIZE = 50
PV = 40                    # PROGRAM_VOCAB_SIZE
PVP = 128                  # output head / decoder table padded to full lanes
PROGRAM_SEQ_LEN = 4
L = PROGRAM_SEQ_LEN + 1    # decode length (program + answer)
L_PAD = 8                  # K/V scratch rows (sublane-aligned)
SPECIAL_TOKEN_ID = 1
LN_EPS = 1e-5
NEG_INF = -1e30


# ----------------------------- in-kernel helpers ------------------------------
def _mm(a, b):
    """f32 matmul with f32 accumulation (tiny shapes are latency-bound; bf16 buys nothing)."""
    return jnp.dot(a, b, preferred_element_type=jnp.float32)


def _dot_nt(a, b):
    """(M,K) x (N,K) -> (M,N): contract dim 1 of both operands, no transpose materialized."""
    return jax.lax.dot_general(a, b, (((1,), (1,)), ((), ())),
                               preferred_element_type=jnp.float32)


def _ln(x, g, b):
    """LayerNorm in f32 (input already contains the residual)."""
    mean = jnp.mean(x, axis=-1, keepdims=True)
    var = jnp.mean(jnp.square(x - mean), axis=-1, keepdims=True)
    return (x - mean) * jax.lax.rsqrt(var + LN_EPS) * g + b


def _mha(q, k, v, wo):
    """Multi-head attention for one batch element (no mask needed).

    q: (Rq, E), k/v: (Rk, E), wo: (E, E).  Per-head outputs go through the
    matching row-slice of W_o and are summed (== concat + W_o), so no lane
    shuffles.  Bias is NOT added here.
    """
    scale = 1.0 / math.sqrt(HD)
    out = None
    for h in range(H):                                   # H=4, static
        sl = slice(h * HD, (h + 1) * HD)
        s = _dot_nt(q[:, sl], k[:, sl]) * scale          # (Rq, Rk), no transpose
        s = s - jnp.max(s, axis=-1, keepdims=True)
        p = jnp.exp(s)
        p = p / jnp.sum(p, axis=-1, keepdims=True)       # f32 softmax
        oh = _mm(p, v[:, sl])                            # (Rq, HD)
        ph = _mm(oh, wo[sl, :])                          # (Rq, E)
        out = ph if out is None else out + ph
    return out


# ----------------------------- the single fused kernel ------------------------
def _fused_kernel(base_ref, img_ref,
                  place_ref, img_w_ref, img_b_ref,
                  e_wqkv_ref, e_bqkv_ref, e_wo_ref, e_bo_ref, e_g1_ref, e_b1_ref,
                  e_w1_ref, e_fb1_ref, e_w2_ref, e_fb2_ref, e_g2_ref, e_b2_ref,
                  table_ref, pe_dec_ref,
                  s_wqkv_ref, s_bqkv_ref, s_wo_ref, s_bo_ref, d_g1_ref, d_b1_ref,
                  c_wq_ref, c_bq_ref, c_wkv_ref, c_bkv_ref, c_wo_ref, c_bo_ref,
                  d_g2_ref, d_b2_ref,
                  f_w1_ref, f_b1_ref, f_w2_ref, f_b2_ref, d_g3_ref, d_b3_ref,
                  ow_ref, ob_ref,
                  o_ref, k_sc, v_sc):
    # ---------------- encoder (one batch element per grid step) ----------------
    img_e = _mm(img_ref[0], img_w_ref[...]) + img_b_ref[...]          # (T_IMG, E)
    # static placement matrix inserts the image rows at positions 1..1+T_IMG
    x = base_ref[0] + _mm(place_ref[...], img_e)                      # (S, E)

    qkv = _mm(x, e_wqkv_ref[...]) + e_bqkv_ref[...]                   # (S, 3E)
    q, k, v = qkv[:, :E], qkv[:, E:2 * E], qkv[:, 2 * E:]
    a = _mha(q, k, v, e_wo_ref[...]) + e_bo_ref[...]
    x1 = _ln(x + a, e_g1_ref[...], e_b1_ref[...])

    hdn = jnp.maximum(_mm(x1, e_w1_ref[...]) + e_fb1_ref[...], 0.0)
    ff = _mm(hdn, e_w2_ref[...]) + e_fb2_ref[...]
    memory = _ln(x1 + ff, e_g2_ref[...], e_b2_ref[...])               # (S, E) stays on-chip

    # cross-attention K/V depend only on the fixed memory -> compute once
    kv_mem = _mm(memory, c_wkv_ref[...]) + c_bkv_ref[...]             # (S, 2E)
    k_mem, v_mem = kv_mem[:, :E], kv_mem[:, E:]

    # ---------------- incremental autoregressive decoder -----------------------
    table = table_ref[...]                                            # (PVP, E)
    col = jax.lax.broadcasted_iota(jnp.int32, (1, PVP), 1)
    onehot = (col == SPECIAL_TOKEN_ID).astype(jnp.float32)            # SOS token

    for t in range(L):                                                # statically unrolled
        # embed ONLY the new target row (one-hot matmul) + positional encoding
        emb_t = _mm(onehot, table) + pe_dec_ref[t:t + 1, :]           # (1, E)

        # QKV projection for the new row; append K/V to the on-chip cache
        qkv_t = _mm(emb_t, s_wqkv_ref[...]) + s_bqkv_ref[...]         # (1, 3E)
        k_sc[pl.ds(t, 1), :] = qkv_t[:, E:2 * E]
        v_sc[pl.ds(t, 1), :] = qkv_t[:, 2 * E:]
        q_t = qkv_t[:, :E]                                            # (1, E)

        # causal self-attention == attend to rows 0..t of the cache (no mask)
        k_hist = k_sc[0:t + 1, :]
        v_hist = v_sc[0:t + 1, :]
        sa = _mha(q_t, k_hist, v_hist, s_wo_ref[...]) + s_bo_ref[...]
        z1 = _ln(emb_t + sa, d_g1_ref[...], d_b1_ref[...])

        # cross-attention over the encoder memory
        qc = _mm(z1, c_wq_ref[...]) + c_bq_ref[...]
        ca = _mha(qc, k_mem, v_mem, c_wo_ref[...]) + c_bo_ref[...]
        z2 = _ln(z1 + ca, d_g2_ref[...], d_b2_ref[...])

        # FFN
        dh = jnp.maximum(_mm(z2, f_w1_ref[...]) + f_b1_ref[...], 0.0)
        df = _mm(dh, f_w2_ref[...]) + f_b2_ref[...]
        z3 = _ln(z2 + df, d_g3_ref[...], d_b3_ref[...])

        # lane-dense (128-wide) output head; padded columns carry -1e30 bias
        logits_t = _mm(z3, ow_ref[...]) + ob_ref[...]                 # (1, PVP)
        o_ref[:, pl.ds(t, 1), :] = logits_t.reshape(1, 1, PVP)        # direct per-step store

        if t + 1 < L:
            # greedy argmax (first max index, matching torch.max) -> next one-hot
            m = jnp.max(logits_t, axis=-1, keepdims=True)
            cand = jnp.where(logits_t == m, col, PVP)
            nxt = jnp.min(cand, axis=-1, keepdims=True)               # (1, 1) int32
            onehot = (col == nxt).astype(jnp.float32)


# ----------------------------- positional encoding ----------------------------
def positional_encoding(max_len, d_model):
    position = jnp.arange(max_len, dtype=jnp.float32)[:, None]
    div_term = jnp.exp(jnp.arange(0, d_model, 2, dtype=jnp.float32)
                       * (-math.log(10000.0) / d_model))
    pe = jnp.zeros((max_len, d_model), jnp.float32)
    pe = pe.at[:, 0::2].set(jnp.sin(position * div_term))
    pe = pe.at[:, 1::2].set(jnp.cos(position * div_term))
    return pe


# ----------------------------- parameter init (weights packed ONCE here) ------
def _linear_params(key, fan_in, fan_out):
    kw, kb = jax.random.split(key)
    w = jax.random.normal(kw, (fan_in, fan_out), jnp.float32) * 0.05
    b = jax.random.normal(kb, (fan_out,), jnp.float32) * 0.05
    return w, b


def _attn_params(key, e):
    ks = jax.random.split(key, 4)
    p = {}
    p["wq"], p["bq"] = _linear_params(ks[0], e, e)
    p["wk"], p["bk"] = _linear_params(ks[1], e, e)
    p["wv"], p["bv"] = _linear_params(ks[2], e, e)
    p["wo"], p["bo"] = _linear_params(ks[3], e, e)
    return p


def init_params(key):
    ks = jax.random.split(key, 12)
    p = {}

    # glue-side params
    emb = jax.random.normal(ks[0], (VOCAB_SIZE, E), jnp.float32) * 0.05
    p["embedding"] = emb.at[0].set(0.0)                              # padding_idx=0
    p["cls_token"] = jax.random.normal(ks[1], (1, 1, E), jnp.float32)
    p["pe_enc"] = positional_encoding(S_ENC, E)

    # image projection
    img_w, img_b = _linear_params(ks[2], IMG_DIM, E)
    p["img_w"], p["img_b"] = img_w, img_b.reshape(1, E)

    # encoder layer (fused QKV packed once)
    ea = _attn_params(ks[3], E)
    p["e_wqkv"] = jnp.concatenate([ea["wq"], ea["wk"], ea["wv"]], axis=1)
    p["e_bqkv"] = jnp.concatenate([ea["bq"], ea["bk"], ea["bv"]]).reshape(1, 3 * E)
    p["e_wo"], p["e_bo"] = ea["wo"], ea["bo"].reshape(1, E)
    w1, b1 = _linear_params(ks[4], E, FF)
    w2, b2 = _linear_params(ks[5], FF, E)
    p["e_w1"], p["e_fb1"] = w1, b1.reshape(1, FF)
    p["e_w2"], p["e_fb2"] = w2, b2.reshape(1, E)
    p["e_g1"], p["e_b1"] = jnp.ones((1, E), jnp.float32), jnp.zeros((1, E), jnp.float32)
    p["e_g2"], p["e_b2"] = jnp.ones((1, E), jnp.float32), jnp.zeros((1, E), jnp.float32)

    # decoder embedding table, zero-padded to 128 rows (one-hot matmul friendly)
    dec_emb = jax.random.normal(ks[6], (PV, E), jnp.float32) * 0.05
    dec_emb = dec_emb.at[0].set(0.0)                                 # padding_idx=0
    p["table"] = jnp.zeros((PVP, E), jnp.float32).at[:PV].set(dec_emb)
    p["pe_dec"] = positional_encoding(L, E)

    # decoder self-attention (fused QKV)
    da = _attn_params(ks[7], E)
    p["s_wqkv"] = jnp.concatenate([da["wq"], da["wk"], da["wv"]], axis=1)
    p["s_bqkv"] = jnp.concatenate([da["bq"], da["bk"], da["bv"]]).reshape(1, 3 * E)
    p["s_wo"], p["s_bo"] = da["wo"], da["bo"].reshape(1, E)
    p["d_g1"], p["d_b1"] = jnp.ones((1, E), jnp.float32), jnp.zeros((1, E), jnp.float32)

    # decoder cross-attention (fused KV)
    ca = _attn_params(ks[8], E)
    p["c_wq"], p["c_bq"] = ca["wq"], ca["bq"].reshape(1, E)
    p["c_wkv"] = jnp.concatenate([ca["wk"], ca["wv"]], axis=1)
    p["c_bkv"] = jnp.concatenate([ca["bk"], ca["bv"]]).reshape(1, 2 * E)
    p["c_wo"], p["c_bo"] = ca["wo"], ca["bo"].reshape(1, E)
    p["d_g2"], p["d_b2"] = jnp.ones((1, E), jnp.float32), jnp.zeros((1, E), jnp.float32)

    # decoder FFN
    fw1, fb1 = _linear_params(ks[9], E, FF)
    fw2, fb2 = _linear_params(ks[10], FF, E)
    p["f_w1"], p["f_b1"] = fw1, fb1.reshape(1, FF)
    p["f_w2"], p["f_b2"] = fw2, fb2.reshape(1, E)
    p["d_g3"], p["d_b3"] = jnp.ones((1, E), jnp.float32), jnp.zeros((1, E), jnp.float32)

    # output head padded to 128 lanes; padded bias columns can never win argmax
    ow, ob = _linear_params(ks[11], E, PV)
    p["ow"] = jnp.zeros((E, PVP), jnp.float32).at[:, :PV].set(ow)
    p["ob"] = jnp.full((1, PVP), NEG_INF, jnp.float32).at[0, :PV].set(ob)

    # static placement matrix: image token i -> encoder row 1+i (replaces concat)
    p["place"] = jnp.zeros((S_ENC, T_IMG), jnp.float32).at[1:1 + T_IMG, :].set(
        jnp.eye(T_IMG, dtype=jnp.float32))
    return p


# ordered list of packed weights passed to the kernel (after base, image_features)
_KERNEL_PARAM_NAMES = (
    "place", "img_w", "img_b",
    "e_wqkv", "e_bqkv", "e_wo", "e_bo", "e_g1", "e_b1",
    "e_w1", "e_fb1", "e_w2", "e_fb2", "e_g2", "e_b2",
    "table", "pe_dec",
    "s_wqkv", "s_bqkv", "s_wo", "s_bo", "d_g1", "d_b1",
    "c_wq", "c_bq", "c_wkv", "c_bkv", "c_wo", "c_bo", "d_g2", "d_b2",
    "f_w1", "f_b1", "f_w2", "f_b2", "d_g3", "d_b3",
    "ow", "ob",
)


# ----------------------------- forward pass ------------------------------------
@jax.jit
def vqa_forward(params, image_features, questions):
    bb = image_features.shape[0]

    # glue (plain JAX): question-embedding gather, CLS token, PE add
    q_emb = jnp.take(params["embedding"], questions, axis=0)            # (B, Q, E)
    cls = jnp.broadcast_to(params["cls_token"], (bb, 1, E))
    base = jnp.concatenate(
        [cls, jnp.zeros((bb, T_IMG, E), jnp.float32), q_emb], axis=1)   # (B, S, E)
    base = base + params["pe_enc"][None]

    inputs = (base, image_features) + tuple(params[n] for n in _KERNEL_PARAM_NAMES)

    in_specs = []
    for a in inputs:
        if a.ndim == 3:      # per-batch tensors: one batch element per grid step
            in_specs.append(pl.BlockSpec((1,) + a.shape[1:], lambda b: (b, 0, 0)))
        else:                # weights: full array, resident across the grid
            in_specs.append(pl.BlockSpec(a.shape, lambda b: (0, 0)))

    logits = pl.pallas_call(
        _fused_kernel,
        out_shape=jax.ShapeDtypeStruct((bb, L, PVP), jnp.float32),
        grid=(bb,),
        in_specs=in_specs,
        out_specs=pl.BlockSpec((1, L, PVP), lambda b: (b, 0, 0)),
        scratch_shapes=[pltpu.VMEM((L_PAD, E), jnp.float32),   # self-attn K cache
                        pltpu.VMEM((L_PAD, E), jnp.float32)],  # self-attn V cache
        compiler_params=pltpu.CompilerParams(
            dimension_semantics=("parallel",)),                # v7x: 2 TCs, one per batch elem
    )(*inputs)

    return logits[:, :, :PV]                                   # drop lane padding


# ----------------------------- main --------------------------------------------
if __name__ == "__main__":
    key = jax.random.PRNGKey(0)
    kp, ki, kq = jax.random.split(key, 3)
    params = init_params(kp)

    image_features = jax.random.normal(ki, (B, T_IMG, IMG_DIM), jnp.float32)
    questions = jax.random.randint(kq, (B, Q_LEN), 1, VOCAB_SIZE, dtype=jnp.int32)

    seq_logits = vqa_forward(params, image_features, questions)
    seq_logits = jax.block_until_ready(seq_logits)

    assert seq_logits.shape == (B, L, PV), seq_logits.shape
    assert bool(jnp.all(jnp.isfinite(seq_logits)))
    print("KERNEL_OK")
</pallas_src>

<mosaic_0001>
module attributes {stable_mosaic.version = 11 : i64} {
  func.func @_fused_kernel(%arg0: i32, %arg1: memref<1x15x32xf32, #tpu.memory_space<vmem>>, %arg2: memref<1x8x64xf32, #tpu.memory_space<vmem>>, %arg3: memref<15x8xf32, #tpu.memory_space<vmem>>, %arg4: memref<64x32xf32, #tpu.memory_space<vmem>>, %arg5: memref<1x32xf32, #tpu.memory_space<vmem>>, %arg6: memref<32x96xf32, #tpu.memory_space<vmem>>, %arg7: memref<1x96xf32, #tpu.memory_space<vmem>>, %arg8: memref<32x32xf32, #tpu.memory_space<vmem>>, %arg9: memref<1x32xf32, #tpu.memory_space<vmem>>, %arg10: memref<1x32xf32, #tpu.memory_space<vmem>>, %arg11: memref<1x32xf32, #tpu.memory_space<vmem>>, %arg12: memref<32x64xf32, #tpu.memory_space<vmem>>, %arg13: memref<1x64xf32, #tpu.memory_space<vmem>>, %arg14: memref<64x32xf32, #tpu.memory_space<vmem>>, %arg15: memref<1x32xf32, #tpu.memory_space<vmem>>, %arg16: memref<1x32xf32, #tpu.memory_space<vmem>>, %arg17: memref<1x32xf32, #tpu.memory_space<vmem>>, %arg18: memref<128x32xf32, #tpu.memory_space<vmem>>, %arg19: memref<5x32xf32, #tpu.memory_space<vmem>>, %arg20: memref<32x96xf32, #tpu.memory_space<vmem>>, %arg21: memref<1x96xf32, #tpu.memory_space<vmem>>, %arg22: memref<32x32xf32, #tpu.memory_space<vmem>>, %arg23: memref<1x32xf32, #tpu.memory_space<vmem>>, %arg24: memref<1x32xf32, #tpu.memory_space<vmem>>, %arg25: memref<1x32xf32, #tpu.memory_space<vmem>>, %arg26: memref<32x32xf32, #tpu.memory_space<vmem>>, %arg27: memref<1x32xf32, #tpu.memory_space<vmem>>, %arg28: memref<32x64xf32, #tpu.memory_space<vmem>>, %arg29: memref<1x64xf32, #tpu.memory_space<vmem>>, %arg30: memref<32x32xf32, #tpu.memory_space<vmem>>, %arg31: memref<1x32xf32, #tpu.memory_space<vmem>>, %arg32: memref<1x32xf32, #tpu.memory_space<vmem>>, %arg33: memref<1x32xf32, #tpu.memory_space<vmem>>, %arg34: memref<32x64xf32, #tpu.memory_space<vmem>>, %arg35: memref<1x64xf32, #tpu.memory_space<vmem>>, %arg36: memref<64x32xf32, #tpu.memory_space<vmem>>, %arg37: memref<1x32xf32, #tpu.memory_space<vmem>>, %arg38: memref<1x32xf32, #tpu.memory_space<vmem>>, %arg39: memref<1x32xf32, #tpu.memory_space<vmem>>, %arg40: memref<32x128xf32, #tpu.memory_space<vmem>>, %arg41: memref<1x128xf32, #tpu.memory_space<vmem>>, %arg42: memref<1x5x128xf32, #tpu.memory_space<vmem>>, %arg43: memref<8x32xf32, #tpu.memory_space<vmem>>, %arg44: memref<8x32xf32, #tpu.memory_space<vmem>>) attributes {dimension_semantics = [#tpu.dimension_semantics<parallel>], iteration_bounds = array<i64: 2>, scalar_prefetch = 0 : i64, scratch_operands = 2 : i64, tpu.core_type = #tpu.core_type<tc>, window_params = [{transform_indices = @transform_0, window_bounds = array<i64: 1, 15, 32>}, {transform_indices = @transform_1, window_bounds = array<i64: 1, 8, 64>}, {pipeline_mode = #tpu.pipeline_mode<synchronous>, transform_indices = @transform_2, window_bounds = array<i64: 15, 8>}, {pipeline_mode = #tpu.pipeline_mode<synchronous>, transform_indices = @transform_3, window_bounds = array<i64: 64, 32>}, {pipeline_mode = #tpu.pipeline_mode<synchronous>, transform_indices = @transform_4, window_bounds = array<i64: 1, 32>}, {pipeline_mode = #tpu.pipeline_mode<synchronous>, transform_indices = @transform_5, window_bounds = array<i64: 32, 96>}, {pipeline_mode = #tpu.pipeline_mode<synchronous>, transform_indices = @transform_6, window_bounds = array<i64: 1, 96>}, {pipeline_mode = #tpu.pipeline_mode<synchronous>, transform_indices = @transform_7, window_bounds = array<i64: 32, 32>}, {pipeline_mode = #tpu.pipeline_mode<synchronous>, transform_indices = @transform_8, window_bounds = array<i64: 1, 32>}, {pipeline_mode = #tpu.pipeline_mode<synchronous>, transform_indices = @transform_9, window_bounds = array<i64: 1, 32>}, {pipeline_mode = #tpu.pipeline_mode<synchronous>, transform_indices = @transform_10, window_bounds = array<i64: 1, 32>}, {pipeline_mode = #tpu.pipeline_mode<synchronous>, transform_indices = @transform_11, window_bounds = array<i64: 32, 64>}, {pipeline_mode = #tpu.pipeline_mode<synchronous>, transform_indices = @transform_12, window_bounds = array<i64: 1, 64>}, {pipeline_mode = #tpu.pipeline_mode<synchronous>, transform_indices = @transform_13, window_bounds = array<i64: 64, 32>}, {pipeline_mode = #tpu.pipeline_mode<synchronous>, transform_indices = @transform_14, window_bounds = array<i64: 1, 32>}, {pipeline_mode = #tpu.pipeline_mode<synchronous>, transform_indices = @transform_15, window_bounds = array<i64: 1, 32>}, {pipeline_mode = #tpu.pipeline_mode<synchronous>, transform_indices = @transform_16, window_bounds = array<i64: 1, 32>}, {pipeline_mode = #tpu.pipeline_mode<synchronous>, transform_indices = @transform_17, window_bounds = array<i64: 128, 32>}, {pipeline_mode = #tpu.pipeline_mode<synchronous>, transform_indices = @transform_18, window_bounds = array<i64: 5, 32>}, {pipeline_mode = #tpu.pipeline_mode<synchronous>, transform_indices = @transform_19, window_bounds = array<i64: 32, 96>}, {pipeline_mode = #tpu.pipeline_mode<synchronous>, transform_indices = @transform_20, window_bounds = array<i64: 1, 96>}, {pipeline_mode = #tpu.pipeline_mode<synchronous>, transform_indices = @transform_21, window_bounds = array<i64: 32, 32>}, {pipeline_mode = #tpu.pipeline_mode<synchronous>, transform_indices = @transform_22, window_bounds = array<i64: 1, 32>}, {pipeline_mode = #tpu.pipeline_mode<synchronous>, transform_indices = @transform_23, window_bounds = array<i64: 1, 32>}, {pipeline_mode = #tpu.pipeline_mode<synchronous>, transform_indices = @transform_24, window_bounds = array<i64: 1, 32>}, {pipeline_mode = #tpu.pipeline_mode<synchronous>, transform_indices = @transform_25, window_bounds = array<i64: 32, 32>}, {pipeline_mode = #tpu.pipeline_mode<synchronous>, transform_indices = @transform_26, window_bounds = array<i64: 1, 32>}, {pipeline_mode = #tpu.pipeline_mode<synchronous>, transform_indices = @transform_27, window_bounds = array<i64: 32, 64>}, {pipeline_mode = #tpu.pipeline_mode<synchronous>, transform_indices = @transform_28, window_bounds = array<i64: 1, 64>}, {pipeline_mode = #tpu.pipeline_mode<synchronous>, transform_indices = @transform_29, window_bounds = array<i64: 32, 32>}, {pipeline_mode = #tpu.pipeline_mode<synchronous>, transform_indices = @transform_30, window_bounds = array<i64: 1, 32>}, {pipeline_mode = #tpu.pipeline_mode<synchronous>, transform_indices = @transform_31, window_bounds = array<i64: 1, 32>}, {pipeline_mode = #tpu.pipeline_mode<synchronous>, transform_indices = @transform_32, window_bounds = array<i64: 1, 32>}, {pipeline_mode = #tpu.pipeline_mode<synchronous>, transform_indices = @transform_33, window_bounds = array<i64: 32, 64>}, {pipeline_mode = #tpu.pipeline_mode<synchronous>, transform_indices = @transform_34, window_bounds = array<i64: 1, 64>}, {pipeline_mode = #tpu.pipeline_mode<synchronous>, transform_indices = @transform_35, window_bounds = array<i64: 64, 32>}, {pipeline_mode = #tpu.pipeline_mode<synchronous>, transform_indices = @transform_36, window_bounds = array<i64: 1, 32>}, {pipeline_mode = #tpu.pipeline_mode<synchronous>, transform_indices = @transform_37, window_bounds = array<i64: 1, 32>}, {pipeline_mode = #tpu.pipeline_mode<synchronous>, transform_indices = @transform_38, window_bounds = array<i64: 1, 32>}, {pipeline_mode = #tpu.pipeline_mode<synchronous>, transform_indices = @transform_39, window_bounds = array<i64: 32, 128>}, {pipeline_mode = #tpu.pipeline_mode<synchronous>, transform_indices = @transform_40, window_bounds = array<i64: 1, 128>}, {transform_indices = @transform_41, window_bounds = array<i64: 1, 5, 128>}]} {
    %c0 = arith.constant 0 : index
    %c0_0 = arith.constant 0 : index
    %c0_1 = arith.constant 0 : index
    %0 = vector.load %arg2[%c0, %c0_0, %c0_1] : memref<1x8x64xf32, #tpu.memory_space<vmem>>, vector<1x8x64xf32>
    %1 = vector.shape_cast %0 : vector<1x8x64xf32> to vector<8x64xf32>
    %c0_2 = arith.constant 0 : index
    %c0_3 = arith.constant 0 : index
    %2 = vector.load %arg4[%c0_2, %c0_3] : memref<64x32xf32, #tpu.memory_space<vmem>>, vector<64x32xf32>
    %cst = arith.constant dense<0.000000e+00> : vector<8x32xf32>
    %3 = tpu.matmul %1, %2, %cst {dimension_numbers = #tpu.dot_dimension_numbers<[1], [0], [0], [1], [0, 0, 1, 1], [], []>} : vector<8x64xf32>, vector<64x32xf32>, vector<8x32xf32> -> vector<8x32xf32>
    %c0_4 = arith.constant 0 : index
    %c0_5 = arith.constant 0 : index
    %4 = vector.load %arg5[%c0_4, %c0_5] : memref<1x32xf32, #tpu.memory_space<vmem>>, vector<1x32xf32>
    %5 = vector.broadcast %4 : vector<1x32xf32> to vector<8x32xf32>
    %6 = arith.addf %3, %5 : vector<8x32xf32>
    %c0_6 = arith.constant 0 : index
    %c0_7 = arith.constant 0 : index
    %c0_8 = arith.constant 0 : index
    %7 = vector.load %arg1[%c0_6, %c0_7, %c0_8] : memref<1x15x32xf32, #tpu.memory_space<vmem>>, vector<1x15x32xf32>
    %8 = vector.shape_cast %7 : vector<1x15x32xf32> to vector<15x32xf32>
    %c0_9 = arith.constant 0 : index
    %c0_10 = arith.constant 0 : index
    %9 = vector.load %arg3[%c0_9, %c0_10] : memref<15x8xf32, #tpu.memory_space<vmem>>, vector<15x8xf32>
    %cst_11 = arith.constant dense<0.000000e+00> : vector<15x32xf32>
    %10 = tpu.matmul %9, %6, %cst_11 {dimension_numbers = #tpu.dot_dimension_numbers<[1], [0], [0], [1], [0, 0, 1, 1], [], []>} : vector<15x8xf32>, vector<8x32xf32>, vector<15x32xf32> -> vector<15x32xf32>
    %11 = arith.addf %8, %10 : vector<15x32xf32>
    %c0_12 = arith.constant 0 : index
    %c0_13 = arith.constant 0 : index
    %12 = vector.load %arg6[%c0_12, %c0_13] : memref<32x96xf32, #tpu.memory_space<vmem>>, vector<32x96xf32>
    %cst_14 = arith.constant dense<0.000000e+00> : vector<15x96xf32>
    %13 = tpu.matmul %11, %12, %cst_14 {dimension_numbers = #tpu.dot_dimension_numbers<[1], [0], [0], [1], [0, 0, 1, 1], [], []>} : vector<15x32xf32>, vector<32x96xf32>, vector<15x96xf32> -> vector<15x96xf32>
    %c0_15 = arith.constant 0 : index
    %c0_16 = arith.constant 0 : index
    %14 = vector.load %arg7[%c0_15, %c0_16] : memref<1x96xf32, #tpu.memory_space<vmem>>, vector<1x96xf32>
    %15 = vector.broadcast %14 : vector<1x96xf32> to vector<15x96xf32>
    %16 = arith.addf %13, %15 : vector<15x96xf32>
    %17 = vector.extract_strided_slice %16 {offsets = [0, 0], sizes = [15, 32], strides = [1, 1]} : vector<15x96xf32> to vector<15x32xf32>
    %18 = vector.extract_strided_slice %16 {offsets = [0, 32], sizes = [15, 32], strides = [1, 1]} : vector<15x96xf32> to vector<15x32xf32>
    %19 = vector.extract_strided_slice %16 {offsets = [0, 64], sizes = [15, 32], strides = [1, 1]} : vector<15x96xf32> to vector<15x32xf32>
    %c0_17 = arith.constant 0 : index
    %c0_18 = arith.constant 0 : index
    %20 = vector.load %arg8[%c0_17, %c0_18] : memref<32x32xf32, #tpu.memory_space<vmem>>, vector<32x32xf32>
    %21 = vector.extract_strided_slice %17 {offsets = [0, 0], sizes = [15, 8], strides = [1, 1]} : vector<15x32xf32> to vector<15x8xf32>
    %22 = vector.extract_strided_slice %18 {offsets = [0, 0], sizes = [15, 8], strides = [1, 1]} : vector<15x32xf32> to vector<15x8xf32>
    %cst_19 = arith.constant dense<0.000000e+00> : vector<15x15xf32>
    %23 = tpu.matmul %21, %22, %cst_19 {dimension_numbers = #tpu.dot_dimension_numbers<[1], [1], [0], [0], [0, 0, 1, 0], [], []>} : vector<15x8xf32>, vector<15x8xf32>, vector<15x15xf32> -> vector<15x15xf32>
    %cst_20 = arith.constant 0.353553385 : f32
    %24 = vector.broadcast %cst_20 : f32 to vector<15x15xf32>
    %25 = arith.mulf %23, %24 : vector<15x15xf32>
    %cst_21 = arith.constant dense<0xFF800000> : vector<15xf32>
    %26 = vector.multi_reduction <maximumf>, %25, %cst_21 [1] : vector<15x15xf32> to vector<15xf32>
    %27 = vector.shape_cast %26 : vector<15xf32> to vector<15x1xf32>
    %28 = vector.broadcast %27 : vector<15x1xf32> to vector<15x15xf32>
    %29 = arith.subf %25, %28 : vector<15x15xf32>
    %30 = math.exp %29 : vector<15x15xf32>
    %cst_22 = arith.constant dense<0.000000e+00> : vector<15xf32>
    %31 = vector.multi_reduction <add>, %30, %cst_22 [1] : vector<15x15xf32> to vector<15xf32>
    %32 = vector.shape_cast %31 : vector<15xf32> to vector<15x1xf32>
    %33 = vector.broadcast %32 : vector<15x1xf32> to vector<15x15xf32>
    %34 = arith.divf %30, %33 : vector<15x15xf32>
    %35 = vector.extract_strided_slice %19 {offsets = [0, 0], sizes = [15, 8], strides = [1, 1]} : vector<15x32xf32> to vector<15x8xf32>
    %cst_23 = arith.constant dense<0.000000e+00> : vector<15x8xf32>
    %36 = tpu.matmul %34, %35, %cst_23 {dimension_numbers = #tpu.dot_dimension_numbers<[1], [0], [0], [1], [0, 0, 1, 1], [], []>} : vector<15x15xf32>, vector<15x8xf32>, vector<15x8xf32> -> vector<15x8xf32>
    %37 = vector.extract_strided_slice %20 {offsets = [0, 0], sizes = [8, 32], strides = [1, 1]} : vector<32x32xf32> to vector<8x32xf32>
    %cst_24 = arith.constant dense<0.000000e+00> : vector<15x32xf32>
    %38 = tpu.matmul %36, %37, %cst_24 {dimension_numbers = #tpu.dot_dimension_numbers<[1], [0], [0], [1], [0, 0, 1, 1], [], []>} : vector<15x8xf32>, vector<8x32xf32>, vector<15x32xf32> -> vector<15x32xf32>
    %39 = vector.extract_strided_slice %17 {offsets = [0, 8], sizes = [15, 8], strides = [1, 1]} : vector<15x32xf32> to vector<15x8xf32>
    %40 = vector.extract_strided_slice %18 {offsets = [0, 8], sizes = [15, 8], strides = [1, 1]} : vector<15x32xf32> to vector<15x8xf32>
    %cst_25 = arith.constant dense<0.000000e+00> : vector<15x15xf32>
    %41 = tpu.matmul %39, %40, %cst_25 {dimension_numbers = #tpu.dot_dimension_numbers<[1], [1], [0], [0], [0, 0, 1, 0], [], []>} : vector<15x8xf32>, vector<15x8xf32>, vector<15x15xf32> -> vector<15x15xf32>
    %cst_26 = arith.constant 0.353553385 : f32
    %42 = vector.broadcast %cst_26 : f32 to vector<15x15xf32>
    %43 = arith.mulf %41, %42 : vector<15x15xf32>
    %cst_27 = arith.constant dense<0xFF800000> : vector<15xf32>
    %44 = vector.multi_reduction <maximumf>, %43, %cst_27 [1] : vector<15x15xf32> to vector<15xf32>
    %45 = vector.shape_cast %44 : vector<15xf32> to vector<15x1xf32>
    %46 = vector.broadcast %45 : vector<15x1xf32> to vector<15x15xf32>
    %47 = arith.subf %43, %46 : vector<15x15xf32>
    %48 = math.exp %47 : vector<15x15xf32>
    %cst_28 = arith.constant dense<0.000000e+00> : vector<15xf32>
    %49 = vector.multi_reduction <add>, %48, %cst_28 [1] : vector<15x15xf32> to vector<15xf32>
    %50 = vector.shape_cast %49 : vector<15xf32> to vector<15x1xf32>
    %51 = vector.broadcast %50 : vector<15x1xf32> to vector<15x15xf32>
    %52 = arith.divf %48, %51 : vector<15x15xf32>
    %53 = vector.extract_strided_slice %19 {offsets = [0, 8], sizes = [15, 8], strides = [1, 1]} : vector<15x32xf32> to vector<15x8xf32>
    %cst_29 = arith.constant dense<0.000000e+00> : vector<15x8xf32>
    %54 = tpu.matmul %52, %53, %cst_29 {dimension_numbers = #tpu.dot_dimension_numbers<[1], [0], [0], [1], [0, 0, 1, 1], [], []>} : vector<15x15xf32>, vector<15x8xf32>, vector<15x8xf32> -> vector<15x8xf32>
    %55 = vector.extract_strided_slice %20 {offsets = [8, 0], sizes = [8, 32], strides = [1, 1]} : vector<32x32xf32> to vector<8x32xf32>
    %cst_30 = arith.constant dense<0.000000e+00> : vector<15x32xf32>
    %56 = tpu.matmul %54, %55, %cst_30 {dimension_numbers = #tpu.dot_dimension_numbers<[1], [0], [0], [1], [0, 0, 1, 1], [], []>} : vector<15x8xf32>, vector<8x32xf32>, vector<15x32xf32> -> vector<15x32xf32>
    %57 = arith.addf %38, %56 : vector<15x32xf32>
    %58 = vector.extract_strided_slice %17 {offsets = [0, 16], sizes = [15, 8], strides = [1, 1]} : vector<15x32xf32> to vector<15x8xf32>
    %59 = vector.extract_strided_slice %18 {offsets = [0, 16], sizes = [15, 8], strides = [1, 1]} : vector<15x32xf32> to vector<15x8xf32>
    %cst_31 = arith.constant dense<0.000000e+00> : vector<15x15xf32>
    %60 = tpu.matmul %58, %59, %cst_31 {dimension_numbers = #tpu.dot_dimension_numbers<[1], [1], [0], [0], [0, 0, 1, 0], [], []>} : vector<15x8xf32>, vector<15x8xf32>, vector<15x15xf32> -> vector<15x15xf32>
    %cst_32 = arith.constant 0.353553385 : f32
    %61 = vector.broadcast %cst_32 : f32 to vector<15x15xf32>
    %62 = arith.mulf %60, %61 : vector<15x15xf32>
    %cst_33 = arith.constant dense<0xFF800000> : vector<15xf32>
    %63 = vector.multi_reduction <maximumf>, %62, %cst_33 [1] : vector<15x15xf32> to vector<15xf32>
    %64 = vector.shape_cast %63 : vector<15xf32> to vector<15x1xf32>
    %65 = vector.broadcast %64 : vector<15x1xf32> to vector<15x15xf32>
    %66 = arith.subf %62, %65 : vector<15x15xf32>
    %67 = math.exp %66 : vector<15x15xf32>
    %cst_34 = arith.constant dense<0.000000e+00> : vector<15xf32>
    %68 = vector.multi_reduction <add>, %67, %cst_34 [1] : vector<15x15xf32> to vector<15xf32>
    %69 = vector.shape_cast %68 : vector<15xf32> to vector<15x1xf32>
    %70 = vector.broadcast %69 : vector<15x1xf32> to vector<15x15xf32>
    %71 = arith.divf %67, %70 : vector<15x15xf32>
    %72 = vector.extract_strided_slice %19 {offsets = [0, 16], sizes = [15, 8], strides = [1, 1]} : vector<15x32xf32> to vector<15x8xf32>
    %cst_35 = arith.constant dense<0.000000e+00> : vector<15x8xf32>
    %73 = tpu.matmul %71, %72, %cst_35 {dimension_numbers = #tpu.dot_dimension_numbers<[1], [0], [0], [1], [0, 0, 1, 1], [], []>} : vector<15x15xf32>, vector<15x8xf32>, vector<15x8xf32> -> vector<15x8xf32>
    %74 = vector.extract_strided_slice %20 {offsets = [16, 0], sizes = [8, 32], strides = [1, 1]} : vector<32x32xf32> to vector<8x32xf32>
    %cst_36 = arith.constant dense<0.000000e+00> : vector<15x32xf32>
    %75 = tpu.matmul %73, %74, %cst_36 {dimension_numbers = #tpu.dot_dimension_numbers<[1], [0], [0], [1], [0, 0, 1, 1], [], []>} : vector<15x8xf32>, vector<8x32xf32>, vector<15x32xf32> -> vector<15x32xf32>
    %76 = arith.addf %57, %75 : vector<15x32xf32>
    %77 = vector.extract_strided_slice %17 {offsets = [0, 24], sizes = [15, 8], strides = [1, 1]} : vector<15x32xf32> to vector<15x8xf32>
    %78 = vector.extract_strided_slice %18 {offsets = [0, 24], sizes = [15, 8], strides = [1, 1]} : vector<15x32xf32> to vector<15x8xf32>
    %cst_37 = arith.constant dense<0.000000e+00> : vector<15x15xf32>
    %79 = tpu.matmul %77, %78, %cst_37 {dimension_numbers = #tpu.dot_dimension_numbers<[1], [1], [0], [0], [0, 0, 1, 0], [], []>} : vector<15x8xf32>, vector<15x8xf32>, vector<15x15xf32> -> vector<15x15xf32>
    %cst_38 = arith.constant 0.353553385 : f32
    %80 = vector.broadcast %cst_38 : f32 to vector<15x15xf32>
    %81 = arith.mulf %79, %80 : vector<15x15xf32>
    %cst_39 = arith.constant dense<0xFF800000> : vector<15xf32>
    %82 = vector.multi_reduction <maximumf>, %81, %cst_39 [1] : vector<15x15xf32> to vector<15xf32>
    %83 = vector.shape_cast %82 : vector<15xf32> to vector<15x1xf32>
    %84 = vector.broadcast %83 : vector<15x1xf32> to vector<15x15xf32>
    %85 = arith.subf %81, %84 : vector<15x15xf32>
    %86 = math.exp %85 : vector<15x15xf32>
    %cst_40 = arith.constant dense<0.000000e+00> : vector<15xf32>
    %87 = vector.multi_reduction <add>, %86, %cst_40 [1] : vector<15x15xf32> to vector<15xf32>
    %88 = vector.shape_cast %87 : vector<15xf32> to vector<15x1xf32>
    %89 = vector.broadcast %88 : vector<15x1xf32> to vector<15x15xf32>
    %90 = arith.divf %86, %89 : vector<15x15xf32>
    %91 = vector.extract_strided_slice %19 {offsets = [0, 24], sizes = [15, 8], strides = [1, 1]} : vector<15x32xf32> to vector<15x8xf32>
    %cst_41 = arith.constant dense<0.000000e+00> : vector<15x8xf32>
    %92 = tpu.matmul %90, %91, %cst_41 {dimension_numbers = #tpu.dot_dimension_numbers<[1], [0], [0], [1], [0, 0, 1, 1], [], []>} : vector<15x15xf32>, vector<15x8xf32>, vector<15x8xf32> -> vector<15x8xf32>
    %93 = vector.extract_strided_slice %20 {offsets = [24, 0], sizes = [8, 32], strides = [1, 1]} : vector<32x32xf32> to vector<8x32xf32>
    %cst_42 = arith.constant dense<0.000000e+00> : vector<15x32xf32>
    %94 = tpu.matmul %92, %93, %cst_42 {dimension_numbers = #tpu.dot_dimension_numbers<[1], [0], [0], [1], [0, 0, 1, 1], [], []>} : vector<15x8xf32>, vector<8x32xf32>, vector<15x32xf32> -> vector<15x32xf32>
    %95 = arith.addf %76, %94 : vector<15x32xf32>
    %c0_43 = arith.constant 0 : index
    %c0_44 = arith.constant 0 : index
    %96 = vector.load %arg9[%c0_43, %c0_44] : memref<1x32xf32, #tpu.memory_space<vmem>>, vector<1x32xf32>
    %97 = vector.broadcast %96 : vector<1x32xf32> to vector<15x32xf32>
    %98 = arith.addf %95, %97 : vector<15x32xf32>
    %99 = arith.addf %11, %98 : vector<15x32xf32>
    %c0_45 = arith.constant 0 : index
    %c0_46 = arith.constant 0 : index
    %100 = vector.load %arg10[%c0_45, %c0_46] : memref<1x32xf32, #tpu.memory_space<vmem>>, vector<1x32xf32>
    %c0_47 = arith.constant 0 : index
    %c0_48 = arith.constant 0 : index
    %101 = vector.load %arg11[%c0_47, %c0_48] : memref<1x32xf32, #tpu.memory_space<vmem>>, vector<1x32xf32>
    %cst_49 = arith.constant dense<0.000000e+00> : vector<15xf32>
    %102 = vector.multi_reduction <add>, %99, %cst_49 [1] : vector<15x32xf32> to vector<15xf32>
    %103 = vector.shape_cast %102 : vector<15xf32> to vector<15x1xf32>
    %cst_50 = arith.constant 3.200000e+01 : f32
    %104 = vector.broadcast %cst_50 : f32 to vector<15x1xf32>
    %105 = arith.divf %103, %104 : vector<15x1xf32>
    %106 = vector.broadcast %105 : vector<15x1xf32> to vector<15x32xf32>
    %107 = arith.subf %99, %106 : vector<15x32xf32>
    %108 = arith.mulf %107, %107 : vector<15x32xf32>
    %cst_51 = arith.constant dense<0.000000e+00> : vector<15xf32>
    %109 = vector.multi_reduction <add>, %108, %cst_51 [1] : vector<15x32xf32> to vector<15xf32>
    %110 = vector.shape_cast %109 : vector<15xf32> to vector<15x1xf32>
    %cst_52 = arith.constant 3.200000e+01 : f32
    %111 = vector.broadcast %cst_52 : f32 to vector<15x1xf32>
    %112 = arith.divf %110, %111 : vector<15x1xf32>
    %113 = vector.broadcast %105 : vector<15x1xf32> to vector<15x32xf32>
    %114 = arith.subf %99, %113 : vector<15x32xf32>
    %cst_53 = arith.constant 9.99999974E-6 : f32
    %115 = vector.broadcast %cst_53 : f32 to vector<15x1xf32>
    %116 = arith.addf %112, %115 : vector<15x1xf32>
    %117 = math.rsqrt %116 : vector<15x1xf32>
    %118 = vector.broadcast %117 : vector<15x1xf32> to vector<15x32xf32>
    %119 = arith.mulf %114, %118 : vector<15x32xf32>
    %120 = vector.broadcast %100 : vector<1x32xf32> to vector<15x32xf32>
    %121 = arith.mulf %119, %120 : vector<15x32xf32>
    %122 = vector.broadcast %101 : vector<1x32xf32> to vector<15x32xf32>
    %123 = arith.addf %121, %122 : vector<15x32xf32>
    %c0_54 = arith.constant 0 : index
    %c0_55 = arith.constant 0 : index
    %124 = vector.load %arg12[%c0_54, %c0_55] : memref<32x64xf32, #tpu.memory_space<vmem>>, vector<32x64xf32>
    %cst_56 = arith.constant dense<0.000000e+00> : vector<15x64xf32>
    %125 = tpu.matmul %123, %124, %cst_56 {dimension_numbers = #tpu.dot_dimension_numbers<[1], [0], [0], [1], [0, 0, 1, 1], [], []>} : vector<15x32xf32>, vector<32x64xf32>, vector<15x64xf32> -> vector<15x64xf32>
    %c0_57 = arith.constant 0 : index
    %c0_58 = arith.constant 0 : index
    %126 = vector.load %arg13[%c0_57, %c0_58] : memref<1x64xf32, #tpu.memory_space<vmem>>, vector<1x64xf32>
    %127 = vector.broadcast %126 : vector<1x64xf32> to vector<15x64xf32>
    %128 = arith.addf %125, %127 : vector<15x64xf32>
    %cst_59 = arith.constant 0.000000e+00 : f32
    %129 = vector.broadcast %cst_59 : f32 to vector<15x64xf32>
    %130 = arith.maximumf %128, %129 : vector<15x64xf32>
    %c0_60 = arith.constant 0 : index
    %c0_61 = arith.constant 0 : index
    %131 = vector.load %arg14[%c0_60, %c0_61] : memref<64x32xf32, #tpu.memory_space<vmem>>, vector<64x32xf32>
    %cst_62 = arith.constant dense<0.000000e+00> : vector<15x32xf32>
    %132 = tpu.matmul %130, %131, %cst_62 {dimension_numbers = #tpu.dot_dimension_numbers<[1], [0], [0], [1], [0, 0, 1, 1], [], []>} : vector<15x64xf32>, vector<64x32xf32>, vector<15x32xf32> -> vector<15x32xf32>
    %c0_63 = arith.constant 0 : index
    %c0_64 = arith.constant 0 : index
    %133 = vector.load %arg15[%c0_63, %c0_64] : memref<1x32xf32, #tpu.memory_space<vmem>>, vector<1x32xf32>
    %134 = vector.broadcast %133 : vector<1x32xf32> to vector<15x32xf32>
    %135 = arith.addf %132, %134 : vector<15x32xf32>
    %136 = arith.addf %123, %135 : vector<15x32xf32>
    %c0_65 = arith.constant 0 : index
    %c0_66 = arith.constant 0 : index
    %137 = vector.load %arg16[%c0_65, %c0_66] : memref<1x32xf32, #tpu.memory_space<vmem>>, vector<1x32xf32>
    %c0_67 = arith.constant 0 : index
    %c0_68 = arith.constant 0 : index
    %138 = vector.load %arg17[%c0_67, %c0_68] : memref<1x32xf32, #tpu.memory_space<vmem>>, vector<1x32xf32>
    %cst_69 = arith.constant dense<0.000000e+00> : vector<15xf32>
    %139 = vector.multi_reduction <add>, %136, %cst_69 [1] : vector<15x32xf32> to vector<15xf32>
    %140 = vector.shape_cast %139 : vector<15xf32> to vector<15x1xf32>
    %cst_70 = arith.constant 3.200000e+01 : f32
    %141 = vector.broadcast %cst_70 : f32 to vector<15x1xf32>
    %142 = arith.divf %140, %141 : vector<15x1xf32>
    %143 = vector.broadcast %142 : vector<15x1xf32> to vector<15x32xf32>
    %144 = arith.subf %136, %143 : vector<15x32xf32>
    %145 = arith.mulf %144, %144 : vector<15x32xf32>
    %cst_71 = arith.constant dense<0.000000e+00> : vector<15xf32>
    %146 = vector.multi_reduction <add>, %145, %cst_71 [1] : vector<15x32xf32> to vector<15xf32>
    %147 = vector.shape_cast %146 : vector<15xf32> to vector<15x1xf32>
    %cst_72 = arith.constant 3.200000e+01 : f32
    %148 = vector.broadcast %cst_72 : f32 to vector<15x1xf32>
    %149 = arith.divf %147, %148 : vector<15x1xf32>
    %150 = vector.broadcast %142 : vector<15x1xf32> to vector<15x32xf32>
    %151 = arith.subf %136, %150 : vector<15x32xf32>
    %cst_73 = arith.constant 9.99999974E-6 : f32
    %152 = vector.broadcast %cst_73 : f32 to vector<15x1xf32>
    %153 = arith.addf %149, %152 : vector<15x1xf32>
    %154 = math.rsqrt %153 : vector<15x1xf32>
    %155 = vector.broadcast %154 : vector<15x1xf32> to vector<15x32xf32>
    %156 = arith.mulf %151, %155 : vector<15x32xf32>
    %157 = vector.broadcast %137 : vector<1x32xf32> to vector<15x32xf32>
    %158 = arith.mulf %156, %157 : vector<15x32xf32>
    %159 = vector.broadcast %138 : vector<1x32xf32> to vector<15x32xf32>
    %160 = arith.addf %158, %159 : vector<15x32xf32>
    %c0_74 = arith.constant 0 : index
    %c0_75 = arith.constant 0 : index
    %161 = vector.load %arg28[%c0_74, %c0_75] : memref<32x64xf32, #tpu.memory_space<vmem>>, vector<32x64xf32>
    %cst_76 = arith.constant dense<0.000000e+00> : vector<15x64xf32>
    %162 = tpu.matmul %160, %161, %cst_76 {dimension_numbers = #tpu.dot_dimension_numbers<[1], [0], [0], [1], [0, 0, 1, 1], [], []>} : vector<15x32xf32>, vector<32x64xf32>, vector<15x64xf32> -> vector<15x64xf32>
    %c0_77 = arith.constant 0 : index
    %c0_78 = arith.constant 0 : index
    %163 = vector.load %arg29[%c0_77, %c0_78] : memref<1x64xf32, #tpu.memory_space<vmem>>, vector<1x64xf32>
    %164 = vector.broadcast %163 : vector<1x64xf32> to vector<15x64xf32>
    %165 = arith.addf %162, %164 : vector<15x64xf32>
    %166 = vector.extract_strided_slice %165 {offsets = [0, 0], sizes = [15, 32], strides = [1, 1]} : vector<15x64xf32> to vector<15x32xf32>
    %167 = vector.extract_strided_slice %165 {offsets = [0, 32], sizes = [15, 32], strides = [1, 1]} : vector<15x64xf32> to vector<15x32xf32>
    %c0_79 = arith.constant 0 : index
    %c0_80 = arith.constant 0 : index
    %168 = vector.load %arg18[%c0_79, %c0_80] : memref<128x32xf32, #tpu.memory_space<vmem>>, vector<128x32xf32>
    %169 = tpu.iota {dimensions = array<i32: 1>} : vector<1x128xi32>
    %c1_i32 = arith.constant 1 : i32
    %170 = vector.broadcast %c1_i32 : i32 to vector<1x128xi32>
    %171 = arith.cmpi eq, %169, %170 : vector<1x128xi32>
    %172 = arith.extui %171 : vector<1x128xi1> to vector<1x128xi32>
    %173 = arith.sitofp %172 : vector<1x128xi32> to vector<1x128xf32>
    %cst_81 = arith.constant dense<0.000000e+00> : vector<1x32xf32>
    %174 = tpu.matmul %173, %168, %cst_81 {dimension_numbers = #tpu.dot_dimension_numbers<[1], [0], [0], [1], [0, 0, 1, 1], [], []>} : vector<1x128xf32>, vector<128x32xf32>, vector<1x32xf32> -> vector<1x32xf32>
    %c0_82 = arith.constant 0 : index
    %c0_83 = arith.constant 0 : index
    %175 = vector.load %arg19[%c0_82, %c0_83] : memref<5x32xf32, #tpu.memory_space<vmem>>, vector<1x32xf32>
    %176 = arith.addf %174, %175 : vector<1x32xf32>
    %c0_84 = arith.constant 0 : index
    %c0_85 = arith.constant 0 : index
    %177 = vector.load %arg20[%c0_84, %c0_85] : memref<32x96xf32, #tpu.memory_space<vmem>>, vector<32x96xf32>
    %cst_86 = arith.constant dense<0.000000e+00> : vector<1x96xf32>
    %178 = tpu.matmul %176, %177, %cst_86 {dimension_numbers = #tpu.dot_dimension_numbers<[1], [0], [0], [1], [0, 0, 1, 1], [], []>} : vector<1x32xf32>, vector<32x96xf32>, vector<1x96xf32> -> vector<1x96xf32>
    %c0_87 = arith.constant 0 : index
    %c0_88 = arith.constant 0 : index
    %179 = vector.load %arg21[%c0_87, %c0_88] : memref<1x96xf32, #tpu.memory_space<vmem>>, vector<1x96xf32>
    %180 = arith.addf %178, %179 : vector<1x96xf32>
    %181 = vector.extract_strided_slice %180 {offsets = [0, 32], sizes = [1, 32], strides = [1, 1]} : vector<1x96xf32> to vector<1x32xf32>
    %c0_89 = arith.constant 0 : index
    %c0_90 = arith.constant 0 : index
    %182 = vector.load %arg43[%c0_89, %c0_90] : memref<8x32xf32, #tpu.memory_space<vmem>>, vector<1x32xf32>
    tpu.vector_store %arg43[%c0_89, %c0_90], %181 {strides = array<i32>} : memref<8x32xf32, #tpu.memory_space<vmem>>, vector<1x32xf32>,
    %183 = vector.extract_strided_slice %180 {offsets = [0, 64], sizes = [1, 32], strides = [1, 1]} : vector<1x96xf32> to vector<1x32xf32>
    %c0_91 = arith.constant 0 : index
    %c0_92 = arith.constant 0 : index
    %184 = vector.load %arg44[%c0_91, %c0_92] : memref<8x32xf32, #tpu.memory_space<vmem>>, vector<1x32xf32>
    tpu.vector_store %arg44[%c0_91, %c0_92], %183 {strides = array<i32>} : memref<8x32xf32, #tpu.memory_space<vmem>>, vector<1x32xf32>,
    %185 = vector.extract_strided_slice %180 {offsets = [0, 0], sizes = [1, 32], strides = [1, 1]} : vector<1x96xf32> to vector<1x32xf32>
    %c0_93 = arith.constant 0 : index
    %c0_94 = arith.constant 0 : index
    %186 = vector.load %arg43[%c0_93, %c0_94] : memref<8x32xf32, #tpu.memory_space<vmem>>, vector<1x32xf32>
    %c0_95 = arith.constant 0 : index
    %c0_96 = arith.constant 0 : index
    %187 = vector.load %arg44[%c0_95, %c0_96] : memref<8x32xf32, #tpu.memory_space<vmem>>, vector<1x32xf32>
    %c0_97 = arith.constant 0 : index
    %c0_98 = arith.constant 0 : index
    %188 = vector.load %arg22[%c0_97, %c0_98] : memref<32x32xf32, #tpu.memory_space<vmem>>, vector<32x32xf32>
    %189 = vector.extract_strided_slice %185 {offsets = [0, 0], sizes = [1, 8], strides = [1, 1]} : vector<1x32xf32> to vector<1x8xf32>
    %190 = vector.extract_strided_slice %186 {offsets = [0, 0], sizes = [1, 8], strides = [1, 1]} : vector<1x32xf32> to vector<1x8xf32>
    %cst_99 = arith.constant dense<0.000000e+00> : vector<1x1xf32>
    %191 = tpu.matmul %189, %190, %cst_99 {dimension_numbers = #tpu.dot_dimension_numbers<[1], [1], [0], [0], [0, 0, 1, 0], [], []>} : vector<1x8xf32>, vector<1x8xf32>, vector<1x1xf32> -> vector<1x1xf32>
    %cst_100 = arith.constant 0.353553385 : f32
    %192 = vector.broadcast %cst_100 : f32 to vector<1x1xf32>
    %193 = arith.mulf %191, %192 : vector<1x1xf32>
    %cst_101 = arith.constant dense<0xFF800000> : vector<1xf32>
    %194 = vector.multi_reduction <maximumf>, %193, %cst_101 [1] : vector<1x1xf32> to vector<1xf32>
    %195 = vector.shape_cast %194 : vector<1xf32> to vector<1x1xf32>
    %196 = arith.subf %193, %195 : vector<1x1xf32>
    %197 = math.exp %196 : vector<1x1xf32>
    %cst_102 = arith.constant dense<0.000000e+00> : vector<1xf32>
    %198 = vector.multi_reduction <add>, %197, %cst_102 [1] : vector<1x1xf32> to vector<1xf32>
    %199 = vector.shape_cast %198 : vector<1xf32> to vector<1x1xf32>
    %200 = arith.divf %197, %199 : vector<1x1xf32>
    %201 = vector.extract_strided_slice %187 {offsets = [0, 0], sizes = [1, 8], strides = [1, 1]} : vector<1x32xf32> to vector<1x8xf32>
    %cst_103 = arith.constant dense<0.000000e+00> : vector<1x8xf32>
    %202 = tpu.matmul %200, %201, %cst_103 {dimension_numbers = #tpu.dot_dimension_numbers<[1], [0], [0], [1], [0, 0, 1, 1], [], []>} : vector<1x1xf32>, vector<1x8xf32>, vector<1x8xf32> -> vector<1x8xf32>
    %203 = vector.extract_strided_slice %188 {offsets = [0, 0], sizes = [8, 32], strides = [1, 1]} : vector<32x32xf32> to vector<8x32xf32>
    %cst_104 = arith.constant dense<0.000000e+00> : vector<1x32xf32>
    %204 = tpu.matmul %202, %203, %cst_104 {dimension_numbers = #tpu.dot_dimension_numbers<[1], [0], [0], [1], [0, 0, 1, 1], [], []>} : vector<1x8xf32>, vector<8x32xf32>, vector<1x32xf32> -> vector<1x32xf32>
    %205 = vector.extract_strided_slice %185 {offsets = [0, 8], sizes = [1, 8], strides = [1, 1]} : vector<1x32xf32> to vector<1x8xf32>
    %206 = vector.extract_strided_slice %186 {offsets = [0, 8], sizes = [1, 8], strides = [1, 1]} : vector<1x32xf32> to vector<1x8xf32>
    %cst_105 = arith.constant dense<0.000000e+00> : vector<1x1xf32>
    %207 = tpu.matmul %205, %206, %cst_105 {dimension_numbers = #tpu.dot_dimension_numbers<[1], [1], [0], [0], [0, 0, 1, 0], [], []>} : vector<1x8xf32>, vector<1x8xf32>, vector<1x1xf32> -> vector<1x1xf32>
    %cst_106 = arith.constant 0.353553385 : f32
    %208 = vector.broadcast %cst_106 : f32 to vector<1x1xf32>
    %209 = arith.mulf %207, %208 : vector<1x1xf32>
    %cst_107 = arith.constant dense<0xFF800000> : vector<1xf32>
    %210 = vector.multi_reduction <maximumf>, %209, %cst_107 [1] : vector<1x1xf32> to vector<1xf32>
    %211 = vector.shape_cast %210 : vector<1xf32> to vector<1x1xf32>
    %212 = arith.subf %209, %211 : vector<1x1xf32>
    %213 = math.exp %212 : vector<1x1xf32>
    %cst_108 = arith.constant dense<0.000000e+00> : vector<1xf32>
    %214 = vector.multi_reduction <add>, %213, %cst_108 [1] : vector<1x1xf32> to vector<1xf32>
    %215 = vector.shape_cast %214 : vector<1xf32> to vector<1x1xf32>
    %216 = arith.divf %213, %215 : vector<1x1xf32>
    %217 = vector.extract_strided_slice %187 {offsets = [0, 8], sizes = [1, 8], strides = [1, 1]} : vector<1x32xf32> to vector<1x8xf32>
    %cst_109 = arith.constant dense<0.000000e+00> : vector<1x8xf32>
    %218 = tpu.matmul %216, %217, %cst_109 {dimension_numbers = #tpu.dot_dimension_numbers<[1], [0], [0], [1], [0, 0, 1, 1], [], []>} : vector<1x1xf32>, vector<1x8xf32>, vector<1x8xf32> -> vector<1x8xf32>
    %219 = vector.extract_strided_slice %188 {offsets = [8, 0], sizes = [8, 32], strides = [1, 1]} : vector<32x32xf32> to vector<8x32xf32>
    %cst_110 = arith.constant dense<0.000000e+00> : vector<1x32xf32>
    %220 = tpu.matmul %218, %219, %cst_110 {dimension_numbers = #tpu.dot_dimension_numbers<[1], [0], [0], [1], [0, 0, 1, 1], [], []>} : vector<1x8xf32>, vector<8x32xf32>, vector<1x32xf32> -> vector<1x32xf32>
    %221 = arith.addf %204, %220 : vector<1x32xf32>
    %222 = vector.extract_strided_slice %185 {offsets = [0, 16], sizes = [1, 8], strides = [1, 1]} : vector<1x32xf32> to vector<1x8xf32>
    %223 = vector.extract_strided_slice %186 {offsets = [0, 16], sizes = [1, 8], strides = [1, 1]} : vector<1x32xf32> to vector<1x8xf32>
    %cst_111 = arith.constant dense<0.000000e+00> : vector<1x1xf32>
    %224 = tpu.matmul %222, %223, %cst_111 {dimension_numbers = #tpu.dot_dimension_numbers<[1], [1], [0], [0], [0, 0, 1, 0], [], []>} : vector<1x8xf32>, vector<1x8xf32>, vector<1x1xf32> -> vector<1x1xf32>
    %cst_112 = arith.constant 0.353553385 : f32
    %225 = vector.broadcast %cst_112 : f32 to vector<1x1xf32>
    %226 = arith.mulf %224, %225 : vector<1x1xf32>
    %cst_113 = arith.constant dense<0xFF800000> : vector<1xf32>
    %227 = vector.multi_reduction <maximumf>, %226, %cst_113 [1] : vector<1x1xf32> to vector<1xf32>
    %228 = vector.shape_cast %227 : vector<1xf32> to vector<1x1xf32>
    %229 = arith.subf %226, %228 : vector<1x1xf32>
    %230 = math.exp %229 : vector<1x1xf32>
    %cst_114 = arith.constant dense<0.000000e+00> : vector<1xf32>
    %231 = vector.multi_reduction <add>, %230, %cst_114 [1] : vector<1x1xf32> to vector<1xf32>
    %232 = vector.shape_cast %231 : vector<1xf32> to vector<1x1xf32>
    %233 = arith.divf %230, %232 : vector<1x1xf32>
    %234 = vector.extract_strided_slice %187 {offsets = [0, 16], sizes = [1, 8], strides = [1, 1]} : vector<1x32xf32> to vector<1x8xf32>
    %cst_115 = arith.constant dense<0.000000e+00> : vector<1x8xf32>
    %235 = tpu.matmul %233, %234, %cst_115 {dimension_numbers = #tpu.dot_dimension_numbers<[1], [0], [0], [1], [0, 0, 1, 1], [], []>} : vector<1x1xf32>, vector<1x8xf32>, vector<1x8xf32> -> vector<1x8xf32>
    %236 = vector.extract_strided_slice %188 {offsets = [16, 0], sizes = [8, 32], strides = [1, 1]} : vector<32x32xf32> to vector<8x32xf32>
    %cst_116 = arith.constant dense<0.000000e+00> : vector<1x32xf32>
    %237 = tpu.matmul %235, %236, %cst_116 {dimension_numbers = #tpu.dot_dimension_numbers<[1], [0], [0], [1], [0, 0, 1, 1], [], []>} : vector<1x8xf32>, vector<8x32xf32>, vector<1x32xf32> -> vector<1x32xf32>
    %238 = arith.addf %221, %237 : vector<1x32xf32>
    %239 = vector.extract_strided_slice %185 {offsets = [0, 24], sizes = [1, 8], strides = [1, 1]} : vector<1x32xf32> to vector<1x8xf32>
    %240 = vector.extract_strided_slice %186 {offsets = [0, 24], sizes = [1, 8], strides = [1, 1]} : vector<1x32xf32> to vector<1x8xf32>
    %cst_117 = arith.constant dense<0.000000e+00> : vector<1x1xf32>
    %241 = tpu.matmul %239, %240, %cst_117 {dimension_numbers = #tpu.dot_dimension_numbers<[1], [1], [0], [0], [0, 0, 1, 0], [], []>} : vector<1x8xf32>, vector<1x8xf32>, vector<1x1xf32> -> vector<1x1xf32>
    %cst_118 = arith.constant 0.353553385 : f32
    %242 = vector.broadcast %cst_118 : f32 to vector<1x1xf32>
    %243 = arith.mulf %241, %242 : vector<1x1xf32>
    %cst_119 = arith.constant dense<0xFF800000> : vector<1xf32>
    %244 = vector.multi_reduction <maximumf>, %243, %cst_119 [1] : vector<1x1xf32> to vector<1xf32>
    %245 = vector.shape_cast %244 : vector<1xf32> to vector<1x1xf32>
    %246 = arith.subf %243, %245 : vector<1x1xf32>
    %247 = math.exp %246 : vector<1x1xf32>
    %cst_120 = arith.constant dense<0.000000e+00> : vector<1xf32>
    %248 = vector.multi_reduction <add>, %247, %cst_120 [1] : vector<1x1xf32> to vector<1xf32>
    %249 = vector.shape_cast %248 : vector<1xf32> to vector<1x1xf32>
    %250 = arith.divf %247, %249 : vector<1x1xf32>
    %251 = vector.extract_strided_slice %187 {offsets = [0, 24], sizes = [1, 8], strides = [1, 1]} : vector<1x32xf32> to vector<1x8xf32>
    %cst_121 = arith.constant dense<0.000000e+00> : vector<1x8xf32>
    %252 = tpu.matmul %250, %251, %cst_121 {dimension_numbers = #tpu.dot_dimension_numbers<[1], [0], [0], [1], [0, 0, 1, 1], [], []>} : vector<1x1xf32>, vector<1x8xf32>, vector<1x8xf32> -> vector<1x8xf32>
    %253 = vector.extract_strided_slice %188 {offsets = [24, 0], sizes = [8, 32], strides = [1, 1]} : vector<32x32xf32> to vector<8x32xf32>
    %cst_122 = arith.constant dense<0.000000e+00> : vector<1x32xf32>
    %254 = tpu.matmul %252, %253, %cst_122 {dimension_numbers = #tpu.dot_dimension_numbers<[1], [0], [0], [1], [0, 0, 1, 1], [], []>} : vector<1x8xf32>, vector<8x32xf32>, vector<1x32xf32> -> vector<1x32xf32>
    %255 = arith.addf %238, %254 : vector<1x32xf32>
    %c0_123 = arith.constant 0 : index
    %c0_124 = arith.constant 0 : index
    %256 = vector.load %arg23[%c0_123, %c0_124] : memref<1x32xf32, #tpu.memory_space<vmem>>, vector<1x32xf32>
    %257 = arith.addf %255, %256 : vector<1x32xf32>
    %258 = arith.addf %176, %257 : vector<1x32xf32>
    %c0_125 = arith.constant 0 : index
    %c0_126 = arith.constant 0 : index
    %259 = vector.load %arg24[%c0_125, %c0_126] : memref<1x32xf32, #tpu.memory_space<vmem>>, vector<1x32xf32>
    %c0_127 = arith.constant 0 : index
    %c0_128 = arith.constant 0 : index
    %260 = vector.load %arg25[%c0_127, %c0_128] : memref<1x32xf32, #tpu.memory_space<vmem>>, vector<1x32xf32>
    %cst_129 = arith.constant dense<0.000000e+00> : vector<1xf32>
    %261 = vector.multi_reduction <add>, %258, %cst_129 [1] : vector<1x32xf32> to vector<1xf32>
    %262 = vector.shape_cast %261 : vector<1xf32> to vector<1x1xf32>
    %cst_130 = arith.constant 3.200000e+01 : f32
    %263 = vector.broadcast %cst_130 : f32 to vector<1x1xf32>
    %264 = arith.divf %262, %263 : vector<1x1xf32>
    %265 = vector.broadcast %264 : vector<1x1xf32> to vector<1x32xf32>
    %266 = arith.subf %258, %265 : vector<1x32xf32>
    %267 = arith.mulf %266, %266 : vector<1x32xf32>
    %cst_131 = arith.constant dense<0.000000e+00> : vector<1xf32>
    %268 = vector.multi_reduction <add>, %267, %cst_131 [1] : vector<1x32xf32> to vector<1xf32>
    %269 = vector.shape_cast %268 : vector<1xf32> to vector<1x1xf32>
    %cst_132 = arith.constant 3.200000e+01 : f32
    %270 = vector.broadcast %cst_132 : f32 to vector<1x1xf32>
    %271 = arith.divf %269, %270 : vector<1x1xf32>
    %272 = vector.broadcast %264 : vector<1x1xf32> to vector<1x32xf32>
    %273 = arith.subf %258, %272 : vector<1x32xf32>
    %cst_133 = arith.constant 9.99999974E-6 : f32
    %274 = vector.broadcast %cst_133 : f32 to vector<1x1xf32>
    %275 = arith.addf %271, %274 : vector<1x1xf32>
    %276 = math.rsqrt %275 : vector<1x1xf32>
    %277 = vector.broadcast %276 : vector<1x1xf32> to vector<1x32xf32>
    %278 = arith.mulf %273, %277 : vector<1x32xf32>
    %279 = arith.mulf %278, %259 : vector<1x32xf32>
    %280 = arith.addf %279, %260 : vector<1x32xf32>
    %c0_134 = arith.constant 0 : index
    %c0_135 = arith.constant 0 : index
    %281 = vector.load %arg26[%c0_134, %c0_135] : memref<32x32xf32, #tpu.memory_space<vmem>>, vector<32x32xf32>
    %cst_136 = arith.constant dense<0.000000e+00> : vector<1x32xf32>
    %282 = tpu.matmul %280, %281, %cst_136 {dimension_numbers = #tpu.dot_dimension_numbers<[1], [0], [0], [1], [0, 0, 1, 1], [], []>} : vector<1x32xf32>, vector<32x32xf32>, vector<1x32xf32> -> vector<1x32xf32>
    %c0_137 = arith.constant 0 : index
    %c0_138 = arith.constant 0 : index
    %283 = vector.load %arg27[%c0_137, %c0_138] : memref<1x32xf32, #tpu.memory_space<vmem>>, vector<1x32xf32>
    %284 = arith.addf %282, %283 : vector<1x32xf32>
    %c0_139 = arith.constant 0 : index
    %c0_140 = arith.constant 0 : index
    %285 = vector.load %arg30[%c0_139, %c0_140] : memref<32x32xf32, #tpu.memory_space<vmem>>, vector<32x32xf32>
    %286 = vector.extract_strided_slice %284 {offsets = [0, 0], sizes = [1, 8], strides = [1, 1]} : vector<1x32xf32> to vector<1x8xf32>
    %287 = vector.extract_strided_slice %166 {offsets = [0, 0], sizes = [15, 8], strides = [1, 1]} : vector<15x32xf32> to vector<15x8xf32>
    %cst_141 = arith.constant dense<0.000000e+00> : vector<1x15xf32>
    %288 = tpu.matmul %286, %287, %cst_141 {dimension_numbers = #tpu.dot_dimension_numbers<[1], [1], [0], [0], [0, 0, 1, 0], [], []>} : vector<1x8xf32>, vector<15x8xf32>, vector<1x15xf32> -> vector<1x15xf32>
    %cst_142 = arith.constant 0.353553385 : f32
    %289 = vector.broadcast %cst_142 : f32 to vector<1x15xf32>
    %290 = arith.mulf %288, %289 : vector<1x15xf32>
    %cst_143 = arith.constant dense<0xFF800000> : vector<1xf32>
    %291 = vector.multi_reduction <maximumf>, %290, %cst_143 [1] : vector<1x15xf32> to vector<1xf32>
    %292 = vector.shape_cast %291 : vector<1xf32> to vector<1x1xf32>
    %293 = vector.broadcast %292 : vector<1x1xf32> to vector<1x15xf32>
    %294 = arith.subf %290, %293 : vector<1x15xf32>
    %295 = math.exp %294 : vector<1x15xf32>
    %cst_144 = arith.constant dense<0.000000e+00> : vector<1xf32>
    %296 = vector.multi_reduction <add>, %295, %cst_144 [1] : vector<1x15xf32> to vector<1xf32>
    %297 = vector.shape_cast %296 : vector<1xf32> to vector<1x1xf32>
    %298 = vector.broadcast %297 : vector<1x1xf32> to vector<1x15xf32>
    %299 = arith.divf %295, %298 : vector<1x15xf32>
    %300 = vector.extract_strided_slice %167 {offsets = [0, 0], sizes = [15, 8], strides = [1, 1]} : vector<15x32xf32> to vector<15x8xf32>
    %cst_145 = arith.constant dense<0.000000e+00> : vector<1x8xf32>
    %301 = tpu.matmul %299, %300, %cst_145 {dimension_numbers = #tpu.dot_dimension_numbers<[1], [0], [0], [1], [0, 0, 1, 1], [], []>} : vector<1x15xf32>, vector<15x8xf32>, vector<1x8xf32> -> vector<1x8xf32>
    %302 = vector.extract_strided_slice %285 {offsets = [0, 0], sizes = [8, 32], strides = [1, 1]} : vector<32x32xf32> to vector<8x32xf32>
    %cst_146 = arith.constant dense<0.000000e+00> : vector<1x32xf32>
    %303 = tpu.matmul %301, %302, %cst_146 {dimension_numbers = #tpu.dot_dimension_numbers<[1], [0], [0], [1], [0, 0, 1, 1], [], []>} : vector<1x8xf32>, vector<8x32xf32>, vector<1x32xf32> -> vector<1x32xf32>
    %304 = vector.extract_strided_slice %284 {offsets = [0, 8], sizes = [1, 8], strides = [1, 1]} : vector<1x32xf32> to vector<1x8xf32>
    %305 = vector.extract_strided_slice %166 {offsets = [0, 8], sizes = [15, 8], strides = [1, 1]} : vector<15x32xf32> to vector<15x8xf32>
    %cst_147 = arith.constant dense<0.000000e+00> : vector<1x15xf32>
    %306 = tpu.matmul %304, %305, %cst_147 {dimension_numbers = #tpu.dot_dimension_numbers<[1], [1], [0], [0], [0, 0, 1, 0], [], []>} : vector<1x8xf32>, vector<15x8xf32>, vector<1x15xf32> -> vector<1x15xf32>
    %cst_148 = arith.constant 0.353553385 : f32
    %307 = vector.broadcast %cst_148 : f32 to vector<1x15xf32>
    %308 = arith.mulf %306, %307 : vector<1x15xf32>
    %cst_149 = arith.constant dense<0xFF800000> : vector<1xf32>
    %309 = vector.multi_reduction <maximumf>, %308, %cst_149 [1] : vector<1x15xf32> to vector<1xf32>
    %310 = vector.shape_cast %309 : vector<1xf32> to vector<1x1xf32>
    %311 = vector.broadcast %310 : vector<1x1xf32> to vector<1x15xf32>
    %312 = arith.subf %308, %311 : vector<1x15xf32>
    %313 = math.exp %312 : vector<1x15xf32>
    %cst_150 = arith.constant dense<0.000000e+00> : vector<1xf32>
    %314 = vector.multi_reduction <add>, %313, %cst_150 [1] : vector<1x15xf32> to vector<1xf32>
    %315 = vector.shape_cast %314 : vector<1xf32> to vector<1x1xf32>
    %316 = vector.broadcast %315 : vector<1x1xf32> to vector<1x15xf32>
    %317 = arith.divf %313, %316 : vector<1x15xf32>
    %318 = vector.extract_strided_slice %167 {offsets = [0, 8], sizes = [15, 8], strides = [1, 1]} : vector<15x32xf32> to vector<15x8xf32>
    %cst_151 = arith.constant dense<0.000000e+00> : vector<1x8xf32>
    %319 = tpu.matmul %317, %318, %cst_151 {dimension_numbers = #tpu.dot_dimension_numbers<[1], [0], [0], [1], [0, 0, 1, 1], [], []>} : vector<1x15xf32>, vector<15x8xf32>, vector<1x8xf32> -> vector<1x8xf32>
    %320 = vector.extract_strided_slice %285 {offsets = [8, 0], sizes = [8, 32], strides = [1, 1]} : vector<32x32xf32> to vector<8x32xf32>
    %cst_152 = arith.constant dense<0.000000e+00> : vector<1x32xf32>
    %321 = tpu.matmul %319, %320, %cst_152 {dimension_numbers = #tpu.dot_dimension_numbers<[1], [0], [0], [1], [0, 0, 1, 1], [], []>} : vector<1x8xf32>, vector<8x32xf32>, vector<1x32xf32> -> vector<1x32xf32>
    %322 = arith.addf %303, %321 : vector<1x32xf32>
    %323 = vector.extract_strided_slice %284 {offsets = [0, 16], sizes = [1, 8], strides = [1, 1]} : vector<1x32xf32> to vector<1x8xf32>
    %324 = vector.extract_strided_slice %166 {offsets = [0, 16], sizes = [15, 8], strides = [1, 1]} : vector<15x32xf32> to vector<15x8xf32>
    %cst_153 = arith.constant dense<0.000000e+00> : vector<1x15xf32>
    %325 = tpu.matmul %323, %324, %cst_153 {dimension_numbers = #tpu.dot_dimension_numbers<[1], [1], [0], [0], [0, 0, 1, 0], [], []>} : vector<1x8xf32>, vector<15x8xf32>, vector<1x15xf32> -> vector<1x15xf32>
    %cst_154 = arith.constant 0.353553385 : f32
    %326 = vector.broadcast %cst_154 : f32 to vector<1x15xf32>
    %327 = arith.mulf %325, %326 : vector<1x15xf32>
    %cst_155 = arith.constant dense<0xFF800000> : vector<1xf32>
    %328 = vector.multi_reduction <maximumf>, %327, %cst_155 [1] : vector<1x15xf32> to vector<1xf32>
    %329 = vector.shape_cast %328 : vector<1xf32> to vector<1x1xf32>
    %330 = vector.broadcast %329 : vector<1x1xf32> to vector<1x15xf32>
    %331 = arith.subf %327, %330 : vector<1x15xf32>
    %332 = math.exp %331 : vector<1x15xf32>
    %cst_156 = arith.constant dense<0.000000e+00> : vector<1xf32>
    %333 = vector.multi_reduction <add>, %332, %cst_156 [1] : vector<1x15xf32> to vector<1xf32>
    %334 = vector.shape_cast %333 : vector<1xf32> to vector<1x1xf32>
    %335 = vector.broadcast %334 : vector<1x1xf32> to vector<1x15xf32>
    %336 = arith.divf %332, %335 : vector<1x15xf32>
    %337 = vector.extract_strided_slice %167 {offsets = [0, 16], sizes = [15, 8], strides = [1, 1]} : vector<15x32xf32> to vector<15x8xf32>
    %cst_157 = arith.constant dense<0.000000e+00> : vector<1x8xf32>
    %338 = tpu.matmul %336, %337, %cst_157 {dimension_numbers = #tpu.dot_dimension_numbers<[1], [0], [0], [1], [0, 0, 1, 1], [], []>} : vector<1x15xf32>, vector<15x8xf32>, vector<1x8xf32> -> vector<1x8xf32>
    %339 = vector.extract_strided_slice %285 {offsets = [16, 0], sizes = [8, 32], strides = [1, 1]} : vector<32x32xf32> to vector<8x32xf32>
    %cst_158 = arith.constant dense<0.000000e+00> : vector<1x32xf32>
    %340 = tpu.matmul %338, %339, %cst_158 {dimension_numbers = #tpu.dot_dimension_numbers<[1], [0], [0], [1], [0, 0, 1, 1], [], []>} : vector<1x8xf32>, vector<8x32xf32>, vector<1x32xf32> -> vector<1x32xf32>
    %341 = arith.addf %322, %340 : vector<1x32xf32>
    %342 = vector.extract_strided_slice %284 {offsets = [0, 24], sizes = [1, 8], strides = [1, 1]} : vector<1x32xf32> to vector<1x8xf32>
    %343 = vector.extract_strided_slice %166 {offsets = [0, 24], sizes = [15, 8], strides = [1, 1]} : vector<15x32xf32> to vector<15x8xf32>
    %cst_159 = arith.constant dense<0.000000e+00> : vector<1x15xf32>
    %344 = tpu.matmul %342, %343, %cst_159 {dimension_numbers = #tpu.dot_dimension_numbers<[1], [1], [0], [0], [0, 0, 1, 0], [], []>} : vector<1x8xf32>, vector<15x8xf32>, vector<1x15xf32> -> vector<1x15xf32>
    %cst_160 = arith.constant 0.353553385 : f32
    %345 = vector.broadcast %cst_160 : f32 to vector<1x15xf32>
    %346 = arith.mulf %344, %345 : vector<1x15xf32>
    %cst_161 = arith.constant dense<0xFF800000> : vector<1xf32>
    %347 = vector.multi_reduction <maximumf>, %346, %cst_161 [1] : vector<1x15xf32> to vector<1xf32>
    %348 = vector.shape_cast %347 : vector<1xf32> to vector<1x1xf32>
    %349 = vector.broadcast %348 : vector<1x1xf32> to vector<1x15xf32>
    %350 = arith.subf %346, %349 : vector<1x15xf32>
    %351 = math.exp %350 : vector<1x15xf32>
    %cst_162 = arith.constant dense<0.000000e+00> : vector<1xf32>
    %352 = vector.multi_reduction <add>, %351, %cst_162 [1] : vector<1x15xf32> to vector<1xf32>
    %353 = vector.shape_cast %352 : vector<1xf32> to vector<1x1xf32>
    %354 = vector.broadcast %353 : vector<1x1xf32> to vector<1x15xf32>
    %355 = arith.divf %351, %354 : vector<1x15xf32>
    %356 = vector.extract_strided_slice %167 {offsets = [0, 24], sizes = [15, 8], strides = [1, 1]} : vector<15x32xf32> to vector<15x8xf32>
    %cst_163 = arith.constant dense<0.000000e+00> : vector<1x8xf32>
    %357 = tpu.matmul %355, %356, %cst_163 {dimension_numbers = #tpu.dot_dimension_numbers<[1], [0], [0], [1], [0, 0, 1, 1], [], []>} : vector<1x15xf32>, vector<15x8xf32>, vector<1x8xf32> -> vector<1x8xf32>
    %358 = vector.extract_strided_slice %285 {offsets = [24, 0], sizes = [8, 32], strides = [1, 1]} : vector<32x32xf32> to vector<8x32xf32>
    %cst_164 = arith.constant dense<0.000000e+00> : vector<1x32xf32>
    %359 = tpu.matmul %357, %358, %cst_164 {dimension_numbers = #tpu.dot_dimension_numbers<[1], [0], [0], [1], [0, 0, 1, 1], [], []>} : vector<1x8xf32>, vector<8x32xf32>, vector<1x32xf32> -> vector<1x32xf32>
    %360 = arith.addf %341, %359 : vector<1x32xf32>
    %c0_165 = arith.constant 0 : index
    %c0_166 = arith.constant 0 : index
    %361 = vector.load %arg31[%c0_165, %c0_166] : memref<1x32xf32, #tpu.memory_space<vmem>>, vector<1x32xf32>
    %362 = arith.addf %360, %361 : vector<1x32xf32>
    %363 = arith.addf %280, %362 : vector<1x32xf32>
    %c0_167 = arith.constant 0 : index
    %c0_168 = arith.constant 0 : index
    %364 = vector.load %arg32[%c0_167, %c0_168] : memref<1x32xf32, #tpu.memory_space<vmem>>, vector<1x32xf32>
    %c0_169 = arith.constant 0 : index
    %c0_170 = arith.constant 0 : index
    %365 = vector.load %arg33[%c0_169, %c0_170] : memref<1x32xf32, #tpu.memory_space<vmem>>, vector<1x32xf32>
    %cst_171 = arith.constant dense<0.000000e+00> : vector<1xf32>
    %366 = vector.multi_reduction <add>, %363, %cst_171 [1] : vector<1x32xf32> to vector<1xf32>
    %367 = vector.shape_cast %366 : vector<1xf32> to vector<1x1xf32>
    %cst_172 = arith.constant 3.200000e+01 : f32
    %368 = vector.broadcast %cst_172 : f32 to vector<1x1xf32>
    %369 = arith.divf %367, %368 : vector<1x1xf32>
    %370 = vector.broadcast %369 : vector<1x1xf32> to vector<1x32xf32>
    %371 = arith.subf %363, %370 : vector<1x32xf32>
    %372 = arith.mulf %371, %371 : vector<1x32xf32>
    %cst_173 = arith.constant dense<0.000000e+00> : vector<1xf32>
    %373 = vector.multi_reduction <add>, %372, %cst_173 [1] : vector<1x32xf32> to vector<1xf32>
    %374 = vector.shape_cast %373 : vector<1xf32> to vector<1x1xf32>
    %cst_174 = arith.constant 3.200000e+01 : f32
    %375 = vector.broadcast %cst_174 : f32 to vector<1x1xf32>
    %376 = arith.divf %374, %375 : vector<1x1xf32>
    %377 = vector.broadcast %369 : vector<1x1xf32> to vector<1x32xf32>
    %378 = arith.subf %363, %377 : vector<1x32xf32>
    %cst_175 = arith.constant 9.99999974E-6 : f32
    %379 = vector.broadcast %cst_175 : f32 to vector<1x1xf32>
    %380 = arith.addf %376, %379 : vector<1x1xf32>
    %381 = math.rsqrt %380 : vector<1x1xf32>
    %382 = vector.broadcast %381 : vector<1x1xf32> to vector<1x32xf32>
    %383 = arith.mulf %378, %382 : vector<1x32xf32>
    %384 = arith.mulf %383, %364 : vector<1x32xf32>
    %385 = arith.addf %384, %365 : vector<1x32xf32>
    %c0_176 = arith.constant 0 : index
    %c0_177 = arith.constant 0 : index
    %386 = vector.load %arg34[%c0_176, %c0_177] : memref<32x64xf32, #tpu.memory_space<vmem>>, vector<32x64xf32>
    %cst_178 = arith.constant dense<0.000000e+00> : vector<1x64xf32>
    %387 = tpu.matmul %385, %386, %cst_178 {dimension_numbers = #tpu.dot_dimension_numbers<[1], [0], [0], [1], [0, 0, 1, 1], [], []>} : vector<1x32xf32>, vector<32x64xf32>, vector<1x64xf32> -> vector<1x64xf32>
    %c0_179 = arith.constant 0 : index
    %c0_180 = arith.constant 0 : index
    %388 = vector.load %arg35[%c0_179, %c0_180] : memref<1x64xf32, #tpu.memory_space<vmem>>, vector<1x64xf32>
    %389 = arith.addf %387, %388 : vector<1x64xf32>
    %cst_181 = arith.constant 0.000000e+00 : f32
    %390 = vector.broadcast %cst_181 : f32 to vector<1x64xf32>
    %391 = arith.maximumf %389, %390 : vector<1x64xf32>
    %c0_182 = arith.constant 0 : index
    %c0_183 = arith.constant 0 : index
    %392 = vector.load %arg36[%c0_182, %c0_183] : memref<64x32xf32, #tpu.memory_space<vmem>>, vector<64x32xf32>
    %cst_184 = arith.constant dense<0.000000e+00> : vector<1x32xf32>
    %393 = tpu.matmul %391, %392, %cst_184 {dimension_numbers = #tpu.dot_dimension_numbers<[1], [0], [0], [1], [0, 0, 1, 1], [], []>} : vector<1x64xf32>, vector<64x32xf32>, vector<1x32xf32> -> vector<1x32xf32>
    %c0_185 = arith.constant 0 : index
    %c0_186 = arith.constant 0 : index
    %394 = vector.load %arg37[%c0_185, %c0_186] : memref<1x32xf32, #tpu.memory_space<vmem>>, vector<1x32xf32>
    %395 = arith.addf %393, %394 : vector<1x32xf32>
    %396 = arith.addf %385, %395 : vector<1x32xf32>
    %c0_187 = arith.constant 0 : index
    %c0_188 = arith.constant 0 : index
    %397 = vector.load %arg38[%c0_187, %c0_188] : memref<1x32xf32, #tpu.memory_space<vmem>>, vector<1x32xf32>
    %c0_189 = arith.constant 0 : index
    %c0_190 = arith.constant 0 : index
    %398 = vector.load %arg39[%c0_189, %c0_190] : memref<1x32xf32, #tpu.memory_space<vmem>>, vector<1x32xf32>
    %cst_191 = arith.constant dense<0.000000e+00> : vector<1xf32>
    %399 = vector.multi_reduction <add>, %396, %cst_191 [1] : vector<1x32xf32> to vector<1xf32>
    %400 = vector.shape_cast %399 : vector<1xf32> to vector<1x1xf32>
    %cst_192 = arith.constant 3.200000e+01 : f32
    %401 = vector.broadcast %cst_192 : f32 to vector<1x1xf32>
    %402 = arith.divf %400, %401 : vector<1x1xf32>
    %403 = vector.broadcast %402 : vector<1x1xf32> to vector<1x32xf32>
    %404 = arith.subf %396, %403 : vector<1x32xf32>
    %405 = arith.mulf %404, %404 : vector<1x32xf32>
    %cst_193 = arith.constant dense<0.000000e+00> : vector<1xf32>
    %406 = vector.multi_reduction <add>, %405, %cst_193 [1] : vector<1x32xf32> to vector<1xf32>
    %407 = vector.shape_cast %406 : vector<1xf32> to vector<1x1xf32>
    %cst_194 = arith.constant 3.200000e+01 : f32
    %408 = vector.broadcast %cst_194 : f32 to vector<1x1xf32>
    %409 = arith.divf %407, %408 : vector<1x1xf32>
    %410 = vector.broadcast %402 : vector<1x1xf32> to vector<1x32xf32>
    %411 = arith.subf %396, %410 : vector<1x32xf32>
    %cst_195 = arith.constant 9.99999974E-6 : f32
    %412 = vector.broadcast %cst_195 : f32 to vector<1x1xf32>
    %413 = arith.addf %409, %412 : vector<1x1xf32>
    %414 = math.rsqrt %413 : vector<1x1xf32>
    %415 = vector.broadcast %414 : vector<1x1xf32> to vector<1x32xf32>
    %416 = arith.mulf %411, %415 : vector<1x32xf32>
    %417 = arith.mulf %416, %397 : vector<1x32xf32>
    %418 = arith.addf %417, %398 : vector<1x32xf32>
    %c0_196 = arith.constant 0 : index
    %c0_197 = arith.constant 0 : index
    %419 = vector.load %arg40[%c0_196, %c0_197] : memref<32x128xf32, #tpu.memory_space<vmem>>, vector<32x128xf32>
    %cst_198 = arith.constant dense<0.000000e+00> : vector<1x128xf32>
    %420 = tpu.matmul %418, %419, %cst_198 {dimension_numbers = #tpu.dot_dimension_numbers<[1], [0], [0], [1], [0, 0, 1, 1], [], []>} : vector<1x32xf32>, vector<32x128xf32>, vector<1x128xf32> -> vector<1x128xf32>
    %c0_199 = arith.constant 0 : index
    %c0_200 = arith.constant 0 : index
    %421 = vector.load %arg41[%c0_199, %c0_200] : memref<1x128xf32, #tpu.memory_space<vmem>>, vector<1x128xf32>
    %422 = arith.addf %420, %421 : vector<1x128xf32>
    %423 = vector.shape_cast %422 : vector<1x128xf32> to vector<1x1x128xf32>
    %c0_201 = arith.constant 0 : index
    %c0_202 = arith.constant 0 : index
    %c0_203 = arith.constant 0 : index
    %424 = vector.load %arg42[%c0_201, %c0_202, %c0_203] : memref<1x5x128xf32, #tpu.memory_space<vmem>>, vector<1x1x128xf32>
    tpu.vector_store %arg42[%c0_201, %c0_202, %c0_203], %423 {strides = array<i32>} : memref<1x5x128xf32, #tpu.memory_space<vmem>>, vector<1x1x128xf32>,
    %cst_204 = arith.constant dense<0xFF800000> : vector<1xf32>
    %425 = vector.multi_reduction <maximumf>, %422, %cst_204 [1] : vector<1x128xf32> to vector<1xf32>
    %426 = vector.shape_cast %425 : vector<1xf32> to vector<1x1xf32>
    %427 = vector.broadcast %426 : vector<1x1xf32> to vector<1x128xf32>
    %428 = arith.cmpf oeq, %422, %427 : vector<1x128xf32>
    %c128_i32 = arith.constant 128 : i32
    %429 = vector.broadcast %c128_i32 : i32 to vector<1x128xi32>
    %430 = arith.select %428, %169, %429 : vector<1x128xi1>, vector<1x128xi32>
    %cst_205 = arith.constant dense<2147483647> : vector<1xi32>
    %431 = vector.multi_reduction <minsi>, %430, %cst_205 [1] : vector<1x128xi32> to vector<1xi32>
    %432 = vector.shape_cast %431 : vector<1xi32> to vector<1x1xi32>
    %433 = vector.broadcast %432 : vector<1x1xi32> to vector<1x128xi32>
    %434 = arith.cmpi eq, %169, %433 : vector<1x128xi32>
    %435 = arith.extui %434 : vector<1x128xi1> to vector<1x128xi32>
    %436 = arith.sitofp %435 : vector<1x128xi32> to vector<1x128xf32>
    %cst_206 = arith.constant dense<0.000000e+00> : vector<1x32xf32>
    %437 = tpu.matmul %436, %168, %cst_206 {dimension_numbers = #tpu.dot_dimension_numbers<[1], [0], [0], [1], [0, 0, 1, 1], [], []>} : vector<1x128xf32>, vector<128x32xf32>, vector<1x32xf32> -> vector<1x32xf32>
    %c1 = arith.constant 1 : index
    %c0_207 = arith.constant 0 : index
    %438 = vector.load %arg19[%c1, %c0_207] : memref<5x32xf32, #tpu.memory_space<vmem>>, vector<1x32xf32>
    %439 = arith.addf %437, %438 : vector<1x32xf32>
    %c0_208 = arith.constant 0 : index
    %c0_209 = arith.constant 0 : index
    %440 = vector.load %arg20[%c0_208, %c0_209] : memref<32x96xf32, #tpu.memory_space<vmem>>, vector<32x96xf32>
    %cst_210 = arith.constant dense<0.000000e+00> : vector<1x96xf32>
    %441 = tpu.matmul %439, %440, %cst_210 {dimension_numbers = #tpu.dot_dimension_numbers<[1], [0], [0], [1], [0, 0, 1, 1], [], []>} : vector<1x32xf32>, vector<32x96xf32>, vector<1x96xf32> -> vector<1x96xf32>
    %c0_211 = arith.constant 0 : index
    %c0_212 = arith.constant 0 : index
    %442 = vector.load %arg21[%c0_211, %c0_212] : memref<1x96xf32, #tpu.memory_space<vmem>>, vector<1x96xf32>
    %443 = arith.addf %441, %442 : vector<1x96xf32>
    %444 = vector.extract_strided_slice %443 {offsets = [0, 32], sizes = [1, 32], strides = [1, 1]} : vector<1x96xf32> to vector<1x32xf32>
    %c1_213 = arith.constant 1 : index
    %c0_214 = arith.constant 0 : index
    %445 = vector.load %arg43[%c1_213, %c0_214] : memref<8x32xf32, #tpu.memory_space<vmem>>, vector<1x32xf32>
    tpu.vector_store %arg43[%c1_213, %c0_214], %444 {strides = array<i32>} : memref<8x32xf32, #tpu.memory_space<vmem>>, vector<1x32xf32>,
    %446 = vector.extract_strided_slice %443 {offsets = [0, 64], sizes = [1, 32], strides = [1, 1]} : vector<1x96xf32> to vector<1x32xf32>
    %c1_215 = arith.constant 1 : index
    %c0_216 = arith.constant 0 : index
    %447 = vector.load %arg44[%c1_215, %c0_216] : memref<8x32xf32, #tpu.memory_space<vmem>>, vector<1x32xf32>
    tpu.vector_store %arg44[%c1_215, %c0_216], %446 {strides = array<i32>} : memref<8x32xf32, #tpu.memory_space<vmem>>, vector<1x32xf32>,
    %448 = vector.extract_strided_slice %443 {offsets = [0, 0], sizes = [1, 32], strides = [1, 1]} : vector<1x96xf32> to vector<1x32xf32>
    %c0_217 = arith.constant 0 : index
    %c0_218 = arith.constant 0 : index
    %449 = vector.load %arg43[%c0_217, %c0_218] : memref<8x32xf32, #tpu.memory_space<vmem>>, vector<2x32xf32>
    %c0_219 = arith.constant 0 : index
    %c0_220 = arith.constant 0 : index
    %450 = vector.load %arg44[%c0_219, %c0_220] : memref<8x32xf32, #tpu.memory_space<vmem>>, vector<2x32xf32>
    %c0_221 = arith.constant 0 : index
    %c0_222 = arith.constant 0 : index
    %451 = vector.load %arg22[%c0_221, %c0_222] : memref<32x32xf32, #tpu.memory_space<vmem>>, vector<32x32xf32>
    %452 = vector.extract_strided_slice %448 {offsets = [0, 0], sizes = [1, 8], strides = [1, 1]} : vector<1x32xf32> to vector<1x8xf32>
    %453 = vector.extract_strided_slice %449 {offsets = [0, 0], sizes = [2, 8], strides = [1, 1]} : vector<2x32xf32> to vector<2x8xf32>
    %cst_223 = arith.constant dense<0.000000e+00> : vector<1x2xf32>
    %454 = tpu.matmul %452, %453, %cst_223 {dimension_numbers = #tpu.dot_dimension_numbers<[1], [1], [0], [0], [0, 0, 1, 0], [], []>} : vector<1x8xf32>, vector<2x8xf32>, vector<1x2xf32> -> vector<1x2xf32>
    %cst_224 = arith.constant 0.353553385 : f32
    %455 = vector.broadcast %cst_224 : f32 to vector<1x2xf32>
    %456 = arith.mulf %454, %455 : vector<1x2xf32>
    %cst_225 = arith.constant dense<0xFF800000> : vector<1xf32>
    %457 = vector.multi_reduction <maximumf>, %456, %cst_225 [1] : vector<1x2xf32> to vector<1xf32>
    %458 = vector.shape_cast %457 : vector<1xf32> to vector<1x1xf32>
    %459 = vector.broadcast %458 : vector<1x1xf32> to vector<1x2xf32>
    %460 = arith.subf %456, %459 : vector<1x2xf32>
    %461 = math.exp %460 : vector<1x2xf32>
    %cst_226 = arith.constant dense<0.000000e+00> : vector<1xf32>
    %462 = vector.multi_reduction <add>, %461, %cst_226 [1] : vector<1x2xf32> to vector<1xf32>
    %463 = vector.shape_cast %462 : vector<1xf32> to vector<1x1xf32>
    %464 = vector.broadcast %463 : vector<1x1xf32> to vector<1x2xf32>
    %465 = arith.divf %461, %464 : vector<1x2xf32>
    %466 = vector.extract_strided_slice %450 {offsets = [0, 0], sizes = [2, 8], strides = [1, 1]} : vector<2x32xf32> to vector<2x8xf32>
    %cst_227 = arith.constant dense<0.000000e+00> : vector<1x8xf32>
    %467 = tpu.matmul %465, %466, %cst_227 {dimension_numbers = #tpu.dot_dimension_numbers<[1], [0], [0], [1], [0, 0, 1, 1], [], []>} : vector<1x2xf32>, vector<2x8xf32>, vector<1x8xf32> -> vector<1x8xf32>
    %468 = vector.extract_strided_slice %451 {offsets = [0, 0], sizes = [8, 32], strides = [1, 1]} : vector<32x32xf32> to vector<8x32xf32>
    %cst_228 = arith.constant dense<0.000000e+00> : vector<1x32xf32>
    %469 = tpu.matmul %467, %468, %cst_228 {dimension_numbers = #tpu.dot_dimension_numbers<[1], [0], [0], [1], [0, 0, 1, 1], [], []>} : vector<1x8xf32>, vector<8x32xf32>, vector<1x32xf32> -> vector<1x32xf32>
    %470 = vector.extract_strided_slice %448 {offsets = [0, 8], sizes = [1, 8], strides = [1, 1]} : vector<1x32xf32> to vector<1x8xf32>
    %471 = vector.extract_strided_slice %449 {offsets = [0, 8], sizes = [2, 8], strides = [1, 1]} : vector<2x32xf32> to vector<2x8xf32>
    %cst_229 = arith.constant dense<0.000000e+00> : vector<1x2xf32>
    %472 = tpu.matmul %470, %471, %cst_229 {dimension_numbers = #tpu.dot_dimension_numbers<[1], [1], [0], [0], [0, 0, 1, 0], [], []>} : vector<1x8xf32>, vector<2x8xf32>, vector<1x2xf32> -> vector<1x2xf32>
    %cst_230 = arith.constant 0.353553385 : f32
    %473 = vector.broadcast %cst_230 : f32 to vector<1x2xf32>
    %474 = arith.mulf %472, %473 : vector<1x2xf32>
    %cst_231 = arith.constant dense<0xFF800000> : vector<1xf32>
    %475 = vector.multi_reduction <maximumf>, %474, %cst_231 [1] : vector<1x2xf32> to vector<1xf32>
    %476 = vector.shape_cast %475 : vector<1xf32> to vector<1x1xf32>
    %477 = vector.broadcast %476 : vector<1x1xf32> to vector<1x2xf32>
    %478 = arith.subf %474, %477 : vector<1x2xf32>
    %479 = math.exp %478 : vector<1x2xf32>
    %cst_232 = arith.constant dense<0.000000e+00> : vector<1xf32>
    %480 = vector.multi_reduction <add>, %479, %cst_232 [1] : vector<1x2xf32> to vector<1xf32>
    %481 = vector.shape_cast %480 : vector<1xf32> to vector<1x1xf32>
    %482 = vector.broadcast %481 : vector<1x1xf32> to vector<1x2xf32>
    %483 = arith.divf %479, %482 : vector<1x2xf32>
    %484 = vector.extract_strided_slice %450 {offsets = [0, 8], sizes = [2, 8], strides = [1, 1]} : vector<2x32xf32> to vector<2x8xf32>
    %cst_233 = arith.constant dense<0.000000e+00> : vector<1x8xf32>
    %485 = tpu.matmul %483, %484, %cst_233 {dimension_numbers = #tpu.dot_dimension_numbers<[1], [0], [0], [1], [0, 0, 1, 1], [], []>} : vector<1x2xf32>, vector<2x8xf32>, vector<1x8xf32> -> vector<1x8xf32>
    %486 = vector.extract_strided_slice %451 {offsets = [8, 0], sizes = [8, 32], strides = [1, 1]} : vector<32x32xf32> to vector<8x32xf32>
    %cst_234 = arith.constant dense<0.000000e+00> : vector<1x32xf32>
    %487 = tpu.matmul %485, %486, %cst_234 {dimension_numbers = #tpu.dot_dimension_numbers<[1], [0], [0], [1], [0, 0, 1, 1], [], []>} : vector<1x8xf32>, vector<8x32xf32>, vector<1x32xf32> -> vector<1x32xf32>
    %488 = arith.addf %469, %487 : vector<1x32xf32>
    %489 = vector.extract_strided_slice %448 {offsets = [0, 16], sizes = [1, 8], strides = [1, 1]} : vector<1x32xf32> to vector<1x8xf32>
    %490 = vector.extract_strided_slice %449 {offsets = [0, 16], sizes = [2, 8], strides = [1, 1]} : vector<2x32xf32> to vector<2x8xf32>
    %cst_235 = arith.constant dense<0.000000e+00> : vector<1x2xf32>
    %491 = tpu.matmul %489, %490, %cst_235 {dimension_numbers = #tpu.dot_dimension_numbers<[1], [1], [0], [0], [0, 0, 1, 0], [], []>} : vector<1x8xf32>, vector<2x8xf32>, vector<1x2xf32> -> vector<1x2xf32>
    %cst_236 = arith.constant 0.353553385 : f32
    %492 = vector.broadcast %cst_236 : f32 to vector<1x2xf32>
    %493 = arith.mulf %491, %492 : vector<1x2xf32>
    %cst_237 = arith.constant dense<0xFF800000> : vector<1xf32>
    %494 = vector.multi_reduction <maximumf>, %493, %cst_237 [1] : vector<1x2xf32> to vector<1xf32>
    %495 = vector.shape_cast %494 : vector<1xf32> to vector<1x1xf32>
    %496 = vector.broadcast %495 : vector<1x1xf32> to vector<1x2xf32>
    %497 = arith.subf %493, %496 : vector<1x2xf32>
    %498 = math.exp %497 : vector<1x2xf32>
    %cst_238 = arith.constant dense<0.000000e+00> : vector<1xf32>
    %499 = vector.multi_reduction <add>, %498, %cst_238 [1] : vector<1x2xf32> to vector<1xf32>
    %500 = vector.shape_cast %499 : vector<1xf32> to vector<1x1xf32>
    %501 = vector.broadcast %500 : vector<1x1xf32> to vector<1x2xf32>
    %502 = arith.divf %498, %501 : vector<1x2xf32>
    %503 = vector.extract_strided_slice %450 {offsets = [0, 16], sizes = [2, 8], strides = [1, 1]} : vector<2x32xf32> to vector<2x8xf32>
    %cst_239 = arith.constant dense<0.000000e+00> : vector<1x8xf32>
    %504 = tpu.matmul %502, %503, %cst_239 {dimension_numbers = #tpu.dot_dimension_numbers<[1], [0], [0], [1], [0, 0, 1, 1], [], []>} : vector<1x2xf32>, vector<2x8xf32>, vector<1x8xf32> -> vector<1x8xf32>
    %505 = vector.extract_strided_slice %451 {offsets = [16, 0], sizes = [8, 32], strides = [1, 1]} : vector<32x32xf32> to vector<8x32xf32>
    %cst_240 = arith.constant dense<0.000000e+00> : vector<1x32xf32>
    %506 = tpu.matmul %504, %505, %cst_240 {dimension_numbers = #tpu.dot_dimension_numbers<[1], [0], [0], [1], [0, 0, 1, 1], [], []>} : vector<1x8xf32>, vector<8x32xf32>, vector<1x32xf32> -> vector<1x32xf32>
    %507 = arith.addf %488, %506 : vector<1x32xf32>
    %508 = vector.extract_strided_slice %448 {offsets = [0, 24], sizes = [1, 8], strides = [1, 1]} : vector<1x32xf32> to vector<1x8xf32>
    %509 = vector.extract_strided_slice %449 {offsets = [0, 24], sizes = [2, 8], strides = [1, 1]} : vector<2x32xf32> to vector<2x8xf32>
    %cst_241 = arith.constant dense<0.000000e+00> : vector<1x2xf32>
    %510 = tpu.matmul %508, %509, %cst_241 {dimension_numbers = #tpu.dot_dimension_numbers<[1], [1], [0], [0], [0, 0, 1, 0], [], []>} : vector<1x8xf32>, vector<2x8xf32>, vector<1x2xf32> -> vector<1x2xf32>
    %cst_242 = arith.constant 0.353553385 : f32
    %511 = vector.broadcast %cst_242 : f32 to vector<1x2xf32>
    %512 = arith.mulf %510, %511 : vector<1x2xf32>
    %cst_243 = arith.constant dense<0xFF800000> : vector<1xf32>
    %513 = vector.multi_reduction <maximumf>, %512, %cst_243 [1] : vector<1x2xf32> to vector<1xf32>
    %514 = vector.shape_cast %513 : vector<1xf32> to vector<1x1xf32>
    %515 = vector.broadcast %514 : vector<1x1xf32> to vector<1x2xf32>
    %516 = arith.subf %512, %515 : vector<1x2xf32>
    %517 = math.exp %516 : vector<1x2xf32>
    %cst_244 = arith.constant dense<0.000000e+00> : vector<1xf32>
    %518 = vector.multi_reduction <add>, %517, %cst_244 [1] : vector<1x2xf32> to vector<1xf32>
    %519 = vector.shape_cast %518 : vector<1xf32> to vector<1x1xf32>
    %520 = vector.broadcast %519 : vector<1x1xf32> to vector<1x2xf32>
    %521 = arith.divf %517, %520 : vector<1x2xf32>
    %522 = vector.extract_strided_slice %450 {offsets = [0, 24], sizes = [2, 8], strides = [1, 1]} : vector<2x32xf32> to vector<2x8xf32>
    %cst_245 = arith.constant dense<0.000000e+00> : vector<1x8xf32>
    %523 = tpu.matmul %521, %522, %cst_245 {dimension_numbers = #tpu.dot_dimension_numbers<[1], [0], [0], [1], [0, 0, 1, 1], [], []>} : vector<1x2xf32>, vector<2x8xf32>, vector<1x8xf32> -> vector<1x8xf32>
    %524 = vector.extract_strided_slice %451 {offsets = [24, 0], sizes = [8, 32], strides = [1, 1]} : vector<32x32xf32> to vector<8x32xf32>
    %cst_246 = arith.constant dense<0.000000e+00> : vector<1x32xf32>
    %525 = tpu.matmul %523, %524, %cst_246 {dimension_numbers = #tpu.dot_dimension_numbers<[1], [0], [0], [1], [0, 0, 1, 1], [], []>} : vector<1x8xf32>, vector<8x32xf32>, vector<1x32xf32> -> vector<1x32xf32>
    %526 = arith.addf %507, %525 : vector<1x32xf32>
    %c0_247 = arith.constant 0 : index
    %c0_248 = arith.constant 0 : index
    %527 = vector.load %arg23[%c0_247, %c0_248] : memref<1x32xf32, #tpu.memory_space<vmem>>, vector<1x32xf32>
    %528 = arith.addf %526, %527 : vector<1x32xf32>
    %529 = arith.addf %439, %528 : vector<1x32xf32>
    %c0_249 = arith.constant 0 : index
    %c0_250 = arith.constant 0 : index
    %530 = vector.load %arg24[%c0_249, %c0_250] : memref<1x32xf32, #tpu.memory_space<vmem>>, vector<1x32xf32>
    %c0_251 = arith.constant 0 : index
    %c0_252 = arith.constant 0 : index
    %531 = vector.load %arg25[%c0_251, %c0_252] : memref<1x32xf32, #tpu.memory_space<vmem>>, vector<1x32xf32>
    %cst_253 = arith.constant dense<0.000000e+00> : vector<1xf32>
    %532 = vector.multi_reduction <add>, %529, %cst_253 [1] : vector<1x32xf32> to vector<1xf32>
    %533 = vector.shape_cast %532 : vector<1xf32> to vector<1x1xf32>
    %cst_254 = arith.constant 3.200000e+01 : f32
    %534 = vector.broadcast %cst_254 : f32 to vector<1x1xf32>
    %535 = arith.divf %533, %534 : vector<1x1xf32>
    %536 = vector.broadcast %535 : vector<1x1xf32> to vector<1x32xf32>
    %537 = arith.subf %529, %536 : vector<1x32xf32>
    %538 = arith.mulf %537, %537 : vector<1x32xf32>
    %cst_255 = arith.constant dense<0.000000e+00> : vector<1xf32>
    %539 = vector.multi_reduction <add>, %538, %cst_255 [1] : vector<1x32xf32> to vector<1xf32>
    %540 = vector.shape_cast %539 : vector<1xf32> to vector<1x1xf32>
    %cst_256 = arith.constant 3.200000e+01 : f32
    %541 = vector.broadcast %cst_256 : f32 to vector<1x1xf32>
    %542 = arith.divf %540, %541 : vector<1x1xf32>
    %543 = vector.broadcast %535 : vector<1x1xf32> to vector<1x32xf32>
    %544 = arith.subf %529, %543 : vector<1x32xf32>
    %cst_257 = arith.constant 9.99999974E-6 : f32
    %545 = vector.broadcast %cst_257 : f32 to vector<1x1xf32>
    %546 = arith.addf %542, %545 : vector<1x1xf32>
    %547 = math.rsqrt %546 : vector<1x1xf32>
    %548 = vector.broadcast %547 : vector<1x1xf32> to vector<1x32xf32>
    %549 = arith.mulf %544, %548 : vector<1x32xf32>
    %550 = arith.mulf %549, %530 : vector<1x32xf32>
    %551 = arith.addf %550, %531 : vector<1x32xf32>
    %c0_258 = arith.constant 0 : index
    %c0_259 = arith.constant 0 : index
    %552 = vector.load %arg26[%c0_258, %c0_259] : memref<32x32xf32, #tpu.memory_space<vmem>>, vector<32x32xf32>
    %cst_260 = arith.constant dense<0.000000e+00> : vector<1x32xf32>
    %553 = tpu.matmul %551, %552, %cst_260 {dimension_numbers = #tpu.dot_dimension_numbers<[1], [0], [0], [1], [0, 0, 1, 1], [], []>} : vector<1x32xf32>, vector<32x32xf32>, vector<1x32xf32> -> vector<1x32xf32>
    %c0_261 = arith.constant 0 : index
    %c0_262 = arith.constant 0 : index
    %554 = vector.load %arg27[%c0_261, %c0_262] : memref<1x32xf32, #tpu.memory_space<vmem>>, vector<1x32xf32>
    %555 = arith.addf %553, %554 : vector<1x32xf32>
    %c0_263 = arith.constant 0 : index
    %c0_264 = arith.constant 0 : index
    %556 = vector.load %arg30[%c0_263, %c0_264] : memref<32x32xf32, #tpu.memory_space<vmem>>, vector<32x32xf32>
    %557 = vector.extract_strided_slice %555 {offsets = [0, 0], sizes = [1, 8], strides = [1, 1]} : vector<1x32xf32> to vector<1x8xf32>
    %558 = vector.extract_strided_slice %166 {offsets = [0, 0], sizes = [15, 8], strides = [1, 1]} : vector<15x32xf32> to vector<15x8xf32>
    %cst_265 = arith.constant dense<0.000000e+00> : vector<1x15xf32>
    %559 = tpu.matmul %557, %558, %cst_265 {dimension_numbers = #tpu.dot_dimension_numbers<[1], [1], [0], [0], [0, 0, 1, 0], [], []>} : vector<1x8xf32>, vector<15x8xf32>, vector<1x15xf32> -> vector<1x15xf32>
    %cst_266 = arith.constant 0.353553385 : f32
    %560 = vector.broadcast %cst_266 : f32 to vector<1x15xf32>
    %561 = arith.mulf %559, %560 : vector<1x15xf32>
    %cst_267 = arith.constant dense<0xFF800000> : vector<1xf32>
    %562 = vector.multi_reduction <maximumf>, %561, %cst_267 [1] : vector<1x15xf32> to vector<1xf32>
    %563 = vector.shape_cast %562 : vector<1xf32> to vector<1x1xf32>
    %564 = vector.broadcast %563 : vector<1x1xf32> to vector<1x15xf32>
    %565 = arith.subf %561, %564 : vector<1x15xf32>
    %566 = math.exp %565 : vector<1x15xf32>
    %cst_268 = arith.constant dense<0.000000e+00> : vector<1xf32>
    %567 = vector.multi_reduction <add>, %566, %cst_268 [1] : vector<1x15xf32> to vector<1xf32>
    %568 = vector.shape_cast %567 : vector<1xf32> to vector<1x1xf32>
    %569 = vector.broadcast %568 : vector<1x1xf32> to vector<1x15xf32>
    %570 = arith.divf %566, %569 : vector<1x15xf32>
    %571 = vector.extract_strided_slice %167 {offsets = [0, 0], sizes = [15, 8], strides = [1, 1]} : vector<15x32xf32> to vector<15x8xf32>
    %cst_269 = arith.constant dense<0.000000e+00> : vector<1x8xf32>
    %572 = tpu.matmul %570, %571, %cst_269 {dimension_numbers = #tpu.dot_dimension_numbers<[1], [0], [0], [1], [0, 0, 1, 1], [], []>} : vector<1x15xf32>, vector<15x8xf32>, vector<1x8xf32> -> vector<1x8xf32>
    %573 = vector.extract_strided_slice %556 {offsets = [0, 0], sizes = [8, 32], strides = [1, 1]} : vector<32x32xf32> to vector<8x32xf32>
    %cst_270 = arith.constant dense<0.000000e+00> : vector<1x32xf32>
    %574 = tpu.matmul %572, %573, %cst_270 {dimension_numbers = #tpu.dot_dimension_numbers<[1], [0], [0], [1], [0, 0, 1, 1], [], []>} : vector<1x8xf32>, vector<8x32xf32>, vector<1x32xf32> -> vector<1x32xf32>
    %575 = vector.extract_strided_slice %555 {offsets = [0, 8], sizes = [1, 8], strides = [1, 1]} : vector<1x32xf32> to vector<1x8xf32>
    %576 = vector.extract_strided_slice %166 {offsets = [0, 8], sizes = [15, 8], strides = [1, 1]} : vector<15x32xf32> to vector<15x8xf32>
    %cst_271 = arith.constant dense<0.000000e+00> : vector<1x15xf32>
    %577 = tpu.matmul %575, %576, %cst_271 {dimension_numbers = #tpu.dot_dimension_numbers<[1], [1], [0], [0], [0, 0, 1, 0], [], []>} : vector<1x8xf32>, vector<15x8xf32>, vector<1x15xf32> -> vector<1x15xf32>
    %cst_272 = arith.constant 0.353553385 : f32
    %578 = vector.broadcast %cst_272 : f32 to vector<1x15xf32>
    %579 = arith.mulf %577, %578 : vector<1x15xf32>
    %cst_273 = arith.constant dense<0xFF800000> : vector<1xf32>
    %580 = vector.multi_reduction <maximumf>, %579, %cst_273 [1] : vector<1x15xf32> to vector<1xf32>
    %581 = vector.shape_cast %580 : vector<1xf32> to vector<1x1xf32>
    %582 = vector.broadcast %581 : vector<1x1xf32> to vector<1x15xf32>
    %583 = arith.subf %579, %582 : vector<1x15xf32>
    %584 = math.exp %583 : vector<1x15xf32>
    %cst_274 = arith.constant dense<0.000000e+00> : vector<1xf32>
    %585 = vector.multi_reduction <add>, %584, %cst_274 [1] : vector<1x15xf32> to vector<1xf32>
    %586 = vector.shape_cast %585 : vector<1xf32> to vector<1x1xf32>
    %587 = vector.broadcast %586 : vector<1x1xf32> to vector<1x15xf32>
    %588 = arith.divf %584, %587 : vector<1x15xf32>
    %589 = vector.extract_strided_slice %167 {offsets = [0, 8], sizes = [15, 8], strides = [1, 1]} : vector<15x32xf32> to vector<15x8xf32>
    %cst_275 = arith.constant dense<0.000000e+00> : vector<1x8xf32>
    %590 = tpu.matmul %588, %589, %cst_275 {dimension_numbers = #tpu.dot_dimension_numbers<[1], [0], [0], [1], [0, 0, 1, 1], [], []>} : vector<1x15xf32>, vector<15x8xf32>, vector<1x8xf32> -> vector<1x8xf32>
    %591 = vector.extract_strided_slice %556 {offsets = [8, 0], sizes = [8, 32], strides = [1, 1]} : vector<32x32xf32> to vector<8x32xf32>
    %cst_276 = arith.constant dense<0.000000e+00> : vector<1x32xf32>
    %592 = tpu.matmul %590, %591, %cst_276 {dimension_numbers = #tpu.dot_dimension_numbers<[1], [0], [0], [1], [0, 0, 1, 1], [], []>} : vector<1x8xf32>, vector<8x32xf32>, vector<1x32xf32> -> vector<1x32xf32>
    %593 = arith.addf %574, %592 : vector<1x32xf32>
    %594 = vector.extract_strided_slice %555 {offsets = [0, 16], sizes = [1, 8], strides = [1, 1]} : vector<1x32xf32> to vector<1x8xf32>
    %595 = vector.extract_strided_slice %166 {offsets = [0, 16], sizes = [15, 8], strides = [1, 1]} : vector<15x32xf32> to vector<15x8xf32>
    %cst_277 = arith.constant dense<0.000000e+00> : vector<1x15xf32>
    %596 = tpu.matmul %594, %595, %cst_277 {dimension_numbers = #tpu.dot_dimension_numbers<[1], [1], [0], [0], [0, 0, 1, 0], [], []>} : vector<1x8xf32>, vector<15x8xf32>, vector<1x15xf32> -> vector<1x15xf32>
    %cst_278 = arith.constant 0.353553385 : f32
    %597 = vector.broadcast %cst_278 : f32 to vector<1x15xf32>
    %598 = arith.mulf %596, %597 : vector<1x15xf32>
    %cst_279 = arith.constant dense<0xFF800000> : vector<1xf32>
    %599 = vector.multi_reduction <maximumf>, %598, %cst_279 [1] : vector<1x15xf32> to vector<1xf32>
    %600 = vector.shape_cast %599 : vector<1xf32> to vector<1x1xf32>
    %601 = vector.broadcast %600 : vector<1x1xf32> to vector<1x15xf32>
    %602 = arith.subf %598, %601 : vector<1x15xf32>
    %603 = math.exp %602 : vector<1x15xf32>
    %cst_280 = arith.constant dense<0.000000e+00> : vector<1xf32>
    %604 = vector.multi_reduction <add>, %603, %cst_280 [1] : vector<1x15xf32> to vector<1xf32>
    %605 = vector.shape_cast %604 : vector<1xf32> to vector<1x1xf32>
    %606 = vector.broadcast %605 : vector<1x1xf32> to vector<1x15xf32>
    %607 = arith.divf %603, %606 : vector<1x15xf32>
    %608 = vector.extract_strided_slice %167 {offsets = [0, 16], sizes = [15, 8], strides = [1, 1]} : vector<15x32xf32> to vector<15x8xf32>
    %cst_281 = arith.constant dense<0.000000e+00> : vector<1x8xf32>
    %609 = tpu.matmul %607, %608, %cst_281 {dimension_numbers = #tpu.dot_dimension_numbers<[1], [0], [0], [1], [0, 0, 1, 1], [], []>} : vector<1x15xf32>, vector<15x8xf32>, vector<1x8xf32> -> vector<1x8xf32>
    %610 = vector.extract_strided_slice %556 {offsets = [16, 0], sizes = [8, 32], strides = [1, 1]} : vector<32x32xf32> to vector<8x32xf32>
    %cst_282 = arith.constant dense<0.000000e+00> : vector<1x32xf32>
    %611 = tpu.matmul %609, %610, %cst_282 {dimension_numbers = #tpu.dot_dimension_numbers<[1], [0], [0], [1], [0, 0, 1, 1], [], []>} : vector<1x8xf32>, vector<8x32xf32>, vector<1x32xf32> -> vector<1x32xf32>
    %612 = arith.addf %593, %611 : vector<1x32xf32>
    %613 = vector.extract_strided_slice %555 {offsets = [0, 24], sizes = [1, 8], strides = [1, 1]} : vector<1x32xf32> to vector<1x8xf32>
    %614 = vector.extract_strided_slice %166 {offsets = [0, 24], sizes = [15, 8], strides = [1, 1]} : vector<15x32xf32> to vector<15x8xf32>
    %cst_283 = arith.constant dense<0.000000e+00> : vector<1x15xf32>
    %615 = tpu.matmul %613, %614, %cst_283 {dimension_numbers = #tpu.dot_dimension_numbers<[1], [1], [0], [0], [0, 0, 1, 0], [], []>} : vector<1x8xf32>, vector<15x8xf32>, vector<1x15xf32> -> vector<1x15xf32>
    %cst_284 = arith.constant 0.353553385 : f32
    %616 = vector.broadcast %cst_284 : f32 to vector<1x15xf32>
    %617 = arith.mulf %615, %616 : vector<1x15xf32>
    %cst_285 = arith.constant dense<0xFF800000> : vector<1xf32>
    %618 = vector.multi_reduction <maximumf>, %617, %cst_285 [1] : vector<1x15xf32> to vector<1xf32>
    %619 = vector.shape_cast %618 : vector<1xf32> to vector<1x1xf32>
    %620 = vector.broadcast %619 : vector<1x1xf32> to vector<1x15xf32>
    %621 = arith.subf %617, %620 : vector<1x15xf32>
    %622 = math.exp %621 : vector<1x15xf32>
    %cst_286 = arith.constant dense<0.000000e+00> : vector<1xf32>
    %623 = vector.multi_reduction <add>, %622, %cst_286 [1] : vector<1x15xf32> to vector<1xf32>
    %624 = vector.shape_cast %623 : vector<1xf32> to vector<1x1xf32>
    %625 = vector.broadcast %624 : vector<1x1xf32> to vector<1x15xf32>
    %626 = arith.divf %622, %625 : vector<1x15xf32>
    %627 = vector.extract_strided_slice %167 {offsets = [0, 24], sizes = [15, 8], strides = [1, 1]} : vector<15x32xf32> to vector<15x8xf32>
    %cst_287 = arith.constant dense<0.000000e+00> : vector<1x8xf32>
    %628 = tpu.matmul %626, %627, %cst_287 {dimension_numbers = #tpu.dot_dimension_numbers<[1], [0], [0], [1], [0, 0, 1, 1], [], []>} : vector<1x15xf32>, vector<15x8xf32>, vector<1x8xf32> -> vector<1x8xf32>
    %629 = vector.extract_strided_slice %556 {offsets = [24, 0], sizes = [8, 32], strides = [1, 1]} : vector<32x32xf32> to vector<8x32xf32>
    %cst_288 = arith.constant dense<0.000000e+00> : vector<1x32xf32>
    %630 = tpu.matmul %628, %629, %cst_288 {dimension_numbers = #tpu.dot_dimension_numbers<[1], [0], [0], [1], [0, 0, 1, 1], [], []>} : vector<1x8xf32>, vector<8x32xf32>, vector<1x32xf32> -> vector<1x32xf32>
    %631 = arith.addf %612, %630 : vector<1x32xf32>
    %c0_289 = arith.constant 0 : index
    %c0_290 = arith.constant 0 : index
    %632 = vector.load %arg31[%c0_289, %c0_290] : memref<1x32xf32, #tpu.memory_space<vmem>>, vector<1x32xf32>
    %633 = arith.addf %631, %632 : vector<1x32xf32>
    %634 = arith.addf %551, %633 : vector<1x32xf32>
    %c0_291 = arith.constant 0 : index
    %c0_292 = arith.constant 0 : index
    %635 = vector.load %arg32[%c0_291, %c0_292] : memref<1x32xf32, #tpu.memory_space<vmem>>, vector<1x32xf32>
    %c0_293 = arith.constant 0 : index
    %c0_294 = arith.constant 0 : index
    %636 = vector.load %arg33[%c0_293, %c0_294] : memref<1x32xf32, #tpu.memory_space<vmem>>, vector<1x32xf32>
    %cst_295 = arith.constant dense<0.000000e+00> : vector<1xf32>
    %637 = vector.multi_reduction <add>, %634, %cst_295 [1] : vector<1x32xf32> to vector<1xf32>
    %638 = vector.shape_cast %637 : vector<1xf32> to vector<1x1xf32>
    %cst_296 = arith.constant 3.200000e+01 : f32
    %639 = vector.broadcast %cst_296 : f32 to vector<1x1xf32>
    %640 = arith.divf %638, %639 : vector<1x1xf32>
    %641 = vector.broadcast %640 : vector<1x1xf32> to vector<1x32xf32>
    %642 = arith.subf %634, %641 : vector<1x32xf32>
    %643 = arith.mulf %642, %642 : vector<1x32xf32>
    %cst_297 = arith.constant dense<0.000000e+00> : vector<1xf32>
    %644 = vector.multi_reduction <add>, %643, %cst_297 [1] : vector<1x32xf32> to vector<1xf32>
    %645 = vector.shape_cast %644 : vector<1xf32> to vector<1x1xf32>
    %cst_298 = arith.constant 3.200000e+01 : f32
    %646 = vector.broadcast %cst_298 : f32 to vector<1x1xf32>
    %647 = arith.divf %645, %646 : vector<1x1xf32>
    %648 = vector.broadcast %640 : vector<1x1xf32> to vector<1x32xf32>
    %649 = arith.subf %634, %648 : vector<1x32xf32>
    %cst_299 = arith.constant 9.99999974E-6 : f32
    %650 = vector.broadcast %cst_299 : f32 to vector<1x1xf32>
    %651 = arith.addf %647, %650 : vector<1x1xf32>
    %652 = math.rsqrt %651 : vector<1x1xf32>
    %653 = vector.broadcast %652 : vector<1x1xf32> to vector<1x32xf32>
    %654 = arith.mulf %649, %653 : vector<1x32xf32>
    %655 = arith.mulf %654, %635 : vector<1x32xf32>
    %656 = arith.addf %655, %636 : vector<1x32xf32>
    %c0_300 = arith.constant 0 : index
    %c0_301 = arith.constant 0 : index
    %657 = vector.load %arg34[%c0_300, %c0_301] : memref<32x64xf32, #tpu.memory_space<vmem>>, vector<32x64xf32>
    %cst_302 = arith.constant dense<0.000000e+00> : vector<1x64xf32>
    %658 = tpu.matmul %656, %657, %cst_302 {dimension_numbers = #tpu.dot_dimension_numbers<[1], [0], [0], [1], [0, 0, 1, 1], [], []>} : vector<1x32xf32>, vector<32x64xf32>, vector<1x64xf32> -> vector<1x64xf32>
    %c0_303 = arith.constant 0 : index
    %c0_304 = arith.constant 0 : index
    %659 = vector.load %arg35[%c0_303, %c0_304] : memref<1x64xf32, #tpu.memory_space<vmem>>, vector<1x64xf32>
    %660 = arith.addf %658, %659 : vector<1x64xf32>
    %cst_305 = arith.constant 0.000000e+00 : f32
    %661 = vector.broadcast %cst_305 : f32 to vector<1x64xf32>
    %662 = arith.maximumf %660, %661 : vector<1x64xf32>
    %c0_306 = arith.constant 0 : index
    %c0_307 = arith.constant 0 : index
    %663 = vector.load %arg36[%c0_306, %c0_307] : memref<64x32xf32, #tpu.memory_space<vmem>>, vector<64x32xf32>
    %cst_308 = arith.constant dense<0.000000e+00> : vector<1x32xf32>
    %664 = tpu.matmul %662, %663, %cst_308 {dimension_numbers = #tpu.dot_dimension_numbers<[1], [0], [0], [1], [0, 0, 1, 1], [], []>} : vector<1x64xf32>, vector<64x32xf32>, vector<1x32xf32> -> vector<1x32xf32>
    %c0_309 = arith.constant 0 : index
    %c0_310 = arith.constant 0 : index
    %665 = vector.load %arg37[%c0_309, %c0_310] : memref<1x32xf32, #tpu.memory_space<vmem>>, vector<1x32xf32>
    %666 = arith.addf %664, %665 : vector<1x32xf32>
    %667 = arith.addf %656, %666 : vector<1x32xf32>
    %c0_311 = arith.constant 0 : index
    %c0_312 = arith.constant 0 : index
    %668 = vector.load %arg38[%c0_311, %c0_312] : memref<1x32xf32, #tpu.memory_space<vmem>>, vector<1x32xf32>
    %c0_313 = arith.constant 0 : index
    %c0_314 = arith.constant 0 : index
    %669 = vector.load %arg39[%c0_313, %c0_314] : memref<1x32xf32, #tpu.memory_space<vmem>>, vector<1x32xf32>
    %cst_315 = arith.constant dense<0.000000e+00> : vector<1xf32>
    %670 = vector.multi_reduction <add>, %667, %cst_315 [1] : vector<1x32xf32> to vector<1xf32>
    %671 = vector.shape_cast %670 : vector<1xf32> to vector<1x1xf32>
    %cst_316 = arith.constant 3.200000e+01 : f32
    %672 = vector.broadcast %cst_316 : f32 to vector<1x1xf32>
    %673 = arith.divf %671, %672 : vector<1x1xf32>
    %674 = vector.broadcast %673 : vector<1x1xf32> to vector<1x32xf32>
    %675 = arith.subf %667, %674 : vector<1x32xf32>
    %676 = arith.mulf %675, %675 : vector<1x32xf32>
    %cst_317 = arith.constant dense<0.000000e+00> : vector<1xf32>
    %677 = vector.multi_reduction <add>, %676, %cst_317 [1] : vector<1x32xf32> to vector<1xf32>
    %678 = vector.shape_cast %677 : vector<1xf32> to vector<1x1xf32>
    %cst_318 = arith.constant 3.200000e+01 : f32
    %679 = vector.broadcast %cst_318 : f32 to vector<1x1xf32>
    %680 = arith.divf %678, %679 : vector<1x1xf32>
    %681 = vector.broadcast %673 : vector<1x1xf32> to vector<1x32xf32>
    %682 = arith.subf %667, %681 : vector<1x32xf32>
    %cst_319 = arith.constant 9.99999974E-6 : f32
    %683 = vector.broadcast %cst_319 : f32 to vector<1x1xf32>
    %684 = arith.addf %680, %683 : vector<1x1xf32>
    %685 = math.rsqrt %684 : vector<1x1xf32>
    %686 = vector.broadcast %685 : vector<1x1xf32> to vector<1x32xf32>
    %687 = arith.mulf %682, %686 : vector<1x32xf32>
    %688 = arith.mulf %687, %668 : vector<1x32xf32>
    %689 = arith.addf %688, %669 : vector<1x32xf32>
    %c0_320 = arith.constant 0 : index
    %c0_321 = arith.constant 0 : index
    %690 = vector.load %arg40[%c0_320, %c0_321] : memref<32x128xf32, #tpu.memory_space<vmem>>, vector<32x128xf32>
    %cst_322 = arith.constant dense<0.000000e+00> : vector<1x128xf32>
    %691 = tpu.matmul %689, %690, %cst_322 {dimension_numbers = #tpu.dot_dimension_numbers<[1], [0], [0], [1], [0, 0, 1, 1], [], []>} : vector<1x32xf32>, vector<32x128xf32>, vector<1x128xf32> -> vector<1x128xf32>
    %c0_323 = arith.constant 0 : index
    %c0_324 = arith.constant 0 : index
    %692 = vector.load %arg41[%c0_323, %c0_324] : memref<1x128xf32, #tpu.memory_space<vmem>>, vector<1x128xf32>
    %693 = arith.addf %691, %692 : vector<1x128xf32>
    %694 = vector.shape_cast %693 : vector<1x128xf32> to vector<1x1x128xf32>
    %c0_325 = arith.constant 0 : index
    %c1_326 = arith.constant 1 : index
    %c0_327 = arith.constant 0 : index
    %695 = vector.load %arg42[%c0_325, %c1_326, %c0_327] : memref<1x5x128xf32, #tpu.memory_space<vmem>>, vector<1x1x128xf32>
    tpu.vector_store %arg42[%c0_325, %c1_326, %c0_327], %694 {strides = array<i32>} : memref<1x5x128xf32, #tpu.memory_space<vmem>>, vector<1x1x128xf32>,
    %cst_328 = arith.constant dense<0xFF800000> : vector<1xf32>
    %696 = vector.multi_reduction <maximumf>, %693, %cst_328 [1] : vector<1x128xf32> to vector<1xf32>
    %697 = vector.shape_cast %696 : vector<1xf32> to vector<1x1xf32>
    %698 = vector.broadcast %697 : vector<1x1xf32> to vector<1x128xf32>
    %699 = arith.cmpf oeq, %693, %698 : vector<1x128xf32>
    %c128_i32_329 = arith.constant 128 : i32
    %700 = vector.broadcast %c128_i32_329 : i32 to vector<1x128xi32>
    %701 = arith.select %699, %169, %700 : vector<1x128xi1>, vector<1x128xi32>
    %cst_330 = arith.constant dense<2147483647> : vector<1xi32>
    %702 = vector.multi_reduction <minsi>, %701, %cst_330 [1] : vector<1x128xi32> to vector<1xi32>
    %703 = vector.shape_cast %702 : vector<1xi32> to vector<1x1xi32>
    %704 = vector.broadcast %703 : vector<1x1xi32> to vector<1x128xi32>
    %705 = arith.cmpi eq, %169, %704 : vector<1x128xi32>
    %706 = arith.extui %705 : vector<1x128xi1> to vector<1x128xi32>
    %707 = arith.sitofp %706 : vector<1x128xi32> to vector<1x128xf32>
    %cst_331 = arith.constant dense<0.000000e+00> : vector<1x32xf32>
    %708 = tpu.matmul %707, %168, %cst_331 {dimension_numbers = #tpu.dot_dimension_numbers<[1], [0], [0], [1], [0, 0, 1, 1], [], []>} : vector<1x128xf32>, vector<128x32xf32>, vector<1x32xf32> -> vector<1x32xf32>
    %c2 = arith.constant 2 : index
    %c0_332 = arith.constant 0 : index
    %709 = vector.load %arg19[%c2, %c0_332] : memref<5x32xf32, #tpu.memory_space<vmem>>, vector<1x32xf32>
    %710 = arith.addf %708, %709 : vector<1x32xf32>
    %c0_333 = arith.constant 0 : index
    %c0_334 = arith.constant 0 : index
    %711 = vector.load %arg20[%c0_333, %c0_334] : memref<32x96xf32, #tpu.memory_space<vmem>>, vector<32x96xf32>
    %cst_335 = arith.constant dense<0.000000e+00> : vector<1x96xf32>
    %712 = tpu.matmul %710, %711, %cst_335 {dimension_numbers = #tpu.dot_dimension_numbers<[1], [0], [0], [1], [0, 0, 1, 1], [], []>} : vector<1x32xf32>, vector<32x96xf32>, vector<1x96xf32> -> vector<1x96xf32>
    %c0_336 = arith.constant 0 : index
    %c0_337 = arith.constant 0 : index
    %713 = vector.load %arg21[%c0_336, %c0_337] : memref<1x96xf32, #tpu.memory_space<vmem>>, vector<1x96xf32>
    %714 = arith.addf %712, %713 : vector<1x96xf32>
    %715 = vector.extract_strided_slice %714 {offsets = [0, 32], sizes = [1, 32], strides = [1, 1]} : vector<1x96xf32> to vector<1x32xf32>
    %c2_338 = arith.constant 2 : index
    %c0_339 = arith.constant 0 : index
    %716 = vector.load %arg43[%c2_338, %c0_339] : memref<8x32xf32, #tpu.memory_space<vmem>>, vector<1x32xf32>
    tpu.vector_store %arg43[%c2_338, %c0_339], %715 {strides = array<i32>} : memref<8x32xf32, #tpu.memory_space<vmem>>, vector<1x32xf32>,
    %717 = vector.extract_strided_slice %714 {offsets = [0, 64], sizes = [1, 32], strides = [1, 1]} : vector<1x96xf32> to vector<1x32xf32>
    %c2_340 = arith.constant 2 : index
    %c0_341 = arith.constant 0 : index
    %718 = vector.load %arg44[%c2_340, %c0_341] : memref<8x32xf32, #tpu.memory_space<vmem>>, vector<1x32xf32>
    tpu.vector_store %arg44[%c2_340, %c0_341], %717 {strides = array<i32>} : memref<8x32xf32, #tpu.memory_space<vmem>>, vector<1x32xf32>,
    %719 = vector.extract_strided_slice %714 {offsets = [0, 0], sizes = [1, 32], strides = [1, 1]} : vector<1x96xf32> to vector<1x32xf32>
    %c0_342 = arith.constant 0 : index
    %c0_343 = arith.constant 0 : index
    %720 = vector.load %arg43[%c0_342, %c0_343] : memref<8x32xf32, #tpu.memory_space<vmem>>, vector<3x32xf32>
    %c0_344 = arith.constant 0 : index
    %c0_345 = arith.constant 0 : index
    %721 = vector.load %arg44[%c0_344, %c0_345] : memref<8x32xf32, #tpu.memory_space<vmem>>, vector<3x32xf32>
    %c0_346 = arith.constant 0 : index
    %c0_347 = arith.constant 0 : index
    %722 = vector.load %arg22[%c0_346, %c0_347] : memref<32x32xf32, #tpu.memory_space<vmem>>, vector<32x32xf32>
    %723 = vector.extract_strided_slice %719 {offsets = [0, 0], sizes = [1, 8], strides = [1, 1]} : vector<1x32xf32> to vector<1x8xf32>
    %724 = vector.extract_strided_slice %720 {offsets = [0, 0], sizes = [3, 8], strides = [1, 1]} : vector<3x32xf32> to vector<3x8xf32>
    %cst_348 = arith.constant dense<0.000000e+00> : vector<1x3xf32>
    %725 = tpu.matmul %723, %724, %cst_348 {dimension_numbers = #tpu.dot_dimension_numbers<[1], [1], [0], [0], [0, 0, 1, 0], [], []>} : vector<1x8xf32>, vector<3x8xf32>, vector<1x3xf32> -> vector<1x3xf32>
    %cst_349 = arith.constant 0.353553385 : f32
    %726 = vector.broadcast %cst_349 : f32 to vector<1x3xf32>
    %727 = arith.mulf %725, %726 : vector<1x3xf32>
    %cst_350 = arith.constant dense<0xFF800000> : vector<1xf32>
    %728 = vector.multi_reduction <maximumf>, %727, %cst_350 [1] : vector<1x3xf32> to vector<1xf32>
    %729 = vector.shape_cast %728 : vector<1xf32> to vector<1x1xf32>
    %730 = vector.broadcast %729 : vector<1x1xf32> to vector<1x3xf32>
    %731 = arith.subf %727, %730 : vector<1x3xf32>
    %732 = math.exp %731 : vector<1x3xf32>
    %cst_351 = arith.constant dense<0.000000e+00> : vector<1xf32>
    %733 = vector.multi_reduction <add>, %732, %cst_351 [1] : vector<1x3xf32> to vector<1xf32>
    %734 = vector.shape_cast %733 : vector<1xf32> to vector<1x1xf32>
    %735 = vector.broadcast %734 : vector<1x1xf32> to vector<1x3xf32>
    %736 = arith.divf %732, %735 : vector<1x3xf32>
    %737 = vector.extract_strided_slice %721 {offsets = [0, 0], sizes = [3, 8], strides = [1, 1]} : vector<3x32xf32> to vector<3x8xf32>
    %cst_352 = arith.constant dense<0.000000e+00> : vector<1x8xf32>
    %738 = tpu.matmul %736, %737, %cst_352 {dimension_numbers = #tpu.dot_dimension_numbers<[1], [0], [0], [1], [0, 0, 1, 1], [], []>} : vector<1x3xf32>, vector<3x8xf32>, vector<1x8xf32> -> vector<1x8xf32>
    %739 = vector.extract_strided_slice %722 {offsets = [0, 0], sizes = [8, 32], strides = [1, 1]} : vector<32x32xf32> to vector<8x32xf32>
    %cst_353 = arith.constant dense<0.000000e+00> : vector<1x32xf32>
    %740 = tpu.matmul %738, %739, %cst_353 {dimension_numbers = #tpu.dot_dimension_numbers<[1], [0], [0], [1], [0, 0, 1, 1], [], []>} : vector<1x8xf32>, vector<8x32xf32>, vector<1x32xf32> -> vector<1x32xf32>
    %741 = vector.extract_strided_slice %719 {offsets = [0, 8], sizes = [1, 8], strides = [1, 1]} : vector<1x32xf32> to vector<1x8xf32>
    %742 = vector.extract_strided_slice %720 {offsets = [0, 8], sizes = [3, 8], strides = [1, 1]} : vector<3x32xf32> to vector<3x8xf32>
    %cst_354 = arith.constant dense<0.000000e+00> : vector<1x3xf32>
    %743 = tpu.matmul %741, %742, %cst_354 {dimension_numbers = #tpu.dot_dimension_numbers<[1], [1], [0], [0], [0, 0, 1, 0], [], []>} : vector<1x8xf32>, vector<3x8xf32>, vector<1x3xf32> -> vector<1x3xf32>
    %cst_355 = arith.constant 0.353553385 : f32
    %744 = vector.broadcast %cst_355 : f32 to vector<1x3xf32>
    %745 = arith.mulf %743, %744 : vector<1x3xf32>
    %cst_356 = arith.constant dense<0xFF800000> : vector<1xf32>
    %746 = vector.multi_reduction <maximumf>, %745, %cst_356 [1] : vector<1x3xf32> to vector<1xf32>
    %747 = vector.shape_cast %746 : vector<1xf32> to vector<1x1xf32>
    %748 = vector.broadcast %747 : vector<1x1xf32> to vector<1x3xf32>
    %749 = arith.subf %745, %748 : vector<1x3xf32>
    %750 = math.exp %749 : vector<1x3xf32>
    %cst_357 = arith.constant dense<0.000000e+00> : vector<1xf32>
    %751 = vector.multi_reduction <add>, %750, %cst_357 [1] : vector<1x3xf32> to vector<1xf32>
    %752 = vector.shape_cast %751 : vector<1xf32> to vector<1x1xf32>
    %753 = vector.broadcast %752 : vector<1x1xf32> to vector<1x3xf32>
    %754 = arith.divf %750, %753 : vector<1x3xf32>
    %755 = vector.extract_strided_slice %721 {offsets = [0, 8], sizes = [3, 8], strides = [1, 1]} : vector<3x32xf32> to vector<3x8xf32>
    %cst_358 = arith.constant dense<0.000000e+00> : vector<1x8xf32>
    %756 = tpu.matmul %754, %755, %cst_358 {dimension_numbers = #tpu.dot_dimension_numbers<[1], [0], [0], [1], [0, 0, 1, 1], [], []>} : vector<1x3xf32>, vector<3x8xf32>, vector<1x8xf32> -> vector<1x8xf32>
    %757 = vector.extract_strided_slice %722 {offsets = [8, 0], sizes = [8, 32], strides = [1, 1]} : vector<32x32xf32> to vector<8x32xf32>
    %cst_359 = arith.constant dense<0.000000e+00> : vector<1x32xf32>
    %758 = tpu.matmul %756, %757, %cst_359 {dimension_numbers = #tpu.dot_dimension_numbers<[1], [0], [0], [1], [0, 0, 1, 1], [], []>} : vector<1x8xf32>, vector<8x32xf32>, vector<1x32xf32> -> vector<1x32xf32>
    %759 = arith.addf %740, %758 : vector<1x32xf32>
    %760 = vector.extract_strided_slice %719 {offsets = [0, 16], sizes = [1, 8], strides = [1, 1]} : vector<1x32xf32> to vector<1x8xf32>
    %761 = vector.extract_strided_slice %720 {offsets = [0, 16], sizes = [3, 8], strides = [1, 1]} : vector<3x32xf32> to vector<3x8xf32>
    %cst_360 = arith.constant dense<0.000000e+00> : vector<1x3xf32>
    %762 = tpu.matmul %760, %761, %cst_360 {dimension_numbers = #tpu.dot_dimension_numbers<[1], [1], [0], [0], [0, 0, 1, 0], [], []>} : vector<1x8xf32>, vector<3x8xf32>, vector<1x3xf32> -> vector<1x3xf32>
    %cst_361 = arith.constant 0.353553385 : f32
    %763 = vector.broadcast %cst_361 : f32 to vector<1x3xf32>
    %764 = arith.mulf %762, %763 : vector<1x3xf32>
    %cst_362 = arith.constant dense<0xFF800000> : vector<1xf32>
    %765 = vector.multi_reduction <maximumf>, %764, %cst_362 [1] : vector<1x3xf32> to vector<1xf32>
    %766 = vector.shape_cast %765 : vector<1xf32> to vector<1x1xf32>
    %767 = vector.broadcast %766 : vector<1x1xf32> to vector<1x3xf32>
    %768 = arith.subf %764, %767 : vector<1x3xf32>
    %769 = math.exp %768 : vector<1x3xf32>
    %cst_363 = arith.constant dense<0.000000e+00> : vector<1xf32>
    %770 = vector.multi_reduction <add>, %769, %cst_363 [1] : vector<1x3xf32> to vector<1xf32>
    %771 = vector.shape_cast %770 : vector<1xf32> to vector<1x1xf32>
    %772 = vector.broadcast %771 : vector<1x1xf32> to vector<1x3xf32>
    %773 = arith.divf %769, %772 : vector<1x3xf32>
    %774 = vector.extract_strided_slice %721 {offsets = [0, 16], sizes = [3, 8], strides = [1, 1]} : vector<3x32xf32> to vector<3x8xf32>
    %cst_364 = arith.constant dense<0.000000e+00> : vector<1x8xf32>
    %775 = tpu.matmul %773, %774, %cst_364 {dimension_numbers = #tpu.dot_dimension_numbers<[1], [0], [0], [1], [0, 0, 1, 1], [], []>} : vector<1x3xf32>, vector<3x8xf32>, vector<1x8xf32> -> vector<1x8xf32>
    %776 = vector.extract_strided_slice %722 {offsets = [16, 0], sizes = [8, 32], strides = [1, 1]} : vector<32x32xf32> to vector<8x32xf32>
    %cst_365 = arith.constant dense<0.000000e+00> : vector<1x32xf32>
    %777 = tpu.matmul %775, %776, %cst_365 {dimension_numbers = #tpu.dot_dimension_numbers<[1], [0], [0], [1], [0, 0, 1, 1], [], []>} : vector<1x8xf32>, vector<8x32xf32>, vector<1x32xf32> -> vector<1x32xf32>
    %778 = arith.addf %759, %777 : vector<1x32xf32>
    %779 = vector.extract_strided_slice %719 {offsets = [0, 24], sizes = [1, 8], strides = [1, 1]} : vector<1x32xf32> to vector<1x8xf32>
    %780 = vector.extract_strided_slice %720 {offsets = [0, 24], sizes = [3, 8], strides = [1, 1]} : vector<3x32xf32> to vector<3x8xf32>
    %cst_366 = arith.constant dense<0.000000e+00> : vector<1x3xf32>
    %781 = tpu.matmul %779, %780, %cst_366 {dimension_numbers = #tpu.dot_dimension_numbers<[1], [1], [0], [0], [0, 0, 1, 0], [], []>} : vector<1x8xf32>, vector<3x8xf32>, vector<1x3xf32> -> vector<1x3xf32>
    %cst_367 = arith.constant 0.353553385 : f32
    %782 = vector.broadcast %cst_367 : f32 to vector<1x3xf32>
    %783 = arith.mulf %781, %782 : vector<1x3xf32>
    %cst_368 = arith.constant dense<0xFF800000> : vector<1xf32>
    %784 = vector.multi_reduction <maximumf>, %783, %cst_368 [1] : vector<1x3xf32> to vector<1xf32>
    %785 = vector.shape_cast %784 : vector<1xf32> to vector<1x1xf32>
    %786 = vector.broadcast %785 : vector<1x1xf32> to vector<1x3xf32>
    %787 = arith.subf %783, %786 : vector<1x3xf32>
    %788 = math.exp %787 : vector<1x3xf32>
    %cst_369 = arith.constant dense<0.000000e+00> : vector<1xf32>
    %789 = vector.multi_reduction <add>, %788, %cst_369 [1] : vector<1x3xf32> to vector<1xf32>
    %790 = vector.shape_cast %789 : vector<1xf32> to vector<1x1xf32>
    %791 = vector.broadcast %790 : vector<1x1xf32> to vector<1x3xf32>
    %792 = arith.divf %788, %791 : vector<1x3xf32>
    %793 = vector.extract_strided_slice %721 {offsets = [0, 24], sizes = [3, 8], strides = [1, 1]} : vector<3x32xf32> to vector<3x8xf32>
    %cst_370 = arith.constant dense<0.000000e+00> : vector<1x8xf32>
    %794 = tpu.matmul %792, %793, %cst_370 {dimension_numbers = #tpu.dot_dimension_numbers<[1], [0], [0], [1], [0, 0, 1, 1], [], []>} : vector<1x3xf32>, vector<3x8xf32>, vector<1x8xf32> -> vector<1x8xf32>
    %795 = vector.extract_strided_slice %722 {offsets = [24, 0], sizes = [8, 32], strides = [1, 1]} : vector<32x32xf32> to vector<8x32xf32>
    %cst_371 = arith.constant dense<0.000000e+00> : vector<1x32xf32>
    %796 = tpu.matmul %794, %795, %cst_371 {dimension_numbers = #tpu.dot_dimension_numbers<[1], [0], [0], [1], [0, 0, 1, 1], [], []>} : vector<1x8xf32>, vector<8x32xf32>, vector<1x32xf32> -> vector<1x32xf32>
    %797 = arith.addf %778, %796 : vector<1x32xf32>
    %c0_372 = arith.constant 0 : index
    %c0_373 = arith.constant 0 : index
    %798 = vector.load %arg23[%c0_372, %c0_373] : memref<1x32xf32, #tpu.memory_space<vmem>>, vector<1x32xf32>
    %799 = arith.addf %797, %798 : vector<1x32xf32>
    %800 = arith.addf %710, %799 : vector<1x32xf32>
    %c0_374 = arith.constant 0 : index
    %c0_375 = arith.constant 0 : index
    %801 = vector.load %arg24[%c0_374, %c0_375] : memref<1x32xf32, #tpu.memory_space<vmem>>, vector<1x32xf32>
    %c0_376 = arith.constant 0 : index
    %c0_377 = arith.constant 0 : index
    %802 = vector.load %arg25[%c0_376, %c0_377] : memref<1x32xf32, #tpu.memory_space<vmem>>, vector<1x32xf32>
    %cst_378 = arith.constant dense<0.000000e+00> : vector<1xf32>
    %803 = vector.multi_reduction <add>, %800, %cst_378 [1] : vector<1x32xf32> to vector<1xf32>
    %804 = vector.shape_cast %803 : vector<1xf32> to vector<1x1xf32>
    %cst_379 = arith.constant 3.200000e+01 : f32
    %805 = vector.broadcast %cst_379 : f32 to vector<1x1xf32>
    %806 = arith.divf %804, %805 : vector<1x1xf32>
    %807 = vector.broadcast %806 : vector<1x1xf32> to vector<1x32xf32>
    %808 = arith.subf %800, %807 : vector<1x32xf32>
    %809 = arith.mulf %808, %808 : vector<1x32xf32>
    %cst_380 = arith.constant dense<0.000000e+00> : vector<1xf32>
    %810 = vector.multi_reduction <add>, %809, %cst_380 [1] : vector<1x32xf32> to vector<1xf32>
    %811 = vector.shape_cast %810 : vector<1xf32> to vector<1x1xf32>
    %cst_381 = arith.constant 3.200000e+01 : f32
    %812 = vector.broadcast %cst_381 : f32 to vector<1x1xf32>
    %813 = arith.divf %811, %812 : vector<1x1xf32>
    %814 = vector.broadcast %806 : vector<1x1xf32> to vector<1x32xf32>
    %815 = arith.subf %800, %814 : vector<1x32xf32>
    %cst_382 = arith.constant 9.99999974E-6 : f32
    %816 = vector.broadcast %cst_382 : f32 to vector<1x1xf32>
    %817 = arith.addf %813, %816 : vector<1x1xf32>
    %818 = math.rsqrt %817 : vector<1x1xf32>
    %819 = vector.broadcast %818 : vector<1x1xf32> to vector<1x32xf32>
    %820 = arith.mulf %815, %819 : vector<1x32xf32>
    %821 = arith.mulf %820, %801 : vector<1x32xf32>
    %822 = arith.addf %821, %802 : vector<1x32xf32>
    %c0_383 = arith.constant 0 : index
    %c0_384 = arith.constant 0 : index
    %823 = vector.load %arg26[%c0_383, %c0_384] : memref<32x32xf32, #tpu.memory_space<vmem>>, vector<32x32xf32>
    %cst_385 = arith.constant dense<0.000000e+00> : vector<1x32xf32>
    %824 = tpu.matmul %822, %823, %cst_385 {dimension_numbers = #tpu.dot_dimension_numbers<[1], [0], [0], [1], [0, 0, 1, 1], [], []>} : vector<1x32xf32>, vector<32x32xf32>, vector<1x32xf32> -> vector<1x32xf32>
    %c0_386 = arith.constant 0 : index
    %c0_387 = arith.constant 0 : index
    %825 = vector.load %arg27[%c0_386, %c0_387] : memref<1x32xf32, #tpu.memory_space<vmem>>, vector<1x32xf32>
    %826 = arith.addf %824, %825 : vector<1x32xf32>
    %c0_388 = arith.constant 0 : index
    %c0_389 = arith.constant 0 : index
    %827 = vector.load %arg30[%c0_388, %c0_389] : memref<32x32xf32, #tpu.memory_space<vmem>>, vector<32x32xf32>
    %828 = vector.extract_strided_slice %826 {offsets = [0, 0], sizes = [1, 8], strides = [1, 1]} : vector<1x32xf32> to vector<1x8xf32>
    %829 = vector.extract_strided_slice %166 {offsets = [0, 0], sizes = [15, 8], strides = [1, 1]} : vector<15x32xf32> to vector<15x8xf32>
    %cst_390 = arith.constant dense<0.000000e+00> : vector<1x15xf32>
    %830 = tpu.matmul %828, %829, %cst_390 {dimension_numbers = #tpu.dot_dimension_numbers<[1], [1], [0], [0], [0, 0, 1, 0], [], []>} : vector<1x8xf32>, vector<15x8xf32>, vector<1x15xf32> -> vector<1x15xf32>
    %cst_391 = arith.constant 0.353553385 : f32
    %831 = vector.broadcast %cst_391 : f32 to vector<1x15xf32>
    %832 = arith.mulf %830, %831 : vector<1x15xf32>
    %cst_392 = arith.constant dense<0xFF800000> : vector<1xf32>
    %833 = vector.multi_reduction <maximumf>, %832, %cst_392 [1] : vector<1x15xf32> to vector<1xf32>
    %834 = vector.shape_cast %833 : vector<1xf32> to vector<1x1xf32>
    %835 = vector.broadcast %834 : vector<1x1xf32> to vector<1x15xf32>
    %836 = arith.subf %832, %835 : vector<1x15xf32>
    %837 = math.exp %836 : vector<1x15xf32>
    %cst_393 = arith.constant dense<0.000000e+00> : vector<1xf32>
    %838 = vector.multi_reduction <add>, %837, %cst_393 [1] : vector<1x15xf32> to vector<1xf32>
    %839 = vector.shape_cast %838 : vector<1xf32> to vector<1x1xf32>
    %840 = vector.broadcast %839 : vector<1x1xf32> to vector<1x15xf32>
    %841 = arith.divf %837, %840 : vector<1x15xf32>
    %842 = vector.extract_strided_slice %167 {offsets = [0, 0], sizes = [15, 8], strides = [1, 1]} : vector<15x32xf32> to vector<15x8xf32>
    %cst_394 = arith.constant dense<0.000000e+00> : vector<1x8xf32>
    %843 = tpu.matmul %841, %842, %cst_394 {dimension_numbers = #tpu.dot_dimension_numbers<[1], [0], [0], [1], [0, 0, 1, 1], [], []>} : vector<1x15xf32>, vector<15x8xf32>, vector<1x8xf32> -> vector<1x8xf32>
    %844 = vector.extract_strided_slice %827 {offsets = [0, 0], sizes = [8, 32], strides = [1, 1]} : vector<32x32xf32> to vector<8x32xf32>
    %cst_395 = arith.constant dense<0.000000e+00> : vector<1x32xf32>
    %845 = tpu.matmul %843, %844, %cst_395 {dimension_numbers = #tpu.dot_dimension_numbers<[1], [0], [0], [1], [0, 0, 1, 1], [], []>} : vector<1x8xf32>, vector<8x32xf32>, vector<1x32xf32> -> vector<1x32xf32>
    %846 = vector.extract_strided_slice %826 {offsets = [0, 8], sizes = [1, 8], strides = [1, 1]} : vector<1x32xf32> to vector<1x8xf32>
    %847 = vector.extract_strided_slice %166 {offsets = [0, 8], sizes = [15, 8], strides = [1, 1]} : vector<15x32xf32> to vector<15x8xf32>
    %cst_396 = arith.constant dense<0.000000e+00> : vector<1x15xf32>
    %848 = tpu.matmul %846, %847, %cst_396 {dimension_numbers = #tpu.dot_dimension_numbers<[1], [1], [0], [0], [0, 0, 1, 0], [], []>} : vector<1x8xf32>, vector<15x8xf32>, vector<1x15xf32> -> vector<1x15xf32>
    %cst_397 = arith.constant 0.353553385 : f32
    %849 = vector.broadcast %cst_397 : f32 to vector<1x15xf32>
    %850 = arith.mulf %848, %849 : vector<1x15xf32>
    %cst_398 = arith.constant dense<0xFF800000> : vector<1xf32>
    %851 = vector.multi_reduction <maximumf>, %850, %cst_398 [1] : vector<1x15xf32> to vector<1xf32>
    %852 = vector.shape_cast %851 : vector<1xf32> to vector<1x1xf32>
    %853 = vector.broadcast %852 : vector<1x1xf32> to vector<1x15xf32>
    %854 = arith.subf %850, %853 : vector<1x15xf32>
    %855 = math.exp %854 : vector<1x15xf32>
    %cst_399 = arith.constant dense<0.000000e+00> : vector<1xf32>
    %856 = vector.multi_reduction <add>, %855, %cst_399 [1] : vector<1x15xf32> to vector<1xf32>
    %857 = vector.shape_cast %856 : vector<1xf32> to vector<1x1xf32>
    %858 = vector.broadcast %857 : vector<1x1xf32> to vector<1x15xf32>
    %859 = arith.divf %855, %858 : vector<1x15xf32>
    %860 = vector.extract_strided_slice %167 {offsets = [0, 8], sizes = [15, 8], strides = [1, 1]} : vector<15x32xf32> to vector<15x8xf32>
    %cst_400 = arith.constant dense<0.000000e+00> : vector<1x8xf32>
    %861 = tpu.matmul %859, %860, %cst_400 {dimension_numbers = #tpu.dot_dimension_numbers<[1], [0], [0], [1], [0, 0, 1, 1], [], []>} : vector<1x15xf32>, vector<15x8xf32>, vector<1x8xf32> -> vector<1x8xf32>
    %862 = vector.extract_strided_slice %827 {offsets = [8, 0], sizes = [8, 32], strides = [1, 1]} : vector<32x32xf32> to vector<8x32xf32>
    %cst_401 = arith.constant dense<0.000000e+00> : vector<1x32xf32>
    %863 = tpu.matmul %861, %862, %cst_401 {dimension_numbers = #tpu.dot_dimension_numbers<[1], [0], [0], [1], [0, 0, 1, 1], [], []>} : vector<1x8xf32>, vector<8x32xf32>, vector<1x32xf32> -> vector<1x32xf32>
    %864 = arith.addf %845, %863 : vector<1x32xf32>
    %865 = vector.extract_strided_slice %826 {offsets = [0, 16], sizes = [1, 8], strides = [1, 1]} : vector<1x32xf32> to vector<1x8xf32>
    %866 = vector.extract_strided_slice %166 {offsets = [0, 16], sizes = [15, 8], strides = [1, 1]} : vector<15x32xf32> to vector<15x8xf32>
    %cst_402 = arith.constant dense<0.000000e+00> : vector<1x15xf32>
    %867 = tpu.matmul %865, %866, %cst_402 {dimension_numbers = #tpu.dot_dimension_numbers<[1], [1], [0], [0], [0, 0, 1, 0], [], []>} : vector<1x8xf32>, vector<15x8xf32>, vector<1x15xf32> -> vector<1x15xf32>
    %cst_403 = arith.constant 0.353553385 : f32
    %868 = vector.broadcast %cst_403 : f32 to vector<1x15xf32>
    %869 = arith.mulf %867, %868 : vector<1x15xf32>
    %cst_404 = arith.constant dense<0xFF800000> : vector<1xf32>
    %870 = vector.multi_reduction <maximumf>, %869, %cst_404 [1] : vector<1x15xf32> to vector<1xf32>
    %871 = vector.shape_cast %870 : vector<1xf32> to vector<1x1xf32>
    %872 = vector.broadcast %871 : vector<1x1xf32> to vector<1x15xf32>
    %873 = arith.subf %869, %872 : vector<1x15xf32>
    %874 = math.exp %873 : vector<1x15xf32>
    %cst_405 = arith.constant dense<0.000000e+00> : vector<1xf32>
    %875 = vector.multi_reduction <add>, %874, %cst_405 [1] : vector<1x15xf32> to vector<1xf32>
    %876 = vector.shape_cast %875 : vector<1xf32> to vector<1x1xf32>
    %877 = vector.broadcast %876 : vector<1x1xf32> to vector<1x15xf32>
    %878 = arith.divf %874, %877 : vector<1x15xf32>
    %879 = vector.extract_strided_slice %167 {offsets = [0, 16], sizes = [15, 8], strides = [1, 1]} : vector<15x32xf32> to vector<15x8xf32>
    %cst_406 = arith.constant dense<0.000000e+00> : vector<1x8xf32>
    %880 = tpu.matmul %878, %879, %cst_406 {dimension_numbers = #tpu.dot_dimension_numbers<[1], [0], [0], [1], [0, 0, 1, 1], [], []>} : vector<1x15xf32>, vector<15x8xf32>, vector<1x8xf32> -> vector<1x8xf32>
    %881 = vector.extract_strided_slice %827 {offsets = [16, 0], sizes = [8, 32], strides = [1, 1]} : vector<32x32xf32> to vector<8x32xf32>
    %cst_407 = arith.constant dense<0.000000e+00> : vector<1x32xf32>
    %882 = tpu.matmul %880, %881, %cst_407 {dimension_numbers = #tpu.dot_dimension_numbers<[1], [0], [0], [1], [0, 0, 1, 1], [], []>} : vector<1x8xf32>, vector<8x32xf32>, vector<1x32xf32> -> vector<1x32xf32>
    %883 = arith.addf %864, %882 : vector<1x32xf32>
    %884 = vector.extract_strided_slice %826 {offsets = [0, 24], sizes = [1, 8], strides = [1, 1]} : vector<1x32xf32> to vector<1x8xf32>
    %885 = vector.extract_strided_slice %166 {offsets = [0, 24], sizes = [15, 8], strides = [1, 1]} : vector<15x32xf32> to vector<15x8xf32>
    %cst_408 = arith.constant dense<0.000000e+00> : vector<1x15xf32>
    %886 = tpu.matmul %884, %885, %cst_408 {dimension_numbers = #tpu.dot_dimension_numbers<[1], [1], [0], [0], [0, 0, 1, 0], [], []>} : vector<1x8xf32>, vector<15x8xf32>, vector<1x15xf32> -> vector<1x15xf32>
    %cst_409 = arith.constant 0.353553385 : f32
    %887 = vector.broadcast %cst_409 : f32 to vector<1x15xf32>
    %888 = arith.mulf %886, %887 : vector<1x15xf32>
    %cst_410 = arith.constant dense<0xFF800000> : vector<1xf32>
    %889 = vector.multi_reduction <maximumf>, %888, %cst_410 [1] : vector<1x15xf32> to vector<1xf32>
    %890 = vector.shape_cast %889 : vector<1xf32> to vector<1x1xf32>
    %891 = vector.broadcast %890 : vector<1x1xf32> to vector<1x15xf32>
    %892 = arith.subf %888, %891 : vector<1x15xf32>
    %893 = math.exp %892 : vector<1x15xf32>
    %cst_411 = arith.constant dense<0.000000e+00> : vector<1xf32>
    %894 = vector.multi_reduction <add>, %893, %cst_411 [1] : vector<1x15xf32> to vector<1xf32>
    %895 = vector.shape_cast %894 : vector<1xf32> to vector<1x1xf32>
    %896 = vector.broadcast %895 : vector<1x1xf32> to vector<1x15xf32>
    %897 = arith.divf %893, %896 : vector<1x15xf32>
    %898 = vector.extract_strided_slice %167 {offsets = [0, 24], sizes = [15, 8], strides = [1, 1]} : vector<15x32xf32> to vector<15x8xf32>
    %cst_412 = arith.constant dense<0.000000e+00> : vector<1x8xf32>
    %899 = tpu.matmul %897, %898, %cst_412 {dimension_numbers = #tpu.dot_dimension_numbers<[1], [0], [0], [1], [0, 0, 1, 1], [], []>} : vector<1x15xf32>, vector<15x8xf32>, vector<1x8xf32> -> vector<1x8xf32>
    %900 = vector.extract_strided_slice %827 {offsets = [24, 0], sizes = [8, 32], strides = [1, 1]} : vector<32x32xf32> to vector<8x32xf32>
    %cst_413 = arith.constant dense<0.000000e+00> : vector<1x32xf32>
    %901 = tpu.matmul %899, %900, %cst_413 {dimension_numbers = #tpu.dot_dimension_numbers<[1], [0], [0], [1], [0, 0, 1, 1], [], []>} : vector<1x8xf32>, vector<8x32xf32>, vector<1x32xf32> -> vector<1x32xf32>
    %902 = arith.addf %883, %901 : vector<1x32xf32>
    %c0_414 = arith.constant 0 : index
    %c0_415 = arith.constant 0 : index
    %903 = vector.load %arg31[%c0_414, %c0_415] : memref<1x32xf32, #tpu.memory_space<vmem>>, vector<1x32xf32>
    %904 = arith.addf %902, %903 : vector<1x32xf32>
    %905 = arith.addf %822, %904 : vector<1x32xf32>
    %c0_416 = arith.constant 0 : index
    %c0_417 = arith.constant 0 : index
    %906 = vector.load %arg32[%c0_416, %c0_417] : memref<1x32xf32, #tpu.memory_space<vmem>>, vector<1x32xf32>
    %c0_418 = arith.constant 0 : index
    %c0_419 = arith.constant 0 : index
    %907 = vector.load %arg33[%c0_418, %c0_419] : memref<1x32xf32, #tpu.memory_space<vmem>>, vector<1x32xf32>
    %cst_420 = arith.constant dense<0.000000e+00> : vector<1xf32>
    %908 = vector.multi_reduction <add>, %905, %cst_420 [1] : vector<1x32xf32> to vector<1xf32>
    %909 = vector.shape_cast %908 : vector<1xf32> to vector<1x1xf32>
    %cst_421 = arith.constant 3.200000e+01 : f32
    %910 = vector.broadcast %cst_421 : f32 to vector<1x1xf32>
    %911 = arith.divf %909, %910 : vector<1x1xf32>
    %912 = vector.broadcast %911 : vector<1x1xf32> to vector<1x32xf32>
    %913 = arith.subf %905, %912 : vector<1x32xf32>
    %914 = arith.mulf %913, %913 : vector<1x32xf32>
    %cst_422 = arith.constant dense<0.000000e+00> : vector<1xf32>
    %915 = vector.multi_reduction <add>, %914, %cst_422 [1] : vector<1x32xf32> to vector<1xf32>
    %916 = vector.shape_cast %915 : vector<1xf32> to vector<1x1xf32>
    %cst_423 = arith.constant 3.200000e+01 : f32
    %917 = vector.broadcast %cst_423 : f32 to vector<1x1xf32>
    %918 = arith.divf %916, %917 : vector<1x1xf32>
    %919 = vector.broadcast %911 : vector<1x1xf32> to vector<1x32xf32>
    %920 = arith.subf %905, %919 : vector<1x32xf32>
    %cst_424 = arith.constant 9.99999974E-6 : f32
    %921 = vector.broadcast %cst_424 : f32 to vector<1x1xf32>
    %922 = arith.addf %918, %921 : vector<1x1xf32>
    %923 = math.rsqrt %922 : vector<1x1xf32>
    %924 = vector.broadcast %923 : vector<1x1xf32> to vector<1x32xf32>
    %925 = arith.mulf %920, %924 : vector<1x32xf32>
    %926 = arith.mulf %925, %906 : vector<1x32xf32>
    %927 = arith.addf %926, %907 : vector<1x32xf32>
    %c0_425 = arith.constant 0 : index
    %c0_426 = arith.constant 0 : index
    %928 = vector.load %arg34[%c0_425, %c0_426] : memref<32x64xf32, #tpu.memory_space<vmem>>, vector<32x64xf32>
    %cst_427 = arith.constant dense<0.000000e+00> : vector<1x64xf32>
    %929 = tpu.matmul %927, %928, %cst_427 {dimension_numbers = #tpu.dot_dimension_numbers<[1], [0], [0], [1], [0, 0, 1, 1], [], []>} : vector<1x32xf32>, vector<32x64xf32>, vector<1x64xf32> -> vector<1x64xf32>
    %c0_428 = arith.constant 0 : index
    %c0_429 = arith.constant 0 : index
    %930 = vector.load %arg35[%c0_428, %c0_429] : memref<1x64xf32, #tpu.memory_space<vmem>>, vector<1x64xf32>
    %931 = arith.addf %929, %930 : vector<1x64xf32>
    %cst_430 = arith.constant 0.000000e+00 : f32
    %932 = vector.broadcast %cst_430 : f32 to vector<1x64xf32>
    %933 = arith.maximumf %931, %932 : vector<1x64xf32>
    %c0_431 = arith.constant 0 : index
    %c0_432 = arith.constant 0 : index
    %934 = vector.load %arg36[%c0_431, %c0_432] : memref<64x32xf32, #tpu.memory_space<vmem>>, vector<64x32xf32>
    %cst_433 = arith.constant dense<0.000000e+00> : vector<1x32xf32>
    %935 = tpu.matmul %933, %934, %cst_433 {dimension_numbers = #tpu.dot_dimension_numbers<[1], [0], [0], [1], [0, 0, 1, 1], [], []>} : vector<1x64xf32>, vector<64x32xf32>, vector<1x32xf32> -> vector<1x32xf32>
    %c0_434 = arith.constant 0 : index
    %c0_435 = arith.constant 0 : index
    %936 = vector.load %arg37[%c0_434, %c0_435] : memref<1x32xf32, #tpu.memory_space<vmem>>, vector<1x32xf32>
    %937 = arith.addf %935, %936 : vector<1x32xf32>
    %938 = arith.addf %927, %937 : vector<1x32xf32>
    %c0_436 = arith.constant 0 : index
    %c0_437 = arith.constant 0 : index
    %939 = vector.load %arg38[%c0_436, %c0_437] : memref<1x32xf32, #tpu.memory_space<vmem>>, vector<1x32xf32>
    %c0_438 = arith.constant 0 : index
    %c0_439 = arith.constant 0 : index
    %940 = vector.load %arg39[%c0_438, %c0_439] : memref<1x32xf32, #tpu.memory_space<vmem>>, vector<1x32xf32>
    %cst_440 = arith.constant dense<0.000000e+00> : vector<1xf32>
    %941 = vector.multi_reduction <add>, %938, %cst_440 [1] : vector<1x32xf32> to vector<1xf32>
    %942 = vector.shape_cast %941 : vector<1xf32> to vector<1x1xf32>
    %cst_441 = arith.constant 3.200000e+01 : f32
    %943 = vector.broadcast %cst_441 : f32 to vector<1x1xf32>
    %944 = arith.divf %942, %943 : vector<1x1xf32>
    %945 = vector.broadcast %944 : vector<1x1xf32> to vector<1x32xf32>
    %946 = arith.subf %938, %945 : vector<1x32xf32>
    %947 = arith.mulf %946, %946 : vector<1x32xf32>
    %cst_442 = arith.constant dense<0.000000e+00> : vector<1xf32>
    %948 = vector.multi_reduction <add>, %947, %cst_442 [1] : vector<1x32xf32> to vector<1xf32>
    %949 = vector.shape_cast %948 : vector<1xf32> to vector<1x1xf32>
    %cst_443 = arith.constant 3.200000e+01 : f32
    %950 = vector.broadcast %cst_443 : f32 to vector<1x1xf32>
    %951 = arith.divf %949, %950 : vector<1x1xf32>
    %952 = vector.broadcast %944 : vector<1x1xf32> to vector<1x32xf32>
    %953 = arith.subf %938, %952 : vector<1x32xf32>
    %cst_444 = arith.constant 9.99999974E-6 : f32
    %954 = vector.broadcast %cst_444 : f32 to vector<1x1xf32>
    %955 = arith.addf %951, %954 : vector<1x1xf32>
    %956 = math.rsqrt %955 : vector<1x1xf32>
    %957 = vector.broadcast %956 : vector<1x1xf32> to vector<1x32xf32>
    %958 = arith.mulf %953, %957 : vector<1x32xf32>
    %959 = arith.mulf %958, %939 : vector<1x32xf32>
    %960 = arith.addf %959, %940 : vector<1x32xf32>
    %c0_445 = arith.constant 0 : index
    %c0_446 = arith.constant 0 : index
    %961 = vector.load %arg40[%c0_445, %c0_446] : memref<32x128xf32, #tpu.memory_space<vmem>>, vector<32x128xf32>
    %cst_447 = arith.constant dense<0.000000e+00> : vector<1x128xf32>
    %962 = tpu.matmul %960, %961, %cst_447 {dimension_numbers = #tpu.dot_dimension_numbers<[1], [0], [0], [1], [0, 0, 1, 1], [], []>} : vector<1x32xf32>, vector<32x128xf32>, vector<1x128xf32> -> vector<1x128xf32>
    %c0_448 = arith.constant 0 : index
    %c0_449 = arith.constant 0 : index
    %963 = vector.load %arg41[%c0_448, %c0_449] : memref<1x128xf32, #tpu.memory_space<vmem>>, vector<1x128xf32>
    %964 = arith.addf %962, %963 : vector<1x128xf32>
    %965 = vector.shape_cast %964 : vector<1x128xf32> to vector<1x1x128xf32>
    %c0_450 = arith.constant 0 : index
    %c2_451 = arith.constant 2 : index
    %c0_452 = arith.constant 0 : index
    %966 = vector.load %arg42[%c0_450, %c2_451, %c0_452] : memref<1x5x128xf32, #tpu.memory_space<vmem>>, vector<1x1x128xf32>
    tpu.vector_store %arg42[%c0_450, %c2_451, %c0_452], %965 {strides = array<i32>} : memref<1x5x128xf32, #tpu.memory_space<vmem>>, vector<1x1x128xf32>,
    %cst_453 = arith.constant dense<0xFF800000> : vector<1xf32>
    %967 = vector.multi_reduction <maximumf>, %964, %cst_453 [1] : vector<1x128xf32> to vector<1xf32>
    %968 = vector.shape_cast %967 : vector<1xf32> to vector<1x1xf32>
    %969 = vector.broadcast %968 : vector<1x1xf32> to vector<1x128xf32>
    %970 = arith.cmpf oeq, %964, %969 : vector<1x128xf32>
    %c128_i32_454 = arith.constant 128 : i32
    %971 = vector.broadcast %c128_i32_454 : i32 to vector<1x128xi32>
    %972 = arith.select %970, %169, %971 : vector<1x128xi1>, vector<1x128xi32>
    %cst_455 = arith.constant dense<2147483647> : vector<1xi32>
    %973 = vector.multi_reduction <minsi>, %972, %cst_455 [1] : vector<1x128xi32> to vector<1xi32>
    %974 = vector.shape_cast %973 : vector<1xi32> to vector<1x1xi32>
    %975 = vector.broadcast %974 : vector<1x1xi32> to vector<1x128xi32>
    %976 = arith.cmpi eq, %169, %975 : vector<1x128xi32>
    %977 = arith.extui %976 : vector<1x128xi1> to vector<1x128xi32>
    %978 = arith.sitofp %977 : vector<1x128xi32> to vector<1x128xf32>
    %cst_456 = arith.constant dense<0.000000e+00> : vector<1x32xf32>
    %979 = tpu.matmul %978, %168, %cst_456 {dimension_numbers = #tpu.dot_dimension_numbers<[1], [0], [0], [1], [0, 0, 1, 1], [], []>} : vector<1x128xf32>, vector<128x32xf32>, vector<1x32xf32> -> vector<1x32xf32>
    %c3 = arith.constant 3 : index
    %c0_457 = arith.constant 0 : index
    %980 = vector.load %arg19[%c3, %c0_457] : memref<5x32xf32, #tpu.memory_space<vmem>>, vector<1x32xf32>
    %981 = arith.addf %979, %980 : vector<1x32xf32>
    %c0_458 = arith.constant 0 : index
    %c0_459 = arith.constant 0 : index
    %982 = vector.load %arg20[%c0_458, %c0_459] : memref<32x96xf32, #tpu.memory_space<vmem>>, vector<32x96xf32>
    %cst_460 = arith.constant dense<0.000000e+00> : vector<1x96xf32>
    %983 = tpu.matmul %981, %982, %cst_460 {dimension_numbers = #tpu.dot_dimension_numbers<[1], [0], [0], [1], [0, 0, 1, 1], [], []>} : vector<1x32xf32>, vector<32x96xf32>, vector<1x96xf32> -> vector<1x96xf32>
    %c0_461 = arith.constant 0 : index
    %c0_462 = arith.constant 0 : index
    %984 = vector.load %arg21[%c0_461, %c0_462] : memref<1x96xf32, #tpu.memory_space<vmem>>, vector<1x96xf32>
    %985 = arith.addf %983, %984 : vector<1x96xf32>
    %986 = vector.extract_strided_slice %985 {offsets = [0, 32], sizes = [1, 32], strides = [1, 1]} : vector<1x96xf32> to vector<1x32xf32>
    %c3_463 = arith.constant 3 : index
    %c0_464 = arith.constant 0 : index
    %987 = vector.load %arg43[%c3_463, %c0_464] : memref<8x32xf32, #tpu.memory_space<vmem>>, vector<1x32xf32>
    tpu.vector_store %arg43[%c3_463, %c0_464], %986 {strides = array<i32>} : memref<8x32xf32, #tpu.memory_space<vmem>>, vector<1x32xf32>,
    %988 = vector.extract_strided_slice %985 {offsets = [0, 64], sizes = [1, 32], strides = [1, 1]} : vector<1x96xf32> to vector<1x32xf32>
    %c3_465 = arith.constant 3 : index
    %c0_466 = arith.constant 0 : index
    %989 = vector.load %arg44[%c3_465, %c0_466] : memref<8x32xf32, #tpu.memory_space<vmem>>, vector<1x32xf32>
    tpu.vector_store %arg44[%c3_465, %c0_466], %988 {strides = array<i32>} : memref<8x32xf32, #tpu.memory_space<vmem>>, vector<1x32xf32>,
    %990 = vector.extract_strided_slice %985 {offsets = [0, 0], sizes = [1, 32], strides = [1, 1]} : vector<1x96xf32> to vector<1x32xf32>
    %c0_467 = arith.constant 0 : index
    %c0_468 = arith.constant 0 : index
    %991 = vector.load %arg43[%c0_467, %c0_468] : memref<8x32xf32, #tpu.memory_space<vmem>>, vector<4x32xf32>
    %c0_469 = arith.constant 0 : index
    %c0_470 = arith.constant 0 : index
    %992 = vector.load %arg44[%c0_469, %c0_470] : memref<8x32xf32, #tpu.memory_space<vmem>>, vector<4x32xf32>
    %c0_471 = arith.constant 0 : index
    %c0_472 = arith.constant 0 : index
    %993 = vector.load %arg22[%c0_471, %c0_472] : memref<32x32xf32, #tpu.memory_space<vmem>>, vector<32x32xf32>
    %994 = vector.extract_strided_slice %990 {offsets = [0, 0], sizes = [1, 8], strides = [1, 1]} : vector<1x32xf32> to vector<1x8xf32>
    %995 = vector.extract_strided_slice %991 {offsets = [0, 0], sizes = [4, 8], strides = [1, 1]} : vector<4x32xf32> to vector<4x8xf32>
    %cst_473 = arith.constant dense<0.000000e+00> : vector<1x4xf32>
    %996 = tpu.matmul %994, %995, %cst_473 {dimension_numbers = #tpu.dot_dimension_numbers<[1], [1], [0], [0], [0, 0, 1, 0], [], []>} : vector<1x8xf32>, vector<4x8xf32>, vector<1x4xf32> -> vector<1x4xf32>
    %cst_474 = arith.constant 0.353553385 : f32
    %997 = vector.broadcast %cst_474 : f32 to vector<1x4xf32>
    %998 = arith.mulf %996, %997 : vector<1x4xf32>
    %cst_475 = arith.constant dense<0xFF800000> : vector<1xf32>
    %999 = vector.multi_reduction <maximumf>, %998, %cst_475 [1] : vector<1x4xf32> to vector<1xf32>
    %1000 = vector.shape_cast %999 : vector<1xf32> to vector<1x1xf32>
    %1001 = vector.broadcast %1000 : vector<1x1xf32> to vector<1x4xf32>
    %1002 = arith.subf %998, %1001 : vector<1x4xf32>
    %1003 = math.exp %1002 : vector<1x4xf32>
    %cst_476 = arith.constant dense<0.000000e+00> : vector<1xf32>
    %1004 = vector.multi_reduction <add>, %1003, %cst_476 [1] : vector<1x4xf32> to vector<1xf32>
    %1005 = vector.shape_cast %1004 : vector<1xf32> to vector<1x1xf32>
    %1006 = vector.broadcast %1005 : vector<1x1xf32> to vector<1x4xf32>
    %1007 = arith.divf %1003, %1006 : vector<1x4xf32>
    %1008 = vector.extract_strided_slice %992 {offsets = [0, 0], sizes = [4, 8], strides = [1, 1]} : vector<4x32xf32> to vector<4x8xf32>
    %cst_477 = arith.constant dense<0.000000e+00> : vector<1x8xf32>
    %1009 = tpu.matmul %1007, %1008, %cst_477 {dimension_numbers = #tpu.dot_dimension_numbers<[1], [0], [0], [1], [0, 0, 1, 1], [], []>} : vector<1x4xf32>, vector<4x8xf32>, vector<1x8xf32> -> vector<1x8xf32>
    %1010 = vector.extract_strided_slice %993 {offsets = [0, 0], sizes = [8, 32], strides = [1, 1]} : vector<32x32xf32> to vector<8x32xf32>
    %cst_478 = arith.constant dense<0.000000e+00> : vector<1x32xf32>
    %1011 = tpu.matmul %1009, %1010, %cst_478 {dimension_numbers = #tpu.dot_dimension_numbers<[1], [0], [0], [1], [0, 0, 1, 1], [], []>} : vector<1x8xf32>, vector<8x32xf32>, vector<1x32xf32> -> vector<1x32xf32>
    %1012 = vector.extract_strided_slice %990 {offsets = [0, 8], sizes = [1, 8], strides = [1, 1]} : vector<1x32xf32> to vector<1x8xf32>
    %1013 = vector.extract_strided_slice %991 {offsets = [0, 8], sizes = [4, 8], strides = [1, 1]} : vector<4x32xf32> to vector<4x8xf32>
    %cst_479 = arith.constant dense<0.000000e+00> : vector<1x4xf32>
    %1014 = tpu.matmul %1012, %1013, %cst_479 {dimension_numbers = #tpu.dot_dimension_numbers<[1], [1], [0], [0], [0, 0, 1, 0], [], []>} : vector<1x8xf32>, vector<4x8xf32>, vector<1x4xf32> -> vector<1x4xf32>
    %cst_480 = arith.constant 0.353553385 : f32
    %1015 = vector.broadcast %cst_480 : f32 to vector<1x4xf32>
    %1016 = arith.mulf %1014, %1015 : vector<1x4xf32>
    %cst_481 = arith.constant dense<0xFF800000> : vector<1xf32>
    %1017 = vector.multi_reduction <maximumf>, %1016, %cst_481 [1] : vector<1x4xf32> to vector<1xf32>
    %1018 = vector.shape_cast %1017 : vector<1xf32> to vector<1x1xf32>
    %1019 = vector.broadcast %1018 : vector<1x1xf32> to vector<1x4xf32>
    %1020 = arith.subf %1016, %1019 : vector<1x4xf32>
    %1021 = math.exp %1020 : vector<1x4xf32>
    %cst_482 = arith.constant dense<0.000000e+00> : vector<1xf32>
    %1022 = vector.multi_reduction <add>, %1021, %cst_482 [1] : vector<1x4xf32> to vector<1xf32>
    %1023 = vector.shape_cast %1022 : vector<1xf32> to vector<1x1xf32>
    %1024 = vector.broadcast %1023 : vector<1x1xf32> to vector<1x4xf32>
    %1025 = arith.divf %1021, %1024 : vector<1x4xf32>
    %1026 = vector.extract_strided_slice %992 {offsets = [0, 8], sizes = [4, 8], strides = [1, 1]} : vector<4x32xf32> to vector<4x8xf32>
    %cst_483 = arith.constant dense<0.000000e+00> : vector<1x8xf32>
    %1027 = tpu.matmul %1025, %1026, %cst_483 {dimension_numbers = #tpu.dot_dimension_numbers<[1], [0], [0], [1], [0, 0, 1, 1], [], []>} : vector<1x4xf32>, vector<4x8xf32>, vector<1x8xf32> -> vector<1x8xf32>
    %1028 = vector.extract_strided_slice %993 {offsets = [8, 0], sizes = [8, 32], strides = [1, 1]} : vector<32x32xf32> to vector<8x32xf32>
    %cst_484 = arith.constant dense<0.000000e+00> : vector<1x32xf32>
    %1029 = tpu.matmul %1027, %1028, %cst_484 {dimension_numbers = #tpu.dot_dimension_numbers<[1], [0], [0], [1], [0, 0, 1, 1], [], []>} : vector<1x8xf32>, vector<8x32xf32>, vector<1x32xf32> -> vector<1x32xf32>
    %1030 = arith.addf %1011, %1029 : vector<1x32xf32>
    %1031 = vector.extract_strided_slice %990 {offsets = [0, 16], sizes = [1, 8], strides = [1, 1]} : vector<1x32xf32> to vector<1x8xf32>
    %1032 = vector.extract_strided_slice %991 {offsets = [0, 16], sizes = [4, 8], strides = [1, 1]} : vector<4x32xf32> to vector<4x8xf32>
    %cst_485 = arith.constant dense<0.000000e+00> : vector<1x4xf32>
    %1033 = tpu.matmul %1031, %1032, %cst_485 {dimension_numbers = #tpu.dot_dimension_numbers<[1], [1], [0], [0], [0, 0, 1, 0], [], []>} : vector<1x8xf32>, vector<4x8xf32>, vector<1x4xf32> -> vector<1x4xf32>
    %cst_486 = arith.constant 0.353553385 : f32
    %1034 = vector.broadcast %cst_486 : f32 to vector<1x4xf32>
    %1035 = arith.mulf %1033, %1034 : vector<1x4xf32>
    %cst_487 = arith.constant dense<0xFF800000> : vector<1xf32>
    %1036 = vector.multi_reduction <maximumf>, %1035, %cst_487 [1] : vector<1x4xf32> to vector<1xf32>
    %1037 = vector.shape_cast %1036 : vector<1xf32> to vector<1x1xf32>
    %1038 = vector.broadcast %1037 : vector<1x1xf32> to vector<1x4xf32>
    %1039 = arith.subf %1035, %1038 : vector<1x4xf32>
    %1040 = math.exp %1039 : vector<1x4xf32>
    %cst_488 = arith.constant dense<0.000000e+00> : vector<1xf32>
    %1041 = vector.multi_reduction <add>, %1040, %cst_488 [1] : vector<1x4xf32> to vector<1xf32>
    %1042 = vector.shape_cast %1041 : vector<1xf32> to vector<1x1xf32>
    %1043 = vector.broadcast %1042 : vector<1x1xf32> to vector<1x4xf32>
    %1044 = arith.divf %1040, %1043 : vector<1x4xf32>
    %1045 = vector.extract_strided_slice %992 {offsets = [0, 16], sizes = [4, 8], strides = [1, 1]} : vector<4x32xf32> to vector<4x8xf32>
    %cst_489 = arith.constant dense<0.000000e+00> : vector<1x8xf32>
    %1046 = tpu.matmul %1044, %1045, %cst_489 {dimension_numbers = #tpu.dot_dimension_numbers<[1], [0], [0], [1], [0, 0, 1, 1], [], []>} : vector<1x4xf32>, vector<4x8xf32>, vector<1x8xf32> -> vector<1x8xf32>
    %1047 = vector.extract_strided_slice %993 {offsets = [16, 0], sizes = [8, 32], strides = [1, 1]} : vector<32x32xf32> to vector<8x32xf32>
    %cst_490 = arith.constant dense<0.000000e+00> : vector<1x32xf32>
    %1048 = tpu.matmul %1046, %1047, %cst_490 {dimension_numbers = #tpu.dot_dimension_numbers<[1], [0], [0], [1], [0, 0, 1, 1], [], []>} : vector<1x8xf32>, vector<8x32xf32>, vector<1x32xf32> -> vector<1x32xf32>
    %1049 = arith.addf %1030, %1048 : vector<1x32xf32>
    %1050 = vector.extract_strided_slice %990 {offsets = [0, 24], sizes = [1, 8], strides = [1, 1]} : vector<1x32xf32> to vector<1x8xf32>
    %1051 = vector.extract_strided_slice %991 {offsets = [0, 24], sizes = [4, 8], strides = [1, 1]} : vector<4x32xf32> to vector<4x8xf32>
    %cst_491 = arith.constant dense<0.000000e+00> : vector<1x4xf32>
    %1052 = tpu.matmul %1050, %1051, %cst_491 {dimension_numbers = #tpu.dot_dimension_numbers<[1], [1], [0], [0], [0, 0, 1, 0], [], []>} : vector<1x8xf32>, vector<4x8xf32>, vector<1x4xf32> -> vector<1x4xf32>
    %cst_492 = arith.constant 0.353553385 : f32
    %1053 = vector.broadcast %cst_492 : f32 to vector<1x4xf32>
    %1054 = arith.mulf %1052, %1053 : vector<1x4xf32>
    %cst_493 = arith.constant dense<0xFF800000> : vector<1xf32>
    %1055 = vector.multi_reduction <maximumf>, %1054, %cst_493 [1] : vector<1x4xf32> to vector<1xf32>
    %1056 = vector.shape_cast %1055 : vector<1xf32> to vector<1x1xf32>
    %1057 = vector.broadcast %1056 : vector<1x1xf32> to vector<1x4xf32>
    %1058 = arith.subf %1054, %1057 : vector<1x4xf32>
    %1059 = math.exp %1058 : vector<1x4xf32>
    %cst_494 = arith.constant dense<0.000000e+00> : vector<1xf32>
    %1060 = vector.multi_reduction <add>, %1059, %cst_494 [1] : vector<1x4xf32> to vector<1xf32>
    %1061 = vector.shape_cast %1060 : vector<1xf32> to vector<1x1xf32>
    %1062 = vector.broadcast %1061 : vector<1x1xf32> to vector<1x4xf32>
    %1063 = arith.divf %1059, %1062 : vector<1x4xf32>
    %1064 = vector.extract_strided_slice %992 {offsets = [0, 24], sizes = [4, 8], strides = [1, 1]} : vector<4x32xf32> to vector<4x8xf32>
    %cst_495 = arith.constant dense<0.000000e+00> : vector<1x8xf32>
    %1065 = tpu.matmul %1063, %1064, %cst_495 {dimension_numbers = #tpu.dot_dimension_numbers<[1], [0], [0], [1], [0, 0, 1, 1], [], []>} : vector<1x4xf32>, vector<4x8xf32>, vector<1x8xf32> -> vector<1x8xf32>
    %1066 = vector.extract_strided_slice %993 {offsets = [24, 0], sizes = [8, 32], strides = [1, 1]} : vector<32x32xf32> to vector<8x32xf32>
    %cst_496 = arith.constant dense<0.000000e+00> : vector<1x32xf32>
    %1067 = tpu.matmul %1065, %1066, %cst_496 {dimension_numbers = #tpu.dot_dimension_numbers<[1], [0], [0], [1], [0, 0, 1, 1], [], []>} : vector<1x8xf32>, vector<8x32xf32>, vector<1x32xf32> -> vector<1x32xf32>
    %1068 = arith.addf %1049, %1067 : vector<1x32xf32>
    %c0_497 = arith.constant 0 : index
    %c0_498 = arith.constant 0 : index
    %1069 = vector.load %arg23[%c0_497, %c0_498] : memref<1x32xf32, #tpu.memory_space<vmem>>, vector<1x32xf32>
    %1070 = arith.addf %1068, %1069 : vector<1x32xf32>
    %1071 = arith.addf %981, %1070 : vector<1x32xf32>
    %c0_499 = arith.constant 0 : index
    %c0_500 = arith.constant 0 : index
    %1072 = vector.load %arg24[%c0_499, %c0_500] : memref<1x32xf32, #tpu.memory_space<vmem>>, vector<1x32xf32>
    %c0_501 = arith.constant 0 : index
    %c0_502 = arith.constant 0 : index
    %1073 = vector.load %arg25[%c0_501, %c0_502] : memref<1x32xf32, #tpu.memory_space<vmem>>, vector<1x32xf32>
    %cst_503 = arith.constant dense<0.000000e+00> : vector<1xf32>
    %1074 = vector.multi_reduction <add>, %1071, %cst_503 [1] : vector<1x32xf32> to vector<1xf32>
    %1075 = vector.shape_cast %1074 : vector<1xf32> to vector<1x1xf32>
    %cst_504 = arith.constant 3.200000e+01 : f32
    %1076 = vector.broadcast %cst_504 : f32 to vector<1x1xf32>
    %1077 = arith.divf %1075, %1076 : vector<1x1xf32>
    %1078 = vector.broadcast %1077 : vector<1x1xf32> to vector<1x32xf32>
    %1079 = arith.subf %1071, %1078 : vector<1x32xf32>
    %1080 = arith.mulf %1079, %1079 : vector<1x32xf32>
    %cst_505 = arith.constant dense<0.000000e+00> : vector<1xf32>
    %1081 = vector.multi_reduction <add>, %1080, %cst_505 [1] : vector<1x32xf32> to vector<1xf32>
    %1082 = vector.shape_cast %1081 : vector<1xf32> to vector<1x1xf32>
    %cst_506 = arith.constant 3.200000e+01 : f32
    %1083 = vector.broadcast %cst_506 : f32 to vector<1x1xf32>
    %1084 = arith.divf %1082, %1083 : vector<1x1xf32>
    %1085 = vector.broadcast %1077 : vector<1x1xf32> to vector<1x32xf32>
    %1086 = arith.subf %1071, %1085 : vector<1x32xf32>
    %cst_507 = arith.constant 9.99999974E-6 : f32
    %1087 = vector.broadcast %cst_507 : f32 to vector<1x1xf32>
    %1088 = arith.addf %1084, %1087 : vector<1x1xf32>
    %1089 = math.rsqrt %1088 : vector<1x1xf32>
    %1090 = vector.broadcast %1089 : vector<1x1xf32> to vector<1x32xf32>
    %1091 = arith.mulf %1086, %1090 : vector<1x32xf32>
    %1092 = arith.mulf %1091, %1072 : vector<1x32xf32>
    %1093 = arith.addf %1092, %1073 : vector<1x32xf32>
    %c0_508 = arith.constant 0 : index
    %c0_509 = arith.constant 0 : index
    %1094 = vector.load %arg26[%c0_508, %c0_509] : memref<32x32xf32, #tpu.memory_space<vmem>>, vector<32x32xf32>
    %cst_510 = arith.constant dense<0.000000e+00> : vector<1x32xf32>
    %1095 = tpu.matmul %1093, %1094, %cst_510 {dimension_numbers = #tpu.dot_dimension_numbers<[1], [0], [0], [1], [0, 0, 1, 1], [], []>} : vector<1x32xf32>, vector<32x32xf32>, vector<1x32xf32> -> vector<1x32xf32>
    %c0_511 = arith.constant 0 : index
    %c0_512 = arith.constant 0 : index
    %1096 = vector.load %arg27[%c0_511, %c0_512] : memref<1x32xf32, #tpu.memory_space<vmem>>, vector<1x32xf32>
    %1097 = arith.addf %1095, %1096 : vector<1x32xf32>
    %c0_513 = arith.constant 0 : index
    %c0_514 = arith.constant 0 : index
    %1098 = vector.load %arg30[%c0_513, %c0_514] : memref<32x32xf32, #tpu.memory_space<vmem>>, vector<32x32xf32>
    %1099 = vector.extract_strided_slice %1097 {offsets = [0, 0], sizes = [1, 8], strides = [1, 1]} : vector<1x32xf32> to vector<1x8xf32>
    %1100 = vector.extract_strided_slice %166 {offsets = [0, 0], sizes = [15, 8], strides = [1, 1]} : vector<15x32xf32> to vector<15x8xf32>
    %cst_515 = arith.constant dense<0.000000e+00> : vector<1x15xf32>
    %1101 = tpu.matmul %1099, %1100, %cst_515 {dimension_numbers = #tpu.dot_dimension_numbers<[1], [1], [0], [0], [0, 0, 1, 0], [], []>} : vector<1x8xf32>, vector<15x8xf32>, vector<1x15xf32> -> vector<1x15xf32>
    %cst_516 = arith.constant 0.353553385 : f32
    %1102 = vector.broadcast %cst_516 : f32 to vector<1x15xf32>
    %1103 = arith.mulf %1101, %1102 : vector<1x15xf32>
    %cst_517 = arith.constant dense<0xFF800000> : vector<1xf32>
    %1104 = vector.multi_reduction <maximumf>, %1103, %cst_517 [1] : vector<1x15xf32> to vector<1xf32>
    %1105 = vector.shape_cast %1104 : vector<1xf32> to vector<1x1xf32>
    %1106 = vector.broadcast %1105 : vector<1x1xf32> to vector<1x15xf32>
    %1107 = arith.subf %1103, %1106 : vector<1x15xf32>
    %1108 = math.exp %1107 : vector<1x15xf32>
    %cst_518 = arith.constant dense<0.000000e+00> : vector<1xf32>
    %1109 = vector.multi_reduction <add>, %1108, %cst_518 [1] : vector<1x15xf32> to vector<1xf32>
    %1110 = vector.shape_cast %1109 : vector<1xf32> to vector<1x1xf32>
    %1111 = vector.broadcast %1110 : vector<1x1xf32> to vector<1x15xf32>
    %1112 = arith.divf %1108, %1111 : vector<1x15xf32>
    %1113 = vector.extract_strided_slice %167 {offsets = [0, 0], sizes = [15, 8], strides = [1, 1]} : vector<15x32xf32> to vector<15x8xf32>
    %cst_519 = arith.constant dense<0.000000e+00> : vector<1x8xf32>
    %1114 = tpu.matmul %1112, %1113, %cst_519 {dimension_numbers = #tpu.dot_dimension_numbers<[1], [0], [0], [1], [0, 0, 1, 1], [], []>} : vector<1x15xf32>, vector<15x8xf32>, vector<1x8xf32> -> vector<1x8xf32>
    %1115 = vector.extract_strided_slice %1098 {offsets = [0, 0], sizes = [8, 32], strides = [1, 1]} : vector<32x32xf32> to vector<8x32xf32>
    %cst_520 = arith.constant dense<0.000000e+00> : vector<1x32xf32>
    %1116 = tpu.matmul %1114, %1115, %cst_520 {dimension_numbers = #tpu.dot_dimension_numbers<[1], [0], [0], [1], [0, 0, 1, 1], [], []>} : vector<1x8xf32>, vector<8x32xf32>, vector<1x32xf32> -> vector<1x32xf32>
    %1117 = vector.extract_strided_slice %1097 {offsets = [0, 8], sizes = [1, 8], strides = [1, 1]} : vector<1x32xf32> to vector<1x8xf32>
    %1118 = vector.extract_strided_slice %166 {offsets = [0, 8], sizes = [15, 8], strides = [1, 1]} : vector<15x32xf32> to vector<15x8xf32>
    %cst_521 = arith.constant dense<0.000000e+00> : vector<1x15xf32>
    %1119 = tpu.matmul %1117, %1118, %cst_521 {dimension_numbers = #tpu.dot_dimension_numbers<[1], [1], [0], [0], [0, 0, 1, 0], [], []>} : vector<1x8xf32>, vector<15x8xf32>, vector<1x15xf32> -> vector<1x15xf32>
    %cst_522 = arith.constant 0.353553385 : f32
    %1120 = vector.broadcast %cst_522 : f32 to vector<1x15xf32>
    %1121 = arith.mulf %1119, %1120 : vector<1x15xf32>
    %cst_523 = arith.constant dense<0xFF800000> : vector<1xf32>
    %1122 = vector.multi_reduction <maximumf>, %1121, %cst_523 [1] : vector<1x15xf32> to vector<1xf32>
    %1123 = vector.shape_cast %1122 : vector<1xf32> to vector<1x1xf32>
    %1124 = vector.broadcast %1123 : vector<1x1xf32> to vector<1x15xf32>
    %1125 = arith.subf %1121, %1124 : vector<1x15xf32>
    %1126 = math.exp %1125 : vector<1x15xf32>
    %cst_524 = arith.constant dense<0.000000e+00> : vector<1xf32>
    %1127 = vector.multi_reduction <add>, %1126, %cst_524 [1] : vector<1x15xf32> to vector<1xf32>
    %1128 = vector.shape_cast %1127 : vector<1xf32> to vector<1x1xf32>
    %1129 = vector.broadcast %1128 : vector<1x1xf32> to vector<1x15xf32>
    %1130 = arith.divf %1126, %1129 : vector<1x15xf32>
    %1131 = vector.extract_strided_slice %167 {offsets = [0, 8], sizes = [15, 8], strides = [1, 1]} : vector<15x32xf32> to vector<15x8xf32>
    %cst_525 = arith.constant dense<0.000000e+00> : vector<1x8xf32>
    %1132 = tpu.matmul %1130, %1131, %cst_525 {dimension_numbers = #tpu.dot_dimension_numbers<[1], [0], [0], [1], [0, 0, 1, 1], [], []>} : vector<1x15xf32>, vector<15x8xf32>, vector<1x8xf32> -> vector<1x8xf32>
    %1133 = vector.extract_strided_slice %1098 {offsets = [8, 0], sizes = [8, 32], strides = [1, 1]} : vector<32x32xf32> to vector<8x32xf32>
    %cst_526 = arith.constant dense<0.000000e+00> : vector<1x32xf32>
    %1134 = tpu.matmul %1132, %1133, %cst_526 {dimension_numbers = #tpu.dot_dimension_numbers<[1], [0], [0], [1], [0, 0, 1, 1], [], []>} : vector<1x8xf32>, vector<8x32xf32>, vector<1x32xf32> -> vector<1x32xf32>
    %1135 = arith.addf %1116, %1134 : vector<1x32xf32>
    %1136 = vector.extract_strided_slice %1097 {offsets = [0, 16], sizes = [1, 8], strides = [1, 1]} : vector<1x32xf32> to vector<1x8xf32>
    %1137 = vector.extract_strided_slice %166 {offsets = [0, 16], sizes = [15, 8], strides = [1, 1]} : vector<15x32xf32> to vector<15x8xf32>
    %cst_527 = arith.constant dense<0.000000e+00> : vector<1x15xf32>
    %1138 = tpu.matmul %1136, %1137, %cst_527 {dimension_numbers = #tpu.dot_dimension_numbers<[1], [1], [0], [0], [0, 0, 1, 0], [], []>} : vector<1x8xf32>, vector<15x8xf32>, vector<1x15xf32> -> vector<1x15xf32>
    %cst_528 = arith.constant 0.353553385 : f32
    %1139 = vector.broadcast %cst_528 : f32 to vector<1x15xf32>
    %1140 = arith.mulf %1138, %1139 : vector<1x15xf32>
    %cst_529 = arith.constant dense<0xFF800000> : vector<1xf32>
    %1141 = vector.multi_reduction <maximumf>, %1140, %cst_529 [1] : vector<1x15xf32> to vector<1xf32>
    %1142 = vector.shape_cast %1141 : vector<1xf32> to vector<1x1xf32>
    %1143 = vector.broadcast %1142 : vector<1x1xf32> to vector<1x15xf32>
    %1144 = arith.subf %1140, %1143 : vector<1x15xf32>
    %1145 = math.exp %1144 : vector<1x15xf32>
    %cst_530 = arith.constant dense<0.000000e+00> : vector<1xf32>
    %1146 = vector.multi_reduction <add>, %1145, %cst_530 [1] : vector<1x15xf32> to vector<1xf32>
    %1147 = vector.shape_cast %1146 : vector<1xf32> to vector<1x1xf32>
    %1148 = vector.broadcast %1147 : vector<1x1xf32> to vector<1x15xf32>
    %1149 = arith.divf %1145, %1148 : vector<1x15xf32>
    %1150 = vector.extract_strided_slice %167 {offsets = [0, 16], sizes = [15, 8], strides = [1, 1]} : vector<15x32xf32> to vector<15x8xf32>
    %cst_531 = arith.constant dense<0.000000e+00> : vector<1x8xf32>
    %1151 = tpu.matmul %1149, %1150, %cst_531 {dimension_numbers = #tpu.dot_dimension_numbers<[1], [0], [0], [1], [0, 0, 1, 1], [], []>} : vector<1x15xf32>, vector<15x8xf32>, vector<1x8xf32> -> vector<1x8xf32>
    %1152 = vector.extract_strided_slice %1098 {offsets = [16, 0], sizes = [8, 32], strides = [1, 1]} : vector<32x32xf32> to vector<8x32xf32>
    %cst_532 = arith.constant dense<0.000000e+00> : vector<1x32xf32>
    %1153 = tpu.matmul %1151, %1152, %cst_532 {dimension_numbers = #tpu.dot_dimension_numbers<[1], [0], [0], [1], [0, 0, 1, 1], [], []>} : vector<1x8xf32>, vector<8x32xf32>, vector<1x32xf32> -> vector<1x32xf32>
    %1154 = arith.addf %1135, %1153 : vector<1x32xf32>
    %1155 = vector.extract_strided_slice %1097 {offsets = [0, 24], sizes = [1, 8], strides = [1, 1]} : vector<1x32xf32> to vector<1x8xf32>
    %1156 = vector.extract_strided_slice %166 {offsets = [0, 24], sizes = [15, 8], strides = [1, 1]} : vector<15x32xf32> to vector<15x8xf32>
    %cst_533 = arith.constant dense<0.000000e+00> : vector<1x15xf32>
    %1157 = tpu.matmul %1155, %1156, %cst_533 {dimension_numbers = #tpu.dot_dimension_numbers<[1], [1], [0], [0], [0, 0, 1, 0], [], []>} : vector<1x8xf32>, vector<15x8xf32>, vector<1x15xf32> -> vector<1x15xf32>
    %cst_534 = arith.constant 0.353553385 : f32
    %1158 = vector.broadcast %cst_534 : f32 to vector<1x15xf32>
    %1159 = arith.mulf %1157, %1158 : vector<1x15xf32>
    %cst_535 = arith.constant dense<0xFF800000> : vector<1xf32>
    %1160 = vector.multi_reduction <maximumf>, %1159, %cst_535 [1] : vector<1x15xf32> to vector<1xf32>
    %1161 = vector.shape_cast %1160 : vector<1xf32> to vector<1x1xf32>
    %1162 = vector.broadcast %1161 : vector<1x1xf32> to vector<1x15xf32>
    %1163 = arith.subf %1159, %1162 : vector<1x15xf32>
    %1164 = math.exp %1163 : vector<1x15xf32>
    %cst_536 = arith.constant dense<0.000000e+00> : vector<1xf32>
    %1165 = vector.multi_reduction <add>, %1164, %cst_536 [1] : vector<1x15xf32> to vector<1xf32>
    %1166 = vector.shape_cast %1165 : vector<1xf32> to vector<1x1xf32>
    %1167 = vector.broadcast %1166 : vector<1x1xf32> to vector<1x15xf32>
    %1168 = arith.divf %1164, %1167 : vector<1x15xf32>
    %1169 = vector.extract_strided_slice %167 {offsets = [0, 24], sizes = [15, 8], strides = [1, 1]} : vector<15x32xf32> to vector<15x8xf32>
    %cst_537 = arith.constant dense<0.000000e+00> : vector<1x8xf32>
    %1170 = tpu.matmul %1168, %1169, %cst_537 {dimension_numbers = #tpu.dot_dimension_numbers<[1], [0], [0], [1], [0, 0, 1, 1], [], []>} : vector<1x15xf32>, vector<15x8xf32>, vector<1x8xf32> -> vector<1x8xf32>
    %1171 = vector.extract_strided_slice %1098 {offsets = [24, 0], sizes = [8, 32], strides = [1, 1]} : vector<32x32xf32> to vector<8x32xf32>
    %cst_538 = arith.constant dense<0.000000e+00> : vector<1x32xf32>
    %1172 = tpu.matmul %1170, %1171, %cst_538 {dimension_numbers = #tpu.dot_dimension_numbers<[1], [0], [0], [1], [0, 0, 1, 1], [], []>} : vector<1x8xf32>, vector<8x32xf32>, vector<1x32xf32> -> vector<1x32xf32>
    %1173 = arith.addf %1154, %1172 : vector<1x32xf32>
    %c0_539 = arith.constant 0 : index
    %c0_540 = arith.constant 0 : index
    %1174 = vector.load %arg31[%c0_539, %c0_540] : memref<1x32xf32, #tpu.memory_space<vmem>>, vector<1x32xf32>
    %1175 = arith.addf %1173, %1174 : vector<1x32xf32>
    %1176 = arith.addf %1093, %1175 : vector<1x32xf32>
    %c0_541 = arith.constant 0 : index
    %c0_542 = arith.constant 0 : index
    %1177 = vector.load %arg32[%c0_541, %c0_542] : memref<1x32xf32, #tpu.memory_space<vmem>>, vector<1x32xf32>
    %c0_543 = arith.constant 0 : index
    %c0_544 = arith.constant 0 : index
    %1178 = vector.load %arg33[%c0_543, %c0_544] : memref<1x32xf32, #tpu.memory_space<vmem>>, vector<1x32xf32>
    %cst_545 = arith.constant dense<0.000000e+00> : vector<1xf32>
    %1179 = vector.multi_reduction <add>, %1176, %cst_545 [1] : vector<1x32xf32> to vector<1xf32>
    %1180 = vector.shape_cast %1179 : vector<1xf32> to vector<1x1xf32>
    %cst_546 = arith.constant 3.200000e+01 : f32
    %1181 = vector.broadcast %cst_546 : f32 to vector<1x1xf32>
    %1182 = arith.divf %1180, %1181 : vector<1x1xf32>
    %1183 = vector.broadcast %1182 : vector<1x1xf32> to vector<1x32xf32>
    %1184 = arith.subf %1176, %1183 : vector<1x32xf32>
    %1185 = arith.mulf %1184, %1184 : vector<1x32xf32>
    %cst_547 = arith.constant dense<0.000000e+00> : vector<1xf32>
    %1186 = vector.multi_reduction <add>, %1185, %cst_547 [1] : vector<1x32xf32> to vector<1xf32>
    %1187 = vector.shape_cast %1186 : vector<1xf32> to vector<1x1xf32>
    %cst_548 = arith.constant 3.200000e+01 : f32
    %1188 = vector.broadcast %cst_548 : f32 to vector<1x1xf32>
    %1189 = arith.divf %1187, %1188 : vector<1x1xf32>
    %1190 = vector.broadcast %1182 : vector<1x1xf32> to vector<1x32xf32>
    %1191 = arith.subf %1176, %1190 : vector<1x32xf32>
    %cst_549 = arith.constant 9.99999974E-6 : f32
    %1192 = vector.broadcast %cst_549 : f32 to vector<1x1xf32>
    %1193 = arith.addf %1189, %1192 : vector<1x1xf32>
    %1194 = math.rsqrt %1193 : vector<1x1xf32>
    %1195 = vector.broadcast %1194 : vector<1x1xf32> to vector<1x32xf32>
    %1196 = arith.mulf %1191, %1195 : vector<1x32xf32>
    %1197 = arith.mulf %1196, %1177 : vector<1x32xf32>
    %1198 = arith.addf %1197, %1178 : vector<1x32xf32>
    %c0_550 = arith.constant 0 : index
    %c0_551 = arith.constant 0 : index
    %1199 = vector.load %arg34[%c0_550, %c0_551] : memref<32x64xf32, #tpu.memory_space<vmem>>, vector<32x64xf32>
    %cst_552 = arith.constant dense<0.000000e+00> : vector<1x64xf32>
    %1200 = tpu.matmul %1198, %1199, %cst_552 {dimension_numbers = #tpu.dot_dimension_numbers<[1], [0], [0], [1], [0, 0, 1, 1], [], []>} : vector<1x32xf32>, vector<32x64xf32>, vector<1x64xf32> -> vector<1x64xf32>
    %c0_553 = arith.constant 0 : index
    %c0_554 = arith.constant 0 : index
    %1201 = vector.load %arg35[%c0_553, %c0_554] : memref<1x64xf32, #tpu.memory_space<vmem>>, vector<1x64xf32>
    %1202 = arith.addf %1200, %1201 : vector<1x64xf32>
    %cst_555 = arith.constant 0.000000e+00 : f32
    %1203 = vector.broadcast %cst_555 : f32 to vector<1x64xf32>
    %1204 = arith.maximumf %1202, %1203 : vector<1x64xf32>
    %c0_556 = arith.constant 0 : index
    %c0_557 = arith.constant 0 : index
    %1205 = vector.load %arg36[%c0_556, %c0_557] : memref<64x32xf32, #tpu.memory_space<vmem>>, vector<64x32xf32>
    %cst_558 = arith.constant dense<0.000000e+00> : vector<1x32xf32>
    %1206 = tpu.matmul %1204, %1205, %cst_558 {dimension_numbers = #tpu.dot_dimension_numbers<[1], [0], [0], [1], [0, 0, 1, 1], [], []>} : vector<1x64xf32>, vector<64x32xf32>, vector<1x32xf32> -> vector<1x32xf32>
    %c0_559 = arith.constant 0 : index
    %c0_560 = arith.constant 0 : index
    %1207 = vector.load %arg37[%c0_559, %c0_560] : memref<1x32xf32, #tpu.memory_space<vmem>>, vector<1x32xf32>
    %1208 = arith.addf %1206, %1207 : vector<1x32xf32>
    %1209 = arith.addf %1198, %1208 : vector<1x32xf32>
    %c0_561 = arith.constant 0 : index
    %c0_562 = arith.constant 0 : index
    %1210 = vector.load %arg38[%c0_561, %c0_562] : memref<1x32xf32, #tpu.memory_space<vmem>>, vector<1x32xf32>
    %c0_563 = arith.constant 0 : index
    %c0_564 = arith.constant 0 : index
    %1211 = vector.load %arg39[%c0_563, %c0_564] : memref<1x32xf32, #tpu.memory_space<vmem>>, vector<1x32xf32>
    %cst_565 = arith.constant dense<0.000000e+00> : vector<1xf32>
    %1212 = vector.multi_reduction <add>, %1209, %cst_565 [1] : vector<1x32xf32> to vector<1xf32>
    %1213 = vector.shape_cast %1212 : vector<1xf32> to vector<1x1xf32>
    %cst_566 = arith.constant 3.200000e+01 : f32
    %1214 = vector.broadcast %cst_566 : f32 to vector<1x1xf32>
    %1215 = arith.divf %1213, %1214 : vector<1x1xf32>
    %1216 = vector.broadcast %1215 : vector<1x1xf32> to vector<1x32xf32>
    %1217 = arith.subf %1209, %1216 : vector<1x32xf32>
    %1218 = arith.mulf %1217, %1217 : vector<1x32xf32>
    %cst_567 = arith.constant dense<0.000000e+00> : vector<1xf32>
    %1219 = vector.multi_reduction <add>, %1218, %cst_567 [1] : vector<1x32xf32> to vector<1xf32>
    %1220 = vector.shape_cast %1219 : vector<1xf32> to vector<1x1xf32>
    %cst_568 = arith.constant 3.200000e+01 : f32
    %1221 = vector.broadcast %cst_568 : f32 to vector<1x1xf32>
    %1222 = arith.divf %1220, %1221 : vector<1x1xf32>
    %1223 = vector.broadcast %1215 : vector<1x1xf32> to vector<1x32xf32>
    %1224 = arith.subf %1209, %1223 : vector<1x32xf32>
    %cst_569 = arith.constant 9.99999974E-6 : f32
    %1225 = vector.broadcast %cst_569 : f32 to vector<1x1xf32>
    %1226 = arith.addf %1222, %1225 : vector<1x1xf32>
    %1227 = math.rsqrt %1226 : vector<1x1xf32>
    %1228 = vector.broadcast %1227 : vector<1x1xf32> to vector<1x32xf32>
    %1229 = arith.mulf %1224, %1228 : vector<1x32xf32>
    %1230 = arith.mulf %1229, %1210 : vector<1x32xf32>
    %1231 = arith.addf %1230, %1211 : vector<1x32xf32>
    %c0_570 = arith.constant 0 : index
    %c0_571 = arith.constant 0 : index
    %1232 = vector.load %arg40[%c0_570, %c0_571] : memref<32x128xf32, #tpu.memory_space<vmem>>, vector<32x128xf32>
    %cst_572 = arith.constant dense<0.000000e+00> : vector<1x128xf32>
    %1233 = tpu.matmul %1231, %1232, %cst_572 {dimension_numbers = #tpu.dot_dimension_numbers<[1], [0], [0], [1], [0, 0, 1, 1], [], []>} : vector<1x32xf32>, vector<32x128xf32>, vector<1x128xf32> -> vector<1x128xf32>
    %c0_573 = arith.constant 0 : index
    %c0_574 = arith.constant 0 : index
    %1234 = vector.load %arg41[%c0_573, %c0_574] : memref<1x128xf32, #tpu.memory_space<vmem>>, vector<1x128xf32>
    %1235 = arith.addf %1233, %1234 : vector<1x128xf32>
    %1236 = vector.shape_cast %1235 : vector<1x128xf32> to vector<1x1x128xf32>
    %c0_575 = arith.constant 0 : index
    %c3_576 = arith.constant 3 : index
    %c0_577 = arith.constant 0 : index
    %1237 = vector.load %arg42[%c0_575, %c3_576, %c0_577] : memref<1x5x128xf32, #tpu.memory_space<vmem>>, vector<1x1x128xf32>
    tpu.vector_store %arg42[%c0_575, %c3_576, %c0_577], %1236 {strides = array<i32>} : memref<1x5x128xf32, #tpu.memory_space<vmem>>, vector<1x1x128xf32>,
    %cst_578 = arith.constant dense<0xFF800000> : vector<1xf32>
    %1238 = vector.multi_reduction <maximumf>, %1235, %cst_578 [1] : vector<1x128xf32> to vector<1xf32>
    %1239 = vector.shape_cast %1238 : vector<1xf32> to vector<1x1xf32>
    %1240 = vector.broadcast %1239 : vector<1x1xf32> to vector<1x128xf32>
    %1241 = arith.cmpf oeq, %1235, %1240 : vector<1x128xf32>
    %c128_i32_579 = arith.constant 128 : i32
    %1242 = vector.broadcast %c128_i32_579 : i32 to vector<1x128xi32>
    %1243 = arith.select %1241, %169, %1242 : vector<1x128xi1>, vector<1x128xi32>
    %cst_580 = arith.constant dense<2147483647> : vector<1xi32>
    %1244 = vector.multi_reduction <minsi>, %1243, %cst_580 [1] : vector<1x128xi32> to vector<1xi32>
    %1245 = vector.shape_cast %1244 : vector<1xi32> to vector<1x1xi32>
    %1246 = vector.broadcast %1245 : vector<1x1xi32> to vector<1x128xi32>
    %1247 = arith.cmpi eq, %169, %1246 : vector<1x128xi32>
    %1248 = arith.extui %1247 : vector<1x128xi1> to vector<1x128xi32>
    %1249 = arith.sitofp %1248 : vector<1x128xi32> to vector<1x128xf32>
    %cst_581 = arith.constant dense<0.000000e+00> : vector<1x32xf32>
    %1250 = tpu.matmul %1249, %168, %cst_581 {dimension_numbers = #tpu.dot_dimension_numbers<[1], [0], [0], [1], [0, 0, 1, 1], [], []>} : vector<1x128xf32>, vector<128x32xf32>, vector<1x32xf32> -> vector<1x32xf32>
    %c4 = arith.constant 4 : index
    %c0_582 = arith.constant 0 : index
    %1251 = vector.load %arg19[%c4, %c0_582] : memref<5x32xf32, #tpu.memory_space<vmem>>, vector<1x32xf32>
    %1252 = arith.addf %1250, %1251 : vector<1x32xf32>
    %c0_583 = arith.constant 0 : index
    %c0_584 = arith.constant 0 : index
    %1253 = vector.load %arg20[%c0_583, %c0_584] : memref<32x96xf32, #tpu.memory_space<vmem>>, vector<32x96xf32>
    %cst_585 = arith.constant dense<0.000000e+00> : vector<1x96xf32>
    %1254 = tpu.matmul %1252, %1253, %cst_585 {dimension_numbers = #tpu.dot_dimension_numbers<[1], [0], [0], [1], [0, 0, 1, 1], [], []>} : vector<1x32xf32>, vector<32x96xf32>, vector<1x96xf32> -> vector<1x96xf32>
    %c0_586 = arith.constant 0 : index
    %c0_587 = arith.constant 0 : index
    %1255 = vector.load %arg21[%c0_586, %c0_587] : memref<1x96xf32, #tpu.memory_space<vmem>>, vector<1x96xf32>
    %1256 = arith.addf %1254, %1255 : vector<1x96xf32>
    %1257 = vector.extract_strided_slice %1256 {offsets = [0, 32], sizes = [1, 32], strides = [1, 1]} : vector<1x96xf32> to vector<1x32xf32>
    %c4_588 = arith.constant 4 : index
    %c0_589 = arith.constant 0 : index
    %1258 = vector.load %arg43[%c4_588, %c0_589] : memref<8x32xf32, #tpu.memory_space<vmem>>, vector<1x32xf32>
    tpu.vector_store %arg43[%c4_588, %c0_589], %1257 {strides = array<i32>} : memref<8x32xf32, #tpu.memory_space<vmem>>, vector<1x32xf32>,
    %1259 = vector.extract_strided_slice %1256 {offsets = [0, 64], sizes = [1, 32], strides = [1, 1]} : vector<1x96xf32> to vector<1x32xf32>
    %c4_590 = arith.constant 4 : index
    %c0_591 = arith.constant 0 : index
    %1260 = vector.load %arg44[%c4_590, %c0_591] : memref<8x32xf32, #tpu.memory_space<vmem>>, vector<1x32xf32>
    tpu.vector_store %arg44[%c4_590, %c0_591], %1259 {strides = array<i32>} : memref<8x32xf32, #tpu.memory_space<vmem>>, vector<1x32xf32>,
    %1261 = vector.extract_strided_slice %1256 {offsets = [0, 0], sizes = [1, 32], strides = [1, 1]} : vector<1x96xf32> to vector<1x32xf32>
    %c0_592 = arith.constant 0 : index
    %c0_593 = arith.constant 0 : index
    %1262 = vector.load %arg43[%c0_592, %c0_593] : memref<8x32xf32, #tpu.memory_space<vmem>>, vector<5x32xf32>
    %c0_594 = arith.constant 0 : index
    %c0_595 = arith.constant 0 : index
    %1263 = vector.load %arg44[%c0_594, %c0_595] : memref<8x32xf32, #tpu.memory_space<vmem>>, vector<5x32xf32>
    %c0_596 = arith.constant 0 : index
    %c0_597 = arith.constant 0 : index
    %1264 = vector.load %arg22[%c0_596, %c0_597] : memref<32x32xf32, #tpu.memory_space<vmem>>, vector<32x32xf32>
    %1265 = vector.extract_strided_slice %1261 {offsets = [0, 0], sizes = [1, 8], strides = [1, 1]} : vector<1x32xf32> to vector<1x8xf32>
    %1266 = vector.extract_strided_slice %1262 {offsets = [0, 0], sizes = [5, 8], strides = [1, 1]} : vector<5x32xf32> to vector<5x8xf32>
    %cst_598 = arith.constant dense<0.000000e+00> : vector<1x5xf32>
    %1267 = tpu.matmul %1265, %1266, %cst_598 {dimension_numbers = #tpu.dot_dimension_numbers<[1], [1], [0], [0], [0, 0, 1, 0], [], []>} : vector<1x8xf32>, vector<5x8xf32>, vector<1x5xf32> -> vector<1x5xf32>
    %cst_599 = arith.constant 0.353553385 : f32
    %1268 = vector.broadcast %cst_599 : f32 to vector<1x5xf32>
    %1269 = arith.mulf %1267, %1268 : vector<1x5xf32>
    %cst_600 = arith.constant dense<0xFF800000> : vector<1xf32>
    %1270 = vector.multi_reduction <maximumf>, %1269, %cst_600 [1] : vector<1x5xf32> to vector<1xf32>
    %1271 = vector.shape_cast %1270 : vector<1xf32> to vector<1x1xf32>
    %1272 = vector.broadcast %1271 : vector<1x1xf32> to vector<1x5xf32>
    %1273 = arith.subf %1269, %1272 : vector<1x5xf32>
    %1274 = math.exp %1273 : vector<1x5xf32>
    %cst_601 = arith.constant dense<0.000000e+00> : vector<1xf32>
    %1275 = vector.multi_reduction <add>, %1274, %cst_601 [1] : vector<1x5xf32> to vector<1xf32>
    %1276 = vector.shape_cast %1275 : vector<1xf32> to vector<1x1xf32>
    %1277 = vector.broadcast %1276 : vector<1x1xf32> to vector<1x5xf32>
    %1278 = arith.divf %1274, %1277 : vector<1x5xf32>
    %1279 = vector.extract_strided_slice %1263 {offsets = [0, 0], sizes = [5, 8], strides = [1, 1]} : vector<5x32xf32> to vector<5x8xf32>
    %cst_602 = arith.constant dense<0.000000e+00> : vector<1x8xf32>
    %1280 = tpu.matmul %1278, %1279, %cst_602 {dimension_numbers = #tpu.dot_dimension_numbers<[1], [0], [0], [1], [0, 0, 1, 1], [], []>} : vector<1x5xf32>, vector<5x8xf32>, vector<1x8xf32> -> vector<1x8xf32>
    %1281 = vector.extract_strided_slice %1264 {offsets = [0, 0], sizes = [8, 32], strides = [1, 1]} : vector<32x32xf32> to vector<8x32xf32>
    %cst_603 = arith.constant dense<0.000000e+00> : vector<1x32xf32>
    %1282 = tpu.matmul %1280, %1281, %cst_603 {dimension_numbers = #tpu.dot_dimension_numbers<[1], [0], [0], [1], [0, 0, 1, 1], [], []>} : vector<1x8xf32>, vector<8x32xf32>, vector<1x32xf32> -> vector<1x32xf32>
    %1283 = vector.extract_strided_slice %1261 {offsets = [0, 8], sizes = [1, 8], strides = [1, 1]} : vector<1x32xf32> to vector<1x8xf32>
    %1284 = vector.extract_strided_slice %1262 {offsets = [0, 8], sizes = [5, 8], strides = [1, 1]} : vector<5x32xf32> to vector<5x8xf32>
    %cst_604 = arith.constant dense<0.000000e+00> : vector<1x5xf32>
    %1285 = tpu.matmul %1283, %1284, %cst_604 {dimension_numbers = #tpu.dot_dimension_numbers<[1], [1], [0], [0], [0, 0, 1, 0], [], []>} : vector<1x8xf32>, vector<5x8xf32>, vector<1x5xf32> -> vector<1x5xf32>
    %cst_605 = arith.constant 0.353553385 : f32
    %1286 = vector.broadcast %cst_605 : f32 to vector<1x5xf32>
    %1287 = arith.mulf %1285, %1286 : vector<1x5xf32>
    %cst_606 = arith.constant dense<0xFF800000> : vector<1xf32>
    %1288 = vector.multi_reduction <maximumf>, %1287, %cst_606 [1] : vector<1x5xf32> to vector<1xf32>
    %1289 = vector.shape_cast %1288 : vector<1xf32> to vector<1x1xf32>
    %1290 = vector.broadcast %1289 : vector<1x1xf32> to vector<1x5xf32>
    %1291 = arith.subf %1287, %1290 : vector<1x5xf32>
    %1292 = math.exp %1291 : vector<1x5xf32>
    %cst_607 = arith.constant dense<0.000000e+00> : vector<1xf32>
    %1293 = vector.multi_reduction <add>, %1292, %cst_607 [1] : vector<1x5xf32> to vector<1xf32>
    %1294 = vector.shape_cast %1293 : vector<1xf32> to vector<1x1xf32>
    %1295 = vector.broadcast %1294 : vector<1x1xf32> to vector<1x5xf32>
    %1296 = arith.divf %1292, %1295 : vector<1x5xf32>
    %1297 = vector.extract_strided_slice %1263 {offsets = [0, 8], sizes = [5, 8], strides = [1, 1]} : vector<5x32xf32> to vector<5x8xf32>
    %cst_608 = arith.constant dense<0.000000e+00> : vector<1x8xf32>
    %1298 = tpu.matmul %1296, %1297, %cst_608 {dimension_numbers = #tpu.dot_dimension_numbers<[1], [0], [0], [1], [0, 0, 1, 1], [], []>} : vector<1x5xf32>, vector<5x8xf32>, vector<1x8xf32> -> vector<1x8xf32>
    %1299 = vector.extract_strided_slice %1264 {offsets = [8, 0], sizes = [8, 32], strides = [1, 1]} : vector<32x32xf32> to vector<8x32xf32>
    %cst_609 = arith.constant dense<0.000000e+00> : vector<1x32xf32>
    %1300 = tpu.matmul %1298, %1299, %cst_609 {dimension_numbers = #tpu.dot_dimension_numbers<[1], [0], [0], [1], [0, 0, 1, 1], [], []>} : vector<1x8xf32>, vector<8x32xf32>, vector<1x32xf32> -> vector<1x32xf32>
    %1301 = arith.addf %1282, %1300 : vector<1x32xf32>
    %1302 = vector.extract_strided_slice %1261 {offsets = [0, 16], sizes = [1, 8], strides = [1, 1]} : vector<1x32xf32> to vector<1x8xf32>
    %1303 = vector.extract_strided_slice %1262 {offsets = [0, 16], sizes = [5, 8], strides = [1, 1]} : vector<5x32xf32> to vector<5x8xf32>
    %cst_610 = arith.constant dense<0.000000e+00> : vector<1x5xf32>
    %1304 = tpu.matmul %1302, %1303, %cst_610 {dimension_numbers = #tpu.dot_dimension_numbers<[1], [1], [0], [0], [0, 0, 1, 0], [], []>} : vector<1x8xf32>, vector<5x8xf32>, vector<1x5xf32> -> vector<1x5xf32>
    %cst_611 = arith.constant 0.353553385 : f32
    %1305 = vector.broadcast %cst_611 : f32 to vector<1x5xf32>
    %1306 = arith.mulf %1304, %1305 : vector<1x5xf32>
    %cst_612 = arith.constant dense<0xFF800000> : vector<1xf32>
    %1307 = vector.multi_reduction <maximumf>, %1306, %cst_612 [1] : vector<1x5xf32> to vector<1xf32>
    %1308 = vector.shape_cast %1307 : vector<1xf32> to vector<1x1xf32>
    %1309 = vector.broadcast %1308 : vector<1x1xf32> to vector<1x5xf32>
    %1310 = arith.subf %1306, %1309 : vector<1x5xf32>
    %1311 = math.exp %1310 : vector<1x5xf32>
    %cst_613 = arith.constant dense<0.000000e+00> : vector<1xf32>
    %1312 = vector.multi_reduction <add>, %1311, %cst_613 [1] : vector<1x5xf32> to vector<1xf32>
    %1313 = vector.shape_cast %1312 : vector<1xf32> to vector<1x1xf32>
    %1314 = vector.broadcast %1313 : vector<1x1xf32> to vector<1x5xf32>
    %1315 = arith.divf %1311, %1314 : vector<1x5xf32>
    %1316 = vector.extract_strided_slice %1263 {offsets = [0, 16], sizes = [5, 8], strides = [1, 1]} : vector<5x32xf32> to vector<5x8xf32>
    %cst_614 = arith.constant dense<0.000000e+00> : vector<1x8xf32>
    %1317 = tpu.matmul %1315, %1316, %cst_614 {dimension_numbers = #tpu.dot_dimension_numbers<[1], [0], [0], [1], [0, 0, 1, 1], [], []>} : vector<1x5xf32>, vector<5x8xf32>, vector<1x8xf32> -> vector<1x8xf32>
    %1318 = vector.extract_strided_slice %1264 {offsets = [16, 0], sizes = [8, 32], strides = [1, 1]} : vector<32x32xf32> to vector<8x32xf32>
    %cst_615 = arith.constant dense<0.000000e+00> : vector<1x32xf32>
    %1319 = tpu.matmul %1317, %1318, %cst_615 {dimension_numbers = #tpu.dot_dimension_numbers<[1], [0], [0], [1], [0, 0, 1, 1], [], []>} : vector<1x8xf32>, vector<8x32xf32>, vector<1x32xf32> -> vector<1x32xf32>
    %1320 = arith.addf %1301, %1319 : vector<1x32xf32>
    %1321 = vector.extract_strided_slice %1261 {offsets = [0, 24], sizes = [1, 8], strides = [1, 1]} : vector<1x32xf32> to vector<1x8xf32>
    %1322 = vector.extract_strided_slice %1262 {offsets = [0, 24], sizes = [5, 8], strides = [1, 1]} : vector<5x32xf32> to vector<5x8xf32>
    %cst_616 = arith.constant dense<0.000000e+00> : vector<1x5xf32>
    %1323 = tpu.matmul %1321, %1322, %cst_616 {dimension_numbers = #tpu.dot_dimension_numbers<[1], [1], [0], [0], [0, 0, 1, 0], [], []>} : vector<1x8xf32>, vector<5x8xf32>, vector<1x5xf32> -> vector<1x5xf32>
    %cst_617 = arith.constant 0.353553385 : f32
    %1324 = vector.broadcast %cst_617 : f32 to vector<1x5xf32>
    %1325 = arith.mulf %1323, %1324 : vector<1x5xf32>
    %cst_618 = arith.constant dense<0xFF800000> : vector<1xf32>
    %1326 = vector.multi_reduction <maximumf>, %1325, %cst_618 [1] : vector<1x5xf32> to vector<1xf32>
    %1327 = vector.shape_cast %1326 : vector<1xf32> to vector<1x1xf32>
    %1328 = vector.broadcast %1327 : vector<1x1xf32> to vector<1x5xf32>
    %1329 = arith.subf %1325, %1328 : vector<1x5xf32>
    %1330 = math.exp %1329 : vector<1x5xf32>
    %cst_619 = arith.constant dense<0.000000e+00> : vector<1xf32>
    %1331 = vector.multi_reduction <add>, %1330, %cst_619 [1] : vector<1x5xf32> to vector<1xf32>
    %1332 = vector.shape_cast %1331 : vector<1xf32> to vector<1x1xf32>
    %1333 = vector.broadcast %1332 : vector<1x1xf32> to vector<1x5xf32>
    %1334 = arith.divf %1330, %1333 : vector<1x5xf32>
    %1335 = vector.extract_strided_slice %1263 {offsets = [0, 24], sizes = [5, 8], strides = [1, 1]} : vector<5x32xf32> to vector<5x8xf32>
    %cst_620 = arith.constant dense<0.000000e+00> : vector<1x8xf32>
    %1336 = tpu.matmul %1334, %1335, %cst_620 {dimension_numbers = #tpu.dot_dimension_numbers<[1], [0], [0], [1], [0, 0, 1, 1], [], []>} : vector<1x5xf32>, vector<5x8xf32>, vector<1x8xf32> -> vector<1x8xf32>
    %1337 = vector.extract_strided_slice %1264 {offsets = [24, 0], sizes = [8, 32], strides = [1, 1]} : vector<32x32xf32> to vector<8x32xf32>
    %cst_621 = arith.constant dense<0.000000e+00> : vector<1x32xf32>
    %1338 = tpu.matmul %1336, %1337, %cst_621 {dimension_numbers = #tpu.dot_dimension_numbers<[1], [0], [0], [1], [0, 0, 1, 1], [], []>} : vector<1x8xf32>, vector<8x32xf32>, vector<1x32xf32> -> vector<1x32xf32>
    %1339 = arith.addf %1320, %1338 : vector<1x32xf32>
    %c0_622 = arith.constant 0 : index
    %c0_623 = arith.constant 0 : index
    %1340 = vector.load %arg23[%c0_622, %c0_623] : memref<1x32xf32, #tpu.memory_space<vmem>>, vector<1x32xf32>
    %1341 = arith.addf %1339, %1340 : vector<1x32xf32>
    %1342 = arith.addf %1252, %1341 : vector<1x32xf32>
    %c0_624 = arith.constant 0 : index
    %c0_625 = arith.constant 0 : index
    %1343 = vector.load %arg24[%c0_624, %c0_625] : memref<1x32xf32, #tpu.memory_space<vmem>>, vector<1x32xf32>
    %c0_626 = arith.constant 0 : index
    %c0_627 = arith.constant 0 : index
    %1344 = vector.load %arg25[%c0_626, %c0_627] : memref<1x32xf32, #tpu.memory_space<vmem>>, vector<1x32xf32>
    %cst_628 = arith.constant dense<0.000000e+00> : vector<1xf32>
    %1345 = vector.multi_reduction <add>, %1342, %cst_628 [1] : vector<1x32xf32> to vector<1xf32>
    %1346 = vector.shape_cast %1345 : vector<1xf32> to vector<1x1xf32>
    %cst_629 = arith.constant 3.200000e+01 : f32
    %1347 = vector.broadcast %cst_629 : f32 to vector<1x1xf32>
    %1348 = arith.divf %1346, %1347 : vector<1x1xf32>
    %1349 = vector.broadcast %1348 : vector<1x1xf32> to vector<1x32xf32>
    %1350 = arith.subf %1342, %1349 : vector<1x32xf32>
    %1351 = arith.mulf %1350, %1350 : vector<1x32xf32>
    %cst_630 = arith.constant dense<0.000000e+00> : vector<1xf32>
    %1352 = vector.multi_reduction <add>, %1351, %cst_630 [1] : vector<1x32xf32> to vector<1xf32>
    %1353 = vector.shape_cast %1352 : vector<1xf32> to vector<1x1xf32>
    %cst_631 = arith.constant 3.200000e+01 : f32
    %1354 = vector.broadcast %cst_631 : f32 to vector<1x1xf32>
    %1355 = arith.divf %1353, %1354 : vector<1x1xf32>
    %1356 = vector.broadcast %1348 : vector<1x1xf32> to vector<1x32xf32>
    %1357 = arith.subf %1342, %1356 : vector<1x32xf32>
    %cst_632 = arith.constant 9.99999974E-6 : f32
    %1358 = vector.broadcast %cst_632 : f32 to vector<1x1xf32>
    %1359 = arith.addf %1355, %1358 : vector<1x1xf32>
    %1360 = math.rsqrt %1359 : vector<1x1xf32>
    %1361 = vector.broadcast %1360 : vector<1x1xf32> to vector<1x32xf32>
    %1362 = arith.mulf %1357, %1361 : vector<1x32xf32>
    %1363 = arith.mulf %1362, %1343 : vector<1x32xf32>
    %1364 = arith.addf %1363, %1344 : vector<1x32xf32>
    %c0_633 = arith.constant 0 : index
    %c0_634 = arith.constant 0 : index
    %1365 = vector.load %arg26[%c0_633, %c0_634] : memref<32x32xf32, #tpu.memory_space<vmem>>, vector<32x32xf32>
    %cst_635 = arith.constant dense<0.000000e+00> : vector<1x32xf32>
    %1366 = tpu.matmul %1364, %1365, %cst_635 {dimension_numbers = #tpu.dot_dimension_numbers<[1], [0], [0], [1], [0, 0, 1, 1], [], []>} : vector<1x32xf32>, vector<32x32xf32>, vector<1x32xf32> -> vector<1x32xf32>
    %c0_636 = arith.constant 0 : index
    %c0_637 = arith.constant 0 : index
    %1367 = vector.load %arg27[%c0_636, %c0_637] : memref<1x32xf32, #tpu.memory_space<vmem>>, vector<1x32xf32>
    %1368 = arith.addf %1366, %1367 : vector<1x32xf32>
    %c0_638 = arith.constant 0 : index
    %c0_639 = arith.constant 0 : index
    %1369 = vector.load %arg30[%c0_638, %c0_639] : memref<32x32xf32, #tpu.memory_space<vmem>>, vector<32x32xf32>
    %1370 = vector.extract_strided_slice %1368 {offsets = [0, 0], sizes = [1, 8], strides = [1, 1]} : vector<1x32xf32> to vector<1x8xf32>
    %1371 = vector.extract_strided_slice %166 {offsets = [0, 0], sizes = [15, 8], strides = [1, 1]} : vector<15x32xf32> to vector<15x8xf32>
    %cst_640 = arith.constant dense<0.000000e+00> : vector<1x15xf32>
    %1372 = tpu.matmul %1370, %1371, %cst_640 {dimension_numbers = #tpu.dot_dimension_numbers<[1], [1], [0], [0], [0, 0, 1, 0], [], []>} : vector<1x8xf32>, vector<15x8xf32>, vector<1x15xf32> -> vector<1x15xf32>
    %cst_641 = arith.constant 0.353553385 : f32
    %1373 = vector.broadcast %cst_641 : f32 to vector<1x15xf32>
    %1374 = arith.mulf %1372, %1373 : vector<1x15xf32>
    %cst_642 = arith.constant dense<0xFF800000> : vector<1xf32>
    %1375 = vector.multi_reduction <maximumf>, %1374, %cst_642 [1] : vector<1x15xf32> to vector<1xf32>
    %1376 = vector.shape_cast %1375 : vector<1xf32> to vector<1x1xf32>
    %1377 = vector.broadcast %1376 : vector<1x1xf32> to vector<1x15xf32>
    %1378 = arith.subf %1374, %1377 : vector<1x15xf32>
    %1379 = math.exp %1378 : vector<1x15xf32>
    %cst_643 = arith.constant dense<0.000000e+00> : vector<1xf32>
    %1380 = vector.multi_reduction <add>, %1379, %cst_643 [1] : vector<1x15xf32> to vector<1xf32>
    %1381 = vector.shape_cast %1380 : vector<1xf32> to vector<1x1xf32>
    %1382 = vector.broadcast %1381 : vector<1x1xf32> to vector<1x15xf32>
    %1383 = arith.divf %1379, %1382 : vector<1x15xf32>
    %1384 = vector.extract_strided_slice %167 {offsets = [0, 0], sizes = [15, 8], strides = [1, 1]} : vector<15x32xf32> to vector<15x8xf32>
    %cst_644 = arith.constant dense<0.000000e+00> : vector<1x8xf32>
    %1385 = tpu.matmul %1383, %1384, %cst_644 {dimension_numbers = #tpu.dot_dimension_numbers<[1], [0], [0], [1], [0, 0, 1, 1], [], []>} : vector<1x15xf32>, vector<15x8xf32>, vector<1x8xf32> -> vector<1x8xf32>
    %1386 = vector.extract_strided_slice %1369 {offsets = [0, 0], sizes = [8, 32], strides = [1, 1]} : vector<32x32xf32> to vector<8x32xf32>
    %cst_645 = arith.constant dense<0.000000e+00> : vector<1x32xf32>
    %1387 = tpu.matmul %1385, %1386, %cst_645 {dimension_numbers = #tpu.dot_dimension_numbers<[1], [0], [0], [1], [0, 0, 1, 1], [], []>} : vector<1x8xf32>, vector<8x32xf32>, vector<1x32xf32> -> vector<1x32xf32>
    %1388 = vector.extract_strided_slice %1368 {offsets = [0, 8], sizes = [1, 8], strides = [1, 1]} : vector<1x32xf32> to vector<1x8xf32>
    %1389 = vector.extract_strided_slice %166 {offsets = [0, 8], sizes = [15, 8], strides = [1, 1]} : vector<15x32xf32> to vector<15x8xf32>
    %cst_646 = arith.constant dense<0.000000e+00> : vector<1x15xf32>
    %1390 = tpu.matmul %1388, %1389, %cst_646 {dimension_numbers = #tpu.dot_dimension_numbers<[1], [1], [0], [0], [0, 0, 1, 0], [], []>} : vector<1x8xf32>, vector<15x8xf32>, vector<1x15xf32> -> vector<1x15xf32>
    %cst_647 = arith.constant 0.353553385 : f32
    %1391 = vector.broadcast %cst_647 : f32 to vector<1x15xf32>
    %1392 = arith.mulf %1390, %1391 : vector<1x15xf32>
    %cst_648 = arith.constant dense<0xFF800000> : vector<1xf32>
    %1393 = vector.multi_reduction <maximumf>, %1392, %cst_648 [1] : vector<1x15xf32> to vector<1xf32>
    %1394 = vector.shape_cast %1393 : vector<1xf32> to vector<1x1xf32>
    %1395 = vector.broadcast %1394 : vector<1x1xf32> to vector<1x15xf32>
    %1396 = arith.subf %1392, %1395 : vector<1x15xf32>
    %1397 = math.exp %1396 : vector<1x15xf32>
    %cst_649 = arith.constant dense<0.000000e+00> : vector<1xf32>
    %1398 = vector.multi_reduction <add>, %1397, %cst_649 [1] : vector<1x15xf32> to vector<1xf32>
    %1399 = vector.shape_cast %1398 : vector<1xf32> to vector<1x1xf32>
    %1400 = vector.broadcast %1399 : vector<1x1xf32> to vector<1x15xf32>
    %1401 = arith.divf %1397, %1400 : vector<1x15xf32>
    %1402 = vector.extract_strided_slice %167 {offsets = [0, 8], sizes = [15, 8], strides = [1, 1]} : vector<15x32xf32> to vector<15x8xf32>
    %cst_650 = arith.constant dense<0.000000e+00> : vector<1x8xf32>
    %1403 = tpu.matmul %1401, %1402, %cst_650 {dimension_numbers = #tpu.dot_dimension_numbers<[1], [0], [0], [1], [0, 0, 1, 1], [], []>} : vector<1x15xf32>, vector<15x8xf32>, vector<1x8xf32> -> vector<1x8xf32>
    %1404 = vector.extract_strided_slice %1369 {offsets = [8, 0], sizes = [8, 32], strides = [1, 1]} : vector<32x32xf32> to vector<8x32xf32>
    %cst_651 = arith.constant dense<0.000000e+00> : vector<1x32xf32>
    %1405 = tpu.matmul %1403, %1404, %cst_651 {dimension_numbers = #tpu.dot_dimension_numbers<[1], [0], [0], [1], [0, 0, 1, 1], [], []>} : vector<1x8xf32>, vector<8x32xf32>, vector<1x32xf32> -> vector<1x32xf32>
    %1406 = arith.addf %1387, %1405 : vector<1x32xf32>
    %1407 = vector.extract_strided_slice %1368 {offsets = [0, 16], sizes = [1, 8], strides = [1, 1]} : vector<1x32xf32> to vector<1x8xf32>
    %1408 = vector.extract_strided_slice %166 {offsets = [0, 16], sizes = [15, 8], strides = [1, 1]} : vector<15x32xf32> to vector<15x8xf32>
    %cst_652 = arith.constant dense<0.000000e+00> : vector<1x15xf32>
    %1409 = tpu.matmul %1407, %1408, %cst_652 {dimension_numbers = #tpu.dot_dimension_numbers<[1], [1], [0], [0], [0, 0, 1, 0], [], []>} : vector<1x8xf32>, vector<15x8xf32>, vector<1x15xf32> -> vector<1x15xf32>
    %cst_653 = arith.constant 0.353553385 : f32
    %1410 = vector.broadcast %cst_653 : f32 to vector<1x15xf32>
    %1411 = arith.mulf %1409, %1410 : vector<1x15xf32>
    %cst_654 = arith.constant dense<0xFF800000> : vector<1xf32>
    %1412 = vector.multi_reduction <maximumf>, %1411, %cst_654 [1] : vector<1x15xf32> to vector<1xf32>
    %1413 = vector.shape_cast %1412 : vector<1xf32> to vector<1x1xf32>
    %1414 = vector.broadcast %1413 : vector<1x1xf32> to vector<1x15xf32>
    %1415 = arith.subf %1411, %1414 : vector<1x15xf32>
    %1416 = math.exp %1415 : vector<1x15xf32>
    %cst_655 = arith.constant dense<0.000000e+00> : vector<1xf32>
    %1417 = vector.multi_reduction <add>, %1416, %cst_655 [1] : vector<1x15xf32> to vector<1xf32>
    %1418 = vector.shape_cast %1417 : vector<1xf32> to vector<1x1xf32>
    %1419 = vector.broadcast %1418 : vector<1x1xf32> to vector<1x15xf32>
    %1420 = arith.divf %1416, %1419 : vector<1x15xf32>
    %1421 = vector.extract_strided_slice %167 {offsets = [0, 16], sizes = [15, 8], strides = [1, 1]} : vector<15x32xf32> to vector<15x8xf32>
    %cst_656 = arith.constant dense<0.000000e+00> : vector<1x8xf32>
    %1422 = tpu.matmul %1420, %1421, %cst_656 {dimension_numbers = #tpu.dot_dimension_numbers<[1], [0], [0], [1], [0, 0, 1, 1], [], []>} : vector<1x15xf32>, vector<15x8xf32>, vector<1x8xf32> -> vector<1x8xf32>
    %1423 = vector.extract_strided_slice %1369 {offsets = [16, 0], sizes = [8, 32], strides = [1, 1]} : vector<32x32xf32> to vector<8x32xf32>
    %cst_657 = arith.constant dense<0.000000e+00> : vector<1x32xf32>
    %1424 = tpu.matmul %1422, %1423, %cst_657 {dimension_numbers = #tpu.dot_dimension_numbers<[1], [0], [0], [1], [0, 0, 1, 1], [], []>} : vector<1x8xf32>, vector<8x32xf32>, vector<1x32xf32> -> vector<1x32xf32>
    %1425 = arith.addf %1406, %1424 : vector<1x32xf32>
    %1426 = vector.extract_strided_slice %1368 {offsets = [0, 24], sizes = [1, 8], strides = [1, 1]} : vector<1x32xf32> to vector<1x8xf32>
    %1427 = vector.extract_strided_slice %166 {offsets = [0, 24], sizes = [15, 8], strides = [1, 1]} : vector<15x32xf32> to vector<15x8xf32>
    %cst_658 = arith.constant dense<0.000000e+00> : vector<1x15xf32>
    %1428 = tpu.matmul %1426, %1427, %cst_658 {dimension_numbers = #tpu.dot_dimension_numbers<[1], [1], [0], [0], [0, 0, 1, 0], [], []>} : vector<1x8xf32>, vector<15x8xf32>, vector<1x15xf32> -> vector<1x15xf32>
    %cst_659 = arith.constant 0.353553385 : f32
    %1429 = vector.broadcast %cst_659 : f32 to vector<1x15xf32>
    %1430 = arith.mulf %1428, %1429 : vector<1x15xf32>
    %cst_660 = arith.constant dense<0xFF800000> : vector<1xf32>
    %1431 = vector.multi_reduction <maximumf>, %1430, %cst_660 [1] : vector<1x15xf32> to vector<1xf32>
    %1432 = vector.shape_cast %1431 : vector<1xf32> to vector<1x1xf32>
    %1433 = vector.broadcast %1432 : vector<1x1xf32> to vector<1x15xf32>
    %1434 = arith.subf %1430, %1433 : vector<1x15xf32>
    %1435 = math.exp %1434 : vector<1x15xf32>
    %cst_661 = arith.constant dense<0.000000e+00> : vector<1xf32>
    %1436 = vector.multi_reduction <add>, %1435, %cst_661 [1] : vector<1x15xf32> to vector<1xf32>
    %1437 = vector.shape_cast %1436 : vector<1xf32> to vector<1x1xf32>
    %1438 = vector.broadcast %1437 : vector<1x1xf32> to vector<1x15xf32>
    %1439 = arith.divf %1435, %1438 : vector<1x15xf32>
    %1440 = vector.extract_strided_slice %167 {offsets = [0, 24], sizes = [15, 8], strides = [1, 1]} : vector<15x32xf32> to vector<15x8xf32>
    %cst_662 = arith.constant dense<0.000000e+00> : vector<1x8xf32>
    %1441 = tpu.matmul %1439, %1440, %cst_662 {dimension_numbers = #tpu.dot_dimension_numbers<[1], [0], [0], [1], [0, 0, 1, 1], [], []>} : vector<1x15xf32>, vector<15x8xf32>, vector<1x8xf32> -> vector<1x8xf32>
    %1442 = vector.extract_strided_slice %1369 {offsets = [24, 0], sizes = [8, 32], strides = [1, 1]} : vector<32x32xf32> to vector<8x32xf32>
    %cst_663 = arith.constant dense<0.000000e+00> : vector<1x32xf32>
    %1443 = tpu.matmul %1441, %1442, %cst_663 {dimension_numbers = #tpu.dot_dimension_numbers<[1], [0], [0], [1], [0, 0, 1, 1], [], []>} : vector<1x8xf32>, vector<8x32xf32>, vector<1x32xf32> -> vector<1x32xf32>
    %1444 = arith.addf %1425, %1443 : vector<1x32xf32>
    %c0_664 = arith.constant 0 : index
    %c0_665 = arith.constant 0 : index
    %1445 = vector.load %arg31[%c0_664, %c0_665] : memref<1x32xf32, #tpu.memory_space<vmem>>, vector<1x32xf32>
    %1446 = arith.addf %1444, %1445 : vector<1x32xf32>
    %1447 = arith.addf %1364, %1446 : vector<1x32xf32>
    %c0_666 = arith.constant 0 : index
    %c0_667 = arith.constant 0 : index
    %1448 = vector.load %arg32[%c0_666, %c0_667] : memref<1x32xf32, #tpu.memory_space<vmem>>, vector<1x32xf32>
    %c0_668 = arith.constant 0 : index
    %c0_669 = arith.constant 0 : index
    %1449 = vector.load %arg33[%c0_668, %c0_669] : memref<1x32xf32, #tpu.memory_space<vmem>>, vector<1x32xf32>
    %cst_670 = arith.constant dense<0.000000e+00> : vector<1xf32>
    %1450 = vector.multi_reduction <add>, %1447, %cst_670 [1] : vector<1x32xf32> to vector<1xf32>
    %1451 = vector.shape_cast %1450 : vector<1xf32> to vector<1x1xf32>
    %cst_671 = arith.constant 3.200000e+01 : f32
    %1452 = vector.broadcast %cst_671 : f32 to vector<1x1xf32>
    %1453 = arith.divf %1451, %1452 : vector<1x1xf32>
    %1454 = vector.broadcast %1453 : vector<1x1xf32> to vector<1x32xf32>
    %1455 = arith.subf %1447, %1454 : vector<1x32xf32>
    %1456 = arith.mulf %1455, %1455 : vector<1x32xf32>
    %cst_672 = arith.constant dense<0.000000e+00> : vector<1xf32>
    %1457 = vector.multi_reduction <add>, %1456, %cst_672 [1] : vector<1x32xf32> to vector<1xf32>
    %1458 = vector.shape_cast %1457 : vector<1xf32> to vector<1x1xf32>
    %cst_673 = arith.constant 3.200000e+01 : f32
    %1459 = vector.broadcast %cst_673 : f32 to vector<1x1xf32>
    %1460 = arith.divf %1458, %1459 : vector<1x1xf32>
    %1461 = vector.broadcast %1453 : vector<1x1xf32> to vector<1x32xf32>
    %1462 = arith.subf %1447, %1461 : vector<1x32xf32>
    %cst_674 = arith.constant 9.99999974E-6 : f32
    %1463 = vector.broadcast %cst_674 : f32 to vector<1x1xf32>
    %1464 = arith.addf %1460, %1463 : vector<1x1xf32>
    %1465 = math.rsqrt %1464 : vector<1x1xf32>
    %1466 = vector.broadcast %1465 : vector<1x1xf32> to vector<1x32xf32>
    %1467 = arith.mulf %1462, %1466 : vector<1x32xf32>
    %1468 = arith.mulf %1467, %1448 : vector<1x32xf32>
    %1469 = arith.addf %1468, %1449 : vector<1x32xf32>
    %c0_675 = arith.constant 0 : index
    %c0_676 = arith.constant 0 : index
    %1470 = vector.load %arg34[%c0_675, %c0_676] : memref<32x64xf32, #tpu.memory_space<vmem>>, vector<32x64xf32>
    %cst_677 = arith.constant dense<0.000000e+00> : vector<1x64xf32>
    %1471 = tpu.matmul %1469, %1470, %cst_677 {dimension_numbers = #tpu.dot_dimension_numbers<[1], [0], [0], [1], [0, 0, 1, 1], [], []>} : vector<1x32xf32>, vector<32x64xf32>, vector<1x64xf32> -> vector<1x64xf32>
    %c0_678 = arith.constant 0 : index
    %c0_679 = arith.constant 0 : index
    %1472 = vector.load %arg35[%c0_678, %c0_679] : memref<1x64xf32, #tpu.memory_space<vmem>>, vector<1x64xf32>
    %1473 = arith.addf %1471, %1472 : vector<1x64xf32>
    %cst_680 = arith.constant 0.000000e+00 : f32
    %1474 = vector.broadcast %cst_680 : f32 to vector<1x64xf32>
    %1475 = arith.maximumf %1473, %1474 : vector<1x64xf32>
    %c0_681 = arith.constant 0 : index
    %c0_682 = arith.constant 0 : index
    %1476 = vector.load %arg36[%c0_681, %c0_682] : memref<64x32xf32, #tpu.memory_space<vmem>>, vector<64x32xf32>
    %cst_683 = arith.constant dense<0.000000e+00> : vector<1x32xf32>
    %1477 = tpu.matmul %1475, %1476, %cst_683 {dimension_numbers = #tpu.dot_dimension_numbers<[1], [0], [0], [1], [0, 0, 1, 1], [], []>} : vector<1x64xf32>, vector<64x32xf32>, vector<1x32xf32> -> vector<1x32xf32>
    %c0_684 = arith.constant 0 : index
    %c0_685 = arith.constant 0 : index
    %1478 = vector.load %arg37[%c0_684, %c0_685] : memref<1x32xf32, #tpu.memory_space<vmem>>, vector<1x32xf32>
    %1479 = arith.addf %1477, %1478 : vector<1x32xf32>
    %1480 = arith.addf %1469, %1479 : vector<1x32xf32>
    %c0_686 = arith.constant 0 : index
    %c0_687 = arith.constant 0 : index
    %1481 = vector.load %arg38[%c0_686, %c0_687] : memref<1x32xf32, #tpu.memory_space<vmem>>, vector<1x32xf32>
    %c0_688 = arith.constant 0 : index
    %c0_689 = arith.constant 0 : index
    %1482 = vector.load %arg39[%c0_688, %c0_689] : memref<1x32xf32, #tpu.memory_space<vmem>>, vector<1x32xf32>
    %cst_690 = arith.constant dense<0.000000e+00> : vector<1xf32>
    %1483 = vector.multi_reduction <add>, %1480, %cst_690 [1] : vector<1x32xf32> to vector<1xf32>
    %1484 = vector.shape_cast %1483 : vector<1xf32> to vector<1x1xf32>
    %cst_691 = arith.constant 3.200000e+01 : f32
    %1485 = vector.broadcast %cst_691 : f32 to vector<1x1xf32>
    %1486 = arith.divf %1484, %1485 : vector<1x1xf32>
    %1487 = vector.broadcast %1486 : vector<1x1xf32> to vector<1x32xf32>
    %1488 = arith.subf %1480, %1487 : vector<1x32xf32>
    %1489 = arith.mulf %1488, %1488 : vector<1x32xf32>
    %cst_692 = arith.constant dense<0.000000e+00> : vector<1xf32>
    %1490 = vector.multi_reduction <add>, %1489, %cst_692 [1] : vector<1x32xf32> to vector<1xf32>
    %1491 = vector.shape_cast %1490 : vector<1xf32> to vector<1x1xf32>
    %cst_693 = arith.constant 3.200000e+01 : f32
    %1492 = vector.broadcast %cst_693 : f32 to vector<1x1xf32>
    %1493 = arith.divf %1491, %1492 : vector<1x1xf32>
    %1494 = vector.broadcast %1486 : vector<1x1xf32> to vector<1x32xf32>
    %1495 = arith.subf %1480, %1494 : vector<1x32xf32>
    %cst_694 = arith.constant 9.99999974E-6 : f32
    %1496 = vector.broadcast %cst_694 : f32 to vector<1x1xf32>
    %1497 = arith.addf %1493, %1496 : vector<1x1xf32>
    %1498 = math.rsqrt %1497 : vector<1x1xf32>
    %1499 = vector.broadcast %1498 : vector<1x1xf32> to vector<1x32xf32>
    %1500 = arith.mulf %1495, %1499 : vector<1x32xf32>
    %1501 = arith.mulf %1500, %1481 : vector<1x32xf32>
    %1502 = arith.addf %1501, %1482 : vector<1x32xf32>
    %c0_695 = arith.constant 0 : index
    %c0_696 = arith.constant 0 : index
    %1503 = vector.load %arg40[%c0_695, %c0_696] : memref<32x128xf32, #tpu.memory_space<vmem>>, vector<32x128xf32>
    %cst_697 = arith.constant dense<0.000000e+00> : vector<1x128xf32>
    %1504 = tpu.matmul %1502, %1503, %cst_697 {dimension_numbers = #tpu.dot_dimension_numbers<[1], [0], [0], [1], [0, 0, 1, 1], [], []>} : vector<1x32xf32>, vector<32x128xf32>, vector<1x128xf32> -> vector<1x128xf32>
    %c0_698 = arith.constant 0 : index
    %c0_699 = arith.constant 0 : index
    %1505 = vector.load %arg41[%c0_698, %c0_699] : memref<1x128xf32, #tpu.memory_space<vmem>>, vector<1x128xf32>
    %1506 = arith.addf %1504, %1505 : vector<1x128xf32>
    %1507 = vector.shape_cast %1506 : vector<1x128xf32> to vector<1x1x128xf32>
    %c0_700 = arith.constant 0 : index
    %c4_701 = arith.constant 4 : index
    %c0_702 = arith.constant 0 : index
    %1508 = vector.load %arg42[%c0_700, %c4_701, %c0_702] : memref<1x5x128xf32, #tpu.memory_space<vmem>>, vector<1x1x128xf32>
    tpu.vector_store %arg42[%c0_700, %c4_701, %c0_702], %1507 {strides = array<i32>} : memref<1x5x128xf32, #tpu.memory_space<vmem>>, vector<1x1x128xf32>,
    return
  }
  func.func @transform_0(%arg0: i32) -> (i32, i32, i32) {
    %c0_i32 = arith.constant 0 : i32
    %c0_i32_0 = arith.constant 0 : i32
    %c0_i32_1 = arith.constant 0 : i32
    return %arg0, %c0_i32, %c0_i32_0 : i32, i32, i32
  }
  func.func @transform_1(%arg0: i32) -> (i32, i32, i32) {
    %c0_i32 = arith.constant 0 : i32
    %c0_i32_0 = arith.constant 0 : i32
    %c0_i32_1 = arith.constant 0 : i32
    return %arg0, %c0_i32, %c0_i32_0 : i32, i32, i32
  }
  func.func @transform_2(%arg0: i32) -> (i32, i32) {
    %c0_i32 = arith.constant 0 : i32
    %c0_i32_0 = arith.constant 0 : i32
    %c0_i32_1 = arith.constant 0 : i32
    return %c0_i32, %c0_i32_0 : i32, i32
  }
  func.func @transform_3(%arg0: i32) -> (i32, i32) {
    %c0_i32 = arith.constant 0 : i32
    %c0_i32_0 = arith.constant 0 : i32
    %c0_i32_1 = arith.constant 0 : i32
    return %c0_i32, %c0_i32_0 : i32, i32
  }
  func.func @transform_4(%arg0: i32) -> (i32, i32) {
    %c0_i32 = arith.constant 0 : i32
    %c0_i32_0 = arith.constant 0 : i32
    %c0_i32_1 = arith.constant 0 : i32
    return %c0_i32, %c0_i32_0 : i32, i32
  }
  func.func @transform_5(%arg0: i32) -> (i32, i32) {
    %c0_i32 = arith.constant 0 : i32
    %c0_i32_0 = arith.constant 0 : i32
    %c0_i32_1 = arith.constant 0 : i32
    return %c0_i32, %c0_i32_0 : i32, i32
  }
  func.func @transform_6(%arg0: i32) -> (i32, i32) {
    %c0_i32 = arith.constant 0 : i32
    %c0_i32_0 = arith.constant 0 : i32
    %c0_i32_1 = arith.constant 0 : i32
    return %c0_i32, %c0_i32_0 : i32, i32
  }
  func.func @transform_7(%arg0: i32) -> (i32, i32) {
    %c0_i32 = arith.constant 0 : i32
    %c0_i32_0 = arith.constant 0 : i32
    %c0_i32_1 = arith.constant 0 : i32
    return %c0_i32, %c0_i32_0 : i32, i32
  }
  func.func @transform_8(%arg0: i32) -> (i32, i32) {
    %c0_i32 = arith.constant 0 : i32
    %c0_i32_0 = arith.constant 0 : i32
    %c0_i32_1 = arith.constant 0 : i32
    return %c0_i32, %c0_i32_0 : i32, i32
  }
  func.func @transform_9(%arg0: i32) -> (i32, i32) {
    %c0_i32 = arith.constant 0 : i32
    %c0_i32_0 = arith.constant 0 : i32
    %c0_i32_1 = arith.constant 0 : i32
    return %c0_i32, %c0_i32_0 : i32, i32
  }
  func.func @transform_10(%arg0: i32) -> (i32, i32) {
    %c0_i32 = arith.constant 0 : i32
    %c0_i32_0 = arith.constant 0 : i32
    %c0_i32_1 = arith.constant 0 : i32
    return %c0_i32, %c0_i32_0 : i32, i32
  }
  func.func @transform_11(%arg0: i32) -> (i32, i32) {
    %c0_i32 = arith.constant 0 : i32
    %c0_i32_0 = arith.constant 0 : i32
    %c0_i32_1 = arith.constant 0 : i32
    return %c0_i32, %c0_i32_0 : i32, i32
  }
  func.func @transform_12(%arg0: i32) -> (i32, i32) {
    %c0_i32 = arith.constant 0 : i32
    %c0_i32_0 = arith.constant 0 : i32
    %c0_i32_1 = arith.constant 0 : i32
    return %c0_i32, %c0_i32_0 : i32, i32
  }
  func.func @transform_13(%arg0: i32) -> (i32, i32) {
    %c0_i32 = arith.constant 0 : i32
    %c0_i32_0 = arith.constant 0 : i32
    %c0_i32_1 = arith.constant 0 : i32
    return %c0_i32, %c0_i32_0 : i32, i32
  }
  func.func @transform_14(%arg0: i32) -> (i32, i32) {
    %c0_i32 = arith.constant 0 : i32
    %c0_i32_0 = arith.constant 0 : i32
    %c0_i32_1 = arith.constant 0 : i32
    return %c0_i32, %c0_i32_0 : i32, i32
  }
  func.func @transform_15(%arg0: i32) -> (i32, i32) {
    %c0_i32 = arith.constant 0 : i32
    %c0_i32_0 = arith.constant 0 : i32
    %c0_i32_1 = arith.constant 0 : i32
    return %c0_i32, %c0_i32_0 : i32, i32
  }
  func.func @transform_16(%arg0: i32) -> (i32, i32) {
    %c0_i32 = arith.constant 0 : i32
    %c0_i32_0 = arith.constant 0 : i32
    %c0_i32_1 = arith.constant 0 : i32
    return %c0_i32, %c0_i32_0 : i32, i32
  }
  func.func @transform_17(%arg0: i32) -> (i32, i32) {
    %c0_i32 = arith.constant 0 : i32
    %c0_i32_0 = arith.constant 0 : i32
    %c0_i32_1 = arith.constant 0 : i32
    return %c0_i32, %c0_i32_0 : i32, i32
  }
  func.func @transform_18(%arg0: i32) -> (i32, i32) {
    %c0_i32 = arith.constant 0 : i32
    %c0_i32_0 = arith.constant 0 : i32
    %c0_i32_1 = arith.constant 0 : i32
    return %c0_i32, %c0_i32_0 : i32, i32
  }
  func.func @transform_19(%arg0: i32) -> (i32, i32) {
    %c0_i32 = arith.constant 0 : i32
    %c0_i32_0 = arith.constant 0 : i32
    %c0_i32_1 = arith.constant 0 : i32
    return %c0_i32, %c0_i32_0 : i32, i32
  }
  func.func @transform_20(%arg0: i32) -> (i32, i32) {
    %c0_i32 = arith.constant 0 : i32
    %c0_i32_0 = arith.constant 0 : i32
    %c0_i32_1 = arith.constant 0 : i32
    return %c0_i32, %c0_i32_0 : i32, i32
  }
  func.func @transform_21(%arg0: i32) -> (i32, i32) {
    %c0_i32 = arith.constant 0 : i32
    %c0_i32_0 = arith.constant 0 : i32
    %c0_i32_1 = arith.constant 0 : i32
    return %c0_i32, %c0_i32_0 : i32, i32
  }
  func.func @transform_22(%arg0: i32) -> (i32, i32) {
    %c0_i32 = arith.constant 0 : i32
    %c0_i32_0 = arith.constant 0 : i32
    %c0_i32_1 = arith.constant 0 : i32
    return %c0_i32, %c0_i32_0 : i32, i32
  }
  func.func @transform_23(%arg0: i32) -> (i32, i32) {
    %c0_i32 = arith.constant 0 : i32
    %c0_i32_0 = arith.constant 0 : i32
    %c0_i32_1 = arith.constant 0 : i32
    return %c0_i32, %c0_i32_0 : i32, i32
  }
  func.func @transform_24(%arg0: i32) -> (i32, i32) {
    %c0_i32 = arith.constant 0 : i32
    %c0_i32_0 = arith.constant 0 : i32
    %c0_i32_1 = arith.constant 0 : i32
    return %c0_i32, %c0_i32_0 : i32, i32
  }
  func.func @transform_25(%arg0: i32) -> (i32, i32) {
    %c0_i32 = arith.constant 0 : i32
    %c0_i32_0 = arith.constant 0 : i32
    %c0_i32_1 = arith.constant 0 : i32
    return %c0_i32, %c0_i32_0 : i32, i32
  }
  func.func @transform_26(%arg0: i32) -> (i32, i32) {
    %c0_i32 = arith.constant 0 : i32
    %c0_i32_0 = arith.constant 0 : i32
    %c0_i32_1 = arith.constant 0 : i32
    return %c0_i32, %c0_i32_0 : i32, i32
  }
  func.func @transform_27(%arg0: i32) -> (i32, i32) {
    %c0_i32 = arith.constant 0 : i32
    %c0_i32_0 = arith.constant 0 : i32
    %c0_i32_1 = arith.constant 0 : i32
    return %c0_i32, %c0_i32_0 : i32, i32
  }
  func.func @transform_28(%arg0: i32) -> (i32, i32) {
    %c0_i32 = arith.constant 0 : i32
    %c0_i32_0 = arith.constant 0 : i32
    %c0_i32_1 = arith.constant 0 : i32
    return %c0_i32, %c0_i32_0 : i32, i32
  }
  func.func @transform_29(%arg0: i32) -> (i32, i32) {
    %c0_i32 = arith.constant 0 : i32
    %c0_i32_0 = arith.constant 0 : i32
    %c0_i32_1 = arith.constant 0 : i32
    return %c0_i32, %c0_i32_0 : i32, i32
  }
  func.func @transform_30(%arg0: i32) -> (i32, i32) {
    %c0_i32 = arith.constant 0 : i32
    %c0_i32_0 = arith.constant 0 : i32
    %c0_i32_1 = arith.constant 0 : i32
    return %c0_i32, %c0_i32_0 : i32, i32
  }
  func.func @transform_31(%arg0: i32) -> (i32, i32) {
    %c0_i32 = arith.constant 0 : i32
    %c0_i32_0 = arith.constant 0 : i32
    %c0_i32_1 = arith.constant 0 : i32
    return %c0_i32, %c0_i32_0 : i32, i32
  }
  func.func @transform_32(%arg0: i32) -> (i32, i32) {
    %c0_i32 = arith.constant 0 : i32
    %c0_i32_0 = arith.constant 0 : i32
    %c0_i32_1 = arith.constant 0 : i32
    return %c0_i32, %c0_i32_0 : i32, i32
  }
  func.func @transform_33(%arg0: i32) -> (i32, i32) {
    %c0_i32 = arith.constant 0 : i32
    %c0_i32_0 = arith.constant 0 : i32
    %c0_i32_1 = arith.constant 0 : i32
    return %c0_i32, %c0_i32_0 : i32, i32
  }
  func.func @transform_34(%arg0: i32) -> (i32, i32) {
    %c0_i32 = arith.constant 0 : i32
    %c0_i32_0 = arith.constant 0 : i32
    %c0_i32_1 = arith.constant 0 : i32
    return %c0_i32, %c0_i32_0 : i32, i32
  }
  func.func @transform_35(%arg0: i32) -> (i32, i32) {
    %c0_i32 = arith.constant 0 : i32
    %c0_i32_0 = arith.constant 0 : i32
    %c0_i32_1 = arith.constant 0 : i32
    return %c0_i32, %c0_i32_0 : i32, i32
  }
  func.func @transform_36(%arg0: i32) -> (i32, i32) {
    %c0_i32 = arith.constant 0 : i32
    %c0_i32_0 = arith.constant 0 : i32
    %c0_i32_1 = arith.constant 0 : i32
    return %c0_i32, %c0_i32_0 : i32, i32
  }
  func.func @transform_37(%arg0: i32) -> (i32, i32) {
    %c0_i32 = arith.constant 0 : i32
    %c0_i32_0 = arith.constant 0 : i32
    %c0_i32_1 = arith.constant 0 : i32
    return %c0_i32, %c0_i32_0 : i32, i32
  }
  func.func @transform_38(%arg0: i32) -> (i32, i32) {
    %c0_i32 = arith.constant 0 : i32
    %c0_i32_0 = arith.constant 0 : i32
    %c0_i32_1 = arith.constant 0 : i32
    return %c0_i32, %c0_i32_0 : i32, i32
  }
  func.func @transform_39(%arg0: i32) -> (i32, i32) {
    %c0_i32 = arith.constant 0 : i32
    %c0_i32_0 = arith.constant 0 : i32
    %c0_i32_1 = arith.constant 0 : i32
    return %c0_i32, %c0_i32_0 : i32, i32
  }
  func.func @transform_40(%arg0: i32) -> (i32, i32) {
    %c0_i32 = arith.constant 0 : i32
    %c0_i32_0 = arith.constant 0 : i32
    %c0_i32_1 = arith.constant 0 : i32
    return %c0_i32, %c0_i32_0 : i32, i32
  }
  func.func @transform_41(%arg0: i32) -> (i32, i32, i32) {
    %c0_i32 = arith.constant 0 : i32
    %c0_i32_0 = arith.constant 0 : i32
    %c0_i32_1 = arith.constant 0 : i32
    return %arg0, %c0_i32, %c0_i32_0 : i32, i32, i32
  }
}

</mosaic_0001>

<bundles_post_ra>
// kernel: vqa_forward.1
= control target key start
LH: loop header
LB: loop body
LE: loop exit
PB: predicated region body
PF: predicated region fallthrough
CT: control target
= control target key end

     0   :  { %s17767_s6 = smov 1   ;;  %s17768_s10 = smov 2   ;;  %s19923_s0 = inlined_call_operand.smem [shape: u32[42], index: -1, kind: input, shape index: {}] }
   0x1   :  { %s17830_s5 = sld [smem:[%s19923_s0]]   ;;  %s17769_s14 = smov 3  }
   0x2   :  { %s17835_s9 = sld [smem:[%s19923_s0 + %s17767_s6]]   ;;  %s17770_s18 = smov 4  }
   0x3   :  { %s17840_s13 = sld [smem:[%s19923_s0 + %s17768_s10]]   ;;  %s17771_s22 = smov 5  }
   0x4   :  { %s17845_s17 = sld [smem:[%s19923_s0 + %s17769_s14]]   ;;  %s17772_s26 = smov 6  }
   0x5   :  { %s17850_s21 = sld [smem:[%s19923_s0 + %s17770_s18]]   ;;  %s17773_s30 = smov 7  }
   0x6   :  { %s17855_s25 = sld [smem:[%s19923_s0 + %s17771_s22]]   ;;  %s17774_s4 = smov 8  }
   0x7   :  { %19968 = sst [smem:[#allocation4_spill]] %s17830_s5  ;;  %s17775_s10 = smov 9  }
   0x8   :  { %19969 = sst [smem:[#allocation5_spill]] %s17835_s9  ;;  %s17776_s15 = smov 10  }
   0x9   :  { %19970 = sst [smem:[#allocation6_spill]] %s17840_s13  ;;  %s17777_s20 = smov 11  }
   0xa   :  { %19971 = sst [smem:[#allocation7_spill]] %s17845_s17  ;;  %s17779_s1 = smov 13  }
   0xb   :  { %19972 = sst [smem:[#allocation8_spill]] %s17850_s21  ;;  %s17780_s7 = smov 14  }
   0xc   :  { %19973 = sst [smem:[#allocation9_spill]] %s17855_s25  ;;  %s17782_s22 = smov 16  }
   0xd   :  { %s17860_s29 = sld [smem:[%s19923_s0 + %s17772_s26]]   ;;  %s17778_s26 = smov 12  }
   0xe   :  { %s17865_s3 = sld [smem:[%s19923_s0 + %s17773_s30]]   ;;  %s17783_s28 = smov 17  }
   0xf   :  { %s17870_s8 = sld [smem:[%s19923_s0 + %s17774_s4]]  }
  0x10   :  { %s17875_s14 = sld [smem:[%s19923_s0 + %s17775_s10]]  }
  0x11   :  { %s17880_s19 = sld [smem:[%s19923_s0 + %s17776_s15]]   ;;  %s17781_s15 = smov 15  }
  0x12   :  { %s17885_s24 = sld [smem:[%s19923_s0 + %s17777_s20]]  }
  0x13   :  { %19974 = sst [smem:[#allocation10_spill]] %s17860_s29 }
  0x14   :  { %19975 = sst [smem:[#allocation11_spill]] %s17865_s3 }
  0x15   :  { %19976 = sst [smem:[#allocation12_spill]] %s17870_s8 }
  0x16   :  { %19977 = sst [smem:[#allocation13_spill]] %s17875_s14 }
  0x17   :  { %19978 = sst [smem:[#allocation14_spill]] %s17880_s19 }
  0x18   :  { %19979 = sst [smem:[#allocation15_spill]] %s17885_s24 }
  0x19   :  { %s17890_s30 = sld [smem:[%s19923_s0 + %s17778_s26]]  }
  0x1a   :  { %s17895_s6 = sld [smem:[%s19923_s0 + %s17779_s1]]  }
  0x1b   :  { %s17900_s12 = sld [smem:[%s19923_s0 + %s17780_s7]]   ;;  %s17784_s7 = smov 18  }
  0x1c   :  { %s17905_s20 = sld [smem:[%s19923_s0 + %s17781_s15]]   ;;  %s17785_s15 = smov 19  }
  0x1d   :  { %s17910_s27 = sld [smem:[%s19923_s0 + %s17782_s22]]   ;;  %s17786_s22 = smov 20  }
  0x1e   :  { %s17915_s4 = sld [smem:[%s19923_s0 + %s17783_s28]]   ;;  %s17787_s28 = smov 21  }
  0x20   :  { %19980 = sst [smem:[#allocation16_spill]] %s17895_s6 }
  0x21   :  { %19981 = sst [smem:[#allocation17_spill]] %s17900_s12 }
  0x22   :  { %19982 = sst [smem:[#allocation18_spill]] %s17905_s20 }
  0x23   :  { %19983 = sst [smem:[#allocation19_spill]] %s17910_s27 }
  0x24   :  { %19984 = sst [smem:[#allocation20_spill]] %s17915_s4 }
  0x25   :  { %s17920_s12 = sld [smem:[%s19923_s0 + %s17784_s7]]   ;;  %s17788_s7 = smov 22  }
  0x26   :  { %s17925_s20 = sld [smem:[%s19923_s0 + %s17785_s15]]   ;;  %s17789_s15 = smov 23  }
  0x27   :  { %s17930_s27 = sld [smem:[%s19923_s0 + %s17786_s22]]   ;;  %s17790_s22 = smov 24  }
  0x28   :  { %s17935_s4 = sld [smem:[%s19923_s0 + %s17787_s28]]   ;;  %s17791_s28 = smov 25  }
  0x2b   :  { %19985 = sst [smem:[#allocation21_spill]] %s17920_s12 }
  0x2c   :  { %19986 = sst [smem:[#allocation22_spill]] %s17925_s20 }
  0x2d   :  { %19987 = sst [smem:[#allocation23_spill]] %s17930_s27 }
  0x2e   :  { %19988 = sst [smem:[#allocation24_spill]] %s17935_s4 }
  0x2f   :  { %s17940_s12 = sld [smem:[%s19923_s0 + %s17788_s7]]   ;;  %s17792_s7 = smov 26  }
  0x30   :  { %s17945_s20 = sld [smem:[%s19923_s0 + %s17789_s15]]   ;;  %s17793_s15 = smov 27  }
  0x31   :  { %s17950_s27 = sld [smem:[%s19923_s0 + %s17790_s22]]   ;;  %s17794_s22 = smov 28  }
  0x32   :  { %s17955_s4 = sld [smem:[%s19923_s0 + %s17791_s28]]   ;;  %s17795_s28 = smov 29  }
  0x35   :  { %19989 = sst [smem:[#allocation25_spill]] %s17940_s12 }
  0x36   :  { %19990 = sst [smem:[#allocation26_spill]] %s17945_s20 }
  0x37   :  { %19991 = sst [smem:[#allocation27_spill]] %s17950_s27 }
  0x38   :  { %19992 = sst [smem:[#allocation28_spill]] %s17955_s4 }
  0x39   :  { %s17960_s12 = sld [smem:[%s19923_s0 + %s17792_s7]]   ;;  %s17796_s7 = smov 30  }
  0x3a   :  { %s17965_s20 = sld [smem:[%s19923_s0 + %s17793_s15]]   ;;  %s17797_s15 = smov 31  }
  0x3b   :  { %s17970_s27 = sld [smem:[%s19923_s0 + %s17794_s22]]   ;;  %s17798_s22 = smov 32  }
  0x3c   :  { %s17975_s4 = sld [smem:[%s19923_s0 + %s17795_s28]]   ;;  %s17799_s28 = smov 33  }
  0x3f   :  { %19993 = sst [smem:[#allocation29_spill]] %s17960_s12 }
  0x40   :  { %19994 = sst [smem:[#allocation30_spill]] %s17965_s20 }
  0x41   :  { %19995 = sst [smem:[#allocation31_spill]] %s17970_s27 }
  0x42   :  { %19996 = sst [smem:[#allocation32_spill]] %s17975_s4 }
  0x43   :  { %s17980_s12 = sld [smem:[%s19923_s0 + %s17796_s7]]   ;;  %s17800_s7 = smov 34  }
  0x44   :  { %s17985_s20 = sld [smem:[%s19923_s0 + %s17797_s15]]   ;;  %s17801_s15 = smov 35  }
  0x45   :  { %s17990_s27 = sld [smem:[%s19923_s0 + %s17798_s22]]   ;;  %s17802_s22 = smov 36  }
  0x46   :  { %s17995_s4 = sld [smem:[%s19923_s0 + %s17799_s28]]   ;;  %s17803_s28 = smov 37  }
  0x49   :  { %19997 = sst [smem:[#allocation33_spill]] %s17980_s12 }
  0x4a   :  { %19998 = sst [smem:[#allocation34_spill]] %s17985_s20 }
  0x4b   :  { %19999 = sst [smem:[#allocation35_spill]] %s17990_s27 }
  0x4c   :  { %20000 = sst [smem:[#allocation36_spill]] %s17995_s4 }
  0x4d   :  { %s18000_s12 = sld [smem:[%s19923_s0 + %s17800_s7]]   ;;  %s17804_s7 = smov 38  }
  0x4e   :  { %s18005_s20 = sld [smem:[%s19923_s0 + %s17801_s15]]   ;;  %s17805_s15 = smov 39  }
  0x4f   :  { %s18010_s27 = sld [smem:[%s19923_s0 + %s17802_s22]]   ;;  %s17806_s22 = smov 40  }
  0x50   :  { %s18015_s4 = sld [smem:[%s19923_s0 + %s17803_s28]]   ;;  %s17807_s28 = smov 41  }
  0x53   :  { %20001 = sst [smem:[#allocation37_spill]] %s18000_s12 }
  0x54   :  { %20002 = sst [smem:[#allocation38_spill]] %s18005_s20 }
  0x55   :  { %20003 = sst [smem:[#allocation39_spill]] %s18010_s27 }
  0x56   :  { %20004 = sst [smem:[#allocation40_spill]] %s18015_s4 }
  0x57   :  { %s18020_s12 = sld [smem:[%s19923_s0 + %s17804_s7]]   ;;  %s18037_s7 = smov 0  }
  0x58   :  { %s18025_s20 = sld [smem:[%s19923_s0 + %s17805_s15]]  }
  0x59   :  { %s18030_s27 = sld [smem:[%s19923_s0 + %s17806_s22]]  }
  0x5a   :  { %s18035_s4 = sld [smem:[%s19923_s0 + %s17807_s28]]  }
  0x5b LB: > { %s20005_s25 = sld [smem:[#allocation9_spill]]  ;;  %s15198_s10 = sadd.s32 4294967295, %s17765_s7   ;;  %s17765_s7 = sphi %s18037_s7, %s93_s7  }
  0x5c   : > { %s20006_s24 = sld [smem:[#allocation15_spill]]  ;;  %p15202_p0 = scmp.ge.s32.totalorder %s17765_s7, 1 }
  0x5d   : > { %s20007_s17 = sld [smem:[#allocation7_spill]]  ;;  %p1138_p1 = scmp.lt.s32.totalorder %s17765_s7, 3 }
  0x5e   : > { %s20008_s13 = sld [smem:[#allocation6_spill]] }
  0x5f   : > { %s20009_s6 = sld [smem:[#allocation16_spill]]  ;;  %p1139_p2 = pnand %p15202_p0, %p1138_p1 }
  0x60   : > { %s20010_s3 = sld [smem:[#allocation11_spill]]  ;;  %p1241_p3 = scmp.lt.s32.totalorder (!%p1139_p2), %s15198_s10, 1 }
  0x61   : > { %1142 = sbr.rel (%p1139_p2) target bundleno = 35572 (0x8af4), region = 184  ;;  %s20011_s9 = sld [smem:[#allocation5_spill]] (!%p1139_p2) }
  0x62   : > { %s20012_s21 = sld [smem:[#allocation8_spill]] (!%p1139_p2)  ;;  %s19955_s18 = smov (!%p1139_p2), 88  }
  0x63   : > { %s20013_s5 = sld [smem:[#allocation4_spill]] (!%p1139_p2)  ;;  %s19957_s22 = smov (!%p1139_p2), 96  }
  0x64   : > { %s20014_s29 = sld [smem:[#allocation10_spill]] (!%p1139_p2)  ;;  %s19960_s23 = smov (!%p1139_p2), 120  }
  0x65   : > { %s19949_s26 = smov (!%p1139_p2), 64   ;;  %s17814_s28 = smov (!%p1139_p2), 56  }
  0x66   : > { %v1262_v0 = vld [vmem:[%s20007_s17 + $0x38] sm:$0xff]  ;;  %v17808_v1 = vmov 0.0   ;;  %v1261_v2 = vld [vmem:[%s20007_s17 + $0x30] sm:$0xff]  ;;  %vm17809_vm0 = vmmov 0   ;;  %v1260_v3 = vld [vmem:[%s20007_s17 + $0x28] sm:$0xff]  ;;  %s20052_s10 = smov (!%p1241_p3, %s15198_s10), 1 }
  0x67   : > { %16100 = vmatprep.subr.mxu0 %v17808_v1  ;;  %16116 = vmatprep.mubr.msk.f32.mxu0 %vm17809_vm0, %v17808_v1  ;;  %v1259_v4 = vld [vmem:[%s20007_s17 + $0x20] sm:$0xff]  ;;  %v1258_v5 = vld [vmem:[%s20007_s17 + $0x18] sm:$0xff]  ;;  %s19944_s0 = sshll.u32 %s20052_s10, 3  ;;  %v1257_v6 = vld [vmem:[%s20007_s17 + $0x10] sm:$0xff]  ;;  %vm1270_vm1 = vcmask 523264   ;;  %vm1348_vm2 = vcmask 64512  }
  0x68   : > { %16101 = vmatpush3.msra.mxu0 %v1262_v0  ;;  %v1256_v7 = vld [vmem:[%s20007_s17 + $0x8] sm:$0xff]  ;;  %s1249_s11 = scalar_lea.vmem %s20011_s9, %s19944_s0  ;;  %v1255_v8 = vld [vmem:[%s20007_s17] sm:$0xff]  ;;  %v1435_v16 = vld [vmem:[%s20005_s25 + $0x18] sm:$0xff]  ;;  %s15513_s15 = sshll.u32 %s20052_s10, 4  ;;  %vm1443_vm3 = vcmask 261120   ;;  %vm1624_vm4 = vcmask 120832  }
  0x69   : > { %16102 = vmatprep.subr.mxu0 %v17808_v1  ;;  %v1254_v9 = vld [vmem:[%s1249_s11] sm:$0xff]  ;;  %v1347_v15 = vld [vmem:[%s20008_s13 + $0x8] sm:$0x7f]  ;;  %v1434_v17 = vld [vmem:[%s20005_s25 + $0x10] sm:$0xff]  ;;  %s1245_s16 = scalar_lea.vmem %s20013_s5, %s15513_s15  ;;  %vm1620_vm5 = vcmask 121856   ;;  %vm1655_vm6 = vcmask 1046528  }
  0x6a   : > { %16103 = vmatpush3.msra.mxu0 %v1261_v2  ;;  %v1346_v10 = vld [vmem:[%s20008_s13] sm:$0xff]  ;;  %v1433_v18 = vld [vmem:[%s20005_s25 + $0x8] sm:$0xff]  ;;  %s19947_s1 = smov 80   ;;  %s19953_s2 = smov 112   ;;  %vm2686_vm7 = vcmask 260096   ;;  %vm3229_vm9 = vcmask 253952  }
  0x6b   : > { %16104 = vmatprep.subr.mxu0 %v17808_v1  ;;  %16121 = vmatprep.mubr.msk.f32.mxu1 %vm1348_vm2, %v1346_v10  ;;  %v15207_v11 = vld [vmem:[%s20012_s21] ss:$0 sm:$0xff]  ;;  %v1345_v22 = vld [vmem:[%s1245_s16 + $0x8] sm:$0x7f]  ;;  %s19945_s11 = smov 72   ;;  %s19951_s15 = smov 104  }
  0x6c   : > { %16105 = vmatpush3.msra.mxu0 %v1260_v3  ;;  %v1432_v19 = vld [vmem:[%s20005_s25] sm:$0xff]  ;;  %s20015_s8 = sld [smem:[#allocation12_spill]]  ;;  %vm3242_vm10 = vcmask 57344   ;;  %vm3257_vm11 = vcmask 1040384   ;;  %vm3253_vm12 = vcmask 7168   ;;  %vm4078_vm13 = vcmask 114688  }
  0x6d   : > { %16106 = vmatprep.subr.mxu0 %v17808_v1  ;;  %v1344_v21 = vld [vmem:[%s1245_s16] sm:$0xff]  ;;  %s17819_s16 = smov 48   ;;  %s20016_s14 = sld [smem:[#allocation13_spill]] }
  0x6e   : > { %16107 = vmatpush3.msra.mxu0 %v1259_v4  ;;  %v15211_v26 = vld [vmem:[%s20014_s29] ss:$0 sm:$0xff]  ;;  %s20017_s19 = sld [smem:[#allocation14_spill]]  ;;  %s20034_s5 = smov 88  }
  0x6f   : > { %16108 = vmatprep.subr.mxu0 %v17808_v1  ;;  %s20021_s0 = sld [smem:[#allocation19_spill]]  ;;  %s20039_s13 = smov 72  }
  0x70   : > { %16109 = vmatpush3.msra.mxu0 %v1258_v5  ;;  %s20037_s9 = sld [smem:[#allocation32_spill]] }
  0x71   : > { %16110 = vmatprep.subr.mxu0 %v17808_v1  ;;  %s20043_s17 = sld [smem:[#allocation34_spill]] }
  0x72   : > { %16111 = vmatpush3.msra.mxu0 %v1257_v6  ;;  %s20045_s21 = sld [smem:[#allocation37_spill]] }
  0x73   : > { %16112 = vmatprep.subr.mxu0 %v17808_v1  ;;  %s20047_s25 = sld [smem:[#allocation40_spill]] }
  0x74   : > { %16113 = vmatpush3.msra.mxu0 %v1256_v7 }
  0x75   : > { %16114 = vmatprep.subr.mxu0 %v17808_v1 }
  0x76   : > { %16115 = vmatpush3.msra.mxu0 %v1255_v8 }
  0x77   : > { %16117 = vmatmul.mubr.msk.f32.vlgmr.msra.gmra.mxu0 %vm1270_vm1, %v1254_v9 }
 0x137   : > { %v1340_v12 = vpop.f32.mrf.mxu0 }
 0x138   : > { %v1341_v13 = vadd.f32 %v15207_v11, %v1340_v12 }
 0x139   : > { %v16118_v14 = vpop.f32.mrf.mxu0 }
 0x13a   : > { %16119 = vmatprep.subr.mxu1 %v1341_v13 }
 0x13b   : > { %16120 = vmatpush3.msra.mxu1 %v1341_v13 }
 0x13c   : > { %16122 = vmatmul.mubr.msk.f32.vlgmr.msra.gmra.mxu1 %vm1348_vm2, %v1347_v15  ;;  %16124 = vmatprep.subr.mxu1 %v1435_v16 }
 0x13d   : > { %16125 = vmatpush3.msra.mxu1 %v1435_v16 }
 0x13e   : > { %16126 = vmatprep.subr.mxu1 %v1434_v17 }
 0x13f   : > { %16127 = vmatpush3.msra.mxu1 %v1434_v17 }
 0x140   : > { %16128 = vmatprep.subr.mxu1 %v1433_v18 }
 0x141   : > { %16129 = vmatpush3.msra.mxu1 %v1433_v18  ;;  %v1526_v18 = vld [vmem:[%s20010_s3 + $0x8] sm:$0xff] }
 0x142   : > { %16130 = vmatprep.subr.mxu1 %v1432_v19 }
 0x143   : > { %16131 = vmatpush3.msra.mxu1 %v1432_v19 }
 0x1fc   : > { %v16123_v20 = vpop.f32.mrf.mxu1 }
 0x1fd   : > { %v18083_v25 = vadd.f32 %v16123_v20, %v1345_v22 }
 0x1fe   : > { %v1421_v23 = vpop.f32.mrf.mxu1 }
 0x1ff   : > { %v18081_v24 = vadd.f32 %v1421_v23, %v1344_v21 }
 0x201   : > { %16132 = vmatprep.mubr.msk.f32.mxu1 %vm1443_vm3, %v18081_v24 }
 0x202   : > { %16133 = vmatmul.mubr.msk.f32.vlgmr.msra.gmra.mxu1 %vm1443_vm3, %v18083_v25 }
 0x2c2   : > { %v16134_v27 = vpop.f32.mrf.mxu1 }
 0x2c3   : > { %v18090_v28 = vadd.f32 %v16134_v27, %v15211_v26 }
 0x2c4   : > { %v1516_v29 = vpop.f32.mrf.mxu1 }
 0x2c5   : > { %v18092_v30 = vadd.f32 %v15211_v26, %v1516_v29  ;;  %1739 = vrot.lane.b32.xlu1 %v18090_v28, %s19955_s18  ;;  %1533 = vrot.lane.b32.xlu0 %v18090_v28, %s19957_s22  ;;  %v1525_v26 = vld [vmem:[%s20010_s3] sm:$0xff] }
 0x2c7   : > { %16139 = vmatprep.mubr.msk.f32.mxu1 %vm1348_vm2, %v18092_v30 }
 0x2c9   : > { %1737 = vrot.lane.b32.xlu1 %v18092_v30, %s19955_s18  ;;  %1531 = vrot.lane.b32.xlu0 %v18092_v30, %s19957_s22  ;;  %s20030_s18 = sld [smem:[#allocation26_spill]] }
 0x2cd   : > { %1735 = vrot.lane.b32.xlu1 %v18090_v28, %s19960_s23  ;;  %1733 = vrot.lane.b32.xlu0 %v18092_v30, %s19960_s23 }
 0x337   : > { %v1534_v31 = vpop.permute.xlu0 %1533  ;;  %v1740_v32 = vpop.permute.xlu1 %1739 }
 0x338   : > { %16135 = vmatprep.subr.msk.mxu1 %vm1348_vm2, %v1534_v31 }
 0x339   : > { %16136 = vmatpush3.xpose.msk.msra.mxu1 %vm1348_vm2, %v1534_v31 }
 0x33b   : > { %v1532_v33 = vpop.permute.xlu0 %1531  ;;  %v1738_v35 = vpop.permute.xlu1 %1737 }
 0x33c   : > { %16137 = vmatprep.subr.msk.mxu1 %vm1348_vm2, %v1532_v33 }
 0x33d   : > { %16138 = vmatpush3.xpose.msk.msra.mxu1 %vm1348_vm2, %v1532_v33 }
 0x33e   : > { %16149 = vmatprep.subr.msk.mxu1 %vm1348_vm2, %v1740_v32 }
 0x33f   : > { %v1734_v34 = vpop.permute.xlu0 %1733  ;;  %v1736_v36 = vpop.permute.xlu1 %1735 }
 0x340   : > { %16140 = vmatmul.mubr.msk.f32.vlgmr.msra.gmra.mxu1 %vm1348_vm2, %v18090_v28 }
 0x341   : > { %16150 = vmatpush3.xpose.msk.msra.mxu1 %vm1348_vm2, %v1740_v32  ;;  %16153 = vmatprep.mubr.msk.f32.mxu1 %vm1348_vm2, %v1734_v34 }
 0x342   : > { %16151 = vmatprep.subr.msk.mxu1 %vm1348_vm2, %v1738_v35 }
 0x345   : > { %16152 = vmatpush3.xpose.msk.msra.mxu1 %vm1348_vm2, %v1738_v35 }
 0x346   : > { %16168 = vmatprep.subr.mxu1 %v1525_v26 }
 0x348   : > { %16154 = vmatmul.mubr.msk.f32.vlgmr.msra.gmra.mxu1 %vm1348_vm2, %v1736_v36 }
 0x349   : > { %16169 = vmatpush3.msra.mxu1 %v1525_v26 }
 0x400   : > { %v16141_v37 = vpop.f32.mrf.mxu1 }
 0x401   : > { %v1619_v38 = vmul.f32 0.35355338, %v16141_v37 }
 0x402   : > { %v1609_v39 = vpop.f32.mrf.mxu1 }
 0x403   : > { %v1618_v40 = vmul.f32 0.35355338, %v1609_v39  ;;  %v1625_v41 = vsel %vm1624_vm4, %v1619_v38, -inf }
 0x404   : > { %1626 = vmax.xlane.f32.xlu1 %v1625_v41 }
 0x405   : > { %v1621_v42 = vsel %vm1620_vm5, %v1618_v40, -inf }
 0x406   : > { %1622 = vmax.xlane.f32.xlu0 %v1621_v42 }
 0x408   : > { %v16155_v43 = vpop.f32.mrf.mxu1 }
 0x409   : > { %v1825_v46 = vmul.f32 0.35355338, %v16155_v43 }
 0x40a   : > { %v1815_v44 = vpop.f32.mrf.mxu1 }
 0x40b   : > { %v1824_v45 = vmul.f32 0.35355338, %v1815_v44  ;;  %v1829_v48 = vsel %vm1624_vm4, %v1825_v46, -inf }
 0x40d   : > { %v1826_v47 = vsel %vm1620_vm5, %v1824_v45, -inf }
 0x40e   : > { %1827 = vmax.xlane.f32.xlu0 %v1826_v47 }
 0x412   : > { %1830 = vmax.xlane.f32.xlu0 %v1829_v48 }
 0x415   : > { %1646 = vrot.lane.b32.xlu1 %v18090_v28, %s19949_s26 }
 0x48d   : > { %v1627_v49 = vpop.xlane.xlu1 %1626 }
 0x48e   : > { %v1629_v50 = vsub.f32 %v1619_v38, %v1627_v49 }
 0x48f   : > { %v1623_v51 = vpop.xlane.xlu0 %1622 }
 0x490   : > { %v1632_v52 = vmul.f32 1.442695, %v1629_v50  ;;  %v1628_v53 = vsub.f32 %v1618_v40, %v1623_v51 }
 0x491   : > { %v1647_v54 = vpop.permute.xlu1 %1646 }
 0x492   : > { %17465 = vpow2.f32 %v1632_v52  ;;  %v1630_v55 = vmul.f32 1.442695, %v1628_v53  ;;  %16142 = vmatprep.subr.msk.mxu0 %vm1655_vm6, %v1647_v54 }
 0x493   : > { %16143 = vmatpush3.msk.msra.mxu0 %vm1655_vm6, %v1647_v54 }
 0x494   : > { %17467 = vpow2.f32 %v1630_v55 }
 0x497   : > { %v1828_v56 = vpop.xlane.xlu0 %1827 }
 0x498   : > { %v1832_v3 = vsub.f32 %v1824_v45, %v1828_v56 }
 0x49a   : > { %v1834_v4 = vmul.f32 1.442695, %v1832_v3 }
 0x49b   : > { %v1831_v57 = vpop.xlane.xlu0 %1830 }
 0x49c   : > { %v1833_v58 = vsub.f32 %v1825_v46, %v1831_v57 }
 0x49e   : > { %v1836_v59 = vmul.f32 1.442695, %v1833_v58 }
 0x49f   : > { %v17466_v60 = vpop.eup %17465 }
 0x4a0   : > { %17469 = vpow2.f32 %v1836_v59  ;;  %v1637_v61 = vsel %vm1624_vm4, %v17466_v60, 0.0 }
 0x4a1   : > { %v17468_v62 = vpop.eup %17467  ;;  %1638 = vadd.xlane.f32.xlu0 %v1637_v61  ;;  %17471 = vpow2.f32 %v1834_v4 }
 0x4a2   : > { %v1634_v63 = vsel %vm1620_vm5, %v17468_v62, 0.0 }
 0x4a3   : > { %1635 = vadd.xlane.f32.xlu1 %v1634_v63 }
 0x4ad   : > { %v17470_v0 = vpop.eup %17469 }
 0x4ae   : > { %v1841_v2 = vsel %vm1624_vm4, %v17470_v0, 0.0  ;;  %v17472_v5 = vpop.eup %17471 }
 0x4af   : > { %1842 = vadd.xlane.f32.xlu0 %v1841_v2  ;;  %v1838_v6 = vsel %vm1620_vm5, %v17472_v5, 0.0 }
 0x4b4   : > { %1850 = vrot.lane.b32.xlu1 %v18090_v28, %s17814_s28 }
 0x4c5   : > { %1644 = vrot.lane.b32.xlu0 %v18092_v30, %s19949_s26 }
 0x4c9   : > { %2104 = vrot.lane.b32.xlu0 %v18090_v28, %s19947_s1 }
 0x4cd   : > { %2098 = vrot.lane.b32.xlu0 %v18092_v30, %s19953_s2 }
 0x4d1   : > { %2390 = vrot.lane.b32.xlu0 %v18090_v28, %s19945_s11 }
 0x4d5   : > { %2384 = vrot.lane.b32.xlu0 %v18092_v30, %s19951_s15 }
 0x4d8   : > { %1839 = vadd.xlane.f32.xlu1 %v1838_v6 }
 0x4e9   : > { %1848 = vrot.lane.b32.xlu1 %v18092_v30, %s17814_s28  ;;  %s17820_s28 = smov 40  }
 0x4ed   : > { %2102 = vrot.lane.b32.xlu1 %v18092_v30, %s19947_s1  ;;  %s20025_s1 = sld [smem:[#allocation23_spill]] }
 0x4f1   : > { %2100 = vrot.lane.b32.xlu1 %v18090_v28, %s19953_s2 }
 0x4f5   : > { %2388 = vrot.lane.b32.xlu1 %v18092_v30, %s19945_s11  ;;  %s20022_s11 = sld [smem:[#allocation20_spill]] }
 0x4f9   : > { %2386 = vrot.lane.b32.xlu1 %v18090_v28, %s19951_s15 }
 0x52a   : > { %v1639_v7 = vpop.xlane.xlu0 %1638 }
 0x52b   : > { %17473 = vrcp.f32 %v1639_v7 }
 0x52c   : > { %v1636_v8 = vpop.xlane.xlu1 %1635 }
 0x52d   : > { %17475 = vrcp.f32 %v1636_v8 }
 0x530   : > { %v1851_v15 = vpop.permute.xlu1 %1850 }
 0x538   : > { %v1843_v9 = vpop.xlane.xlu0 %1842  ;;  %v17474_v10 = vpop.eup %17473 }
 0x539   : > { %v1643_v14 = vmul.f32 %v17474_v10, %v17466_v60  ;;  %17477 = vrcp.f32 %v1843_v9 }
 0x53a   : > { %v17476_v11 = vpop.eup %17475 }
 0x53b   : > { %v1641_v12 = vmul.f32 %v17476_v11, %v17468_v62 }
 0x53c   : > { %v1645_v13 = vpop.permute.xlu0 %1644 }
 0x53d   : > { %16144 = vmatprep.subr.mxu0 %v1645_v13  ;;  %16146 = vmatprep.mubr.msk.f32.mxu0 %vm1620_vm5, %v1641_v12  ;;  %v1527_v12 = vld [vmem:[%s20010_s3 + $0x10] sm:$0xff] }
 0x53e   : > { %16145 = vmatpush3.msra.mxu0 %v1645_v13 }
 0x53f   : > { %16147 = vmatmul.mubr.msk.f32.vlgmr.msra.gmra.mxu0 %vm1620_vm5, %v1643_v14  ;;  %16156 = vmatprep.subr.msk.mxu0 %vm1655_vm6, %v1851_v15 }
 0x540   : > { %16157 = vmatpush3.msk.msra.mxu0 %vm1655_vm6, %v1851_v15  ;;  %v2105_v23 = vpop.permute.xlu0 %2104 }
 0x544   : > { %v2099_v31 = vpop.permute.xlu0 %2098 }
 0x546   : > { %v17478_v19 = vpop.eup %17477 }
 0x547   : > { %v1847_v22 = vmul.f32 %v17478_v19, %v17470_v0 }
 0x548   : > { %v2391_v35 = vpop.permute.xlu0 %2390 }
 0x54c   : > { %v2385_v37 = vpop.permute.xlu0 %2384 }
 0x561   : > { %v1840_v16 = vpop.xlane.xlu1 %1839 }
 0x562   : > { %17479 = vrcp.f32 %v1840_v16 }
 0x565   : > { %v1849_v17 = vpop.permute.xlu1 %1848 }
 0x566   : > { %16158 = vmatprep.subr.mxu0 %v1849_v17 }
 0x567   : > { %16159 = vmatpush3.msra.mxu0 %v1849_v17 }
 0x568   : > { %16163 = vmatprep.subr.mxu0 %v1526_v18 }
 0x569   : > { %v2103_v33 = vpop.permute.xlu1 %2102 }
 0x56d   : > { %v2101_v36 = vpop.permute.xlu1 %2100 }
 0x56f   : > { %v17480_v20 = vpop.eup %17479 }
 0x570   : > { %v1845_v21 = vmul.f32 %v17480_v20, %v17472_v5 }
 0x571   : > { %v2389_v38 = vpop.permute.xlu1 %2388 }
 0x572   : > { %16160 = vmatprep.mubr.msk.f32.mxu0 %vm1620_vm5, %v1845_v21 }
 0x573   : > { %16161 = vmatmul.mubr.msk.f32.vlgmr.msra.gmra.mxu0 %vm1620_vm5, %v1847_v22 }
 0x574   : > { %16164 = vmatpush3.msra.mxu0 %v1526_v18 }
 0x575   : > { %16173 = vmatprep.subr.msk.mxu0 %vm1348_vm2, %v2105_v23  ;;  %v2387_v39 = vpop.permute.xlu1 %2386 }
 0x5ff   : > { %v16148_v27 = vpop.f32.mrf.mxu0 }
 0x601   : > { %v1724_v29 = vpop.f32.mrf.mxu0 }
 0x602   : > { %16170 = vmatprep.mubr.msk.f32.mxu1 %vm1348_vm2, %v1724_v29 }
 0x603   : > { %16171 = vmatmul.mubr.msk.f32.vlgmr.msra.gmra.mxu1 %vm1348_vm2, %v16148_v27 }
 0x633   : > { %v16162_v32 = vpop.f32.mrf.mxu0 }
 0x635   : > { %v1927_v34 = vpop.f32.mrf.mxu0 }
 0x636   : > { %16165 = vmatprep.mubr.msk.f32.mxu0 %vm1348_vm2, %v1927_v34 }
 0x637   : > { %16166 = vmatmul.mubr.msk.f32.vlgmr.msra.gmra.mxu0 %vm1348_vm2, %v16162_v32 }
 0x638   : > { %16174 = vmatpush3.xpose.msk.msra.mxu0 %vm1348_vm2, %v2105_v23  ;;  %16177 = vmatprep.mubr.msk.f32.mxu0 %vm1348_vm2, %v2099_v31 }
 0x639   : > { %16175 = vmatprep.subr.msk.mxu0 %vm1348_vm2, %v2103_v33 }
 0x63c   : > { %16176 = vmatpush3.xpose.msk.msra.mxu0 %vm1348_vm2, %v2103_v33 }
 0x63d   : > { %16192 = vmatprep.subr.msk.mxu0 %vm1348_vm2, %v2391_v35 }
 0x63f   : > { %16178 = vmatmul.mubr.msk.f32.vlgmr.msra.gmra.mxu0 %vm1348_vm2, %v2101_v36 }
 0x640   : > { %16193 = vmatpush3.xpose.msk.msra.mxu0 %vm1348_vm2, %v2391_v35  ;;  %16196 = vmatprep.mubr.msk.f32.mxu0 %vm1348_vm2, %v2385_v37  ;;  %v1528_v35 = vld [vmem:[%s20010_s3 + $0x18] sm:$0xff]  ;;  %s20032_s3 = sld [smem:[#allocation29_spill]] }
 0x641   : > { %16194 = vmatprep.subr.msk.mxu0 %vm1348_vm2, %v2389_v38 }
 0x644   : > { %16195 = vmatpush3.xpose.msk.msra.mxu0 %vm1348_vm2, %v2389_v38 }
 0x647   : > { %16197 = vmatmul.mubr.msk.f32.vlgmr.msra.gmra.mxu0 %vm1348_vm2, %v2387_v39 }
 0x6c3   : > { %v16172_v40 = vpop.f32.mrf.mxu1 }
 0x6c5   : > { %v2089_v23 = vpop.f32.mrf.mxu1 }
 0x6f7   : > { %v16167_v41 = vpop.f32.mrf.mxu0 }
 0x6f8   : > { %v18176_v42 = vadd.f32 %v16172_v40, %v16167_v41 }
 0x6f9   : > { %v18178_v43 = vpop.f32.mrf.mxu0 }
 0x6fa   : > { %v2090_v41 = vadd.f32 %v2089_v23, %v18178_v43  ;;  %v2823_v23 = vld [vmem:[%s20009_s6 + $0x10] sm:$0xff] }
 0x6ff   : > { %v16179_v44 = vpop.f32.mrf.mxu0 }
 0x700   : > { %v2190_v45 = vmul.f32 0.35355338, %v16179_v44 }
 0x701   : > { %v2180_v46 = vpop.f32.mrf.mxu0 }
 0x702   : > { %v2189_v47 = vmul.f32 0.35355338, %v2180_v46  ;;  %v2194_v48 = vsel %vm1624_vm4, %v2190_v45, -inf }
 0x703   : > { %2195 = vmax.xlane.f32.xlu1 %v2194_v48 }
 0x704   : > { %v2191_v49 = vsel %vm1620_vm5, %v2189_v47, -inf }
 0x705   : > { %2192 = vmax.xlane.f32.xlu0 %v2191_v49 }
 0x707   : > { %v16198_v50 = vpop.f32.mrf.mxu0 }
 0x708   : > { %v2476_v6 = vmul.f32 0.35355338, %v16198_v50 }
 0x709   : > { %v2466_v51 = vpop.f32.mrf.mxu0 }
 0x70a   : > { %v2475_v52 = vmul.f32 0.35355338, %v2466_v51  ;;  %v2480_v8 = vsel %vm1624_vm4, %v2476_v6, -inf }
 0x70c   : > { %v2477_v53 = vsel %vm1620_vm5, %v2475_v52, -inf }
 0x714   : > { %2215 = vrot.lane.b32.xlu1 %v18090_v28, %s17819_s16 }
 0x738   : > { %2478 = vmax.xlane.f32.xlu1 %v2477_v53 }
 0x78c   : > { %v2196_v54 = vpop.xlane.xlu1 %2195 }
 0x78d   : > { %v2198_v55 = vsub.f32 %v2190_v45, %v2196_v54  ;;  %v15250_v45 = vld [vmem:[%s20015_s8] ss:$0 sm:$0xff]  ;;  %s20036_s8 = smov 104  }
 0x78e   : > { %v2193_v56 = vpop.xlane.xlu0 %2192 }
 0x78f   : > { %v2201_v57 = vmul.f32 1.442695, %v2198_v55  ;;  %v2197_v58 = vsub.f32 %v2189_v47, %v2193_v56 }
 0x790   : > { %v2216_v59 = vpop.permute.xlu1 %2215 }
 0x791   : > { %17481 = vpow2.f32 %v2201_v57  ;;  %v2199_v60 = vmul.f32 1.442695, %v2197_v58  ;;  %16180 = vmatprep.subr.msk.mxu1 %vm1655_vm6, %v2216_v59 }
 0x792   : > { %16181 = vmatpush3.msk.msra.mxu1 %vm1655_vm6, %v2216_v59 }
 0x793   : > { %17483 = vpow2.f32 %v2199_v60 }
 0x79e   : > { %v17482_v61 = vpop.eup %17481 }
 0x79f   : > { %v2206_v62 = vsel %vm1624_vm4, %v17482_v61, 0.0 }
 0x7a0   : > { %v17484_v63 = vpop.eup %17483  ;;  %2207 = vadd.xlane.f32.xlu0 %v2206_v62  ;;  %v2730_v62 = vld [vmem:[%s20006_s24 + $0x18] sm:$0xff] }
 0x7a1   : > { %v2203_v0 = vsel %vm1620_vm5, %v17484_v63, 0.0  ;;  %16211 = vmatprep.subr.mxu0 %v2730_v62 }
 0x7a2   : > { %16212 = vmatpush3.msra.mxu0 %v2730_v62 }
 0x7a4   : > { %2204 = vadd.xlane.f32.xlu0 %v2203_v0  ;;  %v2728_v0 = vld [vmem:[%s20006_s24 + $0x8] sm:$0xff] }
 0x7ba   : > { %2213 = vrot.lane.b32.xlu0 %v18092_v30, %s17819_s16  ;;  %s20018_s16 = sld [smem:[#allocation17_spill]] }
 0x7c1   : > { %v2479_v2 = vpop.xlane.xlu1 %2478 }
 0x7c2   : > { %v2483_v3 = vsub.f32 %v2475_v52, %v2479_v2  ;;  %v2727_v2 = vld [vmem:[%s20006_s24] sm:$0xff] }
 0x7c4   : > { %v2485_v4 = vmul.f32 1.442695, %v2483_v3  ;;  %v2828_v3 = vld [vmem:[%s20009_s6 + $0x38] sm:$0xff] }
 0x7c6   : > { %17485 = vpow2.f32 %v2485_v4  ;;  %v2827_v4 = vld [vmem:[%s20009_s6 + $0x30] sm:$0xff] }
 0x7d3   : > { %v17486_v5 = vpop.eup %17485 }
 0x7d4   : > { %v2489_v7 = vsel %vm1620_vm5, %v17486_v5, 0.0 }
 0x7d5   : > { %2490 = vadd.xlane.f32.xlu1 %v2489_v7 }
 0x7d9   : > { %2481 = vmax.xlane.f32.xlu0 %v2480_v8 }
 0x7e6   : > { %2501 = vrot.lane.b32.xlu1 %v18090_v28, %s17820_s28 }
 0x829   : > { %v2208_v9 = vpop.xlane.xlu0 %2207 }
 0x82a   : > { %17487 = vrcp.f32 %v2208_v9 }
 0x82d   : > { %v2205_v10 = vpop.xlane.xlu0 %2204 }
 0x82e   : > { %17489 = vrcp.f32 %v2205_v10 }
 0x831   : > { %v2214_v11 = vpop.permute.xlu0 %2213 }
 0x832   : > { %16182 = vmatprep.subr.mxu1 %v2214_v11 }
 0x833   : > { %16183 = vmatpush3.msra.mxu1 %v2214_v11 }
 0x834   : > { %16187 = vmatprep.subr.mxu1 %v1527_v12 }
 0x837   : > { %v17488_v13 = vpop.eup %17487 }
 0x838   : > { %v2212_v16 = vmul.f32 %v17488_v13, %v17482_v61 }
 0x83b   : > { %v17490_v14 = vpop.eup %17489 }
 0x83c   : > { %v2210_v15 = vmul.f32 %v17490_v14, %v17484_v63  ;;  %v2729_v63 = vld [vmem:[%s20006_s24 + $0x10] sm:$0xff]  ;;  %v15251_v14 = vld [vmem:[%s20016_s14] ss:$0 sm:$0xff]  ;;  %s20042_s14 = sld [smem:[#allocation38_spill]] }
 0x83d   : > { %16213 = vmatprep.subr.mxu0 %v2729_v63  ;;  %s20046_s24 = sld [smem:[#allocation39_spill]] }
 0x83e   : > { %16184 = vmatprep.mubr.msk.f32.mxu1 %vm1620_vm5, %v2210_v15  ;;  %16214 = vmatpush3.msra.mxu0 %v2729_v63 }
 0x83f   : > { %16185 = vmatmul.mubr.msk.f32.vlgmr.msra.gmra.mxu1 %vm1620_vm5, %v2212_v16  ;;  %16215 = vmatprep.subr.mxu0 %v2728_v0 }
 0x840   : > { %16188 = vmatpush3.msra.mxu1 %v1527_v12  ;;  %16216 = vmatpush3.msra.mxu0 %v2728_v0 }
 0x841   : > { %16217 = vmatprep.subr.mxu0 %v2727_v2 }
 0x842   : > { %16218 = vmatpush3.msra.mxu0 %v2727_v2 }
 0x85e   : > { %v2491_v17 = vpop.xlane.xlu1 %2490 }
 0x862   : > { %v2502_v28 = vpop.permute.xlu1 %2501  ;;  %v2482_v18 = vpop.xlane.xlu0 %2481 }
 0x863   : > { %v2484_v19 = vsub.f32 %v2476_v6, %v2482_v18  ;;  %16199 = vmatprep.subr.msk.mxu1 %vm1655_vm6, %v2502_v28  ;;  %v2825_v6 = vld [vmem:[%s20009_s6 + $0x20] sm:$0xff] }
 0x864   : > { %v15252_v18 = vld [vmem:[%s20017_s19] ss:$0 sm:$0xff]  ;;  %s20044_s19 = sld [smem:[#allocation35_spill]] }
 0x865   : > { %v2487_v20 = vmul.f32 1.442695, %v2484_v19 }
 0x867   : > { %17491 = vpow2.f32 %v2487_v20 }
 0x868   : > { %17493 = vrcp.f32 %v2491_v17 }
 0x874   : > { %v17492_v21 = vpop.eup %17491 }
 0x875   : > { %v2492_v22 = vsel %vm1624_vm4, %v17492_v21, 0.0  ;;  %v17494_v26 = vpop.eup %17493 }
 0x876   : > { %2493 = vadd.xlane.f32.xlu0 %v2492_v22  ;;  %v2496_v32 = vmul.f32 %v17494_v26, %v17486_v5  ;;  %v2826_v5 = vld [vmem:[%s20009_s6 + $0x28] sm:$0xff]  ;;  %v2824_v22 = vld [vmem:[%s20009_s6 + $0x18] sm:$0xff] }
 0x877   : > { %v2822_v26 = vld [vmem:[%s20009_s6 + $0x8] sm:$0xff] }
 0x88c   : > { %2499 = vrot.lane.b32.xlu0 %v18092_v30, %s17820_s28  ;;  %s20019_s28 = sld [smem:[#allocation30_spill]] }
 0x8ff   : > { %v16186_v27 = vpop.f32.mrf.mxu1  ;;  %v2494_v29 = vpop.xlane.xlu0 %2493 }
 0x900   : > { %17495 = vrcp.f32 %v2494_v29  ;;  %v15253_v29 = vld [vmem:[%s17890_s30] ss:$0 sm:$0xff] }
 0x901   : > { %v2292_v31 = vpop.f32.mrf.mxu1 }
 0x902   : > { %16189 = vmatprep.mubr.msk.f32.mxu1 %vm1348_vm2, %v2292_v31 }
 0x903   : > { %16190 = vmatmul.mubr.msk.f32.vlgmr.msra.gmra.mxu1 %vm1348_vm2, %v16186_v27  ;;  %v2500_v33 = vpop.permute.xlu0 %2499  ;;  %v2821_v27 = vld [vmem:[%s20009_s6] sm:$0xff]  ;;  %s20035_s6 = smov 112  }
 0x904   : > { %16200 = vmatpush3.msk.msra.mxu1 %vm1655_vm6, %v2502_v28  ;;  %16203 = vmatprep.mubr.msk.f32.mxu1 %vm1620_vm5, %v2496_v32 }
 0x905   : > { %16201 = vmatprep.subr.mxu1 %v2500_v33 }
 0x906   : > { %16202 = vmatpush3.msra.mxu1 %v2500_v33 }
 0x907   : > { %16206 = vmatprep.subr.mxu1 %v1528_v35 }
 0x90d   : > { %v17496_v30 = vpop.eup %17495 }
 0x90e   : > { %v2498_v34 = vmul.f32 %v17496_v30, %v17492_v21 }
 0x910   : > { %16204 = vmatmul.mubr.msk.f32.vlgmr.msra.gmra.mxu1 %vm1620_vm5, %v2498_v34 }
 0x911   : > { %16207 = vmatpush3.msra.mxu1 %v1528_v35 }
 0x912   : > { %16222 = vmatprep.subr.mxu1 %v2828_v3 }
 0x9c3   : > { %v16191_v36 = vpop.f32.mrf.mxu1 }
 0x9c4   : > { %v2383_v37 = vadd.f32 %v16191_v36, %v18176_v42  ;;  %v15256_v36 = vld [vmem:[%s20018_s16] ss:$0 sm:$0xff]  ;;  %s20020_s16 = sld [smem:[#allocation18_spill]] }
 0x9c5   : > { %v2373_v38 = vpop.f32.mrf.mxu1 }
 0x9c6   : > { %v2382_v46 = vadd.f32 %v2373_v38, %v2090_v41 }
 0x9ca   : > { %v15259_v0 = vld [vmem:[%s20020_s16] ss:$0 sm:$0xff]  ;;  %s20024_s16 = sld [smem:[#allocation21_spill]] }
 0x9d0   : > { %v16205_v39 = vpop.f32.mrf.mxu1 }
 0x9d2   : > { %v2578_v40 = vpop.f32.mrf.mxu1 }
 0x9d3   : > { %16208 = vmatprep.mubr.msk.f32.mxu1 %vm1348_vm2, %v2578_v40 }
 0x9d4   : > { %16209 = vmatmul.mubr.msk.f32.vlgmr.msra.gmra.mxu1 %vm1348_vm2, %v16205_v39 }
 0x9d5   : > { %16223 = vmatpush3.msra.mxu1 %v2828_v3 }
 0x9d6   : > { %16224 = vmatprep.subr.mxu1 %v2827_v4 }
 0x9d7   : > { %16225 = vmatpush3.msra.mxu1 %v2827_v4 }
 0x9d8   : > { %16226 = vmatprep.subr.mxu1 %v2826_v5 }
 0x9d9   : > { %16227 = vmatpush3.msra.mxu1 %v2826_v5 }
 0x9da   : > { %16228 = vmatprep.subr.mxu1 %v2825_v6 }
 0x9db   : > { %16229 = vmatpush3.msra.mxu1 %v2825_v6  ;;  %v15260_v6 = vld [vmem:[%s20021_s0] ss:$0 sm:$0xff]  ;;  %s20023_s0 = sld [smem:[#allocation22_spill]] }
 0x9dc   : > { %16230 = vmatprep.subr.mxu1 %v2824_v22 }
 0x9dd   : > { %16231 = vmatpush3.msra.mxu1 %v2824_v22  ;;  %v3058_v22 = vld [vmem:[%s20022_s11 + $0x18] sm:$0xff] }
 0x9de   : > { %16232 = vmatprep.subr.mxu1 %v2823_v23 }
 0x9df   : > { %16233 = vmatpush3.msra.mxu1 %v2823_v23  ;;  %v3057_v23 = vld [vmem:[%s20022_s11 + $0x10] sm:$0xff] }
 0x9e0   : > { %16234 = vmatprep.subr.mxu1 %v2822_v26 }
 0x9e1   : > { %16235 = vmatpush3.msra.mxu1 %v2822_v26 }
 0x9e2   : > { %16236 = vmatprep.subr.mxu1 %v2821_v27 }
 0x9e3   : > { %16237 = vmatpush3.msra.mxu1 %v2821_v27  ;;  %v3056_v27 = vld [vmem:[%s20022_s11 + $0x8] sm:$0xff] }
 0x9e4   : > { %16287 = vmatprep.subr.mxu1 %v17808_v1 }
 0xa94   : > { %v16210_v44 = vpop.f32.mrf.mxu1 }
 0xa95   : > { %v2669_v47 = vadd.f32 %v16210_v44, %v2383_v37 }
 0xa96   : > { %v2659_v48 = vpop.f32.mrf.mxu1 }
 0xa97   : > { %v2678_v49 = vadd.f32 %v15250_v45, %v2669_v47  ;;  %v2668_v50 = vadd.f32 %v2659_v48, %v2382_v46 }
 0xa99   : > { %v2677_v51 = vadd.f32 %v15250_v45, %v2668_v50  ;;  %v2680_v42 = vadd.f32 %v2678_v49, %v18083_v25 }
 0xa9b   : > { %v2687_v52 = vsel %vm2686_vm7, %v2680_v42, 0.0  ;;  %v2679_v53 = vadd.f32 %v2677_v51, %v18081_v24 }
 0xa9c   : > { %2688 = vadd.xlane.f32.xlu0 %v2687_v52 }
 0xa9d   : > { %v2683_v43 = vsel %vm1443_vm3, %v2679_v53, 0.0 }
 0xa9e   : > { %2684 = vadd.xlane.f32.xlu1 %v2683_v43 }
 0xb25   : > { %v2689_v54 = vpop.xlane.xlu0 %2688 }
 0xb26   : > { %v2692_v55 = vmul.f32 0.03125, %v2689_v54 }
 0xb27   : > { %v2685_v56 = vpop.xlane.xlu1 %2684 }
 0xb28   : > { %v2694_v57 = vsub.f32 %v2680_v42, %v2692_v55  ;;  %v2691_v58 = vmul.f32 0.03125, %v2685_v56  ;;  %v2966_v55 = vld [vmem:[%s20019_s28 + $0x18] sm:$0xff]  ;;  %v2965_v56 = vld [vmem:[%s20019_s28 + $0x10] sm:$0xff] }
 0xb29   : > { %16241 = vmatprep.subr.mxu0 %v2966_v55 }
 0xb2a   : > { %v2693_v59 = vsub.f32 %v2679_v53, %v2691_v58  ;;  %v2696_v60 = vmul.f32 %v2694_v57, %v2694_v57  ;;  %v2963_v58 = vld [vmem:[%s20019_s28] sm:$0xff] }
 0xb2c   : > { %v2700_v25 = vsel %vm2686_vm7, %v2696_v60, 0.0  ;;  %v2695_v61 = vmul.f32 %v2693_v59, %v2693_v59 }
 0xb2d   : > { %2701 = vadd.xlane.f32.xlu0 %v2700_v25 }
 0xb2e   : > { %v2697_v24 = vsel %vm1443_vm3, %v2695_v61, 0.0 }
 0xb2f   : > { %2698 = vadd.xlane.f32.xlu1 %v2697_v24 }
 0xbb6   : > { %v2702_v7 = vpop.xlane.xlu0 %2701 }
 0xbb7   : > { %v2704_v8 = vmul.f32 0.03125, %v2702_v7 }
 0xbb8   : > { %v2699_v9 = vpop.xlane.xlu1 %2698 }
 0xbb9   : > { %v2706_v10 = vadd.f32 1e-05, %v2704_v8  ;;  %v2703_v11 = vmul.f32 0.03125, %v2699_v9 }
 0xbbb   : > { %17497 = vrsqrt.f32 %v2706_v10  ;;  %v2705_v12 = vadd.f32 1e-05, %v2703_v11  ;;  %v3070_v10 = vld [vmem:[%s20022_s11 + $0x78] sm:$0xff]  ;;  %v3069_v11 = vld [vmem:[%s20022_s11 + $0x70] sm:$0xff] }
 0xbbd   : > { %17499 = vrsqrt.f32 %v2705_v12  ;;  %v3068_v12 = vld [vmem:[%s20022_s11 + $0x68] sm:$0xff] }
 0xbc8   : > { %v17498_v13 = vpop.eup %17497 }
 0xbc9   : > { %v2710_v15 = vmul.f32 %v17498_v13, %v2694_v57  ;;  %v2964_v57 = vld [vmem:[%s20019_s28 + $0x8] sm:$0xff]  ;;  %v3067_v13 = vld [vmem:[%s20022_s11 + $0x60] sm:$0xff]  ;;  %s20048_s28 = sshll.u32 %s20052_s10, 3  ;;  %s20049_s10 = smov 120  }
 0xbca   : > { %v17500_v16 = vpop.eup %17499  ;;  %s18643_s29 = scalar_lea.vmem %s18035_s4, %s20048_s28  ;;  %s20050_s28 = smov 64  }
 0xbcb   : > { %v2709_v17 = vmul.f32 %v17500_v16, %v2693_v59  ;;  %v2718_v28 = vmul.f32 %v15251_v14, %v2710_v15  ;;  %v3065_v15 = vld [vmem:[%s20022_s11 + $0x50] sm:$0xff]  ;;  %v3064_v16 = vld [vmem:[%s20022_s11 + $0x48] sm:$0xff] }
 0xbcd   : > { %v2717_v19 = vmul.f32 %v15251_v14, %v2709_v17  ;;  %v2726_v21 = vadd.f32 %v15252_v18, %v2718_v28  ;;  %v3066_v14 = vld [vmem:[%s20022_s11 + $0x58] sm:$0xff]  ;;  %v3063_v17 = vld [vmem:[%s20022_s11 + $0x40] sm:$0xff] }
 0xbce   : > { %v3062_v28 = vld [vmem:[%s20022_s11 + $0x38] sm:$0xff] }
 0xbcf   : > { %v2725_v20 = vadd.f32 %v15252_v18, %v2717_v19  ;;  %v3061_v18 = vld [vmem:[%s20022_s11 + $0x30] sm:$0xff]  ;;  %v3060_v19 = vld [vmem:[%s20022_s11 + $0x28] sm:$0xff] }
 0xbd1   : > { %16219 = vmatprep.mubr.msk.f32.mxu0 %vm1443_vm3, %v2725_v20 }
 0xbd2   : > { %16220 = vmatmul.mubr.msk.f32.vlgmr.msra.gmra.mxu0 %vm1443_vm3, %v2726_v21 }
 0xbd3   : > { %16242 = vmatpush3.msra.mxu0 %v2966_v55 }
 0xbd4   : > { %16243 = vmatprep.subr.mxu0 %v2965_v56 }
 0xbd5   : > { %16244 = vmatpush3.msra.mxu0 %v2965_v56 }
 0xbd6   : > { %16245 = vmatprep.subr.mxu0 %v2964_v57 }
 0xbd7   : > { %16246 = vmatpush3.msra.mxu0 %v2964_v57 }
 0xbd8   : > { %16247 = vmatprep.subr.mxu0 %v2963_v58 }
 0xbd9   : > { %16248 = vmatpush3.msra.mxu0 %v2963_v58 }
 0xbda   : > { %16252 = vmatprep.subr.mxu0 %v17808_v1 }
 0xc92   : > { %v16221_v31 = vpop.f32.mrf.mxu0 }
 0xc93   : > { %v2816_v32 = vadd.f32 %v16221_v31, %v15253_v29  ;;  %v17821_v31 = vmov 1.0  }
 0xc94   : > { %v2810_v33 = vpop.f32.mrf.mxu0 }
 0xc95   : > { %v2811_v30 = vadd.f32 %v15253_v29, %v2810_v33  ;;  %v2820_v35 = vmax.f32 %v2816_v32, 0.0  ;;  %v3055_v29 = vld [vmem:[%s20022_s11] sm:$0xff]  ;;  %v3150_v32 = vld [vmem:[%s20023_s0 + $0x18] sm:$0xff]  ;;  %v3149_v33 = vld [vmem:[%s20023_s0 + $0x10] sm:$0xff] }
 0xc97   : > { %v2819_v34 = vmax.f32 %v2811_v30, 0.0  ;;  %v3148_v30 = vld [vmem:[%s20023_s0 + $0x8] sm:$0xff] }
 0xc99   : > { %16238 = vmatprep.mubr.msk.f32.mxu1 %vm1270_vm1, %v2819_v34  ;;  %v3147_v34 = vld [vmem:[%s20023_s0] sm:$0xff] }
 0xc9a   : > { %16239 = vmatmul.mubr.msk.f32.vlgmr.msra.gmra.mxu1 %vm1270_vm1, %v2820_v35 }
 0xc9b   : > { %16295 = vmatprep.mubr.msk.f32.mxu1 %vm17809_vm0, %v17808_v1  ;;  %16288 = vmatpush3.msra.mxu1 %v3150_v32 }
 0xc9c   : > { %16289 = vmatprep.subr.mxu1 %v17808_v1 }
 0xc9d   : > { %16290 = vmatpush3.msra.mxu1 %v3149_v33 }
 0xc9e   : > { %16291 = vmatprep.subr.mxu1 %v17808_v1 }
 0xc9f   : > { %16292 = vmatpush3.msra.mxu1 %v3148_v30 }
 0xca0   : > { %16293 = vmatprep.subr.mxu1 %v17808_v1 }
 0xca1   : > { %16294 = vmatpush3.msra.mxu1 %v3147_v34 }
 0xca2   : > { %16298 = vmatprep.subr.mxu1 %v17808_v1 }
 0xd5a   : > { %v16240_v37 = vpop.f32.mrf.mxu1 }
 0xd5b   : > { %v2914_v38 = vadd.f32 %v16240_v37, %v15256_v36  ;;  %v3076_v37 = vld [vmem:[%s20024_s16] sm:$0x1] }
 0xd5c   : > { %v2908_v39 = vpop.f32.mrf.mxu1 }
 0xd5d   : > { %v2909_v40 = vadd.f32 %v15256_v36, %v2908_v39  ;;  %v2918_v41 = vadd.f32 %v2914_v38, %v2726_v21  ;;  %v3071_v21 = vlaneseq }
 0xd5f   : > { %v2924_v44 = vsel %vm2686_vm7, %v2918_v41, 0.0  ;;  %v2917_v45 = vadd.f32 %v2909_v40, %v2725_v20  ;;  %v3059_v20 = vld [vmem:[%s20022_s11 + $0x20] sm:$0xff]  ;;  %v18279_v26 = vand.u32 127, %v3071_v21 }
 0xd60   : > { %2925 = vadd.xlane.f32.xlu0 %v2924_v44 }
 0xd61   : > { %v2921_v46 = vsel %vm1443_vm3, %v2917_v45, 0.0  ;;  %vm3073_vm8 = vcmp.eq.s32.totalorder %v18279_v26, 1 }
 0xd62   : > { %2922 = vadd.xlane.f32.xlu1 %v2921_v46 }
 0xde9   : > { %v2926_v47 = vpop.xlane.xlu0 %2925 }
 0xdea   : > { %v2928_v48 = vmul.f32 0.03125, %v2926_v47 }
 0xdeb   : > { %v2923_v49 = vpop.xlane.xlu1 %2922 }
 0xdec   : > { %v2930_v50 = vsub.f32 %v2918_v41, %v2928_v48  ;;  %v2927_v51 = vmul.f32 0.03125, %v2923_v49  ;;  %v3151_v41 = vld [vmem:[%s20025_s1] sm:$0x1] }
 0xdee   : > { %v2929_v42 = vsub.f32 %v2917_v45, %v2927_v51  ;;  %v2932_v52 = vmul.f32 %v2930_v50, %v2930_v50 }
 0xdf0   : > { %v2936_v53 = vsel %vm2686_vm7, %v2932_v52, 0.0  ;;  %v2931_v43 = vmul.f32 %v2929_v42, %v2929_v42  ;;  %vm5527_vm7 = vcmask 8192  }
 0xdf1   : > { %2937 = vadd.xlane.f32.xlu0 %v2936_v53 }
 0xdf2   : > { %v2933_v54 = vsel %vm1443_vm3, %v2931_v43, 0.0 }
 0xdf3   : > { %2934 = vadd.xlane.f32.xlu1 %v2933_v54 }
 0xe7a   : > { %v2938_v59 = vpop.xlane.xlu0 %2937 }
 0xe7b   : > { %v2940_v60 = vmul.f32 0.03125, %v2938_v59 }
 0xe7c   : > { %v2935_v25 = vpop.xlane.xlu1 %2934 }
 0xe7d   : > { %v2942_v61 = vadd.f32 1e-05, %v2940_v60  ;;  %v2939_v24 = vmul.f32 0.03125, %v2935_v25 }
 0xe7f   : > { %17501 = vrsqrt.f32 %v2942_v61  ;;  %v2941_v62 = vadd.f32 1e-05, %v2939_v24 }
 0xe81   : > { %17503 = vrsqrt.f32 %v2941_v62 }
 0xe8c   : > { %v17502_v63 = vpop.eup %17501 }
 0xe8d   : > { %v2946_v2 = vmul.f32 %v17502_v63, %v2930_v50 }
 0xe8e   : > { %v17504_v3 = vpop.eup %17503 }
 0xe8f   : > { %v2945_v4 = vmul.f32 %v17504_v3, %v2929_v42  ;;  %v2954_v5 = vmul.f32 %v15259_v0, %v2946_v2 }
 0xe91   : > { %v2953_v7 = vmul.f32 %v15259_v0, %v2945_v4  ;;  %v2962_v9 = vadd.f32 %v15260_v6, %v2954_v5 }
 0xe93   : > { %v2961_v8 = vadd.f32 %v15260_v6, %v2953_v7 }
 0xe95   : > { %16249 = vmatprep.mubr.msk.f32.mxu0 %vm1443_vm3, %v2961_v8 }
 0xe96   : > { %16250 = vmatmul.mubr.msk.f32.vlgmr.msra.gmra.mxu0 %vm1443_vm3, %v2962_v9 }
 0xe97   : > { %16253 = vmatpush3.msra.mxu0 %v3070_v10  ;;  %16284 = vmatprep.mubr.msk.f32.mxu0 %vm17809_vm0, %v17808_v1 }
 0xe98   : > { %16254 = vmatprep.subr.mxu0 %v17808_v1 }
 0xe99   : > { %16255 = vmatpush3.msra.mxu0 %v3069_v11 }
 0xe9a   : > { %16256 = vmatprep.subr.mxu0 %v17808_v1 }
 0xe9b   : > { %16257 = vmatpush3.msra.mxu0 %v3068_v12 }
 0xe9c   : > { %16258 = vmatprep.subr.mxu0 %v17808_v1 }
 0xe9d   : > { %16259 = vmatpush3.msra.mxu0 %v3067_v13 }
 0xe9e   : > { %16260 = vmatprep.subr.mxu0 %v17808_v1 }
 0xe9f   : > { %16261 = vmatpush3.msra.mxu0 %v3066_v14 }
 0xea0   : > { %16262 = vmatprep.subr.mxu0 %v17808_v1 }
 0xea1   : > { %16263 = vmatpush3.msra.mxu0 %v3065_v15 }
 0xea2   : > { %16264 = vmatprep.subr.mxu0 %v17808_v1 }
 0xea3   : > { %16265 = vmatpush3.msra.mxu0 %v3064_v16 }
 0xea4   : > { %16266 = vmatprep.subr.mxu0 %v17808_v1 }
 0xea5   : > { %16267 = vmatpush3.msra.mxu0 %v3063_v17 }
 0xea6   : > { %16268 = vmatprep.subr.mxu0 %v17808_v1 }
 0xea7   : > { %16269 = vmatpush3.msra.mxu0 %v3062_v28 }
 0xea8   : > { %16270 = vmatprep.subr.mxu0 %v17808_v1 }
 0xea9   : > { %16271 = vmatpush3.msra.mxu0 %v3061_v18 }
 0xeaa   : > { %16272 = vmatprep.subr.mxu0 %v17808_v1 }
 0xeab   : > { %16273 = vmatpush3.msra.mxu0 %v3060_v19 }
 0xeac   : > { %16274 = vmatprep.subr.mxu0 %v17808_v1 }
 0xead   : > { %16275 = vmatpush3.msra.mxu0 %v3059_v20 }
 0xeae   : > { %16276 = vmatprep.subr.mxu0 %v17808_v1 }
 0xeaf   : > { %16277 = vmatpush3.msra.mxu0 %v3058_v22 }
 0xeb0   : > { %16278 = vmatprep.subr.mxu0 %v17808_v1 }
 0xeb1   : > { %16279 = vmatpush3.msra.mxu0 %v3057_v23 }
 0xeb2   : > { %16280 = vmatprep.subr.mxu0 %v17808_v1 }
 0xeb3   : > { %16281 = vmatpush3.msra.mxu0 %v3056_v27 }
 0xeb4   : > { %16282 = vmatprep.subr.mxu0 %v17808_v1 }
 0xeb5   : > { %16283 = vmatpush3.msra.mxu0 %v3055_v29 }
 0xeb6   : > { %16285 = vmatmul.mubr.msk.f32.vlgmr.msra.gmra.mxu0 %vm3073_vm8, %v17821_v31  ;;  %16328 = vmatprep.subr.mxu0 %v17808_v1  ;;  %vm5543_vm8 = vcmask 1041408  }
 0xeb7   : > { %16330 = vmatprep.mubr.msk.f32.mxu0 %vm17809_vm0, %v17808_v1 }
 0xf56   : > { %v18299_v35 = vpop.f32.mrf.mxu0 }
 0xf58   : > { %v18301_v36 = vpop.f32.mrf.mxu0 }
 0xf76   : > { %v3143_v38 = vpop.f32.mrf.mxu0 }
 0xf77   : > { %v18304_v39 = vadd.f32 %v3143_v38, %v3076_v37 }
 0xf78   : > { %v16286_v40 = vpop.f32.mrf.mxu0 }
 0xf79   : > { %16296 = vmatmul.mubr.msk.f32.vlgmr.msra.gmra.mxu1 %vm1443_vm3, %v18304_v39 }
 0xf7a   : > { %16300 = vmatprep.mubr.msk.f32.mxu1 %vm17809_vm0, %v17808_v1 }
0x1039   : > { %v3221_v44 = vpop.f32.mrf.mxu1 }
0x103a   : > { %v3222_v45 = vadd.f32 %v3221_v44, %v3151_v41 }
0x103b   : > { %v16297_v46 = vpop.f32.mrf.mxu1 }
0x103c   : > { %3226 = vrot.lane.b32.xlu1 %v3222_v45, %s19957_s22  ;;  %s20031_s22 = sld [smem:[#allocation27_spill]] }
0x1040   : > { %3231 = vrot.lane.b32.xlu1 %v3222_v45, %s19949_s26  ;;  %s20026_s26 = sld [smem:[#allocation24_spill]] }
0x1046   : > { %v3238_v10 = vld [vmem:[%s20026_s26 + $0x8] sm:$0xff]  ;;  %v3237_v22 = vld [vmem:[%s20026_s26] sm:$0xff]  ;;  %v3239_v37 = vld [vmem:[%s20026_s26 + $0x10] sm:$0xff] }
0x1047   : > { %v3240_v46 = vld [vmem:[%s20026_s26 + $0x18] sm:$0xff] }
0x10ae   : > { %v3227_v47 = vpop.permute.xlu1 %3226 }
0x10af   : > { %3230 = vst.msk [vmem:[#allocation2] sm:$0x1] %vm3229_vm9, %v3227_v47 }
0x10b2   : > { %v3232_v48 = vpop.permute.xlu1 %3231 }
0x10b3   : > { %3234 = vst.msk [vmem:[#allocation3] sm:$0x1] %vm3229_vm9, %v3232_v48 }
0x10b6   : > { %v3235_v49 = vld [vmem:[#allocation2] sm:$0x1] }
0x10b7   : > { %v3241_v50 = vmul.f32 %v3235_v49, %v3222_v45 }
0x10b9   : > { %3332 = vrot.lane.b32.xlu0 %v3241_v50, %s19960_s23  ;;  %v3243_v51 = vsel %vm3242_vm10, %v3241_v50, 0.0 }
0x10ba   : > { %3244 = vadd.xlane.f32.xlu1 %v3243_v51  ;;  %v3236_v42 = vld [vmem:[#allocation3] sm:$0x1] }
0x10bb   : > { %16299 = vmatpush3.msk.msra.mxu1 %vm3257_vm11, %v3236_v42 }
0x10bc   : > { %16303 = vmatprep.subr.mxu1 %v17808_v1 }
0x10cb   : > { %3568 = vrot.lane.b32.xlu1 %v3241_v50, %s19953_s2 }
0x10cf   : > { %3732 = vrot.lane.b32.xlu1 %v3241_v50, %s19951_s15 }
0x112b   : > { %v3333_v52 = vpop.permute.xlu0 %3332 }
0x112c   : > { %v3335_v53 = vsel %vm3242_vm10, %v3333_v52, 0.0 }
0x112d   : > { %3336 = vadd.xlane.f32.xlu0 %v3335_v53 }
0x1143   : > { %3345 = vrot.lane.b32.xlu0 %v3236_v42, %s19960_s23  ;;  %v3245_v43 = vpop.xlane.xlu1 %3244 }
0x1144   : > { %v3246_v54 = vmul.f32 0.35355338, %v3245_v43 }
0x1146   : > { %v3247_v55 = vsub.f32 %v3246_v54, %v3246_v54 }
0x1147   : > { %v3569_v56 = vpop.permute.xlu1 %3568 }
0x1148   : > { %v3248_v57 = vmul.f32 1.442695, %v3247_v55  ;;  %v3571_v25 = vsel %vm3242_vm10, %v3569_v56, 0.0 }
0x114a   : > { %17505 = vpow2.f32 %v3248_v57 }
0x114b   : > { %v3733_v58 = vpop.permute.xlu1 %3732 }
0x114c   : > { %v3735_v59 = vsel %vm3242_vm10, %v3733_v58, 0.0  ;;  %vm5539_vm10 = vcmask 15360  }
0x114d   : > { %3736 = vadd.xlane.f32.xlu1 %v3735_v59 }
0x1157   : > { %v17506_v60 = vpop.eup %17505 }
0x1158   : > { %17507 = vrcp.f32 %v17506_v60 }
0x115e   : > { %3745 = vrot.lane.b32.xlu1 %v3236_v42, %s19951_s15  ;;  %s20027_s15 = sld [smem:[#allocation31_spill]] }
0x1162   : > { %3572 = vadd.xlane.f32.xlu0 %v3571_v25 }
0x1164   : > { %v15261_v48 = vld [vmem:[%s20027_s15] ss:$0 sm:$0xff]  ;;  %s20029_s15 = sld [smem:[#allocation28_spill]] }
0x1165   : > { %v17508_v61 = vpop.eup %17507  ;;  %v18364_v50 = vadd.f32 %v18299_v35, %v15261_v48  ;;  %v18373_v51 = vadd.f32 %v15261_v48, %v18301_v36 }
0x1166   : > { %v3252_v24 = vmul.f32 %v17508_v61, %v17506_v60 }
0x1168   : > { %16301 = vmatmul.mubr.msk.f32.vlgmr.msra.gmra.mxu1 %vm3253_vm12, %v3252_v24 }
0x1169   : > { %16305 = vmatprep.mubr.msk.f32.mxu1 %vm17809_vm0, %v17808_v1 }
0x116a   : > { %v3919_v24 = vld [vmem:[%s20029_s15 + $0x18] sm:$0xff] }
0x1178   : > { %3581 = vrot.lane.b32.xlu0 %v3236_v42, %s19953_s2  ;;  %s20028_s2 = sld [smem:[#allocation25_spill]] }
0x117e   : > { %v3896_v43 = vld [vmem:[%s20028_s2] sm:$0x1] }
0x11b6   : > { %v3337_v62 = vpop.xlane.xlu0 %3336 }
0x11b7   : > { %v3338_v63 = vmul.f32 0.35355338, %v3337_v62  ;;  %v3918_v62 = vld [vmem:[%s20029_s15 + $0x10] sm:$0xff] }
0x11b9   : > { %v3339_v0 = vsub.f32 %v3338_v63, %v3338_v63  ;;  %v3916_v63 = vld [vmem:[%s20029_s15] sm:$0xff] }
0x11ba   : > { %v3346_v2 = vpop.permute.xlu0 %3345 }
0x11bb   : > { %v3340_v3 = vmul.f32 1.442695, %v3339_v0  ;;  %16304 = vmatpush3.msk.msra.mxu1 %vm3257_vm11, %v3346_v2 }
0x11bc   : > { %16308 = vmatprep.subr.mxu1 %v17808_v1 }
0x11bd   : > { %17509 = vpow2.f32 %v3340_v3 }
0x11ca   : > { %v17510_v4 = vpop.eup %17509 }
0x11cb   : > { %17511 = vrcp.f32 %v17510_v4 }
0x11d6   : > { %v3737_v5 = vpop.xlane.xlu1 %3736 }
0x11d7   : > { %v3738_v6 = vmul.f32 0.35355338, %v3737_v5  ;;  %v3899_v5 = vld [vmem:[%s20030_s18] sm:$0x1] }
0x11d8   : > { %v17512_v7 = vpop.eup %17511 }
0x11d9   : > { %v3739_v8 = vsub.f32 %v3738_v6, %v3738_v6  ;;  %v3344_v9 = vmul.f32 %v17512_v7, %v17510_v4  ;;  %v3900_v7 = vld [vmem:[%s20031_s22] sm:$0x1] }
0x11da   : > { %v3746_v11 = vpop.permute.xlu1 %3745 }
0x11db   : > { %v3740_v12 = vmul.f32 1.442695, %v3739_v8  ;;  %16306 = vmatmul.mubr.msk.f32.vlgmr.msra.gmra.mxu1 %vm3253_vm12, %v3344_v9  ;;  %16329 = vmatpush3.msk.msra.mxu0 %vm3257_vm11, %v3746_v11 }
0x11dc   : > { %16309 = vmatpush3.msra.mxu1 %v3238_v10  ;;  %16310 = vmatprep.mubr.msk.f32.mxu1 %vm17809_vm0, %v17808_v1  ;;  %v3920_v10 = vld [vmem:[%s20032_s3] sm:$0x1] }
0x11dd   : > { %17513 = vpow2.f32 %v3740_v12  ;;  %16313 = vmatprep.subr.mxu1 %v17808_v1  ;;  %16338 = vmatprep.subr.mxu0 %v17808_v1 }
0x11ea   : > { %v17514_v13 = vpop.eup %17513 }
0x11eb   : > { %17515 = vrcp.f32 %v17514_v13  ;;  %v3573_v28 = vpop.xlane.xlu0 %3572 }
0x11ec   : > { %v3574_v18 = vmul.f32 0.35355338, %v3573_v28 }
0x11ee   : > { %v3575_v19 = vsub.f32 %v3574_v18, %v3574_v18 }
0x11ef   : > { %v3582_v32 = vpop.permute.xlu0 %3581 }
0x11f0   : > { %v3576_v20 = vmul.f32 1.442695, %v3575_v19 }
0x11f2   : > { %17517 = vpow2.f32 %v3576_v20 }
0x11f8   : > { %v17516_v14 = vpop.eup %17515 }
0x11f9   : > { %v3744_v15 = vmul.f32 %v17516_v14, %v17514_v13 }
0x11fb   : > { %16331 = vmatmul.mubr.msk.f32.vlgmr.msra.gmra.mxu0 %vm3253_vm12, %v3744_v15 }
0x11fc   : > { %16346 = vmatprep.mubr.msk.f32.mxu0 %vm17809_vm0, %v17808_v1  ;;  %16339 = vmatpush3.msra.mxu0 %v3919_v24 }
0x11fd   : > { %16340 = vmatprep.subr.mxu0 %v17808_v1 }
0x11fe   : > { %16341 = vmatpush3.msra.mxu0 %v3918_v62 }
0x11ff   : > { %v17518_v21 = vpop.eup %17517  ;;  %16342 = vmatprep.subr.mxu0 %v17808_v1 }
0x1200   : > { %17519 = vrcp.f32 %v17518_v21 }
0x120d   : > { %v17520_v29 = vpop.eup %17519 }
0x120e   : > { %v3580_v33 = vmul.f32 %v17520_v29, %v17518_v21 }
0x1228   : > { %v3327_v16 = vpop.f32.mrf.mxu1 }
0x122a   : > { %v16302_v17 = vpop.f32.mrf.mxu1 }
0x129b   : > { %v3418_v23 = vpop.f32.mrf.mxu1 }
0x129c   : > { %16311 = vmatmul.mubr.msk.f32.vlgmr.msra.gmra.mxu1 %vm1348_vm2, %v3418_v23 }
0x129d   : > { %v16307_v27 = vpop.f32.mrf.mxu1  ;;  %16314 = vmatpush3.msra.mxu1 %v3237_v22  ;;  %16315 = vmatprep.mubr.msk.f32.mxu1 %vm17809_vm0, %v17808_v1 }
0x129e   : > { %16318 = vmatprep.subr.mxu1 %v17808_v1 }
0x12a0   : > { %16316 = vmatmul.mubr.msk.f32.vlgmr.msra.gmra.mxu1 %vm1348_vm2, %v3327_v16 }
0x12a1   : > { %16319 = vmatpush3.msk.msra.mxu1 %vm3257_vm11, %v3582_v32  ;;  %16320 = vmatprep.mubr.msk.f32.mxu1 %vm17809_vm0, %v17808_v1 }
0x12a2   : > { %16323 = vmatprep.subr.mxu1 %v17808_v1 }
0x12a4   : > { %16321 = vmatmul.mubr.msk.f32.vlgmr.msra.gmra.mxu1 %vm3253_vm12, %v3580_v33 }
0x12a5   : > { %16325 = vmatprep.mubr.msk.f32.mxu1 %vm17809_vm0, %v17808_v1  ;;  %16324 = vmatpush3.msra.mxu1 %v3239_v37 }
0x12a6   : > { %16333 = vmatprep.subr.mxu1 %v17808_v1 }
0x12bb   : > { %v3818_v30 = vpop.f32.mrf.mxu0 }
0x12bd   : > { %v16332_v34 = vpop.f32.mrf.mxu0 }
0x135c   : > { %v3491_v38 = vpop.f32.mrf.mxu1 }
0x135e   : > { %v16312_v40 = vpop.f32.mrf.mxu1 }
0x1360   : > { %v3564_v41 = vpop.f32.mrf.mxu1 }
0x1361   : > { %v3565_v44 = vadd.f32 %v3564_v41, %v3491_v38 }
0x1362   : > { %v16317_v45 = vpop.f32.mrf.mxu1 }
0x1364   : > { %v3654_v47 = vpop.f32.mrf.mxu1 }
0x1365   : > { %16326 = vmatmul.mubr.msk.f32.vlgmr.msra.gmra.mxu1 %vm1348_vm2, %v3654_v47 }
0x1366   : > { %v16322_v49 = vpop.f32.mrf.mxu1  ;;  %16334 = vmatpush3.msra.mxu1 %v3240_v46  ;;  %16335 = vmatprep.mubr.msk.f32.mxu1 %vm17809_vm0, %v17808_v1 }
0x1367   : > { %16349 = vmatprep.subr.mxu1 %v17808_v1  ;;  %v3994_v49 = vld [vmem:[%s20037_s9] sm:$0xff] }
0x1369   : > { %16336 = vmatmul.mubr.msk.f32.vlgmr.msra.gmra.mxu1 %vm1348_vm2, %v3818_v30 }
0x136a   : > { %16350 = vmatpush3.xpose.msk.msra.mxu1 %vm1348_vm2, %v18364_v50  ;;  %16353 = vmatprep.mubr.msk.f32.mxu1 %vm17809_vm0, %v17808_v1 }
0x136b   : > { %16351 = vmatprep.subr.mxu1 %v17808_v1 }
0x136e   : > { %16352 = vmatpush3.xpose.msk.msra.mxu1 %vm1348_vm2, %v18373_v51 }
0x136f   : > { %16363 = vmatprep.subr.mxu1 %v17808_v1 }
0x1425   : > { %v3727_v35 = vpop.f32.mrf.mxu1 }
0x1426   : > { %v3731_v52 = vadd.f32 %v3727_v35, %v3565_v44 }
0x1427   : > { %v16327_v42 = vpop.f32.mrf.mxu1 }
0x1429   : > { %v3891_v53 = vpop.f32.mrf.mxu1 }
0x142a   : > { %v3895_v54 = vadd.f32 %v3891_v53, %v3731_v52 }
0x142b   : > { %v16337_v55 = vpop.f32.mrf.mxu1 }
0x142c   : > { %v3897_v56 = vadd.f32 %v3896_v43, %v3895_v54  ;;  %v3995_v54 = vld [vmem:[%s20037_s9 + $0x8] sm:$0xff] }
0x142e   : > { %v3898_v57 = vadd.f32 %v3897_v56, %v18304_v39  ;;  %v3917_v39 = vld [vmem:[%s20029_s15 + $0x8] sm:$0xff] }
0x142f   : > { %16343 = vmatpush3.msra.mxu0 %v3917_v39 }
0x1430   : > { %v3901_v36 = vsel %vm3229_vm9, %v3898_v57, 0.0  ;;  %16344 = vmatprep.subr.mxu0 %v17808_v1 }
0x1431   : > { %3902 = vadd.xlane.f32.xlu0 %v3901_v36  ;;  %16345 = vmatpush3.msra.mxu0 %v3916_v63 }
0x1432   : > { %16356 = vmatprep.subr.mxu0 %v17808_v1 }
0x1447   : > { %4174 = vrot.lane.b32.xlu0 %v18364_v50, %s19960_s23 }
0x14ba   : > { %v3903_v58 = vpop.xlane.xlu0 %3902 }
0x14bb   : > { %v3904_v59 = vmul.f32 0.03125, %v3903_v58 }
0x14bd   : > { %v3905_v60 = vsub.f32 %v3898_v57, %v3904_v59 }
0x14be   : > { %v18403_v14 = vpop.permute.xlu0 %4174 }
0x14bf   : > { %v3906_v25 = vmul.f32 %v3905_v60, %v3905_v60 }
0x14c1   : > { %v3907_v61 = vsel %vm3229_vm9, %v3906_v25, 0.0 }
0x14c2   : > { %3908 = vadd.xlane.f32.xlu1 %v3907_v61 }
0x14d3   : > { %4172 = vrot.lane.b32.xlu1 %v18373_v51, %s19960_s23 }
0x154b   : > { %v3909_v0 = vpop.xlane.xlu1 %3908 }
0x154c   : > { %v3910_v2 = vmul.f32 0.03125, %v3909_v0 }
0x154e   : > { %v3911_v3 = vadd.f32 1e-05, %v3910_v2 }
0x154f   : > { %v18412_v15 = vpop.permute.xlu1 %4172 }
0x1550   : > { %17521 = vrsqrt.f32 %v3911_v3 }
0x155d   : > { %v17522_v4 = vpop.eup %17521 }
0x155e   : > { %v3913_v6 = vmul.f32 %v17522_v4, %v3905_v60 }
0x1560   : > { %v3914_v8 = vmul.f32 %v3913_v6, %v3899_v5 }
0x1562   : > { %v18396_v9 = vadd.f32 %v3914_v8, %v3900_v7 }
0x1564   : > { %16347 = vmatmul.mubr.msk.f32.vlgmr.msra.gmra.mxu0 %vm1443_vm3, %v18396_v9 }
0x1565   : > { %16360 = vmatprep.mubr.msk.f32.mxu0 %vm17809_vm0, %v17808_v1 }
0x1624   : > { %v3990_v11 = vpop.f32.mrf.mxu0 }
0x1625   : > { %v3991_v12 = vadd.f32 %v3990_v11, %v3920_v10 }
0x1626   : > { %v16348_v13 = vpop.f32.mrf.mxu0 }
0x1627   : > { %4170 = vrot.lane.b32.xlu0 %v3991_v12, %s19960_s23  ;;  %16354 = vmatmul.mubr.msk.f32.vlgmr.msra.gmra.mxu1 %vm1348_vm2, %v3991_v12  ;;  %s20033_s23 = smov 96  }
0x1628   : > { %16364 = vmatpush3.xpose.msk.msra.mxu1 %vm1348_vm2, %v18403_v14  ;;  %16367 = vmatprep.mubr.msk.f32.mxu1 %vm17809_vm0, %v17808_v1 }
0x1629   : > { %16365 = vmatprep.subr.mxu1 %v17808_v1 }
0x162c   : > { %16366 = vmatpush3.xpose.msk.msra.mxu1 %vm1348_vm2, %v18412_v15 }
0x162d   : > { %16382 = vmatprep.subr.mxu1 %v17808_v1 }
0x1699   : > { %v4171_v16 = vpop.permute.xlu0 %4170 }
0x169a   : > { %16368 = vmatmul.mubr.msk.f32.vlgmr.msra.gmra.mxu1 %vm1348_vm2, %v4171_v16 }
0x169b   : > { %16384 = vmatprep.mubr.msk.f32.mxu1 %vm17809_vm0, %v17808_v1  ;;  %16383 = vmatpush3.msra.mxu1 %v3994_v49 }
0x169c   : > { %16394 = vmatprep.subr.mxu1 %v17808_v1 }
0x16e7   : > { %v4073_v17 = vpop.f32.mrf.mxu1 }
0x16e8   : > { %v4077_v28 = vmul.f32 0.35355338, %v4073_v17 }
0x16e9   : > { %v16355_v18 = vpop.f32.mrf.mxu1 }
0x16ea   : > { %v4079_v19 = vsel %vm4078_vm13, %v4077_v28, -inf }
0x16eb   : > { %4080 = vmax.xlane.f32.xlu1 %v4079_v19 }
0x16fc   : > { %4090 = vrot.lane.b32.xlu1 %v18373_v51, %s20033_s23 }
0x175a   : > { %v4248_v20 = vpop.f32.mrf.mxu1 }
0x175b   : > { %v4252_v21 = vmul.f32 0.35355338, %v4248_v20 }
0x175c   : > { %v16369_v22 = vpop.f32.mrf.mxu1 }
0x175d   : > { %v4253_v23 = vsel %vm4078_vm13, %v4252_v21, -inf }
0x175e   : > { %4254 = vmax.xlane.f32.xlu0 %v4253_v23 }
0x1774   : > { %4092 = vrot.lane.b32.xlu0 %v18364_v50, %s20033_s23  ;;  %v4081_v27 = vpop.xlane.xlu1 %4080 }
0x1775   : > { %v4082_v29 = vsub.f32 %v4077_v28, %v4081_v27 }
0x1777   : > { %v4083_v32 = vmul.f32 1.442695, %v4082_v29 }
0x1778   : > { %v18438_v41 = vpop.permute.xlu1 %4090 }
0x1779   : > { %17523 = vpow2.f32 %v4083_v32 }
0x1786   : > { %v17524_v33 = vpop.eup %17523 }
0x1787   : > { %v4085_v30 = vsel %vm4078_vm13, %v17524_v33, 0.0 }
0x1793   : > { %4086 = vadd.xlane.f32.xlu0 %v4085_v30 }
0x17a9   : > { %4264 = vrot.lane.b32.xlu0 %v18373_v51, %s20034_s5 }
0x17ad   : > { %4492 = vrot.lane.b32.xlu0 %v18373_v51, %s20035_s6 }
0x17b1   : > { %4742 = vrot.lane.b32.xlu0 %v18364_v50, %s20036_s8 }
0x17b5   : > { %4738 = vrot.lane.b32.xlu0 %v3991_v12, %s20036_s8 }
0x17e7   : > { %v4255_v34 = vpop.xlane.xlu0 %4254 }
0x17e8   : > { %v4256_v37 = vsub.f32 %v4252_v21, %v4255_v34 }
0x17ea   : > { %v4257_v38 = vmul.f32 1.442695, %v4256_v37 }
0x17eb   : > { %v18434_v40 = vpop.permute.xlu0 %4092 }
0x17ec   : > { %17525 = vpow2.f32 %v4257_v38  ;;  %16357 = vmatpush3.msk.msra.mxu0 %vm1655_vm6, %v18434_v40 }
0x17ed   : > { %16358 = vmatprep.subr.mxu0 %v17808_v1 }
0x17ee   : > { %16359 = vmatpush3.msra.mxu0 %v18438_v41 }
0x17ef   : > { %16370 = vmatprep.subr.mxu0 %v17808_v1 }
0x17f9   : > { %v17526_v44 = vpop.eup %17525 }
0x17fa   : > { %v4259_v45 = vsel %vm4078_vm13, %v17526_v44, 0.0 }
0x17fb   : > { %4260 = vadd.xlane.f32.xlu1 %v4259_v45 }
0x180c   : > { %4266 = vrot.lane.b32.xlu1 %v18364_v50, %s20034_s5  ;;  %s20038_s5 = smov 80  }
0x1810   : > { %4494 = vrot.lane.b32.xlu1 %v18364_v50, %s20035_s6 }
0x1814   : > { %4490 = vrot.lane.b32.xlu1 %v3991_v12, %s20035_s6 }
0x1818   : > { %4740 = vrot.lane.b32.xlu1 %v18373_v51, %s20036_s8 }
0x181c   : > { %v4087_v46 = vpop.xlane.xlu0 %4086 }
0x181d   : > { %17527 = vrcp.f32 %v4087_v46 }
0x1820   : > { %v18460_v52 = vpop.permute.xlu0 %4264 }
0x1824   : > { %v18480_v59 = vpop.permute.xlu0 %4492 }
0x1828   : > { %v18486_v25 = vpop.permute.xlu0 %4742 }
0x182a   : > { %v17528_v47 = vpop.eup %17527 }
0x182b   : > { %v4089_v48 = vmul.f32 %v17528_v47, %v17524_v33  ;;  %v3996_v33 = vld [vmem:[%s20037_s9 + $0x10] sm:$0xff]  ;;  %v3997_v47 = vld [vmem:[%s20037_s9 + $0x18] sm:$0xff] }
0x182c   : > { %v4739_v24 = vpop.permute.xlu0 %4738 }
0x182d   : > { %16361 = vmatmul.mubr.msk.f32.vlgmr.msra.gmra.mxu0 %vm1620_vm5, %v4089_v48 }
0x182e   : > { %16374 = vmatprep.mubr.msk.f32.mxu0 %vm17809_vm0, %v17808_v1 }
0x1884   : > { %v4261_v35 = vpop.xlane.xlu1 %4260 }
0x1885   : > { %17529 = vrcp.f32 %v4261_v35 }
0x1888   : > { %v18456_v42 = vpop.permute.xlu1 %4266 }
0x1889   : > { %16371 = vmatpush3.msk.msra.mxu0 %vm1655_vm6, %v18456_v42 }
0x188a   : > { %16372 = vmatprep.subr.mxu0 %v17808_v1 }
0x188b   : > { %16373 = vmatpush3.msra.mxu0 %v18460_v52 }
0x188c   : > { %16377 = vmatprep.subr.mxu0 %v17808_v1  ;;  %v18473_v36 = vpop.permute.xlu1 %4494 }
0x1890   : > { %v4491_v60 = vpop.permute.xlu1 %4490 }
0x1892   : > { %v17530_v53 = vpop.eup %17529 }
0x1893   : > { %v4263_v43 = vmul.f32 %v17530_v53, %v17526_v44 }
0x1894   : > { %v18494_v61 = vpop.permute.xlu1 %4740 }
0x1895   : > { %16375 = vmatmul.mubr.msk.f32.vlgmr.msra.gmra.mxu0 %vm1620_vm5, %v4263_v43 }
0x1896   : > { %16378 = vmatpush3.msra.mxu0 %v3995_v54  ;;  %16379 = vmatprep.mubr.msk.f32.mxu0 %vm17809_vm0, %v17808_v1 }
0x1897   : > { %16387 = vmatprep.subr.mxu0 %v17808_v1 }
0x18ed   : > { %v4166_v55 = vpop.f32.mrf.mxu0 }
0x18ee   : > { %16385 = vmatmul.mubr.msk.f32.vlgmr.msra.gmra.mxu1 %vm1348_vm2, %v4166_v55 }
0x18ef   : > { %v16362_v56 = vpop.f32.mrf.mxu0  ;;  %16398 = vmatprep.mubr.msk.f32.mxu1 %vm17809_vm0, %v17808_v1 }
0x1955   : > { %v4340_v57 = vpop.f32.mrf.mxu0 }
0x1956   : > { %16380 = vmatmul.mubr.msk.f32.vlgmr.msra.gmra.mxu0 %vm1348_vm2, %v4340_v57 }
0x1957   : > { %16388 = vmatpush3.xpose.msk.msra.mxu0 %vm1348_vm2, %v18473_v36  ;;  %v16376_v58 = vpop.f32.mrf.mxu0  ;;  %16391 = vmatprep.mubr.msk.f32.mxu0 %vm17809_vm0, %v17808_v1 }
0x1958   : > { %16389 = vmatprep.subr.mxu0 %v17808_v1 }
0x195b   : > { %16390 = vmatpush3.xpose.msk.msra.mxu0 %vm1348_vm2, %v18480_v59 }
0x195c   : > { %16406 = vmatprep.subr.mxu0 %v17808_v1 }
0x195e   : > { %16392 = vmatmul.mubr.msk.f32.vlgmr.msra.gmra.mxu0 %vm1348_vm2, %v4491_v60 }
0x195f   : > { %16407 = vmatpush3.xpose.msk.msra.mxu0 %vm1348_vm2, %v18486_v25  ;;  %16410 = vmatprep.mubr.msk.f32.mxu0 %vm17809_vm0, %v17808_v1 }
0x1960   : > { %16408 = vmatprep.subr.mxu0 %v17808_v1 }
0x1963   : > { %16409 = vmatpush3.xpose.msk.msra.mxu0 %vm1348_vm2, %v18494_v61 }
0x1964   : > { %16425 = vmatprep.subr.mxu0 %v17808_v1 }
0x1966   : > { %16411 = vmatmul.mubr.msk.f32.vlgmr.msra.gmra.mxu0 %vm1348_vm2, %v4739_v24 }
0x1967   : > { %16433 = vmatprep.mubr.msk.f32.mxu0 %vm17809_vm0, %v17808_v1 }
0x19ae   : > { %v18502_v62 = vpop.f32.mrf.mxu1 }
0x19b0   : > { %v16386_v39 = vpop.f32.mrf.mxu1 }
0x1a16   : > { %v18504_v63 = vpop.f32.mrf.mxu0 }
0x1a17   : > { %v4487_v48 = vadd.f32 %v18502_v62, %v18504_v63 }
0x1a18   : > { %v16381_v0 = vpop.f32.mrf.mxu0 }
0x1a1e   : > { %v4568_v2 = vpop.f32.mrf.mxu0 }
0x1a1f   : > { %v4572_v3 = vmul.f32 0.35355338, %v4568_v2 }
0x1a20   : > { %v16393_v4 = vpop.f32.mrf.mxu0 }
0x1a21   : > { %v4573_v5 = vsel %vm4078_vm13, %v4572_v3, -inf }
0x1a22   : > { %4574 = vmax.xlane.f32.xlu1 %v4573_v5 }
0x1a26   : > { %v4816_v6 = vpop.f32.mrf.mxu0 }
0x1a27   : > { %v4820_v8 = vmul.f32 0.35355338, %v4816_v6 }
0x1a28   : > { %v16412_v7 = vpop.f32.mrf.mxu0 }
0x1a29   : > { %v4821_v10 = vsel %vm4078_vm13, %v4820_v8, -inf  ;;  %v5092_v7 = vld [vmem:[%s20042_s14 + $0x38] sm:$0xff] }
0x1a33   : > { %4584 = vrot.lane.b32.xlu1 %v18373_v51, %s20038_s5 }
0x1a57   : > { %4822 = vmax.xlane.f32.xlu1 %v4821_v10  ;;  %v5090_v10 = vld [vmem:[%s20042_s14 + $0x28] sm:$0xff] }
0x1a68   : > { %4832 = vrot.lane.b32.xlu1 %v18373_v51, %s20039_s13 }
0x1aab   : > { %v4575_v11 = vpop.xlane.xlu1 %4574 }
0x1aac   : > { %v4576_v12 = vsub.f32 %v4572_v3, %v4575_v11  ;;  %v5089_v11 = vld [vmem:[%s20042_s14 + $0x20] sm:$0xff] }
0x1aae   : > { %v4577_v13 = vmul.f32 1.442695, %v4576_v12  ;;  %v5088_v12 = vld [vmem:[%s20042_s14 + $0x18] sm:$0xff] }
0x1aaf   : > { %v18515_v28 = vpop.permute.xlu1 %4584 }
0x1ab0   : > { %17531 = vpow2.f32 %v4577_v13 }
0x1abd   : > { %v17532_v16 = vpop.eup %17531 }
0x1abe   : > { %v4579_v17 = vsel %vm4078_vm13, %v17532_v16, 0.0 }
0x1abf   : > { %4580 = vadd.xlane.f32.xlu0 %v4579_v17 }
0x1ad5   : > { %4586 = vrot.lane.b32.xlu0 %v18364_v50, %s20038_s5  ;;  %s20041_s5 = sld [smem:[#allocation36_spill]] }
0x1adb   : > { %v5009_v4 = vld [vmem:[%s20041_s5 + $0x18] sm:$0xff]  ;;  %v5008_v5 = vld [vmem:[%s20041_s5 + $0x10] sm:$0xff]  ;;  %v5006_v6 = vld [vmem:[%s20041_s5] sm:$0xff] }
0x1adc   : > { %16426 = vmatpush3.msra.mxu0 %v5009_v4  ;;  %v5168_v4 = vld [vmem:[%s20047_s25] sm:$0x1] }
0x1add   : > { %16427 = vmatprep.subr.mxu0 %v17808_v1 }
0x1ade   : > { %16428 = vmatpush3.msra.mxu0 %v5008_v5 }
0x1adf   : > { %16429 = vmatprep.subr.mxu0 %v17808_v1 }
0x1ae0   : > { %v4823_v18 = vpop.xlane.xlu1 %4822 }
0x1ae1   : > { %v4824_v19 = vsub.f32 %v4820_v8, %v4823_v18  ;;  %v5091_v8 = vld [vmem:[%s20042_s14 + $0x30] sm:$0xff] }
0x1ae3   : > { %v4825_v20 = vmul.f32 1.442695, %v4824_v19  ;;  %v4989_v19 = vld [vmem:[%s20043_s17] sm:$0x1] }
0x1ae4   : > { %v18539_v45 = vpop.permute.xlu1 %4832 }
0x1ae5   : > { %17533 = vpow2.f32 %v4825_v20 }
0x1af2   : > { %v17534_v21 = vpop.eup %17533 }
0x1af3   : > { %v4827_v22 = vsel %vm4078_vm13, %v17534_v21, 0.0 }
0x1af4   : > { %4828 = vadd.xlane.f32.xlu0 %v4827_v22 }
0x1b0a   : > { %4834 = vrot.lane.b32.xlu0 %v18364_v50, %s20039_s13  ;;  %s20040_s13 = sld [smem:[#allocation33_spill]] }
0x1b10   : > { %v4986_v56 = vld [vmem:[%s20040_s13] sm:$0x1] }
0x1b48   : > { %v4581_v23 = vpop.xlane.xlu0 %4580 }
0x1b49   : > { %17535 = vrcp.f32 %v4581_v23 }
0x1b4c   : > { %v18520_v27 = vpop.permute.xlu0 %4586 }
0x1b4d   : > { %16395 = vmatpush3.msk.msra.mxu1 %vm1655_vm6, %v18520_v27 }
0x1b4e   : > { %16396 = vmatprep.subr.mxu1 %v17808_v1 }
0x1b4f   : > { %16397 = vmatpush3.msra.mxu1 %v18515_v28 }
0x1b50   : > { %16401 = vmatprep.subr.mxu1 %v17808_v1 }
0x1b56   : > { %v17536_v29 = vpop.eup %17535 }
0x1b57   : > { %v4583_v32 = vmul.f32 %v17536_v29, %v17532_v16  ;;  %v5087_v29 = vld [vmem:[%s20042_s14 + $0x10] sm:$0xff] }
0x1b59   : > { %16399 = vmatmul.mubr.msk.f32.vlgmr.msra.gmra.mxu1 %vm1620_vm5, %v4583_v32  ;;  %v5086_v32 = vld [vmem:[%s20042_s14 + $0x8] sm:$0xff] }
0x1b5a   : > { %16402 = vmatpush3.msra.mxu1 %v3996_v33  ;;  %16403 = vmatprep.mubr.msk.f32.mxu1 %vm17809_vm0, %v17808_v1  ;;  %v5085_v33 = vld [vmem:[%s20042_s14] sm:$0xff] }
0x1b5b   : > { %16413 = vmatprep.subr.mxu1 %v17808_v1 }
0x1b7d   : > { %v4829_v30 = vpop.xlane.xlu0 %4828 }
0x1b7e   : > { %17537 = vrcp.f32 %v4829_v30  ;;  %v5010_v30 = vld [vmem:[%s20045_s21] sm:$0x1] }
0x1b81   : > { %v18532_v38 = vpop.permute.xlu0 %4834 }
0x1b8b   : > { %v17538_v34 = vpop.eup %17537 }
0x1b8c   : > { %v4831_v46 = vmul.f32 %v17538_v34, %v17534_v21  ;;  %v4990_v21 = vld [vmem:[%s20044_s19] sm:$0x1] }
0x1c19   : > { %v4660_v37 = vpop.f32.mrf.mxu1 }
0x1c1a   : > { %16404 = vmatmul.mubr.msk.f32.vlgmr.msra.gmra.mxu1 %vm1348_vm2, %v4660_v37 }
0x1c1b   : > { %16414 = vmatpush3.msk.msra.mxu1 %vm1655_vm6, %v18532_v38  ;;  %v16400_v44 = vpop.f32.mrf.mxu1  ;;  %16417 = vmatprep.mubr.msk.f32.mxu1 %vm17809_vm0, %v17808_v1 }
0x1c1c   : > { %16415 = vmatprep.subr.mxu1 %v17808_v1 }
0x1c1d   : > { %16416 = vmatpush3.msra.mxu1 %v18539_v45 }
0x1c1e   : > { %16418 = vmatmul.mubr.msk.f32.vlgmr.msra.gmra.mxu1 %vm1620_vm5, %v4831_v46  ;;  %16420 = vmatprep.subr.mxu1 %v17808_v1 }
0x1c1f   : > { %16422 = vmatprep.mubr.msk.f32.mxu1 %vm17809_vm0, %v17808_v1  ;;  %16421 = vmatpush3.msra.mxu1 %v3997_v47  ;;  %v5093_v47 = vld [vmem:[%s20046_s24] sm:$0x1] }
0x1c20   : > { %16436 = vmatprep.subr.mxu1 %v17808_v1 }
0x1cda   : > { %v4733_v49 = vpop.f32.mrf.mxu1 }
0x1cdb   : > { %v4737_v35 = vadd.f32 %v4733_v49, %v4487_v48 }
0x1cdc   : > { %v16405_v53 = vpop.f32.mrf.mxu1 }
0x1cde   : > { %v4908_v43 = vpop.f32.mrf.mxu1 }
0x1cdf   : > { %16423 = vmatmul.mubr.msk.f32.vlgmr.msra.gmra.mxu1 %vm1348_vm2, %v4908_v43 }
0x1ce0   : > { %v16419_v54 = vpop.f32.mrf.mxu1  ;;  %16452 = vmatprep.mubr.msk.f32.mxu1 %vm17809_vm0, %v17808_v1  ;;  %16437 = vmatpush3.msra.mxu1 %v5092_v7 }
0x1ce1   : > { %16438 = vmatprep.subr.mxu1 %v17808_v1 }
0x1ce2   : > { %16439 = vmatpush3.msra.mxu1 %v5091_v8  ;;  %v17695_v8 = vld [vmem:[%s20022_s11 + $0x78] sm:$0xff] }
0x1ce3   : > { %16440 = vmatprep.subr.mxu1 %v17808_v1 }
0x1ce4   : > { %16441 = vmatpush3.msra.mxu1 %v5090_v10  ;;  %v17696_v10 = vld [vmem:[%s20022_s11 + $0x70] sm:$0xff] }
0x1ce5   : > { %16442 = vmatprep.subr.mxu1 %v17808_v1 }
0x1ce6   : > { %16443 = vmatpush3.msra.mxu1 %v5089_v11  ;;  %v17697_v11 = vld [vmem:[%s20022_s11 + $0x68] sm:$0xff] }
0x1ce7   : > { %16444 = vmatprep.subr.mxu1 %v17808_v1 }
0x1ce8   : > { %16445 = vmatpush3.msra.mxu1 %v5088_v12  ;;  %v17698_v12 = vld [vmem:[%s20022_s11 + $0x60] sm:$0xff] }
0x1ce9   : > { %16446 = vmatprep.subr.mxu1 %v17808_v1 }
0x1cea   : > { %16447 = vmatpush3.msra.mxu1 %v5087_v29  ;;  %v17708_v29 = vld [vmem:[%s20022_s11 + $0x10] sm:$0xff] }
0x1ceb   : > { %16448 = vmatprep.subr.mxu1 %v17808_v1 }
0x1cec   : > { %16449 = vmatpush3.msra.mxu1 %v5086_v32  ;;  %v17709_v32 = vld [vmem:[%s20022_s11 + $0x8] sm:$0xff] }
0x1ced   : > { %16450 = vmatprep.subr.mxu1 %v17808_v1 }
0x1cee   : > { %16451 = vmatpush3.msra.mxu1 %v5085_v33  ;;  %v17710_v33 = vld [vmem:[%s20022_s11] sm:$0xff] }
0x1cef   : > { %16501 = vmatprep.subr.mxu1 %v17808_v1 }
0x1d9f   : > { %v4981_v55 = vpop.f32.mrf.mxu1 }
0x1da0   : > { %v4985_v57 = vadd.f32 %v4981_v55, %v4737_v35 }
0x1da1   : > { %v16424_v58 = vpop.f32.mrf.mxu1 }
0x1da2   : > { %v4987_v60 = vadd.f32 %v4986_v56, %v4985_v57 }
0x1da4   : > { %v4988_v24 = vadd.f32 %v4987_v60, %v18396_v9  ;;  %v5007_v9 = vld [vmem:[%s20041_s5 + $0x8] sm:$0xff]  ;;  %v5188_v60 = vld [vmem:[%s18025_s20 + $0x18] sm:$0xff] }
0x1da5   : > { %16430 = vmatpush3.msra.mxu0 %v5007_v9  ;;  %v5169_v9 = vld [vmem:[%s18020_s12] sm:$0x1] }
0x1da6   : > { %v4991_v62 = vsel %vm3229_vm9, %v4988_v24, 0.0  ;;  %16431 = vmatprep.subr.mxu0 %v17808_v1 }
0x1da7   : > { %4992 = vadd.xlane.f32.xlu1 %v4991_v62  ;;  %16432 = vmatpush3.msra.mxu0 %v5006_v6  ;;  %v5186_v62 = vld [vmem:[%s18025_s20 + $0x8] sm:$0xff] }
0x1da8   : > { %16455 = vmatprep.subr.mxu0 %v17808_v1 }
0x1e30   : > { %v4993_v39 = vpop.xlane.xlu1 %4992 }
0x1e31   : > { %v4994_v63 = vmul.f32 0.03125, %v4993_v39  ;;  %v5185_v39 = vld [vmem:[%s18025_s20] sm:$0xff] }
0x1e33   : > { %v4995_v0 = vsub.f32 %v4988_v24, %v4994_v63  ;;  %v5187_v24 = vld [vmem:[%s18025_s20 + $0x10] sm:$0xff] }
0x1e35   : > { %v4996_v2 = vmul.f32 %v4995_v0, %v4995_v0 }
0x1e37   : > { %v4997_v3 = vsel %vm3229_vm9, %v4996_v2, 0.0 }
0x1e38   : > { %4998 = vadd.xlane.f32.xlu0 %v4997_v3 }
0x1ec1   : > { %v4999_v13 = vpop.xlane.xlu0 %4998 }
0x1ec2   : > { %v5000_v16 = vmul.f32 0.03125, %v4999_v13  ;;  %v17699_v13 = vld [vmem:[%s20022_s11 + $0x58] sm:$0xff] }
0x1ec4   : > { %v5001_v17 = vadd.f32 1e-05, %v5000_v16  ;;  %v17700_v16 = vld [vmem:[%s20022_s11 + $0x50] sm:$0xff] }
0x1ec6   : > { %17539 = vrsqrt.f32 %v5001_v17  ;;  %v17701_v17 = vld [vmem:[%s20022_s11 + $0x48] sm:$0xff] }
0x1ed3   : > { %v17540_v18 = vpop.eup %17539 }
0x1ed4   : > { %v5003_v20 = vmul.f32 %v17540_v18, %v4995_v0  ;;  %v17702_v18 = vld [vmem:[%s20022_s11 + $0x40] sm:$0xff] }
0x1ed6   : > { %v5004_v22 = vmul.f32 %v5003_v20, %v4989_v19  ;;  %v17703_v19 = vld [vmem:[%s20022_s11 + $0x38] sm:$0xff]  ;;  %v17704_v20 = vld [vmem:[%s20022_s11 + $0x30] sm:$0xff] }
0x1ed8   : > { %v5005_v23 = vadd.f32 %v5004_v22, %v4990_v21  ;;  %v17705_v21 = vld [vmem:[%s20022_s11 + $0x28] sm:$0xff]  ;;  %v17706_v22 = vld [vmem:[%s20022_s11 + $0x20] sm:$0xff] }
0x1eda   : > { %16434 = vmatmul.mubr.msk.f32.vlgmr.msra.gmra.mxu0 %vm1443_vm3, %v5005_v23 }
0x1edb   : > { %16463 = vmatprep.mubr.msk.f32.mxu0 %vm17809_vm0, %v17808_v1  ;;  %16456 = vmatpush3.msra.mxu0 %v5188_v60 }
0x1edc   : > { %16457 = vmatprep.subr.mxu0 %v17808_v1 }
0x1edd   : > { %16458 = vmatpush3.msra.mxu0 %v5187_v24 }
0x1ede   : > { %16459 = vmatprep.subr.mxu0 %v17808_v1 }
0x1edf   : > { %16460 = vmatpush3.msra.mxu0 %v5186_v62 }
0x1ee0   : > { %16461 = vmatprep.subr.mxu0 %v17808_v1 }
0x1ee1   : > { %16462 = vmatpush3.msra.mxu0 %v5185_v39 }
0x1ee2   : > { %16466 = vmatprep.subr.mxu0 %v17808_v1 }
0x1f9a   : > { %v5080_v34 = vpop.f32.mrf.mxu0 }
0x1f9b   : > { %v5081_v37 = vadd.f32 %v5080_v34, %v5010_v30  ;;  %v5189_v30 = vld [vmem:[%s18030_s27] sm:$0x1] }
0x1f9c   : > { %v16435_v44 = vpop.f32.mrf.mxu0 }
0x1f9d   : > { %v5084_v46 = vmax.f32 %v5081_v37, 0.0 }
0x1f9f   : > { %16453 = vmatmul.mubr.msk.f32.vlgmr.msra.gmra.mxu1 %vm1270_vm1, %v5084_v46 }
0x1fa0   : > { %16509 = vmatprep.mubr.msk.f32.mxu1 %vm17809_vm0, %v17808_v1 }
0x205f   : > { %v5163_v48 = vpop.f32.mrf.mxu1 }
0x2060   : > { %v5164_v49 = vadd.f32 %v5163_v48, %v5093_v47 }
0x2061   : > { %v16454_v35 = vpop.f32.mrf.mxu1 }
0x2062   : > { %v5167_v53 = vadd.f32 %v5164_v49, %v5005_v23  ;;  %v17707_v23 = vld [vmem:[%s20022_s11 + $0x18] sm:$0xff] }
0x2064   : > { %v5170_v43 = vsel %vm3229_vm9, %v5167_v53, 0.0 }
0x2065   : > { %5171 = vadd.xlane.f32.xlu0 %v5170_v43 }
0x20ee   : > { %v5172_v54 = vpop.xlane.xlu0 %5171 }
0x20ef   : > { %v5173_v55 = vmul.f32 0.03125, %v5172_v54 }
0x20f1   : > { %v5174_v56 = vsub.f32 %v5167_v53, %v5173_v55 }
0x20f3   : > { %v5175_v57 = vmul.f32 %v5174_v56, %v5174_v56 }
0x20f5   : > { %v5176_v58 = vsel %vm3229_vm9, %v5175_v57, 0.0  ;;  %v5361_v57 = vld [vmem:[%s20023_s0 + $0x18] sm:$0xff] }
0x20f6   : > { %5177 = vadd.xlane.f32.xlu1 %v5176_v58  ;;  %v5360_v58 = vld [vmem:[%s20023_s0 + $0x10] sm:$0xff]  ;;  %16502 = vmatpush3.msra.mxu1 %v5361_v57 }
0x20f7   : > { %16503 = vmatprep.subr.mxu1 %v17808_v1 }
0x20f8   : > { %16504 = vmatpush3.msra.mxu1 %v5360_v58 }
0x20f9   : > { %16505 = vmatprep.subr.mxu1 %v17808_v1 }
0x217f   : > { %v5178_v63 = vpop.xlane.xlu1 %5177 }
0x2180   : > { %v5179_v0 = vmul.f32 0.03125, %v5178_v63 }
0x2182   : > { %v5180_v2 = vadd.f32 1e-05, %v5179_v0  ;;  %v5359_v0 = vld [vmem:[%s20023_s0 + $0x8] sm:$0xff] }
0x2183   : > { %16506 = vmatpush3.msra.mxu1 %v5359_v0 }
0x2184   : > { %17541 = vrsqrt.f32 %v5180_v2  ;;  %16507 = vmatprep.subr.mxu1 %v17808_v1  ;;  %v5358_v2 = vld [vmem:[%s20023_s0] sm:$0xff] }
0x2185   : > { %16508 = vmatpush3.msra.mxu1 %v5358_v2 }
0x2186   : > { %16512 = vmatprep.subr.mxu1 %v17808_v1 }
0x2191   : > { %v17542_v3 = vpop.eup %17541 }
0x2192   : > { %v5182_v5 = vmul.f32 %v17542_v3, %v5174_v56  ;;  %v5287_v3 = vld [vmem:[%s20024_s16 + $0x1] sm:$0x1] }
0x2194   : > { %v5183_v6 = vmul.f32 %v5182_v5, %v5168_v4 }
0x2196   : > { %v5184_v7 = vadd.f32 %v5183_v6, %v5169_v9  ;;  %v5362_v6 = vld [vmem:[%s20025_s1] sm:$0x1] }
0x2198   : > { %16464 = vmatmul.mubr.msk.f32.vlgmr.msra.gmra.mxu0 %vm1443_vm3, %v5184_v7 }
0x2199   : > { %16467 = vmatpush3.msra.mxu0 %v17695_v8  ;;  %16498 = vmatprep.mubr.msk.f32.mxu0 %vm17809_vm0, %v17808_v1 }
0x219a   : > { %16468 = vmatprep.subr.mxu0 %v17808_v1 }
0x219b   : > { %16469 = vmatpush3.msra.mxu0 %v17696_v10 }
0x219c   : > { %16470 = vmatprep.subr.mxu0 %v17808_v1 }
0x219d   : > { %16471 = vmatpush3.msra.mxu0 %v17697_v11 }
0x219e   : > { %16472 = vmatprep.subr.mxu0 %v17808_v1 }
0x219f   : > { %16473 = vmatpush3.msra.mxu0 %v17698_v12 }
0x21a0   : > { %16474 = vmatprep.subr.mxu0 %v17808_v1 }
0x21a1   : > { %16475 = vmatpush3.msra.mxu0 %v17699_v13 }
0x21a2   : > { %16476 = vmatprep.subr.mxu0 %v17808_v1 }
0x21a3   : > { %16477 = vmatpush3.msra.mxu0 %v17700_v16 }
0x21a4   : > { %16478 = vmatprep.subr.mxu0 %v17808_v1 }
0x21a5   : > { %16479 = vmatpush3.msra.mxu0 %v17701_v17 }
0x21a6   : > { %16480 = vmatprep.subr.mxu0 %v17808_v1 }
0x21a7   : > { %16481 = vmatpush3.msra.mxu0 %v17702_v18 }
0x21a8   : > { %16482 = vmatprep.subr.mxu0 %v17808_v1 }
0x21a9   : > { %16483 = vmatpush3.msra.mxu0 %v17703_v19 }
0x21aa   : > { %16484 = vmatprep.subr.mxu0 %v17808_v1 }
0x21ab   : > { %16485 = vmatpush3.msra.mxu0 %v17704_v20 }
0x21ac   : > { %16486 = vmatprep.subr.mxu0 %v17808_v1 }
0x21ad   : > { %16487 = vmatpush3.msra.mxu0 %v17705_v21 }
0x21ae   : > { %16488 = vmatprep.subr.mxu0 %v17808_v1 }
0x21af   : > { %16489 = vmatpush3.msra.mxu0 %v17706_v22 }
0x21b0   : > { %16490 = vmatprep.subr.mxu0 %v17808_v1 }
0x21b1   : > { %16491 = vmatpush3.msra.mxu0 %v17707_v23 }
0x21b2   : > { %16492 = vmatprep.subr.mxu0 %v17808_v1 }
0x21b3   : > { %16493 = vmatpush3.msra.mxu0 %v17708_v29 }
0x21b4   : > { %16494 = vmatprep.subr.mxu0 %v17808_v1 }
0x21b5   : > { %16495 = vmatpush3.msra.mxu0 %v17709_v32 }
0x21b6   : > { %16496 = vmatprep.subr.mxu0 %v17808_v1 }
0x21b7   : > { %16497 = vmatpush3.msra.mxu0 %v17710_v33 }
0x21b8   : > { %16542 = vmatprep.subr.mxu0 %v17808_v1 }
0x2258   : > { %v5259_v34 = vpop.f32.mrf.mxu0 }
0x2259   : > { %v5260_v37 = vadd.f32 %v5259_v34, %v5189_v30 }
0x225a   : > { %v16465_v44 = vpop.f32.mrf.mxu0 }
0x225b   : > { %5263 = vst [vmem:[%s18643_s29] sm:$0x1] %v5260_v37  ;;  %v5264_v46 = vsel %vm3257_vm11, %v5260_v37, -inf }
0x225c   : > { %5265 = vmax.xlane.f32.xlu0 %v5264_v46 }
0x22e5   : > { %v5266_v47 = vpop.xlane.xlu0 %5265 }
0x22e6   : > { %vm5267_vm14 = vcmp.eq.f32.partialorder %v5260_v37, %v5266_v47 }
0x22e7   : > { %v5268_v48 = vsel %vm5267_vm14, %v18279_v26, 128 }
0x22e8   : > { %v5269_v49 = vsel %vm3257_vm11, %v5268_v48, 2147483647 }
0x22e9   : > { %v5271_v35 = vshra.s32 %v5269_v49, 16  ;;  %v5270_v43 = vand.u32 65535, %v5269_v49 }
0x22eb   : > { %v5273_v53 = vcvt.s32.f32 %v5271_v35  ;;  %v5272_v55 = vcvt.s32.f32 %v5270_v43 }
0x22ed   : > { %5274 = vmin.xlane.f32.xlu1 %v5273_v53 }
0x2376   : > { %v5275_v54 = vpop.xlane.xlu1 %5274 }
0x2377   : > { %vm5276_vm15 = vcmp.eq.f32.partialorder %v5273_v53, %v5275_v54  ;;  %v5281_v60 = vcvt.f32.s32 %v5275_v54 }
0x2378   : > { %v5277_v56 = vsel %vm5276_vm15, %v5272_v55, inf }
0x2379   : > { %5278 = vmin.xlane.f32.xlu0 %v5277_v56  ;;  %v5282_v62 = vshll.u32 %v5281_v60, 16 }
0x2402   : > { %v5279_v24 = vpop.xlane.xlu0 %5278 }
0x2403   : > { %v5280_v39 = vcvt.f32.s32 %v5279_v24 }
0x2405   : > { %v5283_v63 = vadd.s32 %v5282_v62, %v5280_v39 }
0x2407   : > { %vm5284_vm4 = vcmp.eq.s32.totalorder %v18279_v26, %v5283_v63 }
0x2408   : > { %16499 = vmatmul.mubr.msk.f32.vlgmr.msra.gmra.mxu0 %vm5284_vm4, %v17821_v31  ;;  %vm7984_vm4 = vcmask 16384  }
0x2409   : > { %16544 = vmatprep.mubr.msk.f32.mxu0 %vm17809_vm0, %v17808_v1 }
0x24c8   : > { %v5354_v4 = vpop.f32.mrf.mxu0 }
0x24c9   : > { %v18662_v5 = vadd.f32 %v5354_v4, %v5287_v3 }
0x24ca   : > { %v16500_v9 = vpop.f32.mrf.mxu0 }
0x24cb   : > { %16510 = vmatmul.mubr.msk.f32.vlgmr.msra.gmra.mxu1 %vm1443_vm3, %v18662_v5 }
0x24cc   : > { %16514 = vmatprep.mubr.msk.f32.mxu1 %vm17809_vm0, %v17808_v1 }
0x258b   : > { %v5432_v7 = vpop.f32.mrf.mxu1 }
0x258c   : > { %v18669_v8 = vadd.f32 %v5432_v7, %v5362_v6 }
0x258d   : > { %v16511_v10 = vpop.f32.mrf.mxu1 }
0x258e   : > { %5437 = vrot.lane.b32.xlu1 %v18669_v8, %s20033_s23 }
0x2600   : > { %v5438_v11 = vpop.permute.xlu1 %5437 }
0x2601   : > { %5440 = vst.msk [vmem:[#allocation2 + $0x1] sm:$0x1] %vm3229_vm9, %v5438_v11  ;;  %v5448_v11 = vld [vmem:[%s20026_s26 + $0x8] sm:$0xff] }
0x2608   : > { %v5445_v12 = vld [vmem:[#allocation2] sm:$0x3] }
0x2609   : > { %5619 = vrot.lane.b32.xlu1 %v5445_v12, %s20049_s10  ;;  %16513 = vmatpush3.xpose.msk.msra.mxu1 %vm1348_vm2, %v5445_v12 }
0x260a   : > { %16517 = vmatprep.subr.mxu1 %v17808_v1 }
0x260c   : > { %16515 = vmatmul.mubr.msk.f32.vlgmr.msra.gmra.mxu1 %vm1348_vm2, %v18669_v8 }
0x260d   : > { %5617 = vrot.lane.b32.xlu1 %v18669_v8, %s20049_s10  ;;  %16519 = vmatprep.mubr.msk.f32.mxu1 %vm17809_vm0, %v17808_v1 }
0x2611   : > { %5932 = vrot.lane.b32.xlu1 %v5445_v12, %s20035_s6 }
0x2615   : > { %5930 = vrot.lane.b32.xlu1 %v18669_v8, %s20035_s6 }
0x267b   : > { %v5620_v13 = vpop.permute.xlu1 %5619 }
0x267f   : > { %v5618_v16 = vpop.permute.xlu1 %5617 }
0x2683   : > { %v5933_v17 = vpop.permute.xlu1 %5932 }
0x2684   : > { %16543 = vmatpush3.xpose.msk.msra.mxu0 %vm1348_vm2, %v5933_v17 }
0x2685   : > { %16552 = vmatprep.subr.mxu0 %v17808_v1 }
0x2687   : > { %v5931_v18 = vpop.permute.xlu1 %5930 }
0x2688   : > { %16545 = vmatmul.mubr.msk.f32.vlgmr.msra.gmra.mxu0 %vm1348_vm2, %v5931_v18 }
0x2689   : > { %16554 = vmatprep.mubr.msk.f32.mxu0 %vm17809_vm0, %v17808_v1 }
0x26cc   : > { %v5522_v19 = vpop.f32.mrf.mxu1 }
0x26cd   : > { %v5526_v20 = vmul.f32 0.35355338, %v5522_v19 }
0x26ce   : > { %v16516_v21 = vpop.f32.mrf.mxu1 }
0x26cf   : > { %v5528_v22 = vsel %vm5527_vm7, %v5526_v20, -inf }
0x26d0   : > { %5529 = vmax.xlane.f32.xlu0 %v5528_v22 }
0x2748   : > { %v6004_v23 = vpop.f32.mrf.mxu0 }
0x2749   : > { %v6008_v39 = vmul.f32 0.35355338, %v6004_v23  ;;  %v5449_v23 = vld [vmem:[%s20026_s26 + $0x10] sm:$0xff] }
0x274a   : > { %v16546_v29 = vpop.f32.mrf.mxu0  ;;  %16553 = vmatpush3.msra.mxu0 %v5449_v23 }
0x274b   : > { %v6009_v0 = vsel %vm5527_vm7, %v6008_v39, -inf  ;;  %16562 = vmatprep.subr.mxu0 %v17808_v1 }
0x2759   : > { %v5530_v32 = vpop.xlane.xlu0 %5529 }
0x275a   : > { %v5531_v33 = vsub.f32 %v5526_v20, %v5530_v32 }
0x275c   : > { %v5532_v30 = vmul.f32 1.442695, %v5531_v33 }
0x275e   : > { %17543 = vpow2.f32 %v5532_v30 }
0x276b   : > { %v17544_v34 = vpop.eup %17543 }
0x276c   : > { %v5534_v37 = vsel %vm5527_vm7, %v17544_v34, 0.0 }
0x276d   : > { %5535 = vadd.xlane.f32.xlu0 %v5534_v37 }
0x2783   : > { %5441 = vrot.lane.b32.xlu0 %v18669_v8, %s20050_s28 }
0x27f6   : > { %v5536_v44 = vpop.xlane.xlu0 %5535 }
0x27f7   : > { %17545 = vrcp.f32 %v5536_v44 }
0x27fa   : > { %v5442_v46 = vpop.permute.xlu0 %5441 }
0x27fb   : > { %5444 = vst.msk [vmem:[#allocation3 + $0x1] sm:$0x1] %vm3229_vm9, %v5442_v46 }
0x2802   : > { %v18696_v47 = vld [vmem:[#allocation3] sm:$0x3] }
0x2803   : > { %16518 = vmatpush3.msk.msra.mxu1 %vm5543_vm8, %v18696_v47 }
0x2804   : > { %v17546_v48 = vpop.eup %17545  ;;  %16522 = vmatprep.subr.mxu1 %v17808_v1 }
0x2805   : > { %v5538_v49 = vmul.f32 %v17546_v48, %v17544_v34 }
0x2807   : > { %16520 = vmatmul.mubr.msk.f32.vlgmr.msra.gmra.mxu1 %vm5539_vm10, %v5538_v49 }
0x2808   : > { %16523 = vmatpush3.xpose.msk.msra.mxu1 %vm1348_vm2, %v5620_v13  ;;  %16524 = vmatprep.mubr.msk.f32.mxu1 %vm17809_vm0, %v17808_v1  ;;  %v5447_v13 = vld [vmem:[%s20026_s26] sm:$0xff] }
0x2809   : > { %16527 = vmatprep.subr.mxu1 %v17808_v1 }
0x280b   : > { %16525 = vmatmul.mubr.msk.f32.vlgmr.msra.gmra.mxu1 %vm1348_vm2, %v5618_v16 }
0x280c   : > { %16529 = vmatprep.mubr.msk.f32.mxu1 %vm17809_vm0, %v17808_v1 }
0x28c7   : > { %v5613_v35 = vpop.f32.mrf.mxu1 }
0x28c9   : > { %v16521_v53 = vpop.f32.mrf.mxu1 }
0x28cb   : > { %v5691_v43 = vpop.f32.mrf.mxu1 }
0x28cc   : > { %v5695_v54 = vmul.f32 0.35355338, %v5691_v43 }
0x28cd   : > { %v16526_v55 = vpop.f32.mrf.mxu1 }
0x28ce   : > { %v5696_v56 = vsel %vm5527_vm7, %v5695_v54, -inf }
0x28cf   : > { %5697 = vmax.xlane.f32.xlu0 %v5696_v56 }
0x28e5   : > { %5707 = vrot.lane.b32.xlu0 %v18696_v47, %s20049_s10 }
0x28e9   : > { %6173 = vrot.lane.b32.xlu0 %v5445_v12, %s20036_s8 }
0x28ed   : > { %6171 = vrot.lane.b32.xlu0 %v18669_v8, %s20036_s8 }
0x2958   : > { %v5698_v57 = vpop.xlane.xlu0 %5697 }
0x2959   : > { %v5699_v58 = vsub.f32 %v5695_v54, %v5698_v57 }
0x295b   : > { %v5700_v60 = vmul.f32 1.442695, %v5699_v58  ;;  %v5450_v58 = vld [vmem:[%s20026_s26 + $0x18] sm:$0xff] }
0x295c   : > { %v5708_v24 = vpop.permute.xlu0 %5707 }
0x295d   : > { %17547 = vpow2.f32 %v5700_v60  ;;  %16528 = vmatpush3.msk.msra.mxu1 %vm5543_vm8, %v5708_v24 }
0x295e   : > { %16532 = vmatprep.subr.mxu1 %v17808_v1 }
0x2960   : > { %v6174_v20 = vpop.permute.xlu0 %6173 }
0x2964   : > { %v6172_v22 = vpop.permute.xlu0 %6171 }
0x296a   : > { %v17548_v62 = vpop.eup %17547 }
0x296b   : > { %v5702_v63 = vsel %vm5527_vm7, %v17548_v62, 0.0 }
0x296c   : > { %5703 = vadd.xlane.f32.xlu1 %v5702_v63 }
0x2970   : > { %6010 = vmax.xlane.f32.xlu1 %v6009_v0 }
0x29f5   : > { %v5704_v2 = vpop.xlane.xlu1 %5703 }
0x29f6   : > { %17549 = vrcp.f32 %v5704_v2 }
0x29f9   : > { %v6011_v3 = vpop.xlane.xlu1 %6010 }
0x29fa   : > { %v6012_v4 = vsub.f32 %v6008_v39, %v6011_v3 }
0x29fc   : > { %v6013_v9 = vmul.f32 1.442695, %v6012_v4  ;;  %v6412_v4 = vld [vmem:[%s20028_s2] sm:$0x1] }
0x29fe   : > { %17551 = vpow2.f32 %v6013_v9 }
0x2a03   : > { %v17550_v6 = vpop.eup %17549 }
0x2a04   : > { %v5706_v7 = vmul.f32 %v17550_v6, %v17548_v62 }
0x2a06   : > { %16530 = vmatmul.mubr.msk.f32.vlgmr.msra.gmra.mxu1 %vm5539_vm10, %v5706_v7 }
0x2a07   : > { %16534 = vmatprep.mubr.msk.f32.mxu1 %vm17809_vm0, %v17808_v1  ;;  %16533 = vmatpush3.msra.mxu1 %v5448_v11 }
0x2a08   : > { %16537 = vmatprep.subr.mxu1 %v17808_v1 }
0x2a0b   : > { %v17552_v8 = vpop.eup %17551 }
0x2a0c   : > { %v6015_v10 = vsel %vm5527_vm7, %v17552_v8, 0.0 }
0x2a0d   : > { %6016 = vadd.xlane.f32.xlu1 %v6015_v10 }
0x2a1e   : > { %6020 = vrot.lane.b32.xlu1 %v18696_v47, %s20035_s6 }
0x2a96   : > { %v6017_v12 = vpop.xlane.xlu1 %6016 }
0x2a97   : > { %17553 = vrcp.f32 %v6017_v12 }
0x2a9a   : > { %v6021_v19 = vpop.permute.xlu1 %6020 }
0x2aa4   : > { %v17554_v18 = vpop.eup %17553 }
0x2aa5   : > { %v6019_v21 = vmul.f32 %v17554_v18, %v17552_v8  ;;  %v6435_v18 = vld [vmem:[%s20029_s15 + $0x18] sm:$0xff] }
0x2ac6   : > { %v5780_v16 = vpop.f32.mrf.mxu1 }
0x2ac7   : > { %16535 = vmatmul.mubr.msk.f32.vlgmr.msra.gmra.mxu1 %vm1348_vm2, %v5780_v16 }
0x2ac8   : > { %v16531_v17 = vpop.f32.mrf.mxu1  ;;  %16538 = vmatpush3.msra.mxu1 %v5447_v13  ;;  %16539 = vmatprep.mubr.msk.f32.mxu1 %vm17809_vm0, %v17808_v1 }
0x2ac9   : > { %16547 = vmatprep.subr.mxu1 %v17808_v1 }
0x2acb   : > { %16540 = vmatmul.mubr.msk.f32.vlgmr.msra.gmra.mxu1 %vm1348_vm2, %v5613_v35 }
0x2acc   : > { %16548 = vmatpush3.msk.msra.mxu1 %vm5543_vm8, %v6021_v19  ;;  %16549 = vmatprep.mubr.msk.f32.mxu1 %vm17809_vm0, %v17808_v1  ;;  %v6434_v19 = vld [vmem:[%s20029_s15 + $0x10] sm:$0xff] }
0x2acd   : > { %16557 = vmatprep.subr.mxu1 %v17808_v1 }
0x2acf   : > { %16550 = vmatmul.mubr.msk.f32.vlgmr.msra.gmra.mxu1 %vm5539_vm10, %v6019_v21 }
0x2ad0   : > { %16558 = vmatpush3.xpose.msk.msra.mxu1 %vm1348_vm2, %v6174_v20  ;;  %16559 = vmatprep.mubr.msk.f32.mxu1 %vm17809_vm0, %v17808_v1  ;;  %v6433_v20 = vld [vmem:[%s20029_s15 + $0x8] sm:$0xff] }
0x2ad1   : > { %16567 = vmatprep.subr.mxu1 %v17808_v1 }
0x2ad3   : > { %16560 = vmatmul.mubr.msk.f32.vlgmr.msra.gmra.mxu1 %vm1348_vm2, %v6172_v22 }
0x2ad4   : > { %16569 = vmatprep.mubr.msk.f32.mxu1 %vm17809_vm0, %v17808_v1  ;;  %16568 = vmatpush3.msra.mxu1 %v5450_v58 }
0x2ad5   : > { %16583 = vmatprep.subr.mxu1 %v17808_v1 }
0x2b87   : > { %v5853_v29 = vpop.f32.mrf.mxu1 }
0x2b89   : > { %v16536_v32 = vpop.f32.mrf.mxu1 }
0x2b8a   : > { %v6415_v32 = vld [vmem:[%s20030_s18] sm:$0x1] }
0x2b8b   : > { %v5926_v33 = vpop.f32.mrf.mxu1 }
0x2b8c   : > { %v5927_v30 = vadd.f32 %v5926_v33, %v5853_v29 }
0x2b8d   : > { %v16541_v34 = vpop.f32.mrf.mxu1 }
0x2b8f   : > { %v6093_v37 = vpop.f32.mrf.mxu1 }
0x2b90   : > { %16555 = vmatmul.mubr.msk.f32.vlgmr.msra.gmra.mxu0 %vm1348_vm2, %v6093_v37 }
0x2b91   : > { %v16551_v44 = vpop.f32.mrf.mxu1  ;;  %16564 = vmatprep.mubr.msk.f32.mxu0 %vm17809_vm0, %v17808_v1 }
0x2b92   : > { %v6436_v44 = vld [vmem:[%s20032_s3] sm:$0x1] }
0x2b93   : > { %v6245_v46 = vpop.f32.mrf.mxu1 }
0x2b94   : > { %v6249_v48 = vmul.f32 0.35355338, %v6245_v46 }
0x2b95   : > { %v16561_v49 = vpop.f32.mrf.mxu1 }
0x2b96   : > { %v6250_v35 = vsel %vm5527_vm7, %v6249_v48, -inf }
0x2b97   : > { %6251 = vmax.xlane.f32.xlu0 %v6250_v35 }
0x2bad   : > { %6261 = vrot.lane.b32.xlu0 %v18696_v47, %s20036_s8 }
0x2c20   : > { %v6252_v53 = vpop.xlane.xlu0 %6251 }
0x2c21   : > { %v6253_v43 = vsub.f32 %v6249_v48, %v6252_v53 }
0x2c23   : > { %v6254_v54 = vmul.f32 1.442695, %v6253_v43 }
0x2c24   : > { %v6262_v55 = vpop.permute.xlu0 %6261 }
0x2c25   : > { %17555 = vpow2.f32 %v6254_v54  ;;  %16563 = vmatpush3.msk.msra.mxu0 %vm5543_vm8, %v6262_v55  ;;  %vm7996_vm8 = vcmask 23552  }
0x2c26   : > { %16572 = vmatprep.subr.mxu0 %v17808_v1 }
0x2c32   : > { %v17556_v56 = vpop.eup %17555 }
0x2c33   : > { %v6256_v57 = vsel %vm5527_vm7, %v17556_v56, 0.0  ;;  %vm8000_vm7 = vcmask 1042432  }
0x2c34   : > { %6257 = vadd.xlane.f32.xlu1 %v6256_v57 }
0x2c50   : > { %v6166_v60 = vpop.f32.mrf.mxu0 }
0x2c51   : > { %v6170_v24 = vadd.f32 %v6166_v60, %v5927_v30  ;;  %v6416_v30 = vld [vmem:[%s20031_s22] sm:$0x1] }
0x2c52   : > { %v16556_v47 = vpop.f32.mrf.mxu0 }
0x2cbd   : > { %v6258_v62 = vpop.xlane.xlu1 %6257 }
0x2cbe   : > { %17557 = vrcp.f32 %v6258_v62 }
0x2ccb   : > { %v17558_v39 = vpop.eup %17557 }
0x2ccc   : > { %v6260_v63 = vmul.f32 %v17558_v39, %v17556_v56 }
0x2cce   : > { %16565 = vmatmul.mubr.msk.f32.vlgmr.msra.gmra.mxu0 %vm5539_vm10, %v6260_v63 }
0x2ccf   : > { %16580 = vmatprep.mubr.msk.f32.mxu0 %vm17809_vm0, %v17808_v1  ;;  %16573 = vmatpush3.msra.mxu0 %v6435_v18 }
0x2cd0   : > { %16574 = vmatprep.subr.mxu0 %v17808_v1 }
0x2cd1   : > { %16575 = vmatpush3.msra.mxu0 %v6434_v19 }
0x2cd2   : > { %16576 = vmatprep.subr.mxu0 %v17808_v1 }
0x2cd3   : > { %16577 = vmatpush3.msra.mxu0 %v6433_v20 }
0x2cd4   : > { %16578 = vmatprep.subr.mxu0 %v17808_v1 }
0x2d8e   : > { %v6334_v0 = vpop.f32.mrf.mxu0 }
0x2d8f   : > { %16570 = vmatmul.mubr.msk.f32.vlgmr.msra.gmra.mxu1 %vm1348_vm2, %v6334_v0 }
0x2d90   : > { %16584 = vmatpush3.xpose.msk.msra.mxu1 %vm1348_vm2, %v18364_v50  ;;  %v16566_v2 = vpop.f32.mrf.mxu0  ;;  %16587 = vmatprep.mubr.msk.f32.mxu1 %vm17809_vm0, %v17808_v1 }
0x2d91   : > { %16585 = vmatprep.subr.mxu1 %v17808_v1 }
0x2d94   : > { %16586 = vmatpush3.xpose.msk.msra.mxu1 %vm1348_vm2, %v18373_v51 }
0x2d95   : > { %16597 = vmatprep.subr.mxu1 %v17808_v1 }
0x2e4f   : > { %v6407_v3 = vpop.f32.mrf.mxu1 }
0x2e50   : > { %v6411_v9 = vadd.f32 %v6407_v3, %v6170_v24 }
0x2e51   : > { %v16571_v6 = vpop.f32.mrf.mxu1 }
0x2e52   : > { %v6413_v7 = vadd.f32 %v6412_v4, %v6411_v9 }
0x2e54   : > { %v6414_v8 = vadd.f32 %v6413_v7, %v18662_v5  ;;  %v6432_v5 = vld [vmem:[%s20029_s15] sm:$0xff] }
0x2e55   : > { %16579 = vmatpush3.msra.mxu0 %v6432_v5  ;;  %v6510_v7 = vld [vmem:[%s20037_s9] sm:$0xff] }
0x2e56   : > { %v6417_v10 = vsel %vm3229_vm9, %v6414_v8, 0.0  ;;  %16590 = vmatprep.subr.mxu0 %v17808_v1 }
0x2e57   : > { %6418 = vadd.xlane.f32.xlu1 %v6417_v10 }
0x2ee0   : > { %v6419_v11 = vpop.xlane.xlu1 %6418 }
0x2ee1   : > { %v6420_v12 = vmul.f32 0.03125, %v6419_v11 }
0x2ee3   : > { %v6421_v13 = vsub.f32 %v6414_v8, %v6420_v12 }
0x2ee5   : > { %v6422_v16 = vmul.f32 %v6421_v13, %v6421_v13 }
0x2ee7   : > { %v6423_v17 = vsel %vm3229_vm9, %v6422_v16, 0.0  ;;  %v6511_v16 = vld [vmem:[%s20037_s9 + $0x8] sm:$0xff] }
0x2ee8   : > { %6424 = vadd.xlane.f32.xlu1 %v6423_v17 }
0x2f71   : > { %v6425_v21 = vpop.xlane.xlu1 %6424 }
0x2f72   : > { %v6426_v22 = vmul.f32 0.03125, %v6425_v21 }
0x2f74   : > { %v6427_v23 = vadd.f32 1e-05, %v6426_v22 }
0x2f76   : > { %17559 = vrsqrt.f32 %v6427_v23 }
0x2f83   : > { %v17560_v29 = vpop.eup %17559 }
0x2f84   : > { %v6429_v33 = vmul.f32 %v17560_v29, %v6421_v13 }
0x2f86   : > { %v6430_v34 = vmul.f32 %v6429_v33, %v6415_v32 }
0x2f88   : > { %v18784_v37 = vadd.f32 %v6430_v34, %v6416_v30 }
0x2f8a   : > { %16581 = vmatmul.mubr.msk.f32.vlgmr.msra.gmra.mxu0 %vm1443_vm3, %v18784_v37 }
0x2f8b   : > { %16591 = vmatpush3.msk.msra.mxu0 %vm1655_vm6, %v18434_v40  ;;  %16594 = vmatprep.mubr.msk.f32.mxu0 %vm17809_vm0, %v17808_v1 }
0x2f8c   : > { %16592 = vmatprep.subr.mxu0 %v17808_v1 }
0x2f8d   : > { %16593 = vmatpush3.msra.mxu0 %v18438_v41 }
0x2f8e   : > { %16604 = vmatprep.subr.mxu0 %v17808_v1 }
0x304a   : > { %v6506_v46 = vpop.f32.mrf.mxu0 }
0x304b   : > { %v6507_v48 = vadd.f32 %v6506_v46, %v6436_v44 }
0x304c   : > { %v16582_v49 = vpop.f32.mrf.mxu0 }
0x304d   : > { %6672 = vrot.lane.b32.xlu1 %v6507_v48, %s20049_s10  ;;  %16588 = vmatmul.mubr.msk.f32.vlgmr.msra.gmra.mxu1 %vm1348_vm2, %v6507_v48 }
0x304e   : > { %16598 = vmatpush3.xpose.msk.msra.mxu1 %vm1348_vm2, %v18403_v14  ;;  %16601 = vmatprep.mubr.msk.f32.mxu1 %vm17809_vm0, %v17808_v1 }
0x304f   : > { %16599 = vmatprep.subr.mxu1 %v17808_v1 }
0x3052   : > { %16600 = vmatpush3.xpose.msk.msra.mxu1 %vm1348_vm2, %v18412_v15 }
0x3053   : > { %16616 = vmatprep.subr.mxu1 %v17808_v1 }
0x30bf   : > { %v6673_v35 = vpop.permute.xlu1 %6672 }
0x30c0   : > { %16602 = vmatmul.mubr.msk.f32.vlgmr.msra.gmra.mxu1 %vm1348_vm2, %v6673_v35 }
0x30c1   : > { %16618 = vmatprep.mubr.msk.f32.mxu1 %vm17809_vm0, %v17808_v1  ;;  %16617 = vmatpush3.msra.mxu1 %v6510_v7  ;;  %v6513_v7 = vld [vmem:[%s20037_s9 + $0x18] sm:$0xff] }
0x30c2   : > { %16628 = vmatprep.subr.mxu1 %v17808_v1 }
0x310d   : > { %v6583_v53 = vpop.f32.mrf.mxu1 }
0x310e   : > { %v6587_v43 = vmul.f32 0.35355338, %v6583_v53 }
0x310f   : > { %v16589_v54 = vpop.f32.mrf.mxu1 }
0x3110   : > { %v6588_v55 = vsel %vm4078_vm13, %v6587_v43, -inf }
0x3111   : > { %6589 = vmax.xlane.f32.xlu0 %v6588_v55 }
0x3180   : > { %v6742_v56 = vpop.f32.mrf.mxu1 }
0x3181   : > { %v6746_v57 = vmul.f32 0.35355338, %v6742_v56 }
0x3182   : > { %v16603_v58 = vpop.f32.mrf.mxu1 }
0x3183   : > { %v6747_v60 = vsel %vm4078_vm13, %v6746_v57, -inf }
0x3184   : > { %6748 = vmax.xlane.f32.xlu1 %v6747_v60 }
0x3195   : > { %7210 = vrot.lane.b32.xlu1 %v6507_v48, %s20036_s8 }
0x319a   : > { %v6590_v24 = vpop.xlane.xlu0 %6589 }
0x319b   : > { %v6591_v47 = vsub.f32 %v6587_v43, %v6590_v24 }
0x319d   : > { %v6592_v62 = vmul.f32 1.442695, %v6591_v47 }
0x319f   : > { %17561 = vpow2.f32 %v6592_v62 }
0x31ac   : > { %v17562_v39 = vpop.eup %17561 }
0x31ad   : > { %v6594_v63 = vsel %vm4078_vm13, %v17562_v39, 0.0 }
0x31ae   : > { %6595 = vadd.xlane.f32.xlu0 %v6594_v63 }
0x320d   : > { %v6749_v0 = vpop.xlane.xlu1 %6748 }
0x320e   : > { %v6750_v2 = vsub.f32 %v6746_v57, %v6749_v0  ;;  %v6512_v0 = vld [vmem:[%s20037_s9 + $0x10] sm:$0xff] }
0x3210   : > { %v6751_v3 = vmul.f32 1.442695, %v6750_v2 }
0x3211   : > { %v7211_v21 = vpop.permute.xlu1 %7210 }
0x3212   : > { %17563 = vpow2.f32 %v6751_v3 }
0x321f   : > { %v17564_v4 = vpop.eup %17563 }
0x3220   : > { %v6753_v9 = vsel %vm4078_vm13, %v17564_v4, 0.0 }
0x3221   : > { %6754 = vadd.xlane.f32.xlu0 %v6753_v9 }
0x3237   : > { %v6596_v6 = vpop.xlane.xlu0 %6595  ;;  %6977 = vrot.lane.b32.xlu0 %v6507_v48, %s20035_s6 }
0x3238   : > { %17565 = vrcp.f32 %v6596_v6 }
0x3245   : > { %v17566_v8 = vpop.eup %17565 }
0x3246   : > { %v6598_v10 = vmul.f32 %v17566_v8, %v17562_v39 }
0x3248   : > { %16595 = vmatmul.mubr.msk.f32.vlgmr.msra.gmra.mxu0 %vm1620_vm5, %v6598_v10 }
0x3249   : > { %16605 = vmatpush3.msk.msra.mxu0 %vm1655_vm6, %v18456_v42  ;;  %16608 = vmatprep.mubr.msk.f32.mxu0 %vm17809_vm0, %v17808_v1 }
0x324a   : > { %16606 = vmatprep.subr.mxu0 %v17808_v1 }
0x324b   : > { %16607 = vmatpush3.msra.mxu0 %v18460_v52 }
0x324c   : > { %16611 = vmatprep.subr.mxu0 %v17808_v1 }
0x32aa   : > { %v6755_v11 = vpop.xlane.xlu0 %6754 }
0x32ab   : > { %17567 = vrcp.f32 %v6755_v11 }
0x32ae   : > { %v6978_v5 = vpop.permute.xlu0 %6977 }
0x32b8   : > { %v17568_v12 = vpop.eup %17567 }
0x32b9   : > { %v6757_v13 = vmul.f32 %v17568_v12, %v17564_v4 }
0x32bb   : > { %16609 = vmatmul.mubr.msk.f32.vlgmr.msra.gmra.mxu0 %vm1620_vm5, %v6757_v13 }
0x32bc   : > { %16612 = vmatpush3.msra.mxu0 %v6511_v16  ;;  %16613 = vmatprep.mubr.msk.f32.mxu0 %vm17809_vm0, %v17808_v1 }
0x32bd   : > { %16621 = vmatprep.subr.mxu0 %v17808_v1 }
0x3308   : > { %v6668_v17 = vpop.f32.mrf.mxu0 }
0x3309   : > { %16619 = vmatmul.mubr.msk.f32.vlgmr.msra.gmra.mxu1 %vm1348_vm2, %v6668_v17 }
0x330a   : > { %16629 = vmatpush3.msk.msra.mxu1 %vm1655_vm6, %v18520_v27  ;;  %v16596_v18 = vpop.f32.mrf.mxu0  ;;  %16632 = vmatprep.mubr.msk.f32.mxu1 %vm17809_vm0, %v17808_v1 }
0x330b   : > { %16630 = vmatprep.subr.mxu1 %v17808_v1  ;;  %v7443_v18 = vld [vmem:[%s20040_s13] sm:$0x1] }
0x330c   : > { %16631 = vmatpush3.msra.mxu1 %v18515_v28 }
0x330d   : > { %16635 = vmatprep.subr.mxu1 %v17808_v1 }
0x337b   : > { %v6827_v19 = vpop.f32.mrf.mxu0 }
0x337c   : > { %16614 = vmatmul.mubr.msk.f32.vlgmr.msra.gmra.mxu0 %vm1348_vm2, %v6827_v19 }
0x337d   : > { %16622 = vmatpush3.xpose.msk.msra.mxu0 %vm1348_vm2, %v18473_v36  ;;  %v16610_v20 = vpop.f32.mrf.mxu0  ;;  %16625 = vmatprep.mubr.msk.f32.mxu0 %vm17809_vm0, %v17808_v1 }
0x337e   : > { %16623 = vmatprep.subr.mxu0 %v17808_v1 }
0x3381   : > { %16624 = vmatpush3.xpose.msk.msra.mxu0 %vm1348_vm2, %v18480_v59 }
0x3382   : > { %16640 = vmatprep.subr.mxu0 %v17808_v1 }
0x3384   : > { %16626 = vmatmul.mubr.msk.f32.vlgmr.msra.gmra.mxu0 %vm1348_vm2, %v6978_v5 }
0x3385   : > { %16641 = vmatpush3.xpose.msk.msra.mxu0 %vm1348_vm2, %v18486_v25  ;;  %16644 = vmatprep.mubr.msk.f32.mxu0 %vm17809_vm0, %v17808_v1 }
0x3386   : > { %16642 = vmatprep.subr.mxu0 %v17808_v1 }
0x3389   : > { %16643 = vmatpush3.xpose.msk.msra.mxu0 %vm1348_vm2, %v18494_v61 }
0x338a   : > { %16659 = vmatprep.subr.mxu0 %v17808_v1 }
0x338c   : > { %16645 = vmatmul.mubr.msk.f32.vlgmr.msra.gmra.mxu0 %vm1348_vm2, %v7211_v21 }
0x338d   : > { %16667 = vmatprep.mubr.msk.f32.mxu0 %vm17809_vm0, %v17808_v1 }
0x33c9   : > { %v6973_v22 = vpop.f32.mrf.mxu1 }
0x33cb   : > { %v16620_v23 = vpop.f32.mrf.mxu1 }
0x343c   : > { %v6900_v29 = vpop.f32.mrf.mxu0 }
0x343d   : > { %v6974_v8 = vadd.f32 %v6973_v22, %v6900_v29 }
0x343e   : > { %v16615_v32 = vpop.f32.mrf.mxu0 }
0x3444   : > { %v7047_v33 = vpop.f32.mrf.mxu0 }
0x3445   : > { %v7051_v30 = vmul.f32 0.35355338, %v7047_v33 }
0x3446   : > { %v16627_v34 = vpop.f32.mrf.mxu0 }
0x3447   : > { %v7052_v44 = vsel %vm4078_vm13, %v7051_v30, -inf  ;;  %v7466_v34 = vld [vmem:[%s20041_s5 + $0x18] sm:$0xff] }
0x3448   : > { %7053 = vmax.xlane.f32.xlu0 %v7052_v44  ;;  %v7465_v44 = vld [vmem:[%s20041_s5 + $0x10] sm:$0xff]  ;;  %16660 = vmatpush3.msra.mxu0 %v7466_v34  ;;  %v7625_v34 = vld [vmem:[%s20047_s25] sm:$0x1] }
0x3449   : > { %16661 = vmatprep.subr.mxu0 %v17808_v1 }
0x344a   : > { %16662 = vmatpush3.msra.mxu0 %v7465_v44 }
0x344b   : > { %16663 = vmatprep.subr.mxu0 %v17808_v1 }
0x344c   : > { %v7280_v46 = vpop.f32.mrf.mxu0 }
0x344d   : > { %v7284_v48 = vmul.f32 0.35355338, %v7280_v46  ;;  %v7463_v46 = vld [vmem:[%s20041_s5] sm:$0xff] }
0x344e   : > { %v16646_v49 = vpop.f32.mrf.mxu0 }
0x344f   : > { %v7285_v35 = vsel %vm4078_vm13, %v7284_v48, -inf  ;;  %v7548_v49 = vld [vmem:[%s20042_s14 + $0x30] sm:$0xff] }
0x3450   : > { %7286 = vmax.xlane.f32.xlu0 %v7285_v35  ;;  %v7547_v35 = vld [vmem:[%s20042_s14 + $0x28] sm:$0xff] }
0x34d1   : > { %v7054_v53 = vpop.xlane.xlu0 %7053 }
0x34d2   : > { %v7055_v43 = vsub.f32 %v7051_v30, %v7054_v53  ;;  %v7546_v53 = vld [vmem:[%s20042_s14 + $0x20] sm:$0xff] }
0x34d4   : > { %v7056_v54 = vmul.f32 1.442695, %v7055_v43  ;;  %v7545_v43 = vld [vmem:[%s20042_s14 + $0x18] sm:$0xff] }
0x34d6   : > { %17569 = vpow2.f32 %v7056_v54 }
0x34d9   : > { %v7287_v55 = vpop.xlane.xlu0 %7286 }
0x34da   : > { %v7288_v56 = vsub.f32 %v7284_v48, %v7287_v55  ;;  %v7549_v48 = vld [vmem:[%s20042_s14 + $0x38] sm:$0xff] }
0x34dc   : > { %v7289_v57 = vmul.f32 1.442695, %v7288_v56 }
0x34de   : > { %17571 = vpow2.f32 %v7289_v57 }
0x34e3   : > { %v17570_v58 = vpop.eup %17569 }
0x34e4   : > { %v7058_v60 = vsel %vm4078_vm13, %v17570_v58, 0.0 }
0x34e5   : > { %7059 = vadd.xlane.f32.xlu1 %v7058_v60 }
0x34eb   : > { %v17572_v24 = vpop.eup %17571 }
0x34ec   : > { %v7291_v47 = vsel %vm4078_vm13, %v17572_v24, 0.0 }
0x34ed   : > { %7292 = vadd.xlane.f32.xlu0 %v7291_v47 }
0x356e   : > { %v7060_v62 = vpop.xlane.xlu1 %7059 }
0x356f   : > { %17573 = vrcp.f32 %v7060_v62 }
0x3576   : > { %v7293_v2 = vpop.xlane.xlu0 %7292 }
0x3577   : > { %17575 = vrcp.f32 %v7293_v2  ;;  %v7467_v2 = vld [vmem:[%s20045_s21] sm:$0x1] }
0x357c   : > { %v17574_v39 = vpop.eup %17573 }
0x357d   : > { %v7062_v63 = vmul.f32 %v17574_v39, %v17570_v58  ;;  %v7446_v58 = vld [vmem:[%s20043_s17] sm:$0x1]  ;;  %v7544_v39 = vld [vmem:[%s20042_s14 + $0x10] sm:$0xff] }
0x357f   : > { %16633 = vmatmul.mubr.msk.f32.vlgmr.msra.gmra.mxu1 %vm1620_vm5, %v7062_v63  ;;  %v7543_v63 = vld [vmem:[%s20042_s14 + $0x8] sm:$0xff] }
0x3580   : > { %16636 = vmatpush3.msra.mxu1 %v6512_v0  ;;  %16637 = vmatprep.mubr.msk.f32.mxu1 %vm17809_vm0, %v17808_v1  ;;  %v7542_v0 = vld [vmem:[%s20042_s14] sm:$0xff] }
0x3581   : > { %16647 = vmatprep.subr.mxu1 %v17808_v1 }
0x3584   : > { %v17576_v3 = vpop.eup %17575 }
0x3585   : > { %v7295_v6 = vmul.f32 %v17576_v3, %v17572_v24  ;;  %v7447_v24 = vld [vmem:[%s20044_s19] sm:$0x1] }
0x363f   : > { %v7132_v4 = vpop.f32.mrf.mxu1 }
0x3640   : > { %16638 = vmatmul.mubr.msk.f32.vlgmr.msra.gmra.mxu1 %vm1348_vm2, %v7132_v4 }
0x3641   : > { %16648 = vmatpush3.msk.msra.mxu1 %vm1655_vm6, %v18532_v38  ;;  %v16634_v9 = vpop.f32.mrf.mxu1  ;;  %16651 = vmatprep.mubr.msk.f32.mxu1 %vm17809_vm0, %v17808_v1 }
0x3642   : > { %16649 = vmatprep.subr.mxu1 %v17808_v1 }
0x3643   : > { %16650 = vmatpush3.msra.mxu1 %v18539_v45 }
0x3644   : > { %16652 = vmatmul.mubr.msk.f32.vlgmr.msra.gmra.mxu1 %vm1620_vm5, %v7295_v6  ;;  %16654 = vmatprep.subr.mxu1 %v17808_v1 }
0x3645   : > { %16656 = vmatprep.mubr.msk.f32.mxu1 %vm17809_vm0, %v17808_v1  ;;  %16655 = vmatpush3.msra.mxu1 %v6513_v7  ;;  %v7550_v7 = vld [vmem:[%s20046_s24] sm:$0x1] }
0x3646   : > { %16670 = vmatprep.subr.mxu1 %v17808_v1 }
0x3700   : > { %v7205_v10 = vpop.f32.mrf.mxu1 }
0x3701   : > { %v7209_v11 = vadd.f32 %v7205_v10, %v6974_v8 }
0x3702   : > { %v16639_v12 = vpop.f32.mrf.mxu1 }
0x3704   : > { %v7365_v13 = vpop.f32.mrf.mxu1 }
0x3705   : > { %16657 = vmatmul.mubr.msk.f32.vlgmr.msra.gmra.mxu1 %vm1348_vm2, %v7365_v13 }
0x3706   : > { %v16653_v16 = vpop.f32.mrf.mxu1  ;;  %16686 = vmatprep.mubr.msk.f32.mxu1 %vm17809_vm0, %v17808_v1  ;;  %16671 = vmatpush3.msra.mxu1 %v7549_v48 }
0x3707   : > { %16672 = vmatprep.subr.mxu1 %v17808_v1 }
0x3708   : > { %16673 = vmatpush3.msra.mxu1 %v7548_v49  ;;  %v17711_v49 = vld [vmem:[%s20022_s11 + $0x78] sm:$0xff] }
0x3709   : > { %16674 = vmatprep.subr.mxu1 %v17808_v1 }
0x370a   : > { %16675 = vmatpush3.msra.mxu1 %v7547_v35  ;;  %v17712_v35 = vld [vmem:[%s20022_s11 + $0x70] sm:$0xff] }
0x370b   : > { %16676 = vmatprep.subr.mxu1 %v17808_v1 }
0x370c   : > { %16677 = vmatpush3.msra.mxu1 %v7546_v53  ;;  %v17713_v53 = vld [vmem:[%s20022_s11 + $0x68] sm:$0xff] }
0x370d   : > { %16678 = vmatprep.subr.mxu1 %v17808_v1 }
0x370e   : > { %16679 = vmatpush3.msra.mxu1 %v7545_v43  ;;  %v17714_v43 = vld [vmem:[%s20022_s11 + $0x60] sm:$0xff] }
0x370f   : > { %16680 = vmatprep.subr.mxu1 %v17808_v1 }
0x3710   : > { %16681 = vmatpush3.msra.mxu1 %v7544_v39  ;;  %v17724_v39 = vld [vmem:[%s20022_s11 + $0x10] sm:$0xff] }
0x3711   : > { %16682 = vmatprep.subr.mxu1 %v17808_v1 }
0x3712   : > { %16683 = vmatpush3.msra.mxu1 %v7543_v63  ;;  %v17725_v63 = vld [vmem:[%s20022_s11 + $0x8] sm:$0xff] }
0x3713   : > { %16684 = vmatprep.subr.mxu1 %v17808_v1 }
0x3714   : > { %16685 = vmatpush3.msra.mxu1 %v7542_v0  ;;  %v17726_v0 = vld [vmem:[%s20022_s11] sm:$0xff] }
0x3715   : > { %16735 = vmatprep.subr.mxu1 %v17808_v1 }
0x37c5   : > { %v7438_v17 = vpop.f32.mrf.mxu1 }
0x37c6   : > { %v7442_v19 = vadd.f32 %v7438_v17, %v7209_v11 }
0x37c7   : > { %v16658_v20 = vpop.f32.mrf.mxu1 }
0x37c8   : > { %v7444_v5 = vadd.f32 %v7443_v18, %v7442_v19 }
0x37ca   : > { %v7445_v21 = vadd.f32 %v7444_v5, %v18784_v37  ;;  %v7464_v37 = vld [vmem:[%s20041_s5 + $0x8] sm:$0xff]  ;;  %v7645_v5 = vld [vmem:[%s18025_s20 + $0x18] sm:$0xff] }
0x37cb   : > { %16664 = vmatpush3.msra.mxu0 %v7464_v37  ;;  %v7626_v37 = vld [vmem:[%s18020_s12] sm:$0x1] }
0x37cc   : > { %v7448_v22 = vsel %vm3229_vm9, %v7445_v21, 0.0  ;;  %16665 = vmatprep.subr.mxu0 %v17808_v1 }
0x37cd   : > { %7449 = vadd.xlane.f32.xlu1 %v7448_v22  ;;  %16666 = vmatpush3.msra.mxu0 %v7463_v46  ;;  %v7643_v22 = vld [vmem:[%s18025_s20 + $0x8] sm:$0xff] }
0x37ce   : > { %16689 = vmatprep.subr.mxu0 %v17808_v1 }
0x3856   : > { %v7450_v23 = vpop.xlane.xlu1 %7449 }
0x3857   : > { %v7451_v29 = vmul.f32 0.03125, %v7450_v23  ;;  %v7642_v23 = vld [vmem:[%s18025_s20] sm:$0xff] }
0x3859   : > { %v7452_v32 = vsub.f32 %v7445_v21, %v7451_v29  ;;  %v7644_v21 = vld [vmem:[%s18025_s20 + $0x10] sm:$0xff] }
0x385b   : > { %v7453_v33 = vmul.f32 %v7452_v32, %v7452_v32 }
0x385d   : > { %v7454_v30 = vsel %vm3229_vm9, %v7453_v33, 0.0 }
0x385e   : > { %7455 = vadd.xlane.f32.xlu0 %v7454_v30 }
0x38e7   : > { %v7456_v54 = vpop.xlane.xlu0 %7455 }
0x38e8   : > { %v7457_v55 = vmul.f32 0.03125, %v7456_v54  ;;  %v17715_v54 = vld [vmem:[%s20022_s11 + $0x58] sm:$0xff] }
0x38ea   : > { %v7458_v56 = vadd.f32 1e-05, %v7457_v55  ;;  %v17716_v55 = vld [vmem:[%s20022_s11 + $0x50] sm:$0xff] }
0x38ec   : > { %17577 = vrsqrt.f32 %v7458_v56  ;;  %v17717_v56 = vld [vmem:[%s20022_s11 + $0x48] sm:$0xff] }
0x38f9   : > { %v17578_v57 = vpop.eup %17577 }
0x38fa   : > { %v7460_v60 = vmul.f32 %v17578_v57, %v7452_v32  ;;  %v17718_v57 = vld [vmem:[%s20022_s11 + $0x40] sm:$0xff] }
0x38fc   : > { %v7461_v47 = vmul.f32 %v7460_v60, %v7446_v58  ;;  %v17719_v58 = vld [vmem:[%s20022_s11 + $0x38] sm:$0xff]  ;;  %v17720_v60 = vld [vmem:[%s20022_s11 + $0x30] sm:$0xff] }
0x38fe   : > { %v7462_v62 = vadd.f32 %v7461_v47, %v7447_v24  ;;  %v17721_v24 = vld [vmem:[%s20022_s11 + $0x28] sm:$0xff]  ;;  %v17722_v47 = vld [vmem:[%s20022_s11 + $0x20] sm:$0xff] }
0x3900   : > { %16668 = vmatmul.mubr.msk.f32.vlgmr.msra.gmra.mxu0 %vm1443_vm3, %v7462_v62 }
0x3901   : > { %16697 = vmatprep.mubr.msk.f32.mxu0 %vm17809_vm0, %v17808_v1  ;;  %16690 = vmatpush3.msra.mxu0 %v7645_v5 }
0x3902   : > { %16691 = vmatprep.subr.mxu0 %v17808_v1 }
0x3903   : > { %16692 = vmatpush3.msra.mxu0 %v7644_v21 }
0x3904   : > { %16693 = vmatprep.subr.mxu0 %v17808_v1 }
0x3905   : > { %16694 = vmatpush3.msra.mxu0 %v7643_v22 }
0x3906   : > { %16695 = vmatprep.subr.mxu0 %v17808_v1 }
0x3907   : > { %16696 = vmatpush3.msra.mxu0 %v7642_v23 }
0x3908   : > { %16700 = vmatprep.subr.mxu0 %v17808_v1 }
0x39c0   : > { %v7537_v3 = vpop.f32.mrf.mxu0 }
0x39c1   : > { %v7538_v4 = vadd.f32 %v7537_v3, %v7467_v2  ;;  %v7646_v2 = vld [vmem:[%s18030_s27] sm:$0x1] }
0x39c2   : > { %v16669_v9 = vpop.f32.mrf.mxu0 }
0x39c3   : > { %v7541_v6 = vmax.f32 %v7538_v4, 0.0 }
0x39c5   : > { %16687 = vmatmul.mubr.msk.f32.vlgmr.msra.gmra.mxu1 %vm1270_vm1, %v7541_v6 }
0x39c6   : > { %16743 = vmatprep.mubr.msk.f32.mxu1 %vm17809_vm0, %v17808_v1 }
0x3a85   : > { %v7620_v8 = vpop.f32.mrf.mxu1 }
0x3a86   : > { %v7621_v10 = vadd.f32 %v7620_v8, %v7550_v7 }
0x3a87   : > { %v16688_v11 = vpop.f32.mrf.mxu1 }
0x3a88   : > { %v7624_v12 = vadd.f32 %v7621_v10, %v7462_v62  ;;  %v17723_v62 = vld [vmem:[%s20022_s11 + $0x18] sm:$0xff] }
0x3a8a   : > { %v7627_v13 = vsel %vm3229_vm9, %v7624_v12, 0.0 }
0x3a8b   : > { %7628 = vadd.xlane.f32.xlu1 %v7627_v13 }
0x3b14   : > { %v7629_v16 = vpop.xlane.xlu1 %7628 }
0x3b15   : > { %v7630_v17 = vmul.f32 0.03125, %v7629_v16 }
0x3b17   : > { %v7631_v18 = vsub.f32 %v7624_v12, %v7630_v17 }
0x3b19   : > { %v7632_v19 = vmul.f32 %v7631_v18, %v7631_v18 }
0x3b1b   : > { %v7633_v20 = vsel %vm3229_vm9, %v7632_v19, 0.0  ;;  %v7818_v19 = vld [vmem:[%s20023_s0 + $0x18] sm:$0xff] }
0x3b1c   : > { %7634 = vadd.xlane.f32.xlu0 %v7633_v20  ;;  %v7817_v20 = vld [vmem:[%s20023_s0 + $0x10] sm:$0xff]  ;;  %16736 = vmatpush3.msra.mxu1 %v7818_v19 }
0x3b1d   : > { %16737 = vmatprep.subr.mxu1 %v17808_v1 }
0x3b1e   : > { %16738 = vmatpush3.msra.mxu1 %v7817_v20 }
0x3b1f   : > { %16739 = vmatprep.subr.mxu1 %v17808_v1 }
0x3ba5   : > { %v7635_v29 = vpop.xlane.xlu0 %7634 }
0x3ba6   : > { %v7636_v32 = vmul.f32 0.03125, %v7635_v29 }
0x3ba8   : > { %v7637_v33 = vadd.f32 1e-05, %v7636_v32  ;;  %v7816_v32 = vld [vmem:[%s20023_s0 + $0x8] sm:$0xff] }
0x3ba9   : > { %16740 = vmatpush3.msra.mxu1 %v7816_v32 }
0x3baa   : > { %17579 = vrsqrt.f32 %v7637_v33  ;;  %16741 = vmatprep.subr.mxu1 %v17808_v1  ;;  %v7815_v33 = vld [vmem:[%s20023_s0] sm:$0xff] }
0x3bab   : > { %16742 = vmatpush3.msra.mxu1 %v7815_v33 }
0x3bac   : > { %16746 = vmatprep.subr.mxu1 %v17808_v1 }
0x3bb7   : > { %v17580_v30 = vpop.eup %17579 }
0x3bb8   : > { %v7639_v44 = vmul.f32 %v17580_v30, %v7631_v18  ;;  %v7744_v30 = vld [vmem:[%s20024_s16 + $0x2] sm:$0x1] }
0x3bba   : > { %v7640_v46 = vmul.f32 %v7639_v44, %v7625_v34 }
0x3bbc   : > { %v7641_v48 = vadd.f32 %v7640_v46, %v7626_v37  ;;  %v7819_v46 = vld [vmem:[%s20025_s1] sm:$0x1] }
0x3bbe   : > { %16698 = vmatmul.mubr.msk.f32.vlgmr.msra.gmra.mxu0 %vm1443_vm3, %v7641_v48 }
0x3bbf   : > { %16701 = vmatpush3.msra.mxu0 %v17711_v49  ;;  %16732 = vmatprep.mubr.msk.f32.mxu0 %vm17809_vm0, %v17808_v1 }
0x3bc0   : > { %16702 = vmatprep.subr.mxu0 %v17808_v1 }
0x3bc1   : > { %16703 = vmatpush3.msra.mxu0 %v17712_v35 }
0x3bc2   : > { %16704 = vmatprep.subr.mxu0 %v17808_v1 }
0x3bc3   : > { %16705 = vmatpush3.msra.mxu0 %v17713_v53 }
0x3bc4   : > { %16706 = vmatprep.subr.mxu0 %v17808_v1 }
0x3bc5   : > { %16707 = vmatpush3.msra.mxu0 %v17714_v43 }
0x3bc6   : > { %16708 = vmatprep.subr.mxu0 %v17808_v1 }
0x3bc7   : > { %16709 = vmatpush3.msra.mxu0 %v17715_v54 }
0x3bc8   : > { %16710 = vmatprep.subr.mxu0 %v17808_v1 }
0x3bc9   : > { %16711 = vmatpush3.msra.mxu0 %v17716_v55 }
0x3bca   : > { %16712 = vmatprep.subr.mxu0 %v17808_v1 }
0x3bcb   : > { %16713 = vmatpush3.msra.mxu0 %v17717_v56 }
0x3bcc   : > { %16714 = vmatprep.subr.mxu0 %v17808_v1 }
0x3bcd   : > { %16715 = vmatpush3.msra.mxu0 %v17718_v57 }
0x3bce   : > { %16716 = vmatprep.subr.mxu0 %v17808_v1 }
0x3bcf   : > { %16717 = vmatpush3.msra.mxu0 %v17719_v58 }
0x3bd0   : > { %16718 = vmatprep.subr.mxu0 %v17808_v1 }
0x3bd1   : > { %16719 = vmatpush3.msra.mxu0 %v17720_v60 }
0x3bd2   : > { %16720 = vmatprep.subr.mxu0 %v17808_v1 }
0x3bd3   : > { %16721 = vmatpush3.msra.mxu0 %v17721_v24 }
0x3bd4   : > { %16722 = vmatprep.subr.mxu0 %v17808_v1 }
0x3bd5   : > { %16723 = vmatpush3.msra.mxu0 %v17722_v47 }
0x3bd6   : > { %16724 = vmatprep.subr.mxu0 %v17808_v1 }
0x3bd7   : > { %16725 = vmatpush3.msra.mxu0 %v17723_v62 }
0x3bd8   : > { %16726 = vmatprep.subr.mxu0 %v17808_v1 }
0x3bd9   : > { %16727 = vmatpush3.msra.mxu0 %v17724_v39 }
0x3bda   : > { %16728 = vmatprep.subr.mxu0 %v17808_v1 }
0x3bdb   : > { %16729 = vmatpush3.msra.mxu0 %v17725_v63 }
0x3bdc   : > { %16730 = vmatprep.subr.mxu0 %v17808_v1 }
0x3bdd   : > { %16731 = vmatpush3.msra.mxu0 %v17726_v0 }
0x3bde   : > { %16776 = vmatprep.subr.mxu0 %v17808_v1 }
0x3c7e   : > { %v7716_v3 = vpop.f32.mrf.mxu0 }
0x3c7f   : > { %v7717_v4 = vadd.f32 %v7716_v3, %v7646_v2 }
0x3c80   : > { %v16699_v9 = vpop.f32.mrf.mxu0 }
0x3c81   : > { %7720 = vst [vmem:[%s18643_s29 + $0x1] sm:$0x1] %v7717_v4  ;;  %v7721_v6 = vsel %vm3257_vm11, %v7717_v4, -inf }
0x3c82   : > { %7722 = vmax.xlane.f32.xlu1 %v7721_v6 }
0x3d0b   : > { %v7723_v7 = vpop.xlane.xlu1 %7722 }
0x3d0c   : > { %vm7724_vm12 = vcmp.eq.f32.partialorder %v7717_v4, %v7723_v7 }
0x3d0d   : > { %v7725_v8 = vsel %vm7724_vm12, %v18279_v26, 128 }
0x3d0e   : > { %v7726_v10 = vsel %vm3257_vm11, %v7725_v8, 2147483647 }
0x3d0f   : > { %v7728_v11 = vshra.s32 %v7726_v10, 16  ;;  %v7727_v13 = vand.u32 65535, %v7726_v10 }
0x3d11   : > { %v7730_v12 = vcvt.s32.f32 %v7728_v11  ;;  %v7729_v17 = vcvt.s32.f32 %v7727_v13 }
0x3d13   : > { %7731 = vmin.xlane.f32.xlu0 %v7730_v12 }
0x3d9c   : > { %v7732_v16 = vpop.xlane.xlu0 %7731 }
0x3d9d   : > { %vm7733_vm14 = vcmp.eq.f32.partialorder %v7730_v12, %v7732_v16  ;;  %v7738_v5 = vcvt.f32.s32 %v7732_v16 }
0x3d9e   : > { %v7734_v18 = vsel %vm7733_vm14, %v7729_v17, inf }
0x3d9f   : > { %7735 = vmin.xlane.f32.xlu1 %v7734_v18  ;;  %v7739_v22 = vshll.u32 %v7738_v5, 16 }
0x3e28   : > { %v7736_v21 = vpop.xlane.xlu1 %7735 }
0x3e29   : > { %v7737_v23 = vcvt.f32.s32 %v7736_v21 }
0x3e2b   : > { %v7740_v29 = vadd.s32 %v7739_v22, %v7737_v23 }
0x3e2d   : > { %vm7741_vm15 = vcmp.eq.s32.totalorder %v18279_v26, %v7740_v29 }
0x3e2e   : > { %16733 = vmatmul.mubr.msk.f32.vlgmr.msra.gmra.mxu0 %vm7741_vm15, %v17821_v31  ;;  %vm10441_vm15 = vcmask 24576  }
0x3e2f   : > { %16778 = vmatprep.mubr.msk.f32.mxu0 %vm17809_vm0, %v17808_v1 }
0x3eee   : > { %v7811_v34 = vpop.f32.mrf.mxu0 }
0x3eef   : > { %v18987_v44 = vadd.f32 %v7811_v34, %v7744_v30 }
0x3ef0   : > { %v16734_v37 = vpop.f32.mrf.mxu0 }
0x3ef1   : > { %16744 = vmatmul.mubr.msk.f32.vlgmr.msra.gmra.mxu1 %vm1443_vm3, %v18987_v44 }
0x3ef2   : > { %16748 = vmatprep.mubr.msk.f32.mxu1 %vm17809_vm0, %v17808_v1 }
0x3fb1   : > { %v7889_v48 = vpop.f32.mrf.mxu1 }
0x3fb2   : > { %v18994_v49 = vadd.f32 %v7889_v48, %v7819_v46 }
0x3fb3   : > { %v16745_v35 = vpop.f32.mrf.mxu1 }
0x3fb4   : > { %7894 = vrot.lane.b32.xlu0 %v18994_v49, %s20033_s23 }
0x4026   : > { %v7895_v53 = vpop.permute.xlu0 %7894 }
0x4027   : > { %7897 = vst.msk [vmem:[#allocation2 + $0x2] sm:$0x1] %vm3229_vm9, %v7895_v53 }
0x402e   : > { %v18999_v43 = vld [vmem:[#allocation2] sm:$0x7] }
0x402f   : > { %8076 = vrot.lane.b32.xlu0 %v18999_v43, %s20049_s10  ;;  %16747 = vmatpush3.xpose.msk.msra.mxu1 %vm1348_vm2, %v18999_v43 }
0x4030   : > { %16751 = vmatprep.subr.mxu1 %v17808_v1 }
0x4032   : > { %16749 = vmatmul.mubr.msk.f32.vlgmr.msra.gmra.mxu1 %vm1348_vm2, %v18994_v49 }
0x4033   : > { %8074 = vrot.lane.b32.xlu0 %v18994_v49, %s20049_s10  ;;  %16753 = vmatprep.mubr.msk.f32.mxu1 %vm17809_vm0, %v17808_v1 }
0x4037   : > { %8387 = vrot.lane.b32.xlu0 %v18994_v49, %s20035_s6 }
0x40a1   : > { %v8077_v39 = vpop.permute.xlu0 %8076 }
0x40a5   : > { %v8075_v2 = vpop.permute.xlu0 %8074 }
0x40a9   : > { %v8388_v4 = vpop.permute.xlu0 %8387 }
0x40f2   : > { %v7979_v54 = vpop.f32.mrf.mxu1 }
0x40f3   : > { %v7983_v55 = vmul.f32 0.35355338, %v7979_v54  ;;  %v7905_v54 = vld [vmem:[%s20026_s26 + $0x8] sm:$0xff] }
0x40f4   : > { %v16750_v56 = vpop.f32.mrf.mxu1 }
0x40f5   : > { %v7985_v57 = vsel %vm7984_vm4, %v7983_v55, -inf }
0x40f6   : > { %7986 = vmax.xlane.f32.xlu1 %v7985_v57 }
0x417f   : > { %v7987_v58 = vpop.xlane.xlu1 %7986 }
0x4180   : > { %v7988_v60 = vsub.f32 %v7983_v55, %v7987_v58 }
0x4182   : > { %v7989_v24 = vmul.f32 1.442695, %v7988_v60 }
0x4184   : > { %17581 = vpow2.f32 %v7989_v24 }
0x4191   : > { %v17582_v47 = vpop.eup %17581 }
0x4192   : > { %v7991_v62 = vsel %vm7984_vm4, %v17582_v47, 0.0 }
0x4193   : > { %7992 = vadd.xlane.f32.xlu1 %v7991_v62  ;;  %v7906_v62 = vld [vmem:[%s20026_s26 + $0x10] sm:$0xff] }
0x41a4   : > { %7898 = vrot.lane.b32.xlu1 %v18994_v49, %s20050_s28 }
0x41a8   : > { %8389 = vrot.lane.b32.xlu1 %v18999_v43, %s20035_s6 }
0x421c   : > { %v7993_v63 = vpop.xlane.xlu1 %7992 }
0x421d   : > { %17583 = vrcp.f32 %v7993_v63 }
0x4220   : > { %v7899_v0 = vpop.permute.xlu1 %7898 }
0x4221   : > { %7901 = vst.msk [vmem:[#allocation3 + $0x2] sm:$0x1] %vm3229_vm9, %v7899_v0 }
0x4224   : > { %v8390_v3 = vpop.permute.xlu1 %8389 }
0x4225   : > { %16777 = vmatpush3.xpose.msk.msra.mxu0 %vm1348_vm2, %v8390_v3 }
0x4226   : > { %16786 = vmatprep.subr.mxu0 %v17808_v1 }
0x4228   : > { %16779 = vmatmul.mubr.msk.f32.vlgmr.msra.gmra.mxu0 %vm1348_vm2, %v8388_v4  ;;  %v19024_v9 = vld [vmem:[#allocation3] sm:$0x7] }
0x4229   : > { %16752 = vmatpush3.msk.msra.mxu1 %vm8000_vm7, %v19024_v9  ;;  %16788 = vmatprep.mubr.msk.f32.mxu0 %vm17809_vm0, %v17808_v1 }
0x422a   : > { %v17584_v6 = vpop.eup %17583  ;;  %16756 = vmatprep.subr.mxu1 %v17808_v1  ;;  %16787 = vmatpush3.msra.mxu0 %v7906_v62 }
0x422b   : > { %v7995_v7 = vmul.f32 %v17584_v6, %v17582_v47  ;;  %16796 = vmatprep.subr.mxu0 %v17808_v1 }
0x422d   : > { %16754 = vmatmul.mubr.msk.f32.vlgmr.msra.gmra.mxu1 %vm7996_vm8, %v7995_v7 }
0x422e   : > { %16757 = vmatpush3.xpose.msk.msra.mxu1 %vm1348_vm2, %v8077_v39  ;;  %16758 = vmatprep.mubr.msk.f32.mxu1 %vm17809_vm0, %v17808_v1 }
0x422f   : > { %16761 = vmatprep.subr.mxu1 %v17808_v1 }
0x4231   : > { %16759 = vmatmul.mubr.msk.f32.vlgmr.msra.gmra.mxu1 %vm1348_vm2, %v8075_v2 }
0x4232   : > { %16763 = vmatprep.mubr.msk.f32.mxu1 %vm17809_vm0, %v17808_v1 }
0x42e8   : > { %v8461_v8 = vpop.f32.mrf.mxu0 }
0x42e9   : > { %v8465_v18 = vmul.f32 0.35355338, %v8461_v8 }
0x42ea   : > { %v16780_v10 = vpop.f32.mrf.mxu0 }
0x42eb   : > { %v8466_v20 = vsel %vm7984_vm4, %v8465_v18, -inf }
0x42ed   : > { %v8070_v11 = vpop.f32.mrf.mxu1 }
0x42ef   : > { %v16755_v12 = vpop.f32.mrf.mxu1 }
0x42f1   : > { %v8148_v13 = vpop.f32.mrf.mxu1 }
0x42f2   : > { %v8152_v16 = vmul.f32 0.35355338, %v8148_v13 }
0x42f3   : > { %v16760_v17 = vpop.f32.mrf.mxu1 }
0x42f4   : > { %v8153_v19 = vsel %vm7984_vm4, %v8152_v16, -inf }
0x42f5   : > { %8154 = vmax.xlane.f32.xlu1 %v8153_v19  ;;  %v7907_v19 = vld [vmem:[%s20026_s26 + $0x18] sm:$0xff] }
0x42f9   : > { %8467 = vmax.xlane.f32.xlu1 %v8466_v20 }
0x437e   : > { %v8155_v5 = vpop.xlane.xlu1 %8154 }
0x437f   : > { %v8156_v21 = vsub.f32 %v8152_v16, %v8155_v5 }
0x4381   : > { %v8157_v22 = vmul.f32 1.442695, %v8156_v21 }
0x4382   : > { %v8468_v23 = vpop.xlane.xlu1 %8467 }
0x4383   : > { %17585 = vpow2.f32 %v8157_v22  ;;  %v8469_v29 = vsub.f32 %v8465_v18, %v8468_v23 }
0x4385   : > { %v8470_v32 = vmul.f32 1.442695, %v8469_v29 }
0x4387   : > { %17587 = vpow2.f32 %v8470_v32 }
0x4390   : > { %v17586_v33 = vpop.eup %17585 }
0x4391   : > { %v8159_v30 = vsel %vm7984_vm4, %v17586_v33, 0.0 }
0x4392   : > { %8160 = vadd.xlane.f32.xlu0 %v8159_v30 }
0x4394   : > { %v17588_v34 = vpop.eup %17587 }
0x4395   : > { %v8472_v37 = vsel %vm7984_vm4, %v17588_v34, 0.0 }
0x4396   : > { %8473 = vadd.xlane.f32.xlu1 %v8472_v37 }
0x43a7   : > { %8477 = vrot.lane.b32.xlu1 %v19024_v9, %s20035_s6 }
0x43a8   : > { %8164 = vrot.lane.b32.xlu0 %v19024_v9, %s20049_s10 }
0x43ac   : > { %8630 = vrot.lane.b32.xlu0 %v18999_v43, %s20036_s8 }
0x43b0   : > { %8628 = vrot.lane.b32.xlu0 %v18994_v49, %s20036_s8  ;;  %v7904_v49 = vld [vmem:[%s20026_s26] sm:$0xff] }
0x441b   : > { %v8161_v46 = vpop.xlane.xlu0 %8160 }
0x441c   : > { %17589 = vrcp.f32 %v8161_v46 }
0x441f   : > { %v8165_v48 = vpop.permute.xlu0 %8164  ;;  %v8474_v43 = vpop.xlane.xlu1 %8473 }
0x4420   : > { %16762 = vmatpush3.msk.msra.mxu1 %vm8000_vm7, %v8165_v48  ;;  %17591 = vrcp.f32 %v8474_v43 }
0x4421   : > { %16766 = vmatprep.subr.mxu1 %v17808_v1 }
0x4423   : > { %v8478_v58 = vpop.permute.xlu1 %8477  ;;  %v8631_v60 = vpop.permute.xlu0 %8630 }
0x4427   : > { %v8629_v47 = vpop.permute.xlu0 %8628 }
0x4429   : > { %v17590_v35 = vpop.eup %17589 }
0x442a   : > { %v8163_v53 = vmul.f32 %v17590_v35, %v17586_v33 }
0x442c   : > { %16764 = vmatmul.mubr.msk.f32.vlgmr.msra.gmra.mxu1 %vm7996_vm8, %v8163_v53 }
0x442d   : > { %16767 = vmatpush3.msra.mxu1 %v7905_v54  ;;  %16768 = vmatprep.mubr.msk.f32.mxu1 %vm17809_vm0, %v17808_v1  ;;  %v17592_v57 = vpop.eup %17591 }
0x442e   : > { %16771 = vmatprep.subr.mxu1 %v17808_v1  ;;  %v8476_v24 = vmul.f32 %v17592_v57, %v17588_v34  ;;  %v8869_v34 = vld [vmem:[%s20028_s2] sm:$0x1]  ;;  %v8892_v57 = vld [vmem:[%s20029_s15 + $0x18] sm:$0xff] }
0x44ec   : > { %v8237_v55 = vpop.f32.mrf.mxu1 }
0x44ed   : > { %16769 = vmatmul.mubr.msk.f32.vlgmr.msra.gmra.mxu1 %vm1348_vm2, %v8237_v55 }
0x44ee   : > { %v16765_v56 = vpop.f32.mrf.mxu1  ;;  %16772 = vmatpush3.msra.mxu1 %v7904_v49  ;;  %16773 = vmatprep.mubr.msk.f32.mxu1 %vm17809_vm0, %v17808_v1 }
0x44ef   : > { %16781 = vmatprep.subr.mxu1 %v17808_v1 }
0x44f1   : > { %16774 = vmatmul.mubr.msk.f32.vlgmr.msra.gmra.mxu1 %vm1348_vm2, %v8070_v11 }
0x44f2   : > { %16782 = vmatpush3.msk.msra.mxu1 %vm8000_vm7, %v8478_v58  ;;  %16783 = vmatprep.mubr.msk.f32.mxu1 %vm17809_vm0, %v17808_v1  ;;  %v8891_v58 = vld [vmem:[%s20029_s15 + $0x10] sm:$0xff] }
0x44f3   : > { %16791 = vmatprep.subr.mxu1 %v17808_v1 }
0x44f5   : > { %16784 = vmatmul.mubr.msk.f32.vlgmr.msra.gmra.mxu1 %vm7996_vm8, %v8476_v24 }
0x44f6   : > { %16792 = vmatpush3.xpose.msk.msra.mxu1 %vm1348_vm2, %v8631_v60  ;;  %16793 = vmatprep.mubr.msk.f32.mxu1 %vm17809_vm0, %v17808_v1  ;;  %v8890_v60 = vld [vmem:[%s20029_s15 + $0x8] sm:$0xff] }
0x44f7   : > { %16801 = vmatprep.subr.mxu1 %v17808_v1 }
0x44f9   : > { %16794 = vmatmul.mubr.msk.f32.vlgmr.msra.gmra.mxu1 %vm1348_vm2, %v8629_v47 }
0x44fa   : > { %16803 = vmatprep.mubr.msk.f32.mxu1 %vm17809_vm0, %v17808_v1  ;;  %16802 = vmatpush3.msra.mxu1 %v7907_v19 }
0x44fb   : > { %16817 = vmatprep.subr.mxu1 %v17808_v1 }
0x45ad   : > { %v8310_v39 = vpop.f32.mrf.mxu1 }
0x45af   : > { %v16770_v63 = vpop.f32.mrf.mxu1 }
0x45b0   : > { %v8872_v63 = vld [vmem:[%s20030_s18] sm:$0x1] }
0x45b1   : > { %v8383_v0 = vpop.f32.mrf.mxu1 }
0x45b2   : > { %v8384_v2 = vadd.f32 %v8383_v0, %v8310_v39 }
0x45b3   : > { %v16775_v3 = vpop.f32.mrf.mxu1 }
0x45b5   : > { %v8550_v4 = vpop.f32.mrf.mxu1 }
0x45b6   : > { %16789 = vmatmul.mubr.msk.f32.vlgmr.msra.gmra.mxu0 %vm1348_vm2, %v8550_v4 }
0x45b7   : > { %v16785_v6 = vpop.f32.mrf.mxu1  ;;  %16798 = vmatprep.mubr.msk.f32.mxu0 %vm17809_vm0, %v17808_v1 }
0x45b8   : > { %v8893_v6 = vld [vmem:[%s20032_s3] sm:$0x1] }
0x45b9   : > { %v8702_v7 = vpop.f32.mrf.mxu1 }
0x45ba   : > { %v8706_v8 = vmul.f32 0.35355338, %v8702_v7 }
0x45bb   : > { %v16795_v10 = vpop.f32.mrf.mxu1 }
0x45bc   : > { %v8707_v11 = vsel %vm7984_vm4, %v8706_v8, -inf }
0x45bd   : > { %8708 = vmax.xlane.f32.xlu1 %v8707_v11 }
0x4646   : > { %v8709_v12 = vpop.xlane.xlu1 %8708 }
0x4647   : > { %v8710_v13 = vsub.f32 %v8706_v8, %v8709_v12 }
0x4649   : > { %v8711_v16 = vmul.f32 1.442695, %v8710_v13 }
0x464b   : > { %17593 = vpow2.f32 %v8711_v16 }
0x4658   : > { %v17594_v17 = vpop.eup %17593 }
0x4659   : > { %v8713_v18 = vsel %vm7984_vm4, %v17594_v17, 0.0  ;;  %vm10457_vm4 = vcmask 1043456  }
0x465a   : > { %8714 = vadd.xlane.f32.xlu0 %v8713_v18 }
0x4670   : > { %8718 = vrot.lane.b32.xlu0 %v19024_v9, %s20036_s8 }
0x4676   : > { %v8623_v20 = vpop.f32.mrf.mxu0 }
0x4677   : > { %v8627_v5 = vadd.f32 %v8623_v20, %v8384_v2  ;;  %v8873_v2 = vld [vmem:[%s20031_s22] sm:$0x1] }
0x4678   : > { %v16790_v21 = vpop.f32.mrf.mxu0 }
0x46e3   : > { %v8715_v22 = vpop.xlane.xlu0 %8714 }
0x46e4   : > { %17595 = vrcp.f32 %v8715_v22 }
0x46e7   : > { %v8719_v23 = vpop.permute.xlu0 %8718 }
0x46e8   : > { %16797 = vmatpush3.msk.msra.mxu0 %vm8000_vm7, %v8719_v23  ;;  %vm10453_vm7 = vcmask 31744  }
0x46e9   : > { %16806 = vmatprep.subr.mxu0 %v17808_v1 }
0x46f1   : > { %v17596_v29 = vpop.eup %17595 }
0x46f2   : > { %v8717_v32 = vmul.f32 %v17596_v29, %v17594_v17 }
0x46f4   : > { %16799 = vmatmul.mubr.msk.f32.vlgmr.msra.gmra.mxu0 %vm7996_vm8, %v8717_v32 }
0x46f5   : > { %16814 = vmatprep.mubr.msk.f32.mxu0 %vm17809_vm0, %v17808_v1  ;;  %16807 = vmatpush3.msra.mxu0 %v8892_v57 }
0x46f6   : > { %16808 = vmatprep.subr.mxu0 %v17808_v1 }
0x46f7   : > { %16809 = vmatpush3.msra.mxu0 %v8891_v58 }
0x46f8   : > { %16810 = vmatprep.subr.mxu0 %v17808_v1 }
0x46f9   : > { %16811 = vmatpush3.msra.mxu0 %v8890_v60 }
0x46fa   : > { %16812 = vmatprep.subr.mxu0 %v17808_v1 }
0x47b4   : > { %v8791_v9 = vpop.f32.mrf.mxu0 }
0x47b5   : > { %16804 = vmatmul.mubr.msk.f32.vlgmr.msra.gmra.mxu1 %vm1348_vm2, %v8791_v9 }
0x47b6   : > { %16818 = vmatpush3.xpose.msk.msra.mxu1 %vm1348_vm2, %v18364_v50  ;;  %v16800_v33 = vpop.f32.mrf.mxu0  ;;  %16821 = vmatprep.mubr.msk.f32.mxu1 %vm17809_vm0, %v17808_v1 }
0x47b7   : > { %16819 = vmatprep.subr.mxu1 %v17808_v1 }
0x47ba   : > { %16820 = vmatpush3.xpose.msk.msra.mxu1 %vm1348_vm2, %v18373_v51 }
0x47bb   : > { %16831 = vmatprep.subr.mxu1 %v17808_v1 }
0x4875   : > { %v8864_v30 = vpop.f32.mrf.mxu1 }
0x4876   : > { %v8868_v37 = vadd.f32 %v8864_v30, %v8627_v5 }
0x4877   : > { %v16805_v46 = vpop.f32.mrf.mxu1 }
0x4878   : > { %v8870_v48 = vadd.f32 %v8869_v34, %v8868_v37 }
0x487a   : > { %v8871_v35 = vadd.f32 %v8870_v48, %v18987_v44  ;;  %v8889_v44 = vld [vmem:[%s20029_s15] sm:$0xff] }
0x487b   : > { %16813 = vmatpush3.msra.mxu0 %v8889_v44  ;;  %v8967_v48 = vld [vmem:[%s20037_s9] sm:$0xff] }
0x487c   : > { %v8874_v53 = vsel %vm3229_vm9, %v8871_v35, 0.0  ;;  %16824 = vmatprep.subr.mxu0 %v17808_v1 }
0x487d   : > { %8875 = vadd.xlane.f32.xlu1 %v8874_v53 }
0x4906   : > { %v8876_v54 = vpop.xlane.xlu1 %8875 }
0x4907   : > { %v8877_v43 = vmul.f32 0.03125, %v8876_v54 }
0x4909   : > { %v8878_v49 = vsub.f32 %v8871_v35, %v8877_v43 }
0x490b   : > { %v8879_v55 = vmul.f32 %v8878_v49, %v8878_v49 }
0x490d   : > { %v8880_v56 = vsel %vm3229_vm9, %v8879_v55, 0.0  ;;  %v8968_v55 = vld [vmem:[%s20037_s9 + $0x8] sm:$0xff] }
0x490e   : > { %8881 = vadd.xlane.f32.xlu1 %v8880_v56 }
0x4997   : > { %v8882_v24 = vpop.xlane.xlu1 %8881 }
0x4998   : > { %v8883_v47 = vmul.f32 0.03125, %v8882_v24 }
0x499a   : > { %v8884_v62 = vadd.f32 1e-05, %v8883_v47 }
0x499c   : > { %17597 = vrsqrt.f32 %v8884_v62 }
0x49a9   : > { %v17598_v39 = vpop.eup %17597 }
0x49aa   : > { %v8886_v0 = vmul.f32 %v17598_v39, %v8878_v49 }
0x49ac   : > { %v8887_v3 = vmul.f32 %v8886_v0, %v8872_v63 }
0x49ae   : > { %v19115_v4 = vadd.f32 %v8887_v3, %v8873_v2 }
0x49b0   : > { %16815 = vmatmul.mubr.msk.f32.vlgmr.msra.gmra.mxu0 %vm1443_vm3, %v19115_v4 }
0x49b1   : > { %16825 = vmatpush3.msk.msra.mxu0 %vm1655_vm6, %v18434_v40  ;;  %16828 = vmatprep.mubr.msk.f32.mxu0 %vm17809_vm0, %v17808_v1 }
0x49b2   : > { %16826 = vmatprep.subr.mxu0 %v17808_v1 }
0x49b3   : > { %16827 = vmatpush3.msra.mxu0 %v18438_v41 }
0x49b4   : > { %16838 = vmatprep.subr.mxu0 %v17808_v1 }
0x4a70   : > { %v8963_v7 = vpop.f32.mrf.mxu0 }
0x4a71   : > { %v8964_v8 = vadd.f32 %v8963_v7, %v8893_v6 }
0x4a72   : > { %v16816_v10 = vpop.f32.mrf.mxu0 }
0x4a73   : > { %9129 = vrot.lane.b32.xlu1 %v8964_v8, %s20049_s10  ;;  %16822 = vmatmul.mubr.msk.f32.vlgmr.msra.gmra.mxu1 %vm1348_vm2, %v8964_v8 }
0x4a74   : > { %16832 = vmatpush3.xpose.msk.msra.mxu1 %vm1348_vm2, %v18403_v14  ;;  %16835 = vmatprep.mubr.msk.f32.mxu1 %vm17809_vm0, %v17808_v1 }
0x4a75   : > { %16833 = vmatprep.subr.mxu1 %v17808_v1 }
0x4a78   : > { %16834 = vmatpush3.xpose.msk.msra.mxu1 %vm1348_vm2, %v18412_v15 }
0x4a79   : > { %16850 = vmatprep.subr.mxu1 %v17808_v1 }
0x4ae5   : > { %v9130_v11 = vpop.permute.xlu1 %9129 }
0x4ae6   : > { %16836 = vmatmul.mubr.msk.f32.vlgmr.msra.gmra.mxu1 %vm1348_vm2, %v9130_v11 }
0x4ae7   : > { %16852 = vmatprep.mubr.msk.f32.mxu1 %vm17809_vm0, %v17808_v1  ;;  %16851 = vmatpush3.msra.mxu1 %v8967_v48  ;;  %v8970_v48 = vld [vmem:[%s20037_s9 + $0x18] sm:$0xff] }
0x4ae8   : > { %16862 = vmatprep.subr.mxu1 %v17808_v1 }
0x4b33   : > { %v9040_v12 = vpop.f32.mrf.mxu1 }
0x4b34   : > { %v9044_v13 = vmul.f32 0.35355338, %v9040_v12 }
0x4b35   : > { %v16823_v16 = vpop.f32.mrf.mxu1 }
0x4b36   : > { %v9045_v17 = vsel %vm4078_vm13, %v9044_v13, -inf }
0x4b37   : > { %9046 = vmax.xlane.f32.xlu0 %v9045_v17 }
0x4ba6   : > { %v9199_v18 = vpop.f32.mrf.mxu1 }
0x4ba7   : > { %v9203_v19 = vmul.f32 0.35355338, %v9199_v18 }
0x4ba8   : > { %v16837_v20 = vpop.f32.mrf.mxu1 }
0x4ba9   : > { %v9204_v5 = vsel %vm4078_vm13, %v9203_v19, -inf }
0x4baa   : > { %9205 = vmax.xlane.f32.xlu1 %v9204_v5 }
0x4bbb   : > { %9667 = vrot.lane.b32.xlu1 %v8964_v8, %s20036_s8 }
0x4bc0   : > { %v9047_v21 = vpop.xlane.xlu0 %9046 }
0x4bc1   : > { %v9048_v22 = vsub.f32 %v9044_v13, %v9047_v21 }
0x4bc3   : > { %v9049_v23 = vmul.f32 1.442695, %v9048_v22 }
0x4bc5   : > { %17599 = vpow2.f32 %v9049_v23 }
0x4bd2   : > { %v17600_v29 = vpop.eup %17599 }
0x4bd3   : > { %v9051_v32 = vsel %vm4078_vm13, %v17600_v29, 0.0 }
0x4bd4   : > { %9052 = vadd.xlane.f32.xlu0 %v9051_v32 }
0x4c33   : > { %v9206_v9 = vpop.xlane.xlu1 %9205 }
0x4c34   : > { %v9207_v33 = vsub.f32 %v9203_v19, %v9206_v9  ;;  %v8969_v9 = vld [vmem:[%s20037_s9 + $0x10] sm:$0xff] }
0x4c36   : > { %v9208_v30 = vmul.f32 1.442695, %v9207_v33 }
0x4c37   : > { %v9668_v24 = vpop.permute.xlu1 %9667 }
0x4c38   : > { %17601 = vpow2.f32 %v9208_v30 }
0x4c45   : > { %v17602_v34 = vpop.eup %17601 }
0x4c46   : > { %v9210_v37 = vsel %vm4078_vm13, %v17602_v34, 0.0 }
0x4c47   : > { %9211 = vadd.xlane.f32.xlu0 %v9210_v37 }
0x4c5d   : > { %v9053_v46 = vpop.xlane.xlu0 %9052  ;;  %9434 = vrot.lane.b32.xlu0 %v8964_v8, %s20035_s6 }
0x4c5e   : > { %17603 = vrcp.f32 %v9053_v46 }
0x4c6b   : > { %v17604_v35 = vpop.eup %17603 }
0x4c6c   : > { %v9055_v53 = vmul.f32 %v17604_v35, %v17600_v29 }
0x4c6e   : > { %16829 = vmatmul.mubr.msk.f32.vlgmr.msra.gmra.mxu0 %vm1620_vm5, %v9055_v53 }
0x4c6f   : > { %16839 = vmatpush3.msk.msra.mxu0 %vm1655_vm6, %v18456_v42  ;;  %16842 = vmatprep.mubr.msk.f32.mxu0 %vm17809_vm0, %v17808_v1 }
0x4c70   : > { %16840 = vmatprep.subr.mxu0 %v17808_v1 }
0x4c71   : > { %16841 = vmatpush3.msra.mxu0 %v18460_v52 }
0x4c72   : > { %16845 = vmatprep.subr.mxu0 %v17808_v1 }
0x4cd0   : > { %v9212_v54 = vpop.xlane.xlu0 %9211 }
0x4cd1   : > { %17605 = vrcp.f32 %v9212_v54 }
0x4cd4   : > { %v9435_v44 = vpop.permute.xlu0 %9434 }
0x4cde   : > { %v17606_v43 = vpop.eup %17605 }
0x4cdf   : > { %v9214_v49 = vmul.f32 %v17606_v43, %v17602_v34 }
0x4ce1   : > { %16843 = vmatmul.mubr.msk.f32.vlgmr.msra.gmra.mxu0 %vm1620_vm5, %v9214_v49 }
0x4ce2   : > { %16846 = vmatpush3.msra.mxu0 %v8968_v55  ;;  %16847 = vmatprep.mubr.msk.f32.mxu0 %vm17809_vm0, %v17808_v1 }
0x4ce3   : > { %16855 = vmatprep.subr.mxu0 %v17808_v1 }
0x4d2e   : > { %v9125_v56 = vpop.f32.mrf.mxu0 }
0x4d2f   : > { %16853 = vmatmul.mubr.msk.f32.vlgmr.msra.gmra.mxu1 %vm1348_vm2, %v9125_v56 }
0x4d30   : > { %16863 = vmatpush3.msk.msra.mxu1 %vm1655_vm6, %v18520_v27  ;;  %v16830_v57 = vpop.f32.mrf.mxu0  ;;  %16866 = vmatprep.mubr.msk.f32.mxu1 %vm17809_vm0, %v17808_v1 }
0x4d31   : > { %16864 = vmatprep.subr.mxu1 %v17808_v1  ;;  %v9900_v57 = vld [vmem:[%s20040_s13] sm:$0x1] }
0x4d32   : > { %16865 = vmatpush3.msra.mxu1 %v18515_v28 }
0x4d33   : > { %16869 = vmatprep.subr.mxu1 %v17808_v1 }
0x4da1   : > { %v9284_v58 = vpop.f32.mrf.mxu0 }
0x4da2   : > { %16848 = vmatmul.mubr.msk.f32.vlgmr.msra.gmra.mxu0 %vm1348_vm2, %v9284_v58 }
0x4da3   : > { %16856 = vmatpush3.xpose.msk.msra.mxu0 %vm1348_vm2, %v18473_v36  ;;  %v16844_v60 = vpop.f32.mrf.mxu0  ;;  %16859 = vmatprep.mubr.msk.f32.mxu0 %vm17809_vm0, %v17808_v1 }
0x4da4   : > { %16857 = vmatprep.subr.mxu0 %v17808_v1 }
0x4da7   : > { %16858 = vmatpush3.xpose.msk.msra.mxu0 %vm1348_vm2, %v18480_v59 }
0x4da8   : > { %16874 = vmatprep.subr.mxu0 %v17808_v1 }
0x4daa   : > { %16860 = vmatmul.mubr.msk.f32.vlgmr.msra.gmra.mxu0 %vm1348_vm2, %v9435_v44 }
0x4dab   : > { %16875 = vmatpush3.xpose.msk.msra.mxu0 %vm1348_vm2, %v18486_v25  ;;  %16878 = vmatprep.mubr.msk.f32.mxu0 %vm17809_vm0, %v17808_v1 }
0x4dac   : > { %16876 = vmatprep.subr.mxu0 %v17808_v1 }
0x4daf   : > { %16877 = vmatpush3.xpose.msk.msra.mxu0 %vm1348_vm2, %v18494_v61 }
0x4db0   : > { %16893 = vmatprep.subr.mxu0 %v17808_v1 }
0x4db2   : > { %16879 = vmatmul.mubr.msk.f32.vlgmr.msra.gmra.mxu0 %vm1348_vm2, %v9668_v24 }
0x4db3   : > { %16901 = vmatprep.mubr.msk.f32.mxu0 %vm17809_vm0, %v17808_v1 }
0x4def   : > { %v9430_v47 = vpop.f32.mrf.mxu1 }
0x4df1   : > { %v16854_v62 = vpop.f32.mrf.mxu1 }
0x4e62   : > { %v9357_v39 = vpop.f32.mrf.mxu0 }
0x4e63   : > { %v9431_v35 = vadd.f32 %v9430_v47, %v9357_v39 }
0x4e64   : > { %v16849_v63 = vpop.f32.mrf.mxu0 }
0x4e6a   : > { %v9504_v0 = vpop.f32.mrf.mxu0 }
0x4e6b   : > { %v9508_v2 = vmul.f32 0.35355338, %v9504_v0 }
0x4e6c   : > { %v16861_v3 = vpop.f32.mrf.mxu0 }
0x4e6d   : > { %v9509_v6 = vsel %vm4078_vm13, %v9508_v2, -inf  ;;  %v9923_v3 = vld [vmem:[%s20041_s5 + $0x18] sm:$0xff] }
0x4e6e   : > { %9510 = vmax.xlane.f32.xlu1 %v9509_v6  ;;  %16894 = vmatpush3.msra.mxu0 %v9923_v3  ;;  %v9922_v6 = vld [vmem:[%s20041_s5 + $0x10] sm:$0xff]  ;;  %v10082_v3 = vld [vmem:[%s20047_s25] sm:$0x1] }
0x4e6f   : > { %16895 = vmatprep.subr.mxu0 %v17808_v1 }
0x4e70   : > { %16896 = vmatpush3.msra.mxu0 %v9922_v6 }
0x4e71   : > { %16897 = vmatprep.subr.mxu0 %v17808_v1 }
0x4e72   : > { %v9737_v7 = vpop.f32.mrf.mxu0 }
0x4e73   : > { %v9741_v16 = vmul.f32 0.35355338, %v9737_v7  ;;  %v9920_v7 = vld [vmem:[%s20041_s5] sm:$0xff] }
0x4e74   : > { %v16880_v8 = vpop.f32.mrf.mxu0 }
0x4e75   : > { %v9742_v18 = vsel %vm4078_vm13, %v9741_v16, -inf  ;;  %v10006_v8 = vld [vmem:[%s20042_s14 + $0x38] sm:$0xff] }
0x4ef7   : > { %v9511_v10 = vpop.xlane.xlu1 %9510 }
0x4ef8   : > { %v9512_v11 = vsub.f32 %v9508_v2, %v9511_v10  ;;  %v10005_v10 = vld [vmem:[%s20042_s14 + $0x30] sm:$0xff] }
0x4efa   : > { %v9513_v12 = vmul.f32 1.442695, %v9512_v11  ;;  %v10004_v11 = vld [vmem:[%s20042_s14 + $0x28] sm:$0xff] }
0x4efc   : > { %17607 = vpow2.f32 %v9513_v12  ;;  %v10003_v12 = vld [vmem:[%s20042_s14 + $0x20] sm:$0xff] }
0x4f09   : > { %v17608_v13 = vpop.eup %17607 }
0x4f0a   : > { %v9515_v17 = vsel %vm4078_vm13, %v17608_v13, 0.0 }
0x4f0b   : > { %9516 = vadd.xlane.f32.xlu0 %v9515_v17 }
0x4f0f   : > { %9743 = vmax.xlane.f32.xlu0 %v9742_v18 }
0x4f94   : > { %v9517_v19 = vpop.xlane.xlu0 %9516 }
0x4f95   : > { %17609 = vrcp.f32 %v9517_v19 }
0x4f98   : > { %v9744_v20 = vpop.xlane.xlu0 %9743 }
0x4f99   : > { %v9745_v5 = vsub.f32 %v9741_v16, %v9744_v20  ;;  %v9903_v20 = vld [vmem:[%s20043_s17] sm:$0x1] }
0x4f9b   : > { %v9746_v21 = vmul.f32 1.442695, %v9745_v5 }
0x4f9d   : > { %17611 = vpow2.f32 %v9746_v21  ;;  %v9904_v21 = vld [vmem:[%s20044_s19] sm:$0x1] }
0x4fa2   : > { %v17610_v22 = vpop.eup %17609 }
0x4fa3   : > { %v9519_v23 = vmul.f32 %v17610_v22, %v17608_v13  ;;  %v10002_v13 = vld [vmem:[%s20042_s14 + $0x18] sm:$0xff] }
0x4fa5   : > { %16867 = vmatmul.mubr.msk.f32.vlgmr.msra.gmra.mxu1 %vm1620_vm5, %v9519_v23 }
0x4fa6   : > { %16871 = vmatprep.mubr.msk.f32.mxu1 %vm17809_vm0, %v17808_v1  ;;  %16870 = vmatpush3.msra.mxu1 %v8969_v9  ;;  %v9999_v9 = vld [vmem:[%s20042_s14] sm:$0xff] }
0x4fa7   : > { %16881 = vmatprep.subr.mxu1 %v17808_v1 }
0x4faa   : > { %v17612_v29 = vpop.eup %17611 }
0x4fab   : > { %v9748_v32 = vsel %vm4078_vm13, %v17612_v29, 0.0 }
0x4fac   : > { %9749 = vadd.xlane.f32.xlu1 %v9748_v32  ;;  %v10000_v32 = vld [vmem:[%s20042_s14 + $0x8] sm:$0xff] }
0x5035   : > { %v9750_v33 = vpop.xlane.xlu1 %9749 }
0x5036   : > { %17613 = vrcp.f32 %v9750_v33  ;;  %v9924_v33 = vld [vmem:[%s20045_s21] sm:$0x1] }
0x5043   : > { %v17614_v30 = vpop.eup %17613 }
0x5044   : > { %v9752_v46 = vmul.f32 %v17614_v30, %v17612_v29  ;;  %v10001_v29 = vld [vmem:[%s20042_s14 + $0x10] sm:$0xff] }
0x5065   : > { %v9589_v34 = vpop.f32.mrf.mxu1 }
0x5066   : > { %16872 = vmatmul.mubr.msk.f32.vlgmr.msra.gmra.mxu1 %vm1348_vm2, %v9589_v34 }
0x5067   : > { %16882 = vmatpush3.msk.msra.mxu1 %vm1655_vm6, %v18532_v38  ;;  %v16868_v37 = vpop.f32.mrf.mxu1  ;;  %16885 = vmatprep.mubr.msk.f32.mxu1 %vm17809_vm0, %v17808_v1 }
0x5068   : > { %16883 = vmatprep.subr.mxu1 %v17808_v1 }
0x5069   : > { %16884 = vmatpush3.msra.mxu1 %v18539_v45 }
0x506a   : > { %16886 = vmatmul.mubr.msk.f32.vlgmr.msra.gmra.mxu1 %vm1620_vm5, %v9752_v46  ;;  %16888 = vmatprep.subr.mxu1 %v17808_v1 }
0x506b   : > { %16890 = vmatprep.mubr.msk.f32.mxu1 %vm17809_vm0, %v17808_v1  ;;  %16889 = vmatpush3.msra.mxu1 %v8970_v48  ;;  %v10007_v48 = vld [vmem:[%s20046_s24] sm:$0x1] }
0x506c   : > { %16904 = vmatprep.subr.mxu1 %v17808_v1 }
0x5126   : > { %v9662_v53 = vpop.f32.mrf.mxu1 }
0x5127   : > { %v9666_v54 = vadd.f32 %v9662_v53, %v9431_v35 }
0x5128   : > { %v16873_v43 = vpop.f32.mrf.mxu1 }
0x512a   : > { %v9822_v49 = vpop.f32.mrf.mxu1 }
0x512b   : > { %16891 = vmatmul.mubr.msk.f32.vlgmr.msra.gmra.mxu1 %vm1348_vm2, %v9822_v49 }
0x512c   : > { %v16887_v55 = vpop.f32.mrf.mxu1  ;;  %16920 = vmatprep.mubr.msk.f32.mxu1 %vm17809_vm0, %v17808_v1  ;;  %16905 = vmatpush3.msra.mxu1 %v10006_v8 }
0x512d   : > { %16906 = vmatprep.subr.mxu1 %v17808_v1 }
0x512e   : > { %16907 = vmatpush3.msra.mxu1 %v10005_v10  ;;  %v17727_v10 = vld [vmem:[%s20022_s11 + $0x78] sm:$0xff] }
0x512f   : > { %16908 = vmatprep.subr.mxu1 %v17808_v1 }
0x5130   : > { %16909 = vmatpush3.msra.mxu1 %v10004_v11  ;;  %v17728_v11 = vld [vmem:[%s20022_s11 + $0x70] sm:$0xff] }
0x5131   : > { %16910 = vmatprep.subr.mxu1 %v17808_v1 }
0x5132   : > { %16911 = vmatpush3.msra.mxu1 %v10003_v12  ;;  %v17729_v12 = vld [vmem:[%s20022_s11 + $0x68] sm:$0xff] }
0x5133   : > { %16912 = vmatprep.subr.mxu1 %v17808_v1 }
0x5134   : > { %16913 = vmatpush3.msra.mxu1 %v10002_v13  ;;  %v17730_v13 = vld [vmem:[%s20022_s11 + $0x60] sm:$0xff] }
0x5135   : > { %16914 = vmatprep.subr.mxu1 %v17808_v1 }
0x5136   : > { %16915 = vmatpush3.msra.mxu1 %v10001_v29  ;;  %v17740_v29 = vld [vmem:[%s20022_s11 + $0x10] sm:$0xff] }
0x5137   : > { %16916 = vmatprep.subr.mxu1 %v17808_v1 }
0x5138   : > { %16917 = vmatpush3.msra.mxu1 %v10000_v32  ;;  %v17741_v32 = vld [vmem:[%s20022_s11 + $0x8] sm:$0xff] }
0x5139   : > { %16918 = vmatprep.subr.mxu1 %v17808_v1 }
0x513a   : > { %16919 = vmatpush3.msra.mxu1 %v9999_v9  ;;  %v17742_v9 = vld [vmem:[%s20022_s11] sm:$0xff] }
0x513b   : > { %16969 = vmatprep.subr.mxu1 %v17808_v1 }
0x51eb   : > { %v9895_v56 = vpop.f32.mrf.mxu1 }
0x51ec   : > { %v9899_v58 = vadd.f32 %v9895_v56, %v9666_v54 }
0x51ed   : > { %v16892_v60 = vpop.f32.mrf.mxu1 }
0x51ee   : > { %v9901_v44 = vadd.f32 %v9900_v57, %v9899_v58 }
0x51f0   : > { %v9902_v24 = vadd.f32 %v9901_v44, %v19115_v4  ;;  %v9921_v4 = vld [vmem:[%s20041_s5 + $0x8] sm:$0xff]  ;;  %v10102_v44 = vld [vmem:[%s18025_s20 + $0x18] sm:$0xff] }
0x51f1   : > { %16898 = vmatpush3.msra.mxu0 %v9921_v4  ;;  %v10083_v4 = vld [vmem:[%s18020_s12] sm:$0x1] }
0x51f2   : > { %v9905_v47 = vsel %vm3229_vm9, %v9902_v24, 0.0  ;;  %16899 = vmatprep.subr.mxu0 %v17808_v1 }
0x51f3   : > { %9906 = vadd.xlane.f32.xlu0 %v9905_v47  ;;  %16900 = vmatpush3.msra.mxu0 %v9920_v7  ;;  %v10100_v47 = vld [vmem:[%s18025_s20 + $0x8] sm:$0xff] }
0x51f4   : > { %16923 = vmatprep.subr.mxu0 %v17808_v1 }
0x527c   : > { %v9907_v62 = vpop.xlane.xlu0 %9906 }
0x527d   : > { %v9908_v39 = vmul.f32 0.03125, %v9907_v62  ;;  %v10099_v62 = vld [vmem:[%s18025_s20] sm:$0xff] }
0x527f   : > { %v9909_v63 = vsub.f32 %v9902_v24, %v9908_v39  ;;  %v10101_v24 = vld [vmem:[%s18025_s20 + $0x10] sm:$0xff] }
0x5281   : > { %v9910_v0 = vmul.f32 %v9909_v63, %v9909_v63 }
0x5283   : > { %v9911_v2 = vsel %vm3229_vm9, %v9910_v0, 0.0 }
0x5284   : > { %9912 = vadd.xlane.f32.xlu1 %v9911_v2 }
0x530d   : > { %v9913_v16 = vpop.xlane.xlu1 %9912 }
0x530e   : > { %v9914_v17 = vmul.f32 0.03125, %v9913_v16  ;;  %v17731_v16 = vld [vmem:[%s20022_s11 + $0x58] sm:$0xff] }
0x5310   : > { %v9915_v18 = vadd.f32 1e-05, %v9914_v17  ;;  %v17732_v17 = vld [vmem:[%s20022_s11 + $0x50] sm:$0xff] }
0x5312   : > { %17615 = vrsqrt.f32 %v9915_v18  ;;  %v17733_v18 = vld [vmem:[%s20022_s11 + $0x48] sm:$0xff] }
0x531f   : > { %v17616_v19 = vpop.eup %17615 }
0x5320   : > { %v9917_v5 = vmul.f32 %v17616_v19, %v9909_v63  ;;  %v17734_v19 = vld [vmem:[%s20022_s11 + $0x40] sm:$0xff] }
0x5322   : > { %v9918_v22 = vmul.f32 %v9917_v5, %v9903_v20  ;;  %v17735_v20 = vld [vmem:[%s20022_s11 + $0x38] sm:$0xff]  ;;  %v17736_v5 = vld [vmem:[%s20022_s11 + $0x30] sm:$0xff] }
0x5324   : > { %v9919_v23 = vadd.f32 %v9918_v22, %v9904_v21  ;;  %v17737_v21 = vld [vmem:[%s20022_s11 + $0x28] sm:$0xff]  ;;  %v17738_v22 = vld [vmem:[%s20022_s11 + $0x20] sm:$0xff] }
0x5326   : > { %16902 = vmatmul.mubr.msk.f32.vlgmr.msra.gmra.mxu0 %vm1443_vm3, %v9919_v23 }
0x5327   : > { %16931 = vmatprep.mubr.msk.f32.mxu0 %vm17809_vm0, %v17808_v1  ;;  %16924 = vmatpush3.msra.mxu0 %v10102_v44 }
0x5328   : > { %16925 = vmatprep.subr.mxu0 %v17808_v1 }
0x5329   : > { %16926 = vmatpush3.msra.mxu0 %v10101_v24 }
0x532a   : > { %16927 = vmatprep.subr.mxu0 %v17808_v1 }
0x532b   : > { %16928 = vmatpush3.msra.mxu0 %v10100_v47 }
0x532c   : > { %16929 = vmatprep.subr.mxu0 %v17808_v1 }
0x532d   : > { %16930 = vmatpush3.msra.mxu0 %v10099_v62 }
0x532e   : > { %16934 = vmatprep.subr.mxu0 %v17808_v1 }
0x53e6   : > { %v9994_v30 = vpop.f32.mrf.mxu0 }
0x53e7   : > { %v9995_v34 = vadd.f32 %v9994_v30, %v9924_v33  ;;  %v10103_v33 = vld [vmem:[%s18030_s27] sm:$0x1] }
0x53e8   : > { %v16903_v37 = vpop.f32.mrf.mxu0 }
0x53e9   : > { %v9998_v46 = vmax.f32 %v9995_v34, 0.0 }
0x53eb   : > { %16921 = vmatmul.mubr.msk.f32.vlgmr.msra.gmra.mxu1 %vm1270_vm1, %v9998_v46 }
0x53ec   : > { %16977 = vmatprep.mubr.msk.f32.mxu1 %vm17809_vm0, %v17808_v1 }
0x54ab   : > { %v10077_v35 = vpop.f32.mrf.mxu1 }
0x54ac   : > { %v10078_v53 = vadd.f32 %v10077_v35, %v10007_v48 }
0x54ad   : > { %v16922_v54 = vpop.f32.mrf.mxu1 }
0x54ae   : > { %v10081_v43 = vadd.f32 %v10078_v53, %v9919_v23  ;;  %v17739_v23 = vld [vmem:[%s20022_s11 + $0x18] sm:$0xff] }
0x54b0   : > { %v10084_v49 = vsel %vm3229_vm9, %v10081_v43, 0.0 }
0x54b1   : > { %10085 = vadd.xlane.f32.xlu0 %v10084_v49 }
0x553a   : > { %v10086_v55 = vpop.xlane.xlu0 %10085 }
0x553b   : > { %v10087_v56 = vmul.f32 0.03125, %v10086_v55 }
0x553d   : > { %v10088_v57 = vsub.f32 %v10081_v43, %v10087_v56 }
0x553f   : > { %v10089_v58 = vmul.f32 %v10088_v57, %v10088_v57 }
0x5541   : > { %v10090_v60 = vsel %vm3229_vm9, %v10089_v58, 0.0  ;;  %v10275_v58 = vld [vmem:[%s20023_s0 + $0x18] sm:$0xff] }
0x5542   : > { %10091 = vadd.xlane.f32.xlu1 %v10090_v60  ;;  %v10274_v60 = vld [vmem:[%s20023_s0 + $0x10] sm:$0xff]  ;;  %16970 = vmatpush3.msra.mxu1 %v10275_v58 }
0x5543   : > { %16971 = vmatprep.subr.mxu1 %v17808_v1 }
0x5544   : > { %16972 = vmatpush3.msra.mxu1 %v10274_v60 }
0x5545   : > { %16973 = vmatprep.subr.mxu1 %v17808_v1 }
0x55cb   : > { %v10092_v39 = vpop.xlane.xlu1 %10091 }
0x55cc   : > { %v10093_v63 = vmul.f32 0.03125, %v10092_v39 }
0x55ce   : > { %v10094_v0 = vadd.f32 1e-05, %v10093_v63  ;;  %v10273_v63 = vld [vmem:[%s20023_s0 + $0x8] sm:$0xff] }
0x55cf   : > { %16974 = vmatpush3.msra.mxu1 %v10273_v63 }
0x55d0   : > { %17617 = vrsqrt.f32 %v10094_v0  ;;  %16975 = vmatprep.subr.mxu1 %v17808_v1  ;;  %v10272_v0 = vld [vmem:[%s20023_s0] sm:$0xff] }
0x55d1   : > { %16976 = vmatpush3.msra.mxu1 %v10272_v0 }
0x55d2   : > { %16980 = vmatprep.subr.mxu1 %v17808_v1 }
0x55dd   : > { %v17618_v2 = vpop.eup %17617 }
0x55de   : > { %v10096_v6 = vmul.f32 %v17618_v2, %v10088_v57  ;;  %v10201_v2 = vld [vmem:[%s20024_s16 + $0x3] sm:$0x1] }
0x55e0   : > { %v10097_v7 = vmul.f32 %v10096_v6, %v10082_v3 }
0x55e2   : > { %v10098_v8 = vadd.f32 %v10097_v7, %v10083_v4  ;;  %v10276_v7 = vld [vmem:[%s20025_s1] sm:$0x1] }
0x55e4   : > { %16932 = vmatmul.mubr.msk.f32.vlgmr.msra.gmra.mxu0 %vm1443_vm3, %v10098_v8 }
0x55e5   : > { %16935 = vmatpush3.msra.mxu0 %v17727_v10  ;;  %16966 = vmatprep.mubr.msk.f32.mxu0 %vm17809_vm0, %v17808_v1 }
0x55e6   : > { %16936 = vmatprep.subr.mxu0 %v17808_v1 }
0x55e7   : > { %16937 = vmatpush3.msra.mxu0 %v17728_v11 }
0x55e8   : > { %16938 = vmatprep.subr.mxu0 %v17808_v1 }
0x55e9   : > { %16939 = vmatpush3.msra.mxu0 %v17729_v12 }
0x55ea   : > { %16940 = vmatprep.subr.mxu0 %v17808_v1 }
0x55eb   : > { %16941 = vmatpush3.msra.mxu0 %v17730_v13 }
0x55ec   : > { %16942 = vmatprep.subr.mxu0 %v17808_v1 }
0x55ed   : > { %16943 = vmatpush3.msra.mxu0 %v17731_v16 }
0x55ee   : > { %16944 = vmatprep.subr.mxu0 %v17808_v1 }
0x55ef   : > { %16945 = vmatpush3.msra.mxu0 %v17732_v17 }
0x55f0   : > { %16946 = vmatprep.subr.mxu0 %v17808_v1 }
0x55f1   : > { %16947 = vmatpush3.msra.mxu0 %v17733_v18 }
0x55f2   : > { %16948 = vmatprep.subr.mxu0 %v17808_v1 }
0x55f3   : > { %16949 = vmatpush3.msra.mxu0 %v17734_v19 }
0x55f4   : > { %16950 = vmatprep.subr.mxu0 %v17808_v1 }
0x55f5   : > { %16951 = vmatpush3.msra.mxu0 %v17735_v20 }
0x55f6   : > { %16952 = vmatprep.subr.mxu0 %v17808_v1 }
0x55f7   : > { %16953 = vmatpush3.msra.mxu0 %v17736_v5 }
0x55f8   : > { %16954 = vmatprep.subr.mxu0 %v17808_v1 }
0x55f9   : > { %16955 = vmatpush3.msra.mxu0 %v17737_v21 }
0x55fa   : > { %16956 = vmatprep.subr.mxu0 %v17808_v1 }
0x55fb   : > { %16957 = vmatpush3.msra.mxu0 %v17738_v22 }
0x55fc   : > { %16958 = vmatprep.subr.mxu0 %v17808_v1 }
0x55fd   : > { %16959 = vmatpush3.msra.mxu0 %v17739_v23 }
0x55fe   : > { %16960 = vmatprep.subr.mxu0 %v17808_v1 }
0x55ff   : > { %16961 = vmatpush3.msra.mxu0 %v17740_v29 }
0x5600   : > { %16962 = vmatprep.subr.mxu0 %v17808_v1 }
0x5601   : > { %16963 = vmatpush3.msra.mxu0 %v17741_v32 }
0x5602   : > { %16964 = vmatprep.subr.mxu0 %v17808_v1 }
0x5603   : > { %16965 = vmatpush3.msra.mxu0 %v17742_v9 }
0x5604   : > { %17010 = vmatprep.subr.mxu0 %v17808_v1 }
0x56a4   : > { %v10173_v30 = vpop.f32.mrf.mxu0 }
0x56a5   : > { %v10174_v34 = vadd.f32 %v10173_v30, %v10103_v33 }
0x56a6   : > { %v16933_v37 = vpop.f32.mrf.mxu0 }
0x56a7   : > { %10177 = vst [vmem:[%s18643_s29 + $0x2] sm:$0x1] %v10174_v34  ;;  %v10178_v46 = vsel %vm3257_vm11, %v10174_v34, -inf }
0x56a8   : > { %10179 = vmax.xlane.f32.xlu0 %v10178_v46 }
0x5731   : > { %v10180_v48 = vpop.xlane.xlu0 %10179 }
0x5732   : > { %vm10181_vm10 = vcmp.eq.f32.partialorder %v10174_v34, %v10180_v48 }
0x5733   : > { %v10182_v35 = vsel %vm10181_vm10, %v18279_v26, 128 }
0x5734   : > { %v10183_v53 = vsel %vm3257_vm11, %v10182_v35, 2147483647 }
0x5735   : > { %v10185_v54 = vshra.s32 %v10183_v53, 16  ;;  %v10184_v49 = vand.u32 65535, %v10183_v53 }
0x5737   : > { %v10187_v43 = vcvt.s32.f32 %v10185_v54  ;;  %v10186_v56 = vcvt.s32.f32 %v10184_v49 }
0x5739   : > { %10188 = vmin.xlane.f32.xlu1 %v10187_v43 }
0x57c2   : > { %v10189_v55 = vpop.xlane.xlu1 %10188 }
0x57c3   : > { %vm10190_vm12 = vcmp.eq.f32.partialorder %v10187_v43, %v10189_v55  ;;  %v10195_v44 = vcvt.f32.s32 %v10189_v55 }
0x57c4   : > { %v10191_v57 = vsel %vm10190_vm12, %v10186_v56, inf  ;;  %vm12898_vm12 = vcmask 32768  }
0x57c5   : > { %10192 = vmin.xlane.f32.xlu0 %v10191_v57  ;;  %v10196_v47 = vshll.u32 %v10195_v44, 16 }
0x584e   : > { %v10193_v24 = vpop.xlane.xlu0 %10192 }
0x584f   : > { %v10194_v62 = vcvt.f32.s32 %v10193_v24 }
0x5851   : > { %v10197_v39 = vadd.s32 %v10196_v47, %v10194_v62 }
0x5853   : > { %vm10198_vm14 = vcmp.eq.s32.totalorder %v18279_v26, %v10197_v39 }
0x5854   : > { %16967 = vmatmul.mubr.msk.f32.vlgmr.msra.gmra.mxu0 %vm10198_vm14, %v17821_v31  ;;  %vm12914_vm14 = vcmask 1044480  }
0x5855   : > { %17012 = vmatprep.mubr.msk.f32.mxu0 %vm17809_vm0, %v17808_v1 }
0x5914   : > { %v10268_v3 = vpop.f32.mrf.mxu0 }
0x5915   : > { %v19318_v6 = vadd.f32 %v10268_v3, %v10201_v2 }
0x5916   : > { %v16968_v4 = vpop.f32.mrf.mxu0 }
0x5917   : > { %16978 = vmatmul.mubr.msk.f32.vlgmr.msra.gmra.mxu1 %vm1443_vm3, %v19318_v6 }
0x5918   : > { %16982 = vmatprep.mubr.msk.f32.mxu1 %vm17809_vm0, %v17808_v1 }
0x59d7   : > { %v10346_v8 = vpop.f32.mrf.mxu1 }
0x59d8   : > { %v19325_v10 = vadd.f32 %v10346_v8, %v10276_v7 }
0x59d9   : > { %v16979_v11 = vpop.f32.mrf.mxu1 }
0x59da   : > { %10351 = vrot.lane.b32.xlu1 %v19325_v10, %s20033_s23 }
0x5a4c   : > { %v10352_v12 = vpop.permute.xlu1 %10351 }
0x5a4d   : > { %10354 = vst.msk [vmem:[#allocation2 + $0x3] sm:$0x1] %vm3229_vm9, %v10352_v12  ;;  %v10362_v12 = vld [vmem:[%s20026_s26 + $0x8] sm:$0xff] }
0x5a54   : > { %v10359_v13 = vld [vmem:[#allocation2] sm:$0xf] }
0x5a55   : > { %10533 = vrot.lane.b32.xlu1 %v10359_v13, %s20049_s10  ;;  %16981 = vmatpush3.xpose.msk.msra.mxu1 %vm1348_vm2, %v10359_v13 }
0x5a56   : > { %16985 = vmatprep.subr.mxu1 %v17808_v1 }
0x5a58   : > { %16983 = vmatmul.mubr.msk.f32.vlgmr.msra.gmra.mxu1 %vm1348_vm2, %v19325_v10 }
0x5a59   : > { %10531 = vrot.lane.b32.xlu1 %v19325_v10, %s20049_s10  ;;  %16987 = vmatprep.mubr.msk.f32.mxu1 %vm17809_vm0, %v17808_v1 }
0x5a5d   : > { %10846 = vrot.lane.b32.xlu1 %v10359_v13, %s20035_s6 }
0x5a61   : > { %10844 = vrot.lane.b32.xlu1 %v19325_v10, %s20035_s6 }
0x5ac7   : > { %v10534_v16 = vpop.permute.xlu1 %10533 }
0x5acb   : > { %v10532_v17 = vpop.permute.xlu1 %10531 }
0x5acf   : > { %v10847_v18 = vpop.permute.xlu1 %10846 }
0x5ad0   : > { %17011 = vmatpush3.xpose.msk.msra.mxu0 %vm1348_vm2, %v10847_v18 }
0x5ad1   : > { %17020 = vmatprep.subr.mxu0 %v17808_v1 }
0x5ad3   : > { %v10845_v19 = vpop.permute.xlu1 %10844 }
0x5ad4   : > { %17013 = vmatmul.mubr.msk.f32.vlgmr.msra.gmra.mxu0 %vm1348_vm2, %v10845_v19 }
0x5ad5   : > { %17022 = vmatprep.mubr.msk.f32.mxu0 %vm17809_vm0, %v17808_v1 }
0x5b18   : > { %v10436_v20 = vpop.f32.mrf.mxu1 }
0x5b19   : > { %v10440_v5 = vmul.f32 0.35355338, %v10436_v20 }
0x5b1a   : > { %v16984_v21 = vpop.f32.mrf.mxu1 }
0x5b1b   : > { %v10442_v22 = vsel %vm10441_vm15, %v10440_v5, -inf }
0x5b1c   : > { %10443 = vmax.xlane.f32.xlu0 %v10442_v22 }
0x5b94   : > { %v10918_v23 = vpop.f32.mrf.mxu0 }
0x5b95   : > { %v10922_v62 = vmul.f32 0.35355338, %v10918_v23  ;;  %v10363_v23 = vld [vmem:[%s20026_s26 + $0x10] sm:$0xff] }
0x5b96   : > { %v17014_v29 = vpop.f32.mrf.mxu0  ;;  %17021 = vmatpush3.msra.mxu0 %v10363_v23 }
0x5b97   : > { %v10923_v63 = vsel %vm10441_vm15, %v10922_v62, -inf  ;;  %17030 = vmatprep.subr.mxu0 %v17808_v1 }
0x5ba5   : > { %v10444_v32 = vpop.xlane.xlu0 %10443 }
0x5ba6   : > { %v10445_v9 = vsub.f32 %v10440_v5, %v10444_v32 }
0x5ba8   : > { %v10446_v33 = vmul.f32 1.442695, %v10445_v9 }
0x5baa   : > { %17619 = vpow2.f32 %v10446_v33 }
0x5bb7   : > { %v17620_v30 = vpop.eup %17619 }
0x5bb8   : > { %v10448_v34 = vsel %vm10441_vm15, %v17620_v30, 0.0 }
0x5bb9   : > { %10449 = vadd.xlane.f32.xlu0 %v10448_v34 }
0x5bcf   : > { %10355 = vrot.lane.b32.xlu0 %v19325_v10, %s20050_s28 }
0x5c42   : > { %v10450_v37 = vpop.xlane.xlu0 %10449 }
0x5c43   : > { %17621 = vrcp.f32 %v10450_v37 }
0x5c46   : > { %v10356_v46 = vpop.permute.xlu0 %10355 }
0x5c47   : > { %10358 = vst.msk [vmem:[#allocation3 + $0x3] sm:$0x1] %vm3229_vm9, %v10356_v46 }
0x5c4e   : > { %v19352_v48 = vld [vmem:[#allocation3] sm:$0xf] }
0x5c4f   : > { %16986 = vmatpush3.msk.msra.mxu1 %vm10457_vm4, %v19352_v48 }
0x5c50   : > { %v17622_v35 = vpop.eup %17621  ;;  %16990 = vmatprep.subr.mxu1 %v17808_v1 }
0x5c51   : > { %v10452_v53 = vmul.f32 %v17622_v35, %v17620_v30 }
0x5c53   : > { %16988 = vmatmul.mubr.msk.f32.vlgmr.msra.gmra.mxu1 %vm10453_vm7, %v10452_v53 }
0x5c54   : > { %16991 = vmatpush3.xpose.msk.msra.mxu1 %vm1348_vm2, %v10534_v16  ;;  %16992 = vmatprep.mubr.msk.f32.mxu1 %vm17809_vm0, %v17808_v1  ;;  %v10361_v16 = vld [vmem:[%s20026_s26] sm:$0xff] }
0x5c55   : > { %16995 = vmatprep.subr.mxu1 %v17808_v1 }
0x5c57   : > { %16993 = vmatmul.mubr.msk.f32.vlgmr.msra.gmra.mxu1 %vm1348_vm2, %v10532_v17 }
0x5c58   : > { %16997 = vmatprep.mubr.msk.f32.mxu1 %vm17809_vm0, %v17808_v1 }
0x5d13   : > { %v10527_v54 = vpop.f32.mrf.mxu1 }
0x5d15   : > { %v16989_v43 = vpop.f32.mrf.mxu1 }
0x5d17   : > { %v10605_v49 = vpop.f32.mrf.mxu1 }
0x5d18   : > { %v10609_v55 = vmul.f32 0.35355338, %v10605_v49 }
0x5d19   : > { %v16994_v56 = vpop.f32.mrf.mxu1 }
0x5d1a   : > { %v10610_v57 = vsel %vm10441_vm15, %v10609_v55, -inf }
0x5d1b   : > { %10611 = vmax.xlane.f32.xlu0 %v10610_v57 }
0x5d31   : > { %10621 = vrot.lane.b32.xlu0 %v19352_v48, %s20049_s10 }
0x5d35   : > { %11087 = vrot.lane.b32.xlu0 %v10359_v13, %s20036_s8 }
0x5d39   : > { %11085 = vrot.lane.b32.xlu0 %v19325_v10, %s20036_s8 }
0x5da4   : > { %v10612_v58 = vpop.xlane.xlu0 %10611 }
0x5da5   : > { %v10613_v60 = vsub.f32 %v10609_v55, %v10612_v58 }
0x5da7   : > { %v10614_v44 = vmul.f32 1.442695, %v10613_v60  ;;  %v10364_v60 = vld [vmem:[%s20026_s26 + $0x18] sm:$0xff] }
0x5da8   : > { %v10622_v24 = vpop.permute.xlu0 %10621 }
0x5da9   : > { %17623 = vpow2.f32 %v10614_v44  ;;  %16996 = vmatpush3.msk.msra.mxu1 %vm10457_vm4, %v10622_v24 }
0x5daa   : > { %17000 = vmatprep.subr.mxu1 %v17808_v1 }
0x5dac   : > { %v11088_v5 = vpop.permute.xlu0 %11087 }
0x5db0   : > { %v11086_v22 = vpop.permute.xlu0 %11085 }
0x5db6   : > { %v17624_v47 = vpop.eup %17623 }
0x5db7   : > { %v10616_v39 = vsel %vm10441_vm15, %v17624_v47, 0.0 }
0x5db8   : > { %10617 = vadd.xlane.f32.xlu1 %v10616_v39 }
0x5dbc   : > { %10924 = vmax.xlane.f32.xlu1 %v10923_v63 }
0x5e41   : > { %v10618_v0 = vpop.xlane.xlu1 %10617 }
0x5e42   : > { %17625 = vrcp.f32 %v10618_v0 }
0x5e45   : > { %v10925_v2 = vpop.xlane.xlu1 %10924 }
0x5e46   : > { %v10926_v3 = vsub.f32 %v10922_v62, %v10925_v2 }
0x5e48   : > { %v10927_v4 = vmul.f32 1.442695, %v10926_v3  ;;  %v11326_v3 = vld [vmem:[%s20028_s2] sm:$0x1] }
0x5e4a   : > { %17627 = vpow2.f32 %v10927_v4 }
0x5e4f   : > { %v17626_v7 = vpop.eup %17625 }
0x5e50   : > { %v10620_v8 = vmul.f32 %v17626_v7, %v17624_v47 }
0x5e52   : > { %16998 = vmatmul.mubr.msk.f32.vlgmr.msra.gmra.mxu1 %vm10453_vm7, %v10620_v8 }
0x5e53   : > { %17002 = vmatprep.mubr.msk.f32.mxu1 %vm17809_vm0, %v17808_v1  ;;  %17001 = vmatpush3.msra.mxu1 %v10362_v12 }
0x5e54   : > { %17005 = vmatprep.subr.mxu1 %v17808_v1 }
0x5e57   : > { %v17628_v10 = vpop.eup %17627 }
0x5e58   : > { %v10929_v11 = vsel %vm10441_vm15, %v17628_v10, 0.0 }
0x5e59   : > { %10930 = vadd.xlane.f32.xlu1 %v10929_v11 }
0x5e6a   : > { %10934 = vrot.lane.b32.xlu1 %v19352_v48, %s20035_s6 }
0x5ee2   : > { %v10931_v13 = vpop.xlane.xlu1 %10930 }
0x5ee3   : > { %17629 = vrcp.f32 %v10931_v13 }
0x5ee6   : > { %v10935_v20 = vpop.permute.xlu1 %10934 }
0x5ef0   : > { %v17630_v19 = vpop.eup %17629 }
0x5ef1   : > { %v10933_v21 = vmul.f32 %v17630_v19, %v17628_v10  ;;  %v11349_v19 = vld [vmem:[%s20029_s15 + $0x18] sm:$0xff] }
0x5f12   : > { %v10694_v17 = vpop.f32.mrf.mxu1 }
0x5f13   : > { %17003 = vmatmul.mubr.msk.f32.vlgmr.msra.gmra.mxu1 %vm1348_vm2, %v10694_v17 }
0x5f14   : > { %v16999_v18 = vpop.f32.mrf.mxu1  ;;  %17006 = vmatpush3.msra.mxu1 %v10361_v16  ;;  %17007 = vmatprep.mubr.msk.f32.mxu1 %vm17809_vm0, %v17808_v1 }
0x5f15   : > { %17015 = vmatprep.subr.mxu1 %v17808_v1 }
0x5f17   : > { %17008 = vmatmul.mubr.msk.f32.vlgmr.msra.gmra.mxu1 %vm1348_vm2, %v10527_v54 }
0x5f18   : > { %17016 = vmatpush3.msk.msra.mxu1 %vm10457_vm4, %v10935_v20  ;;  %17017 = vmatprep.mubr.msk.f32.mxu1 %vm17809_vm0, %v17808_v1  ;;  %v11348_v20 = vld [vmem:[%s20029_s15 + $0x10] sm:$0xff] }
0x5f19   : > { %17025 = vmatprep.subr.mxu1 %v17808_v1 }
0x5f1b   : > { %17018 = vmatmul.mubr.msk.f32.vlgmr.msra.gmra.mxu1 %vm10453_vm7, %v10933_v21 }
0x5f1c   : > { %17026 = vmatpush3.xpose.msk.msra.mxu1 %vm1348_vm2, %v11088_v5  ;;  %17027 = vmatprep.mubr.msk.f32.mxu1 %vm17809_vm0, %v17808_v1  ;;  %v11347_v5 = vld [vmem:[%s20029_s15 + $0x8] sm:$0xff] }
0x5f1d   : > { %17035 = vmatprep.subr.mxu1 %v17808_v1 }
0x5f1f   : > { %17028 = vmatmul.mubr.msk.f32.vlgmr.msra.gmra.mxu1 %vm1348_vm2, %v11086_v22 }
0x5f20   : > { %17037 = vmatprep.mubr.msk.f32.mxu1 %vm17809_vm0, %v17808_v1  ;;  %17036 = vmatpush3.msra.mxu1 %v10364_v60 }
0x5f21   : > { %17051 = vmatprep.subr.mxu1 %v17808_v1 }
0x5fd3   : > { %v10767_v29 = vpop.f32.mrf.mxu1 }
0x5fd5   : > { %v17004_v32 = vpop.f32.mrf.mxu1 }
0x5fd6   : > { %v11329_v32 = vld [vmem:[%s20030_s18] sm:$0x1] }
0x5fd7   : > { %v10840_v9 = vpop.f32.mrf.mxu1 }
0x5fd8   : > { %v10841_v33 = vadd.f32 %v10840_v9, %v10767_v29 }
0x5fd9   : > { %v17009_v30 = vpop.f32.mrf.mxu1 }
0x5fdb   : > { %v11007_v34 = vpop.f32.mrf.mxu1 }
0x5fdc   : > { %17023 = vmatmul.mubr.msk.f32.vlgmr.msra.gmra.mxu0 %vm1348_vm2, %v11007_v34 }
0x5fdd   : > { %v17019_v37 = vpop.f32.mrf.mxu1  ;;  %17032 = vmatprep.mubr.msk.f32.mxu0 %vm17809_vm0, %v17808_v1 }
0x5fde   : > { %v11350_v37 = vld [vmem:[%s20032_s3] sm:$0x1] }
0x5fdf   : > { %v11159_v46 = vpop.f32.mrf.mxu1 }
0x5fe0   : > { %v11163_v35 = vmul.f32 0.35355338, %v11159_v46 }
0x5fe1   : > { %v17029_v53 = vpop.f32.mrf.mxu1 }
0x5fe2   : > { %v11164_v54 = vsel %vm10441_vm15, %v11163_v35, -inf }
0x5fe3   : > { %11165 = vmax.xlane.f32.xlu0 %v11164_v54 }
0x5ff9   : > { %11175 = vrot.lane.b32.xlu0 %v19352_v48, %s20036_s8 }
0x606c   : > { %v11166_v43 = vpop.xlane.xlu0 %11165 }
0x606d   : > { %v11167_v49 = vsub.f32 %v11163_v35, %v11166_v43 }
0x606f   : > { %v11168_v55 = vmul.f32 1.442695, %v11167_v49 }
0x6070   : > { %v11176_v56 = vpop.permute.xlu0 %11175 }
0x6071   : > { %17631 = vpow2.f32 %v11168_v55  ;;  %17031 = vmatpush3.msk.msra.mxu0 %vm10457_vm4, %v11176_v56 }
0x6072   : > { %17040 = vmatprep.subr.mxu0 %v17808_v1 }
0x607e   : > { %v17632_v57 = vpop.eup %17631 }
0x607f   : > { %v11170_v58 = vsel %vm10441_vm15, %v17632_v57, 0.0  ;;  %vm12910_vm15 = vcmask 39936  }
0x6080   : > { %11171 = vadd.xlane.f32.xlu1 %v11170_v58 }
0x609c   : > { %v11080_v44 = vpop.f32.mrf.mxu0 }
0x609d   : > { %v11084_v24 = vadd.f32 %v11080_v44, %v10841_v33  ;;  %v11330_v33 = vld [vmem:[%s20031_s22] sm:$0x1] }
0x609e   : > { %v17024_v48 = vpop.f32.mrf.mxu0 }
0x6109   : > { %v11172_v47 = vpop.xlane.xlu1 %11171 }
0x610a   : > { %17633 = vrcp.f32 %v11172_v47 }
0x6117   : > { %v17634_v62 = vpop.eup %17633 }
0x6118   : > { %v11174_v39 = vmul.f32 %v17634_v62, %v17632_v57 }
0x611a   : > { %17033 = vmatmul.mubr.msk.f32.vlgmr.msra.gmra.mxu0 %vm10453_vm7, %v11174_v39 }
0x611b   : > { %17048 = vmatprep.mubr.msk.f32.mxu0 %vm17809_vm0, %v17808_v1  ;;  %17041 = vmatpush3.msra.mxu0 %v11349_v19 }
0x611c   : > { %17042 = vmatprep.subr.mxu0 %v17808_v1 }
0x611d   : > { %17043 = vmatpush3.msra.mxu0 %v11348_v20 }
0x611e   : > { %17044 = vmatprep.subr.mxu0 %v17808_v1 }
0x611f   : > { %17045 = vmatpush3.msra.mxu0 %v11347_v5 }
0x6120   : > { %17046 = vmatprep.subr.mxu0 %v17808_v1 }
0x61da   : > { %v11248_v63 = vpop.f32.mrf.mxu0 }
0x61db   : > { %17038 = vmatmul.mubr.msk.f32.vlgmr.msra.gmra.mxu1 %vm1348_vm2, %v11248_v63 }
0x61dc   : > { %17052 = vmatpush3.xpose.msk.msra.mxu1 %vm1348_vm2, %v18364_v50  ;;  %v17034_v0 = vpop.f32.mrf.mxu0  ;;  %17055 = vmatprep.mubr.msk.f32.mxu1 %vm17809_vm0, %v17808_v1 }
0x61dd   : > { %17053 = vmatprep.subr.mxu1 %v17808_v1 }
0x61e0   : > { %17054 = vmatpush3.xpose.msk.msra.mxu1 %vm1348_vm2, %v18373_v51 }
0x61e1   : > { %17065 = vmatprep.subr.mxu1 %v17808_v1 }
0x629b   : > { %v11321_v2 = vpop.f32.mrf.mxu1 }
0x629c   : > { %v11325_v4 = vadd.f32 %v11321_v2, %v11084_v24 }
0x629d   : > { %v17039_v7 = vpop.f32.mrf.mxu1 }
0x629e   : > { %v11327_v8 = vadd.f32 %v11326_v3, %v11325_v4 }
0x62a0   : > { %v11328_v10 = vadd.f32 %v11327_v8, %v19318_v6  ;;  %v11346_v6 = vld [vmem:[%s20029_s15] sm:$0xff] }
0x62a1   : > { %17047 = vmatpush3.msra.mxu0 %v11346_v6  ;;  %v11424_v8 = vld [vmem:[%s20037_s9] sm:$0xff] }
0x62a2   : > { %v11331_v11 = vsel %vm3229_vm9, %v11328_v10, 0.0  ;;  %17058 = vmatprep.subr.mxu0 %v17808_v1 }
0x62a3   : > { %11332 = vadd.xlane.f32.xlu1 %v11331_v11 }
0x632c   : > { %v11333_v12 = vpop.xlane.xlu1 %11332 }
0x632d   : > { %v11334_v13 = vmul.f32 0.03125, %v11333_v12 }
0x632f   : > { %v11335_v16 = vsub.f32 %v11328_v10, %v11334_v13 }
0x6331   : > { %v11336_v17 = vmul.f32 %v11335_v16, %v11335_v16 }
0x6333   : > { %v11337_v18 = vsel %vm3229_vm9, %v11336_v17, 0.0  ;;  %v11425_v17 = vld [vmem:[%s20037_s9 + $0x8] sm:$0xff] }
0x6334   : > { %11338 = vadd.xlane.f32.xlu1 %v11337_v18 }
0x63bd   : > { %v11339_v21 = vpop.xlane.xlu1 %11338 }
0x63be   : > { %v11340_v22 = vmul.f32 0.03125, %v11339_v21 }
0x63c0   : > { %v11341_v23 = vadd.f32 1e-05, %v11340_v22 }
0x63c2   : > { %17635 = vrsqrt.f32 %v11341_v23 }
0x63cf   : > { %v17636_v29 = vpop.eup %17635 }
0x63d0   : > { %v11343_v9 = vmul.f32 %v17636_v29, %v11335_v16 }
0x63d2   : > { %v11344_v30 = vmul.f32 %v11343_v9, %v11329_v32 }
0x63d4   : > { %v19440_v34 = vadd.f32 %v11344_v30, %v11330_v33 }
0x63d6   : > { %17049 = vmatmul.mubr.msk.f32.vlgmr.msra.gmra.mxu0 %vm1443_vm3, %v19440_v34 }
0x63d7   : > { %17059 = vmatpush3.msk.msra.mxu0 %vm1655_vm6, %v18434_v40  ;;  %17062 = vmatprep.mubr.msk.f32.mxu0 %vm17809_vm0, %v17808_v1 }
0x63d8   : > { %17060 = vmatprep.subr.mxu0 %v17808_v1 }
0x63d9   : > { %17061 = vmatpush3.msra.mxu0 %v18438_v41 }
0x63da   : > { %17072 = vmatprep.subr.mxu0 %v17808_v1 }
0x6496   : > { %v11420_v46 = vpop.f32.mrf.mxu0 }
0x6497   : > { %v11421_v35 = vadd.f32 %v11420_v46, %v11350_v37 }
0x6498   : > { %v17050_v53 = vpop.f32.mrf.mxu0 }
0x6499   : > { %11586 = vrot.lane.b32.xlu1 %v11421_v35, %s20049_s10  ;;  %17056 = vmatmul.mubr.msk.f32.vlgmr.msra.gmra.mxu1 %vm1348_vm2, %v11421_v35 }
0x649a   : > { %17066 = vmatpush3.xpose.msk.msra.mxu1 %vm1348_vm2, %v18403_v14  ;;  %17069 = vmatprep.mubr.msk.f32.mxu1 %vm17809_vm0, %v17808_v1 }
0x649b   : > { %17067 = vmatprep.subr.mxu1 %v17808_v1 }
0x649e   : > { %17068 = vmatpush3.xpose.msk.msra.mxu1 %vm1348_vm2, %v18412_v15 }
0x649f   : > { %17084 = vmatprep.subr.mxu1 %v17808_v1 }
0x650b   : > { %v11587_v54 = vpop.permute.xlu1 %11586 }
0x650c   : > { %17070 = vmatmul.mubr.msk.f32.vlgmr.msra.gmra.mxu1 %vm1348_vm2, %v11587_v54 }
0x650d   : > { %17086 = vmatprep.mubr.msk.f32.mxu1 %vm17809_vm0, %v17808_v1  ;;  %17085 = vmatpush3.msra.mxu1 %v11424_v8  ;;  %v11427_v8 = vld [vmem:[%s20037_s9 + $0x18] sm:$0xff] }
0x650e   : > { %17096 = vmatprep.subr.mxu1 %v17808_v1 }
0x6559   : > { %v11497_v43 = vpop.f32.mrf.mxu1 }
0x655a   : > { %v11501_v49 = vmul.f32 0.35355338, %v11497_v43 }
0x655b   : > { %v17057_v55 = vpop.f32.mrf.mxu1 }
0x655c   : > { %v11502_v56 = vsel %vm4078_vm13, %v11501_v49, -inf }
0x655d   : > { %11503 = vmax.xlane.f32.xlu0 %v11502_v56 }
0x65cc   : > { %v11656_v57 = vpop.f32.mrf.mxu1 }
0x65cd   : > { %v11660_v58 = vmul.f32 0.35355338, %v11656_v57 }
0x65ce   : > { %v17071_v60 = vpop.f32.mrf.mxu1 }
0x65cf   : > { %v11661_v44 = vsel %vm4078_vm13, %v11660_v58, -inf }
0x65d0   : > { %11662 = vmax.xlane.f32.xlu1 %v11661_v44 }
0x65e1   : > { %12124 = vrot.lane.b32.xlu1 %v11421_v35, %s20036_s8 }
0x65e6   : > { %v11504_v24 = vpop.xlane.xlu0 %11503 }
0x65e7   : > { %v11505_v48 = vsub.f32 %v11501_v49, %v11504_v24 }
0x65e9   : > { %v11506_v47 = vmul.f32 1.442695, %v11505_v48 }
0x65eb   : > { %17637 = vpow2.f32 %v11506_v47 }
0x65f8   : > { %v17638_v62 = vpop.eup %17637 }
0x65f9   : > { %v11508_v39 = vsel %vm4078_vm13, %v17638_v62, 0.0 }
0x65fa   : > { %11509 = vadd.xlane.f32.xlu0 %v11508_v39 }
0x6659   : > { %v11663_v63 = vpop.xlane.xlu1 %11662 }
0x665a   : > { %v11664_v0 = vsub.f32 %v11660_v58, %v11663_v63  ;;  %v11426_v63 = vld [vmem:[%s20037_s9 + $0x10] sm:$0xff] }
0x665c   : > { %v11665_v2 = vmul.f32 1.442695, %v11664_v0 }
0x665d   : > { %v12125_v21 = vpop.permute.xlu1 %12124 }
0x665e   : > { %17639 = vpow2.f32 %v11665_v2 }
0x666b   : > { %v17640_v3 = vpop.eup %17639 }
0x666c   : > { %v11667_v4 = vsel %vm4078_vm13, %v17640_v3, 0.0 }
0x666d   : > { %11668 = vadd.xlane.f32.xlu0 %v11667_v4 }
0x6683   : > { %v11510_v7 = vpop.xlane.xlu0 %11509  ;;  %11891 = vrot.lane.b32.xlu0 %v11421_v35, %s20035_s6 }
0x6684   : > { %17641 = vrcp.f32 %v11510_v7 }
0x6691   : > { %v17642_v10 = vpop.eup %17641 }
0x6692   : > { %v11512_v11 = vmul.f32 %v17642_v10, %v17638_v62 }
0x6694   : > { %17063 = vmatmul.mubr.msk.f32.vlgmr.msra.gmra.mxu0 %vm1620_vm5, %v11512_v11 }
0x6695   : > { %17073 = vmatpush3.msk.msra.mxu0 %vm1655_vm6, %v18456_v42  ;;  %17076 = vmatprep.mubr.msk.f32.mxu0 %vm17809_vm0, %v17808_v1 }
0x6696   : > { %17074 = vmatprep.subr.mxu0 %v17808_v1 }
0x6697   : > { %17075 = vmatpush3.msra.mxu0 %v18460_v52 }
0x6698   : > { %17079 = vmatprep.subr.mxu0 %v17808_v1 }
0x66f6   : > { %v11669_v12 = vpop.xlane.xlu0 %11668 }
0x66f7   : > { %17643 = vrcp.f32 %v11669_v12 }
0x66fa   : > { %v11892_v6 = vpop.permute.xlu0 %11891 }
0x6704   : > { %v17644_v13 = vpop.eup %17643 }
0x6705   : > { %v11671_v16 = vmul.f32 %v17644_v13, %v17640_v3 }
0x6707   : > { %17077 = vmatmul.mubr.msk.f32.vlgmr.msra.gmra.mxu0 %vm1620_vm5, %v11671_v16 }
0x6708   : > { %17080 = vmatpush3.msra.mxu0 %v11425_v17  ;;  %17081 = vmatprep.mubr.msk.f32.mxu0 %vm17809_vm0, %v17808_v1 }
0x6709   : > { %17089 = vmatprep.subr.mxu0 %v17808_v1 }
0x6754   : > { %v11582_v18 = vpop.f32.mrf.mxu0 }
0x6755   : > { %17087 = vmatmul.mubr.msk.f32.vlgmr.msra.gmra.mxu1 %vm1348_vm2, %v11582_v18 }
0x6756   : > { %17097 = vmatpush3.msk.msra.mxu1 %vm1655_vm6, %v18520_v27  ;;  %v17064_v19 = vpop.f32.mrf.mxu0  ;;  %17100 = vmatprep.mubr.msk.f32.mxu1 %vm17809_vm0, %v17808_v1 }
0x6757   : > { %17098 = vmatprep.subr.mxu1 %v17808_v1  ;;  %v12357_v19 = vld [vmem:[%s20040_s13] sm:$0x1] }
0x6758   : > { %17099 = vmatpush3.msra.mxu1 %v18515_v28 }
0x6759   : > { %17103 = vmatprep.subr.mxu1 %v17808_v1 }
0x67c7   : > { %v11741_v20 = vpop.f32.mrf.mxu0 }
0x67c8   : > { %17082 = vmatmul.mubr.msk.f32.vlgmr.msra.gmra.mxu0 %vm1348_vm2, %v11741_v20 }
0x67c9   : > { %17090 = vmatpush3.xpose.msk.msra.mxu0 %vm1348_vm2, %v18473_v36  ;;  %v17078_v5 = vpop.f32.mrf.mxu0  ;;  %17093 = vmatprep.mubr.msk.f32.mxu0 %vm17809_vm0, %v17808_v1 }
0x67ca   : > { %17091 = vmatprep.subr.mxu0 %v17808_v1 }
0x67cd   : > { %17092 = vmatpush3.xpose.msk.msra.mxu0 %vm1348_vm2, %v18480_v59 }
0x67ce   : > { %17108 = vmatprep.subr.mxu0 %v17808_v1 }
0x67d0   : > { %17094 = vmatmul.mubr.msk.f32.vlgmr.msra.gmra.mxu0 %vm1348_vm2, %v11892_v6 }
0x67d1   : > { %17109 = vmatpush3.xpose.msk.msra.mxu0 %vm1348_vm2, %v18486_v25  ;;  %17112 = vmatprep.mubr.msk.f32.mxu0 %vm17809_vm0, %v17808_v1 }
0x67d2   : > { %17110 = vmatprep.subr.mxu0 %v17808_v1 }
0x67d5   : > { %17111 = vmatpush3.xpose.msk.msra.mxu0 %vm1348_vm2, %v18494_v61 }
0x67d6   : > { %17127 = vmatprep.subr.mxu0 %v17808_v1 }
0x67d8   : > { %17113 = vmatmul.mubr.msk.f32.vlgmr.msra.gmra.mxu0 %vm1348_vm2, %v12125_v21 }
0x67d9   : > { %17135 = vmatprep.mubr.msk.f32.mxu0 %vm17809_vm0, %v17808_v1 }
0x6815   : > { %v11887_v22 = vpop.f32.mrf.mxu1 }
0x6817   : > { %v17088_v23 = vpop.f32.mrf.mxu1 }
0x6888   : > { %v11814_v29 = vpop.f32.mrf.mxu0 }
0x6889   : > { %v11888_v10 = vadd.f32 %v11887_v22, %v11814_v29 }
0x688a   : > { %v17083_v32 = vpop.f32.mrf.mxu0 }
0x6890   : > { %v11961_v9 = vpop.f32.mrf.mxu0 }
0x6891   : > { %v11965_v33 = vmul.f32 0.35355338, %v11961_v9 }
0x6892   : > { %v17095_v30 = vpop.f32.mrf.mxu0 }
0x6893   : > { %v11966_v37 = vsel %vm4078_vm13, %v11965_v33, -inf  ;;  %v12380_v30 = vld [vmem:[%s20041_s5 + $0x18] sm:$0xff] }
0x6894   : > { %11967 = vmax.xlane.f32.xlu0 %v11966_v37  ;;  %17128 = vmatpush3.msra.mxu0 %v12380_v30  ;;  %v12379_v37 = vld [vmem:[%s20041_s5 + $0x10] sm:$0xff]  ;;  %v12539_v30 = vld [vmem:[%s20047_s25] sm:$0x1] }
0x6895   : > { %17129 = vmatprep.subr.mxu0 %v17808_v1 }
0x6896   : > { %17130 = vmatpush3.msra.mxu0 %v12379_v37 }
0x6897   : > { %17131 = vmatprep.subr.mxu0 %v17808_v1 }
0x6898   : > { %v12194_v46 = vpop.f32.mrf.mxu0 }
0x6899   : > { %v12198_v35 = vmul.f32 0.35355338, %v12194_v46  ;;  %v12377_v46 = vld [vmem:[%s20041_s5] sm:$0xff] }
0x689a   : > { %v17114_v53 = vpop.f32.mrf.mxu0 }
0x689b   : > { %v12199_v54 = vsel %vm4078_vm13, %v12198_v35, -inf  ;;  %v12462_v53 = vld [vmem:[%s20042_s14 + $0x30] sm:$0xff] }
0x689c   : > { %12200 = vmax.xlane.f32.xlu0 %v12199_v54  ;;  %v12461_v54 = vld [vmem:[%s20042_s14 + $0x28] sm:$0xff] }
0x691d   : > { %v11968_v43 = vpop.xlane.xlu0 %11967 }
0x691e   : > { %v11969_v49 = vsub.f32 %v11965_v33, %v11968_v43  ;;  %v12460_v43 = vld [vmem:[%s20042_s14 + $0x20] sm:$0xff] }
0x6920   : > { %v11970_v55 = vmul.f32 1.442695, %v11969_v49  ;;  %v12459_v49 = vld [vmem:[%s20042_s14 + $0x18] sm:$0xff] }
0x6922   : > { %17645 = vpow2.f32 %v11970_v55 }
0x6925   : > { %v12201_v56 = vpop.xlane.xlu0 %12200 }
0x6926   : > { %v12202_v57 = vsub.f32 %v12198_v35, %v12201_v56  ;;  %v12463_v35 = vld [vmem:[%s20042_s14 + $0x38] sm:$0xff] }
0x6928   : > { %v12203_v58 = vmul.f32 1.442695, %v12202_v57 }
0x692a   : > { %17647 = vpow2.f32 %v12203_v58 }
0x692f   : > { %v17646_v60 = vpop.eup %17645 }
0x6930   : > { %v11972_v44 = vsel %vm4078_vm13, %v17646_v60, 0.0 }
0x6931   : > { %11973 = vadd.xlane.f32.xlu1 %v11972_v44 }
0x6937   : > { %v17648_v24 = vpop.eup %17647 }
0x6938   : > { %v12205_v48 = vsel %vm4078_vm13, %v17648_v24, 0.0 }
0x6939   : > { %12206 = vadd.xlane.f32.xlu0 %v12205_v48 }
0x69ba   : > { %v11974_v47 = vpop.xlane.xlu1 %11973 }
0x69bb   : > { %17649 = vrcp.f32 %v11974_v47 }
0x69c2   : > { %v12207_v0 = vpop.xlane.xlu0 %12206 }
0x69c3   : > { %17651 = vrcp.f32 %v12207_v0  ;;  %v12381_v0 = vld [vmem:[%s20045_s21] sm:$0x1] }
0x69c8   : > { %v17650_v62 = vpop.eup %17649 }
0x69c9   : > { %v11976_v39 = vmul.f32 %v17650_v62, %v17646_v60  ;;  %v12360_v60 = vld [vmem:[%s20043_s17] sm:$0x1]  ;;  %v12458_v62 = vld [vmem:[%s20042_s14 + $0x10] sm:$0xff] }
0x69cb   : > { %17101 = vmatmul.mubr.msk.f32.vlgmr.msra.gmra.mxu1 %vm1620_vm5, %v11976_v39  ;;  %v12457_v39 = vld [vmem:[%s20042_s14 + $0x8] sm:$0xff] }
0x69cc   : > { %17104 = vmatpush3.msra.mxu1 %v11426_v63  ;;  %17105 = vmatprep.mubr.msk.f32.mxu1 %vm17809_vm0, %v17808_v1  ;;  %v12456_v63 = vld [vmem:[%s20042_s14] sm:$0xff] }
0x69cd   : > { %17115 = vmatprep.subr.mxu1 %v17808_v1 }
0x69d0   : > { %v17652_v2 = vpop.eup %17651 }
0x69d1   : > { %v12209_v7 = vmul.f32 %v17652_v2, %v17648_v24  ;;  %v12361_v24 = vld [vmem:[%s20044_s19] sm:$0x1] }
0x6a8b   : > { %v12046_v3 = vpop.f32.mrf.mxu1 }
0x6a8c   : > { %17106 = vmatmul.mubr.msk.f32.vlgmr.msra.gmra.mxu1 %vm1348_vm2, %v12046_v3 }
0x6a8d   : > { %17116 = vmatpush3.msk.msra.mxu1 %vm1655_vm6, %v18532_v38  ;;  %v17102_v4 = vpop.f32.mrf.mxu1  ;;  %17119 = vmatprep.mubr.msk.f32.mxu1 %vm17809_vm0, %v17808_v1 }
0x6a8e   : > { %17117 = vmatprep.subr.mxu1 %v17808_v1 }
0x6a8f   : > { %17118 = vmatpush3.msra.mxu1 %v18539_v45 }
0x6a90   : > { %17120 = vmatmul.mubr.msk.f32.vlgmr.msra.gmra.mxu1 %vm1620_vm5, %v12209_v7  ;;  %17122 = vmatprep.subr.mxu1 %v17808_v1 }
0x6a91   : > { %17124 = vmatprep.mubr.msk.f32.mxu1 %vm17809_vm0, %v17808_v1  ;;  %17123 = vmatpush3.msra.mxu1 %v11427_v8  ;;  %v12464_v8 = vld [vmem:[%s20046_s24] sm:$0x1] }
0x6a92   : > { %17138 = vmatprep.subr.mxu1 %v17808_v1 }
0x6b4c   : > { %v12119_v11 = vpop.f32.mrf.mxu1 }
0x6b4d   : > { %v12123_v12 = vadd.f32 %v12119_v11, %v11888_v10 }
0x6b4e   : > { %v17107_v13 = vpop.f32.mrf.mxu1 }
0x6b50   : > { %v12279_v16 = vpop.f32.mrf.mxu1 }
0x6b51   : > { %17125 = vmatmul.mubr.msk.f32.vlgmr.msra.gmra.mxu1 %vm1348_vm2, %v12279_v16 }
0x6b52   : > { %v17121_v17 = vpop.f32.mrf.mxu1  ;;  %17154 = vmatprep.mubr.msk.f32.mxu1 %vm17809_vm0, %v17808_v1  ;;  %17139 = vmatpush3.msra.mxu1 %v12463_v35 }
0x6b53   : > { %17140 = vmatprep.subr.mxu1 %v17808_v1 }
0x6b54   : > { %17141 = vmatpush3.msra.mxu1 %v12462_v53  ;;  %v17743_v53 = vld [vmem:[%s20022_s11 + $0x78] sm:$0xff] }
0x6b55   : > { %17142 = vmatprep.subr.mxu1 %v17808_v1 }
0x6b56   : > { %17143 = vmatpush3.msra.mxu1 %v12461_v54  ;;  %v17744_v54 = vld [vmem:[%s20022_s11 + $0x70] sm:$0xff] }
0x6b57   : > { %17144 = vmatprep.subr.mxu1 %v17808_v1 }
0x6b58   : > { %17145 = vmatpush3.msra.mxu1 %v12460_v43  ;;  %v17745_v43 = vld [vmem:[%s20022_s11 + $0x68] sm:$0xff] }
0x6b59   : > { %17146 = vmatprep.subr.mxu1 %v17808_v1 }
0x6b5a   : > { %17147 = vmatpush3.msra.mxu1 %v12459_v49  ;;  %v17746_v49 = vld [vmem:[%s20022_s11 + $0x60] sm:$0xff] }
0x6b5b   : > { %17148 = vmatprep.subr.mxu1 %v17808_v1 }
0x6b5c   : > { %17149 = vmatpush3.msra.mxu1 %v12458_v62  ;;  %v17756_v62 = vld [vmem:[%s20022_s11 + $0x10] sm:$0xff] }
0x6b5d   : > { %17150 = vmatprep.subr.mxu1 %v17808_v1 }
0x6b5e   : > { %17151 = vmatpush3.msra.mxu1 %v12457_v39  ;;  %v17757_v39 = vld [vmem:[%s20022_s11 + $0x8] sm:$0xff] }
0x6b5f   : > { %17152 = vmatprep.subr.mxu1 %v17808_v1 }
0x6b60   : > { %17153 = vmatpush3.msra.mxu1 %v12456_v63  ;;  %v17758_v63 = vld [vmem:[%s20022_s11] sm:$0xff] }
0x6b61   : > { %17203 = vmatprep.subr.mxu1 %v17808_v1 }
0x6c11   : > { %v12352_v18 = vpop.f32.mrf.mxu1 }
0x6c12   : > { %v12356_v20 = vadd.f32 %v12352_v18, %v12123_v12 }
0x6c13   : > { %v17126_v5 = vpop.f32.mrf.mxu1 }
0x6c14   : > { %v12358_v6 = vadd.f32 %v12357_v19, %v12356_v20 }
0x6c16   : > { %v12359_v21 = vadd.f32 %v12358_v6, %v19440_v34  ;;  %v12378_v34 = vld [vmem:[%s20041_s5 + $0x8] sm:$0xff]  ;;  %v12559_v6 = vld [vmem:[%s18025_s20 + $0x18] sm:$0xff] }
0x6c17   : > { %17132 = vmatpush3.msra.mxu0 %v12378_v34  ;;  %v12540_v34 = vld [vmem:[%s18020_s12] sm:$0x1] }
0x6c18   : > { %v12362_v22 = vsel %vm3229_vm9, %v12359_v21, 0.0  ;;  %17133 = vmatprep.subr.mxu0 %v17808_v1 }
0x6c19   : > { %12363 = vadd.xlane.f32.xlu1 %v12362_v22  ;;  %17134 = vmatpush3.msra.mxu0 %v12377_v46  ;;  %v12557_v22 = vld [vmem:[%s18025_s20 + $0x8] sm:$0xff] }
0x6c1a   : > { %17157 = vmatprep.subr.mxu0 %v17808_v1 }
0x6ca2   : > { %v12364_v23 = vpop.xlane.xlu1 %12363 }
0x6ca3   : > { %v12365_v29 = vmul.f32 0.03125, %v12364_v23  ;;  %v12556_v23 = vld [vmem:[%s18025_s20] sm:$0xff] }
0x6ca5   : > { %v12366_v32 = vsub.f32 %v12359_v21, %v12365_v29  ;;  %v12558_v21 = vld [vmem:[%s18025_s20 + $0x10] sm:$0xff] }
0x6ca7   : > { %v12367_v9 = vmul.f32 %v12366_v32, %v12366_v32 }
0x6ca9   : > { %v12368_v33 = vsel %vm3229_vm9, %v12367_v9, 0.0 }
0x6caa   : > { %12369 = vadd.xlane.f32.xlu0 %v12368_v33 }
0x6d33   : > { %v12370_v55 = vpop.xlane.xlu0 %12369 }
0x6d34   : > { %v12371_v56 = vmul.f32 0.03125, %v12370_v55  ;;  %v17747_v55 = vld [vmem:[%s20022_s11 + $0x58] sm:$0xff] }
0x6d36   : > { %v12372_v57 = vadd.f32 1e-05, %v12371_v56  ;;  %v17748_v56 = vld [vmem:[%s20022_s11 + $0x50] sm:$0xff] }
0x6d38   : > { %17653 = vrsqrt.f32 %v12372_v57  ;;  %v17749_v57 = vld [vmem:[%s20022_s11 + $0x48] sm:$0xff] }
0x6d45   : > { %v17654_v58 = vpop.eup %17653 }
0x6d46   : > { %v12374_v44 = vmul.f32 %v17654_v58, %v12366_v32  ;;  %v17750_v58 = vld [vmem:[%s20022_s11 + $0x40] sm:$0xff] }
0x6d48   : > { %v12375_v48 = vmul.f32 %v12374_v44, %v12360_v60  ;;  %v17751_v60 = vld [vmem:[%s20022_s11 + $0x38] sm:$0xff]  ;;  %v17752_v44 = vld [vmem:[%s20022_s11 + $0x30] sm:$0xff] }
0x6d4a   : > { %v12376_v47 = vadd.f32 %v12375_v48, %v12361_v24  ;;  %v17753_v24 = vld [vmem:[%s20022_s11 + $0x28] sm:$0xff]  ;;  %v17754_v48 = vld [vmem:[%s20022_s11 + $0x20] sm:$0xff] }
0x6d4c   : > { %17136 = vmatmul.mubr.msk.f32.vlgmr.msra.gmra.mxu0 %vm1443_vm3, %v12376_v47 }
0x6d4d   : > { %17165 = vmatprep.mubr.msk.f32.mxu0 %vm17809_vm0, %v17808_v1  ;;  %17158 = vmatpush3.msra.mxu0 %v12559_v6 }
0x6d4e   : > { %17159 = vmatprep.subr.mxu0 %v17808_v1 }
0x6d4f   : > { %17160 = vmatpush3.msra.mxu0 %v12558_v21 }
0x6d50   : > { %17161 = vmatprep.subr.mxu0 %v17808_v1 }
0x6d51   : > { %17162 = vmatpush3.msra.mxu0 %v12557_v22 }
0x6d52   : > { %17163 = vmatprep.subr.mxu0 %v17808_v1 }
0x6d53   : > { %17164 = vmatpush3.msra.mxu0 %v12556_v23 }
0x6d54   : > { %17168 = vmatprep.subr.mxu0 %v17808_v1 }
0x6e0c   : > { %v12451_v2 = vpop.f32.mrf.mxu0 }
0x6e0d   : > { %v12452_v3 = vadd.f32 %v12451_v2, %v12381_v0  ;;  %v12560_v0 = vld [vmem:[%s18030_s27] sm:$0x1] }
0x6e0e   : > { %v17137_v4 = vpop.f32.mrf.mxu0 }
0x6e0f   : > { %v12455_v7 = vmax.f32 %v12452_v3, 0.0 }
0x6e11   : > { %17155 = vmatmul.mubr.msk.f32.vlgmr.msra.gmra.mxu1 %vm1270_vm1, %v12455_v7 }
0x6e12   : > { %17211 = vmatprep.mubr.msk.f32.mxu1 %vm17809_vm0, %v17808_v1 }
0x6ed1   : > { %v12534_v10 = vpop.f32.mrf.mxu1 }
0x6ed2   : > { %v12535_v11 = vadd.f32 %v12534_v10, %v12464_v8 }
0x6ed3   : > { %v17156_v12 = vpop.f32.mrf.mxu1 }
0x6ed4   : > { %v12538_v13 = vadd.f32 %v12535_v11, %v12376_v47  ;;  %v17755_v47 = vld [vmem:[%s20022_s11 + $0x18] sm:$0xff] }
0x6ed6   : > { %v12541_v16 = vsel %vm3229_vm9, %v12538_v13, 0.0 }
0x6ed7   : > { %12542 = vadd.xlane.f32.xlu1 %v12541_v16 }
0x6f60   : > { %v12543_v17 = vpop.xlane.xlu1 %12542 }
0x6f61   : > { %v12544_v18 = vmul.f32 0.03125, %v12543_v17 }
0x6f63   : > { %v12545_v19 = vsub.f32 %v12538_v13, %v12544_v18 }
0x6f65   : > { %v12546_v20 = vmul.f32 %v12545_v19, %v12545_v19 }
0x6f67   : > { %v12547_v5 = vsel %vm3229_vm9, %v12546_v20, 0.0  ;;  %v12732_v20 = vld [vmem:[%s20023_s0 + $0x18] sm:$0xff] }
0x6f68   : > { %12548 = vadd.xlane.f32.xlu0 %v12547_v5  ;;  %v12731_v5 = vld [vmem:[%s20023_s0 + $0x10] sm:$0xff]  ;;  %17204 = vmatpush3.msra.mxu1 %v12732_v20 }
0x6f69   : > { %17205 = vmatprep.subr.mxu1 %v17808_v1 }
0x6f6a   : > { %17206 = vmatpush3.msra.mxu1 %v12731_v5 }
0x6f6b   : > { %17207 = vmatprep.subr.mxu1 %v17808_v1 }
0x6ff1   : > { %v12549_v29 = vpop.xlane.xlu0 %12548 }
0x6ff2   : > { %v12550_v32 = vmul.f32 0.03125, %v12549_v29 }
0x6ff4   : > { %v12551_v9 = vadd.f32 1e-05, %v12550_v32  ;;  %v12730_v32 = vld [vmem:[%s20023_s0 + $0x8] sm:$0xff] }
0x6ff5   : > { %17208 = vmatpush3.msra.mxu1 %v12730_v32 }
0x6ff6   : > { %17655 = vrsqrt.f32 %v12551_v9  ;;  %17209 = vmatprep.subr.mxu1 %v17808_v1  ;;  %v12729_v9 = vld [vmem:[%s20023_s0] sm:$0xff] }
0x6ff7   : > { %17210 = vmatpush3.msra.mxu1 %v12729_v9 }
0x6ff8   : > { %17214 = vmatprep.subr.mxu1 %v17808_v1 }
0x7003   : > { %v17656_v33 = vpop.eup %17655 }
0x7004   : > { %v12553_v37 = vmul.f32 %v17656_v33, %v12545_v19  ;;  %v12658_v33 = vld [vmem:[%s20024_s16 + $0x4] sm:$0x1] }
0x7006   : > { %v12554_v46 = vmul.f32 %v12553_v37, %v12539_v30 }
0x7008   : > { %v12555_v35 = vadd.f32 %v12554_v46, %v12540_v34 }
0x700a   : > { %17166 = vmatmul.mubr.msk.f32.vlgmr.msra.gmra.mxu0 %vm1443_vm3, %v12555_v35 }
0x700b   : > { %17169 = vmatpush3.msra.mxu0 %v17743_v53  ;;  %17200 = vmatprep.mubr.msk.f32.mxu0 %vm17809_vm0, %v17808_v1 }
0x700c   : > { %17170 = vmatprep.subr.mxu0 %v17808_v1 }
0x700d   : > { %17171 = vmatpush3.msra.mxu0 %v17744_v54 }
0x700e   : > { %17172 = vmatprep.subr.mxu0 %v17808_v1 }
0x700f   : > { %17173 = vmatpush3.msra.mxu0 %v17745_v43 }
0x7010   : > { %17174 = vmatprep.subr.mxu0 %v17808_v1 }
0x7011   : > { %17175 = vmatpush3.msra.mxu0 %v17746_v49 }
0x7012   : > { %17176 = vmatprep.subr.mxu0 %v17808_v1 }
0x7013   : > { %17177 = vmatpush3.msra.mxu0 %v17747_v55 }
0x7014   : > { %17178 = vmatprep.subr.mxu0 %v17808_v1 }
0x7015   : > { %17179 = vmatpush3.msra.mxu0 %v17748_v56 }
0x7016   : > { %17180 = vmatprep.subr.mxu0 %v17808_v1 }
0x7017   : > { %17181 = vmatpush3.msra.mxu0 %v17749_v57 }
0x7018   : > { %17182 = vmatprep.subr.mxu0 %v17808_v1 }
0x7019   : > { %17183 = vmatpush3.msra.mxu0 %v17750_v58 }
0x701a   : > { %17184 = vmatprep.subr.mxu0 %v17808_v1 }
0x701b   : > { %17185 = vmatpush3.msra.mxu0 %v17751_v60 }
0x701c   : > { %17186 = vmatprep.subr.mxu0 %v17808_v1 }
0x701d   : > { %17187 = vmatpush3.msra.mxu0 %v17752_v44 }
0x701e   : > { %17188 = vmatprep.subr.mxu0 %v17808_v1 }
0x701f   : > { %17189 = vmatpush3.msra.mxu0 %v17753_v24 }
0x7020   : > { %17190 = vmatprep.subr.mxu0 %v17808_v1 }
0x7021   : > { %17191 = vmatpush3.msra.mxu0 %v17754_v48 }
0x7022   : > { %17192 = vmatprep.subr.mxu0 %v17808_v1 }
0x7023   : > { %17193 = vmatpush3.msra.mxu0 %v17755_v47 }
0x7024   : > { %17194 = vmatprep.subr.mxu0 %v17808_v1 }
0x7025   : > { %17195 = vmatpush3.msra.mxu0 %v17756_v62 }
0x7026   : > { %17196 = vmatprep.subr.mxu0 %v17808_v1 }
0x7027   : > { %17197 = vmatpush3.msra.mxu0 %v17757_v39 }
0x7028   : > { %17198 = vmatprep.subr.mxu0 %v17808_v1 }
0x7029   : > { %17199 = vmatpush3.msra.mxu0 %v17758_v63 }
0x702a   : > { %17244 = vmatprep.subr.mxu0 %v17808_v1 }
0x70ca   : > { %v12630_v2 = vpop.f32.mrf.mxu0 }
0x70cb   : > { %v12631_v3 = vadd.f32 %v12630_v2, %v12560_v0 }
0x70cc   : > { %v17167_v4 = vpop.f32.mrf.mxu0 }
0x70cd   : > { %12634 = vst [vmem:[%s18643_s29 + $0x3] sm:$0x1] %v12631_v3  ;;  %v12635_v7 = vsel %vm3257_vm11, %v12631_v3, -inf }
0x70ce   : > { %12636 = vmax.xlane.f32.xlu1 %v12635_v7 }
0x7157   : > { %v12637_v8 = vpop.xlane.xlu1 %12636 }
0x7158   : > { %vm12638_vm8 = vcmp.eq.f32.partialorder %v12631_v3, %v12637_v8 }
0x7159   : > { %v12639_v10 = vsel %vm12638_vm8, %v18279_v26, 128 }
0x715a   : > { %v12640_v11 = vsel %vm3257_vm11, %v12639_v10, 2147483647 }
0x715b   : > { %v12642_v12 = vshra.s32 %v12640_v11, 16  ;;  %v12641_v16 = vand.u32 65535, %v12640_v11 }
0x715d   : > { %v12644_v13 = vcvt.s32.f32 %v12642_v12  ;;  %v12643_v18 = vcvt.s32.f32 %v12641_v16 }
0x715f   : > { %12645 = vmin.xlane.f32.xlu0 %v12644_v13 }
0x71e8   : > { %v12646_v17 = vpop.xlane.xlu0 %12645 }
0x71e9   : > { %vm12647_vm10 = vcmp.eq.f32.partialorder %v12644_v13, %v12646_v17  ;;  %v12652_v6 = vcvt.f32.s32 %v12646_v17 }
0x71ea   : > { %v12648_v19 = vsel %vm12647_vm10, %v12643_v18, inf }
0x71eb   : > { %12649 = vmin.xlane.f32.xlu1 %v12648_v19  ;;  %v12653_v22 = vshll.u32 %v12652_v6, 16 }
0x7274   : > { %v12650_v21 = vpop.xlane.xlu1 %12649 }
0x7275   : > { %v12651_v23 = vcvt.f32.s32 %v12650_v21 }
0x7277   : > { %v12654_v29 = vadd.s32 %v12653_v22, %v12651_v23 }
0x7279   : > { %vm12655_vm11 = vcmp.eq.s32.totalorder %v18279_v26, %v12654_v29  ;;  %v12733_v26 = vld [vmem:[%s20025_s1] sm:$0x1] }
0x727a   : > { %17201 = vmatmul.mubr.msk.f32.vlgmr.msra.gmra.mxu0 %vm12655_vm11, %v17821_v31 }
0x727b   : > { %17246 = vmatprep.mubr.msk.f32.mxu0 %vm17809_vm0, %v17808_v1 }
0x733a   : > { %v12725_v30 = vpop.f32.mrf.mxu0 }
0x733b   : > { %v19643_v37 = vadd.f32 %v12725_v30, %v12658_v33 }
0x733c   : > { %v17202_v34 = vpop.f32.mrf.mxu0 }
0x733d   : > { %17212 = vmatmul.mubr.msk.f32.vlgmr.msra.gmra.mxu1 %vm1443_vm3, %v19643_v37 }
0x733e   : > { %17216 = vmatprep.mubr.msk.f32.mxu1 %vm17809_vm0, %v17808_v1 }
0x73fd   : > { %v12803_v31 = vpop.f32.mrf.mxu1 }
0x73fe   : > { %v19650_v46 = vadd.f32 %v12803_v31, %v12733_v26 }
0x73ff   : > { %v17213_v35 = vpop.f32.mrf.mxu1 }
0x7400   : > { %12808 = vrot.lane.b32.xlu0 %v19650_v46, %s20033_s23  ;;  %v12819_v35 = vld [vmem:[%s20026_s26 + $0x8] sm:$0xff] }
0x7472   : > { %v12809_v53 = vpop.permute.xlu0 %12808 }
0x7473   : > { %12811 = vst.msk [vmem:[#allocation2 + $0x4] sm:$0x1] %vm3229_vm9, %v12809_v53 }
0x747a   : > { %v19655_v54 = vld [vmem:[#allocation2] sm:$0x1f] }
0x747b   : > { %12990 = vrot.lane.b32.xlu0 %v19655_v54, %s20049_s10  ;;  %17215 = vmatpush3.xpose.msk.msra.mxu1 %vm1348_vm2, %v19655_v54 }
0x747c   : > { %17219 = vmatprep.subr.mxu1 %v17808_v1 }
0x747e   : > { %17217 = vmatmul.mubr.msk.f32.vlgmr.msra.gmra.mxu1 %vm1348_vm2, %v19650_v46 }
0x747f   : > { %12988 = vrot.lane.b32.xlu0 %v19650_v46, %s20049_s10  ;;  %17221 = vmatprep.mubr.msk.f32.mxu1 %vm17809_vm0, %v17808_v1 }
0x7483   : > { %13301 = vrot.lane.b32.xlu0 %v19650_v46, %s20035_s6 }
0x74ed   : > { %v12991_v48 = vpop.permute.xlu0 %12990 }
0x74f1   : > { %v12989_v39 = vpop.permute.xlu0 %12988 }
0x74f5   : > { %v13302_v0 = vpop.permute.xlu0 %13301 }
0x753e   : > { %v12893_v43 = vpop.f32.mrf.mxu1 }
0x753f   : > { %v12897_v49 = vmul.f32 0.35355338, %v12893_v43 }
0x7540   : > { %v17218_v55 = vpop.f32.mrf.mxu1 }
0x7541   : > { %v12899_v56 = vsel %vm12898_vm12, %v12897_v49, -inf }
0x7542   : > { %12900 = vmax.xlane.f32.xlu1 %v12899_v56 }
0x75cb   : > { %v12901_v57 = vpop.xlane.xlu1 %12900 }
0x75cc   : > { %v12902_v58 = vsub.f32 %v12897_v49, %v12901_v57 }
0x75ce   : > { %v12903_v60 = vmul.f32 1.442695, %v12902_v58 }
0x75d0   : > { %17657 = vpow2.f32 %v12903_v60  ;;  %v12820_v60 = vld [vmem:[%s20026_s26 + $0x10] sm:$0xff] }
0x75dd   : > { %v17658_v44 = vpop.eup %17657 }
0x75de   : > { %v12905_v24 = vsel %vm12898_vm12, %v17658_v44, 0.0 }
0x75df   : > { %12906 = vadd.xlane.f32.xlu1 %v12905_v24 }
0x75f0   : > { %12812 = vrot.lane.b32.xlu1 %v19650_v46, %s20050_s28 }
0x75f4   : > { %13303 = vrot.lane.b32.xlu1 %v19655_v54, %s20035_s6 }
0x7668   : > { %v12907_v47 = vpop.xlane.xlu1 %12906 }
0x7669   : > { %17659 = vrcp.f32 %v12907_v47 }
0x766c   : > { %v12813_v62 = vpop.permute.xlu1 %12812 }
0x766d   : > { %12815 = vst.msk [vmem:[#allocation3 + $0x4] sm:$0x1] %vm3229_vm9, %v12813_v62 }
0x7670   : > { %v13304_v63 = vpop.permute.xlu1 %13303 }
0x7671   : > { %17245 = vmatpush3.xpose.msk.msra.mxu0 %vm1348_vm2, %v13304_v63 }
0x7672   : > { %17254 = vmatprep.subr.mxu0 %v17808_v1 }
0x7674   : > { %17247 = vmatmul.mubr.msk.f32.vlgmr.msra.gmra.mxu0 %vm1348_vm2, %v13302_v0  ;;  %v19680_v2 = vld [vmem:[#allocation3] sm:$0x1f] }
0x7675   : > { %17220 = vmatpush3.msk.msra.mxu1 %vm12914_vm14, %v19680_v2  ;;  %17256 = vmatprep.mubr.msk.f32.mxu0 %vm17809_vm0, %v17808_v1 }
0x7676   : > { %v17660_v3 = vpop.eup %17659  ;;  %17224 = vmatprep.subr.mxu1 %v17808_v1  ;;  %17255 = vmatpush3.msra.mxu0 %v12820_v60  ;;  %v13787_v60 = vld [vmem:[%s20031_s22] sm:$0x1] }
0x7677   : > { %v12909_v4 = vmul.f32 %v17660_v3, %v17658_v44  ;;  %17264 = vmatprep.subr.mxu0 %v17808_v1 }
0x7679   : > { %17222 = vmatmul.mubr.msk.f32.vlgmr.msra.gmra.mxu1 %vm12910_vm15, %v12909_v4 }
0x767a   : > { %17225 = vmatpush3.xpose.msk.msra.mxu1 %vm1348_vm2, %v12991_v48  ;;  %17226 = vmatprep.mubr.msk.f32.mxu1 %vm17809_vm0, %v17808_v1 }
0x767b   : > { %17229 = vmatprep.subr.mxu1 %v17808_v1 }
0x767d   : > { %17227 = vmatmul.mubr.msk.f32.vlgmr.msra.gmra.mxu1 %vm1348_vm2, %v12989_v39 }
0x767e   : > { %17231 = vmatprep.mubr.msk.f32.mxu1 %vm17809_vm0, %v17808_v1 }
0x7734   : > { %v13375_v7 = vpop.f32.mrf.mxu0 }
0x7735   : > { %v13379_v17 = vmul.f32 0.35355338, %v13375_v7 }
0x7736   : > { %v17248_v8 = vpop.f32.mrf.mxu0 }
0x7737   : > { %v13380_v19 = vsel %vm12898_vm12, %v13379_v17, -inf }
0x7739   : > { %v12984_v10 = vpop.f32.mrf.mxu1 }
0x773b   : > { %v17223_v11 = vpop.f32.mrf.mxu1 }
0x773d   : > { %v13062_v12 = vpop.f32.mrf.mxu1 }
0x773e   : > { %v13066_v13 = vmul.f32 0.35355338, %v13062_v12 }
0x773f   : > { %v17228_v16 = vpop.f32.mrf.mxu1 }
0x7740   : > { %v13067_v18 = vsel %vm12898_vm12, %v13066_v13, -inf  ;;  %v12821_v16 = vld [vmem:[%s20026_s26 + $0x18] sm:$0xff] }
0x7741   : > { %13068 = vmax.xlane.f32.xlu1 %v13067_v18 }
0x7745   : > { %13381 = vmax.xlane.f32.xlu1 %v13380_v19 }
0x77ca   : > { %v13069_v20 = vpop.xlane.xlu1 %13068 }
0x77cb   : > { %v13070_v5 = vsub.f32 %v13066_v13, %v13069_v20 }
0x77cd   : > { %v13071_v6 = vmul.f32 1.442695, %v13070_v5 }
0x77ce   : > { %v13382_v21 = vpop.xlane.xlu1 %13381 }
0x77cf   : > { %17661 = vpow2.f32 %v13071_v6  ;;  %v13383_v22 = vsub.f32 %v13379_v17, %v13382_v21 }
0x77d1   : > { %v13384_v23 = vmul.f32 1.442695, %v13383_v22 }
0x77d3   : > { %17663 = vpow2.f32 %v13384_v23 }
0x77dc   : > { %v17662_v29 = vpop.eup %17661 }
0x77dd   : > { %v13073_v32 = vsel %vm12898_vm12, %v17662_v29, 0.0 }
0x77de   : > { %13074 = vadd.xlane.f32.xlu0 %v13073_v32 }
0x77e0   : > { %v17664_v9 = vpop.eup %17663 }
0x77e1   : > { %v13386_v33 = vsel %vm12898_vm12, %v17664_v9, 0.0 }
0x77e2   : > { %13387 = vadd.xlane.f32.xlu1 %v13386_v33 }
0x77f3   : > { %13391 = vrot.lane.b32.xlu1 %v19680_v2, %s20035_s6 }
0x77f4   : > { %13078 = vrot.lane.b32.xlu0 %v19680_v2, %s20049_s10 }
0x77f8   : > { %13544 = vrot.lane.b32.xlu0 %v19655_v54, %s20036_s8 }
0x77fc   : > { %13542 = vrot.lane.b32.xlu0 %v19650_v46, %s20036_s8  ;;  %v12818_v46 = vld [vmem:[%s20026_s26] sm:$0xff] }
0x7867   : > { %v13075_v30 = vpop.xlane.xlu0 %13074 }
0x7868   : > { %17665 = vrcp.f32 %v13075_v30 }
0x786b   : > { %v13079_v34 = vpop.permute.xlu0 %13078  ;;  %v13388_v53 = vpop.xlane.xlu1 %13387 }
0x786c   : > { %17230 = vmatpush3.msk.msra.mxu1 %vm12914_vm14, %v13079_v34  ;;  %17667 = vrcp.f32 %v13388_v53  ;;  %v13806_v53 = vld [vmem:[%s20029_s15 + $0x18] sm:$0xff] }
0x786d   : > { %17234 = vmatprep.subr.mxu1 %v17808_v1 }
0x786f   : > { %v13392_v55 = vpop.permute.xlu1 %13391  ;;  %v13545_v56 = vpop.permute.xlu0 %13544 }
0x7873   : > { %v13543_v58 = vpop.permute.xlu0 %13542 }
0x7875   : > { %v17666_v26 = vpop.eup %17665 }
0x7876   : > { %v13077_v31 = vmul.f32 %v17666_v26, %v17662_v29  ;;  %v13783_v29 = vld [vmem:[%s20028_s2] sm:$0x1] }
0x7878   : > { %17232 = vmatmul.mubr.msk.f32.vlgmr.msra.gmra.mxu1 %vm12910_vm15, %v13077_v31 }
0x7879   : > { %17235 = vmatpush3.msra.mxu1 %v12819_v35  ;;  %17236 = vmatprep.mubr.msk.f32.mxu1 %vm17809_vm0, %v17808_v1  ;;  %v17668_v49 = vpop.eup %17667 }
0x787a   : > { %17239 = vmatprep.subr.mxu1 %v17808_v1  ;;  %v13390_v57 = vmul.f32 %v17668_v49, %v17664_v9 }
0x7938   : > { %v13151_v54 = vpop.f32.mrf.mxu1 }
0x7939   : > { %17237 = vmatmul.mubr.msk.f32.vlgmr.msra.gmra.mxu1 %vm1348_vm2, %v13151_v54  ;;  %v13803_v54 = vld [vmem:[%s20029_s15] sm:$0xff] }
0x793a   : > { %v17233_v43 = vpop.f32.mrf.mxu1  ;;  %17240 = vmatpush3.msra.mxu1 %v12818_v46  ;;  %17241 = vmatprep.mubr.msk.f32.mxu1 %vm17809_vm0, %v17808_v1  ;;  %v13805_v46 = vld [vmem:[%s20029_s15 + $0x10] sm:$0xff] }
0x793b   : > { %17249 = vmatprep.subr.mxu1 %v17808_v1 }
0x793d   : > { %17242 = vmatmul.mubr.msk.f32.vlgmr.msra.gmra.mxu1 %vm1348_vm2, %v12984_v10 }
0x793e   : > { %17250 = vmatpush3.msk.msra.mxu1 %vm12914_vm14, %v13392_v55  ;;  %17251 = vmatprep.mubr.msk.f32.mxu1 %vm17809_vm0, %v17808_v1 }
0x793f   : > { %17259 = vmatprep.subr.mxu1 %v17808_v1 }
0x7941   : > { %17252 = vmatmul.mubr.msk.f32.vlgmr.msra.gmra.mxu1 %vm12910_vm15, %v13390_v57  ;;  %v13786_v57 = vld [vmem:[%s20030_s18] sm:$0x1] }
0x7942   : > { %17260 = vmatpush3.xpose.msk.msra.mxu1 %vm1348_vm2, %v13545_v56  ;;  %17261 = vmatprep.mubr.msk.f32.mxu1 %vm17809_vm0, %v17808_v1 }
0x7943   : > { %17269 = vmatprep.subr.mxu1 %v17808_v1 }
0x7945   : > { %17262 = vmatmul.mubr.msk.f32.vlgmr.msra.gmra.mxu1 %vm1348_vm2, %v13543_v58 }
0x7946   : > { %17271 = vmatprep.mubr.msk.f32.mxu1 %vm17809_vm0, %v17808_v1  ;;  %17270 = vmatpush3.msra.mxu1 %v12821_v16 }
0x7947   : > { %17285 = vmatprep.subr.mxu1 %v17808_v1 }
0x79f9   : > { %v13224_v44 = vpop.f32.mrf.mxu1 }
0x79fb   : > { %v17238_v24 = vpop.f32.mrf.mxu1 }
0x79fd   : > { %v13297_v48 = vpop.f32.mrf.mxu1 }
0x79fe   : > { %v13298_v47 = vadd.f32 %v13297_v48, %v13224_v44  ;;  %v13807_v48 = vld [vmem:[%s20032_s3] sm:$0x1] }
0x79ff   : > { %v17243_v62 = vpop.f32.mrf.mxu1 }
0x7a01   : > { %v13464_v39 = vpop.f32.mrf.mxu1 }
0x7a02   : > { %17257 = vmatmul.mubr.msk.f32.vlgmr.msra.gmra.mxu0 %vm1348_vm2, %v13464_v39 }
0x7a03   : > { %v17253_v63 = vpop.f32.mrf.mxu1  ;;  %17266 = vmatprep.mubr.msk.f32.mxu0 %vm17809_vm0, %v17808_v1 }
0x7a05   : > { %v13616_v0 = vpop.f32.mrf.mxu1 }
0x7a06   : > { %v13620_v3 = vmul.f32 0.35355338, %v13616_v0 }
0x7a07   : > { %v17263_v4 = vpop.f32.mrf.mxu1 }
0x7a08   : > { %v13621_v7 = vsel %vm12898_vm12, %v13620_v3, -inf }
0x7a09   : > { %13622 = vmax.xlane.f32.xlu1 %v13621_v7 }
0x7a92   : > { %v13623_v8 = vpop.xlane.xlu1 %13622 }
0x7a93   : > { %v13624_v10 = vsub.f32 %v13620_v3, %v13623_v8 }
0x7a95   : > { %v13625_v11 = vmul.f32 1.442695, %v13624_v10 }
0x7a97   : > { %17669 = vpow2.f32 %v13625_v11 }
0x7aa4   : > { %v17670_v12 = vpop.eup %17669 }
0x7aa5   : > { %v13627_v13 = vsel %vm12898_vm12, %v17670_v12, 0.0 }
0x7aa6   : > { %13628 = vadd.xlane.f32.xlu0 %v13627_v13 }
0x7abc   : > { %13632 = vrot.lane.b32.xlu0 %v19680_v2, %s20036_s8 }
0x7ac2   : > { %v13537_v17 = vpop.f32.mrf.mxu0 }
0x7ac3   : > { %v13541_v18 = vadd.f32 %v13537_v17, %v13298_v47 }
0x7ac4   : > { %v17258_v19 = vpop.f32.mrf.mxu0 }
0x7b2f   : > { %v13629_v20 = vpop.xlane.xlu0 %13628 }
0x7b30   : > { %17671 = vrcp.f32 %v13629_v20 }
0x7b33   : > { %v13633_v5 = vpop.permute.xlu0 %13632 }
0x7b34   : > { %17265 = vmatpush3.msk.msra.mxu0 %vm12914_vm14, %v13633_v5 }
0x7b35   : > { %17274 = vmatprep.subr.mxu0 %v17808_v1 }
0x7b3d   : > { %v17672_v6 = vpop.eup %17671 }
0x7b3e   : > { %v13631_v21 = vmul.f32 %v17672_v6, %v17670_v12  ;;  %v13881_v6 = vld [vmem:[%s20037_s9] sm:$0xff] }
0x7b40   : > { %17267 = vmatmul.mubr.msk.f32.vlgmr.msra.gmra.mxu0 %vm12910_vm15, %v13631_v21 }
0x7b41   : > { %17282 = vmatprep.mubr.msk.f32.mxu0 %vm17809_vm0, %v17808_v1  ;;  %17275 = vmatpush3.msra.mxu0 %v13806_v53 }
0x7b42   : > { %17276 = vmatprep.subr.mxu0 %v17808_v1 }
0x7b43   : > { %17277 = vmatpush3.msra.mxu0 %v13805_v46 }
0x7b44   : > { %17278 = vmatprep.subr.mxu0 %v17808_v1 }
0x7c00   : > { %v13705_v2 = vpop.f32.mrf.mxu0 }
0x7c01   : > { %17272 = vmatmul.mubr.msk.f32.vlgmr.msra.gmra.mxu1 %vm1348_vm2, %v13705_v2 }
0x7c02   : > { %17286 = vmatpush3.xpose.msk.msra.mxu1 %vm1348_vm2, %v18364_v50  ;;  %v17268_v22 = vpop.f32.mrf.mxu0  ;;  %17289 = vmatprep.mubr.msk.f32.mxu1 %vm17809_vm0, %v17808_v1 }
0x7c03   : > { %17287 = vmatprep.subr.mxu1 %v17808_v1 }
0x7c06   : > { %17288 = vmatpush3.xpose.msk.msra.mxu1 %vm1348_vm2, %v18373_v51 }
0x7c07   : > { %17299 = vmatprep.subr.mxu1 %v17808_v1 }
0x7cc1   : > { %v13778_v23 = vpop.f32.mrf.mxu1 }
0x7cc2   : > { %v13782_v32 = vadd.f32 %v13778_v23, %v13541_v18 }
0x7cc3   : > { %v17273_v9 = vpop.f32.mrf.mxu1 }
0x7cc4   : > { %v13784_v33 = vadd.f32 %v13783_v29, %v13782_v32  ;;  %v13882_v32 = vld [vmem:[%s20037_s9 + $0x8] sm:$0xff] }
0x7cc6   : > { %v13785_v50 = vadd.f32 %v13784_v33, %v19643_v37  ;;  %v13804_v37 = vld [vmem:[%s20029_s15 + $0x8] sm:$0xff] }
0x7cc7   : > { %17279 = vmatpush3.msra.mxu0 %v13804_v37 }
0x7cc8   : > { %v13788_v30 = vsel %vm3229_vm9, %v13785_v50, 0.0  ;;  %17280 = vmatprep.subr.mxu0 %v17808_v1 }
0x7cc9   : > { %13789 = vadd.xlane.f32.xlu1 %v13788_v30  ;;  %17281 = vmatpush3.msra.mxu0 %v13803_v54 }
0x7cca   : > { %17292 = vmatprep.subr.mxu0 %v17808_v1 }
0x7d52   : > { %v13790_v34 = vpop.xlane.xlu1 %13789 }
0x7d53   : > { %v13791_v26 = vmul.f32 0.03125, %v13790_v34 }
0x7d55   : > { %v13792_v31 = vsub.f32 %v13785_v50, %v13791_v26 }
0x7d57   : > { %v13793_v51 = vmul.f32 %v13792_v31, %v13792_v31 }
0x7d59   : > { %v13794_v35 = vsel %vm3229_vm9, %v13793_v51, 0.0 }
0x7d5a   : > { %13795 = vadd.xlane.f32.xlu1 %v13794_v35 }
0x7de3   : > { %v13796_v43 = vpop.xlane.xlu1 %13795 }
0x7de4   : > { %v13797_v49 = vmul.f32 0.03125, %v13796_v43 }
0x7de6   : > { %v13798_v55 = vadd.f32 1e-05, %v13797_v49 }
0x7de8   : > { %17673 = vrsqrt.f32 %v13798_v55 }
0x7df5   : > { %v17674_v56 = vpop.eup %17673 }
0x7df6   : > { %v13800_v58 = vmul.f32 %v17674_v56, %v13792_v31 }
0x7df8   : > { %v13801_v44 = vmul.f32 %v13800_v58, %v13786_v57 }
0x7dfa   : > { %v19771_v24 = vadd.f32 %v13801_v44, %v13787_v60 }
0x7dfc   : > { %17283 = vmatmul.mubr.msk.f32.vlgmr.msra.gmra.mxu0 %vm1443_vm3, %v19771_v24 }
0x7dfd   : > { %17293 = vmatpush3.msk.msra.mxu0 %vm1655_vm6, %v18434_v40  ;;  %17296 = vmatprep.mubr.msk.f32.mxu0 %vm17809_vm0, %v17808_v1 }
0x7dfe   : > { %17294 = vmatprep.subr.mxu0 %v17808_v1 }
0x7dff   : > { %17295 = vmatpush3.msra.mxu0 %v18438_v41 }
0x7e00   : > { %17306 = vmatprep.subr.mxu0 %v17808_v1 }
0x7ebc   : > { %v13877_v47 = vpop.f32.mrf.mxu0 }
0x7ebd   : > { %v13878_v62 = vadd.f32 %v13877_v47, %v13807_v48 }
0x7ebe   : > { %v17284_v39 = vpop.f32.mrf.mxu0 }
0x7ebf   : > { %14043 = vrot.lane.b32.xlu1 %v13878_v62, %s20049_s10  ;;  %17290 = vmatmul.mubr.msk.f32.vlgmr.msra.gmra.mxu1 %vm1348_vm2, %v13878_v62 }
0x7ec0   : > { %17300 = vmatpush3.xpose.msk.msra.mxu1 %vm1348_vm2, %v18403_v14  ;;  %17303 = vmatprep.mubr.msk.f32.mxu1 %vm17809_vm0, %v17808_v1 }
0x7ec1   : > { %17301 = vmatprep.subr.mxu1 %v17808_v1 }
0x7ec4   : > { %17302 = vmatpush3.xpose.msk.msra.mxu1 %vm1348_vm2, %v18412_v15 }
0x7ec5   : > { %17318 = vmatprep.subr.mxu1 %v17808_v1 }
0x7f31   : > { %v14044_v40 = vpop.permute.xlu1 %14043 }
0x7f32   : > { %17304 = vmatmul.mubr.msk.f32.vlgmr.msra.gmra.mxu1 %vm1348_vm2, %v14044_v40 }
0x7f33   : > { %17320 = vmatprep.mubr.msk.f32.mxu1 %vm17809_vm0, %v17808_v1  ;;  %17319 = vmatpush3.msra.mxu1 %v13881_v6 }
0x7f34   : > { %17330 = vmatprep.subr.mxu1 %v17808_v1 }
0x7f7f   : > { %v13954_v41 = vpop.f32.mrf.mxu1 }
0x7f80   : > { %v13958_v63 = vmul.f32 0.35355338, %v13954_v41 }
0x7f81   : > { %v17291_v0 = vpop.f32.mrf.mxu1 }
0x7f82   : > { %v13959_v14 = vsel %vm4078_vm13, %v13958_v63, -inf }
0x7f83   : > { %13960 = vmax.xlane.f32.xlu0 %v13959_v14  ;;  %v13884_v14 = vld [vmem:[%s20037_s9 + $0x18] sm:$0xff] }
0x7ff2   : > { %v14113_v3 = vpop.f32.mrf.mxu1 }
0x7ff3   : > { %v14117_v4 = vmul.f32 0.35355338, %v14113_v3 }
0x7ff4   : > { %v17305_v7 = vpop.f32.mrf.mxu1 }
0x7ff5   : > { %v14118_v8 = vsel %vm4078_vm13, %v14117_v4, -inf }
0x7ff6   : > { %14119 = vmax.xlane.f32.xlu1 %v14118_v8 }
0x8007   : > { %14581 = vrot.lane.b32.xlu1 %v13878_v62, %s20036_s8 }
0x800c   : > { %v13961_v15 = vpop.xlane.xlu0 %13960 }
0x800d   : > { %v13962_v10 = vsub.f32 %v13958_v63, %v13961_v15 }
0x800f   : > { %v13963_v11 = vmul.f32 1.442695, %v13962_v10  ;;  %v14814_v10 = vld [vmem:[%s20040_s13] sm:$0x1] }
0x8011   : > { %17675 = vpow2.f32 %v13963_v11 }
0x801e   : > { %v17676_v12 = vpop.eup %17675 }
0x801f   : > { %v13965_v13 = vsel %vm4078_vm13, %v17676_v12, 0.0 }
0x8020   : > { %13966 = vadd.xlane.f32.xlu0 %v13965_v13 }
0x807f   : > { %v14120_v16 = vpop.xlane.xlu1 %14119 }
0x8080   : > { %v14121_v17 = vsub.f32 %v14117_v4, %v14120_v16 }
0x8082   : > { %v14122_v18 = vmul.f32 1.442695, %v14121_v17 }
0x8084   : > { %17677 = vpow2.f32 %v14122_v18 }
0x8091   : > { %v17678_v19 = vpop.eup %17677 }
0x8092   : > { %v14124_v20 = vsel %vm4078_vm13, %v17678_v19, 0.0 }
0x8093   : > { %14125 = vadd.xlane.f32.xlu0 %v14124_v20 }
0x80a9   : > { %v13967_v5 = vpop.xlane.xlu0 %13966  ;;  %14348 = vrot.lane.b32.xlu0 %v13878_v62, %s20035_s6  ;;  %v13883_v62 = vld [vmem:[%s20037_s9 + $0x10] sm:$0xff] }
0x80aa   : > { %17679 = vrcp.f32 %v13967_v5 }
0x80b7   : > { %v17680_v21 = vpop.eup %17679 }
0x80b8   : > { %v13969_v2 = vmul.f32 %v17680_v21, %v17676_v12  ;;  %v14837_v21 = vld [vmem:[%s20041_s5 + $0x18] sm:$0xff] }
0x80ba   : > { %17297 = vmatmul.mubr.msk.f32.vlgmr.msra.gmra.mxu0 %vm1620_vm5, %v13969_v2  ;;  %v14836_v2 = vld [vmem:[%s20041_s5 + $0x10] sm:$0xff] }
0x80bb   : > { %17307 = vmatpush3.msk.msra.mxu0 %vm1655_vm6, %v18456_v42  ;;  %17310 = vmatprep.mubr.msk.f32.mxu0 %vm17809_vm0, %v17808_v1 }
0x80bc   : > { %17308 = vmatprep.subr.mxu0 %v17808_v1 }
0x80bd   : > { %17309 = vmatpush3.msra.mxu0 %v18460_v52 }
0x80be   : > { %17313 = vmatprep.subr.mxu0 %v17808_v1 }
0x811c   : > { %v14126_v22 = vpop.xlane.xlu0 %14125 }
0x811d   : > { %17681 = vrcp.f32 %v14126_v22  ;;  %v14834_v22 = vld [vmem:[%s20041_s5] sm:$0xff] }
0x812a   : > { %v17682_v23 = vpop.eup %17681 }
0x812b   : > { %v14128_v29 = vmul.f32 %v17682_v23, %v17678_v19  ;;  %v14920_v23 = vld [vmem:[%s20042_s14 + $0x38] sm:$0xff] }
0x812d   : > { %17311 = vmatmul.mubr.msk.f32.vlgmr.msra.gmra.mxu0 %vm1620_vm5, %v14128_v29  ;;  %v14919_v29 = vld [vmem:[%s20042_s14 + $0x30] sm:$0xff] }
0x812e   : > { %17314 = vmatpush3.msra.mxu0 %v13882_v32  ;;  %17315 = vmatprep.mubr.msk.f32.mxu0 %vm17809_vm0, %v17808_v1  ;;  %v14918_v32 = vld [vmem:[%s20042_s14 + $0x28] sm:$0xff] }
0x812f   : > { %17323 = vmatprep.subr.mxu0 %v17808_v1 }
0x817a   : > { %v14039_v42 = vpop.f32.mrf.mxu0 }
0x817b   : > { %17321 = vmatmul.mubr.msk.f32.vlgmr.msra.gmra.mxu1 %vm1348_vm2, %v14039_v42  ;;  %v14917_v42 = vld [vmem:[%s20042_s14 + $0x20] sm:$0xff] }
0x817c   : > { %17331 = vmatpush3.msk.msra.mxu1 %vm1655_vm6, %v18520_v27  ;;  %v17298_v52 = vpop.f32.mrf.mxu0  ;;  %17334 = vmatprep.mubr.msk.f32.mxu1 %vm17809_vm0, %v17808_v1 }
0x817d   : > { %17332 = vmatprep.subr.mxu1 %v17808_v1  ;;  %v14916_v52 = vld [vmem:[%s20042_s14 + $0x18] sm:$0xff] }
0x817e   : > { %17333 = vmatpush3.msra.mxu1 %v18515_v28  ;;  %v14349_v28 = vpop.permute.xlu0 %14348 }
0x817f   : > { %17337 = vmatprep.subr.mxu1 %v17808_v1 }
0x81ed   : > { %v14198_v9 = vpop.f32.mrf.mxu0 }
0x81ee   : > { %17316 = vmatmul.mubr.msk.f32.vlgmr.msra.gmra.mxu0 %vm1348_vm2, %v14198_v9 }
0x81ef   : > { %17324 = vmatpush3.xpose.msk.msra.mxu0 %vm1348_vm2, %v18473_v36  ;;  %v17312_v33 = vpop.f32.mrf.mxu0  ;;  %17327 = vmatprep.mubr.msk.f32.mxu0 %vm17809_vm0, %v17808_v1  ;;  %v14582_v36 = vpop.permute.xlu1 %14581 }
0x81f0   : > { %17325 = vmatprep.subr.mxu0 %v17808_v1 }
0x81f3   : > { %17326 = vmatpush3.xpose.msk.msra.mxu0 %vm1348_vm2, %v18480_v59 }
0x81f4   : > { %17342 = vmatprep.subr.mxu0 %v17808_v1 }
0x81f6   : > { %17328 = vmatmul.mubr.msk.f32.vlgmr.msra.gmra.mxu0 %vm1348_vm2, %v14349_v28 }
0x81f7   : > { %17343 = vmatpush3.xpose.msk.msra.mxu0 %vm1348_vm2, %v18486_v25  ;;  %17346 = vmatprep.mubr.msk.f32.mxu0 %vm17809_vm0, %v17808_v1 }
0x81f8   : > { %17344 = vmatprep.subr.mxu0 %v17808_v1 }
0x81fb   : > { %17345 = vmatpush3.xpose.msk.msra.mxu0 %vm1348_vm2, %v18494_v61 }
0x81fc   : > { %17361 = vmatprep.subr.mxu0 %v17808_v1 }
0x81fe   : > { %17347 = vmatmul.mubr.msk.f32.vlgmr.msra.gmra.mxu0 %vm1348_vm2, %v14582_v36 }
0x81ff   : > { %17369 = vmatprep.mubr.msk.f32.mxu0 %vm17809_vm0, %v17808_v1  ;;  %17362 = vmatpush3.msra.mxu0 %v14837_v21 }
0x8200   : > { %17363 = vmatprep.subr.mxu0 %v17808_v1 }
0x8201   : > { %17364 = vmatpush3.msra.mxu0 %v14836_v2 }
0x8202   : > { %17365 = vmatprep.subr.mxu0 %v17808_v1 }
0x823b   : > { %v14344_v59 = vpop.f32.mrf.mxu1 }
0x823d   : > { %v17322_v27 = vpop.f32.mrf.mxu1 }
0x82ae   : > { %v14271_v50 = vpop.f32.mrf.mxu0 }
0x82b0   : > { %v17317_v25 = vpop.f32.mrf.mxu0 }
0x82b6   : > { %v14418_v30 = vpop.f32.mrf.mxu0 }
0x82b7   : > { %v14422_v34 = vmul.f32 0.35355338, %v14418_v30 }
0x82b8   : > { %v17329_v26 = vpop.f32.mrf.mxu0 }
0x82b9   : > { %v14423_v31 = vsel %vm4078_vm13, %v14422_v34, -inf  ;;  %v14914_v26 = vld [vmem:[%s20042_s14 + $0x8] sm:$0xff] }
0x82ba   : > { %14424 = vmax.xlane.f32.xlu1 %v14423_v31  ;;  %v14913_v31 = vld [vmem:[%s20042_s14] sm:$0xff] }
0x82be   : > { %v14651_v51 = vpop.f32.mrf.mxu0 }
0x82bf   : > { %v14655_v54 = vmul.f32 0.35355338, %v14651_v51  ;;  %v14838_v51 = vld [vmem:[%s20045_s21] sm:$0x1] }
0x82c0   : > { %v17348_v61 = vpop.f32.mrf.mxu0 }
0x82c1   : > { %v14656_v49 = vsel %vm4078_vm13, %v14655_v54, -inf }
0x8343   : > { %v14425_v35 = vpop.xlane.xlu1 %14424 }
0x8344   : > { %v14426_v53 = vsub.f32 %v14422_v34, %v14425_v35  ;;  %v14915_v34 = vld [vmem:[%s20042_s14 + $0x10] sm:$0xff] }
0x8346   : > { %v14427_v46 = vmul.f32 1.442695, %v14426_v53 }
0x8348   : > { %17683 = vpow2.f32 %v14427_v46 }
0x8355   : > { %v17684_v37 = vpop.eup %17683 }
0x8356   : > { %v14429_v43 = vsel %vm4078_vm13, %v17684_v37, 0.0 }
0x8357   : > { %14430 = vadd.xlane.f32.xlu0 %v14429_v43 }
0x835b   : > { %14657 = vmax.xlane.f32.xlu0 %v14656_v49 }
0x83e0   : > { %v14431_v55 = vpop.xlane.xlu0 %14430 }
0x83e1   : > { %17685 = vrcp.f32 %v14431_v55 }
0x83e4   : > { %v14658_v56 = vpop.xlane.xlu0 %14657 }
0x83e5   : > { %v14659_v57 = vsub.f32 %v14655_v54, %v14658_v56 }
0x83e7   : > { %v14660_v58 = vmul.f32 1.442695, %v14659_v57 }
0x83e9   : > { %17687 = vpow2.f32 %v14660_v58 }
0x83ee   : > { %v17686_v60 = vpop.eup %17685 }
0x83ef   : > { %v14433_v44 = vmul.f32 %v17686_v60, %v17684_v37  ;;  %v14921_v37 = vld [vmem:[%s20046_s24] sm:$0x1] }
0x83f1   : > { %17335 = vmatmul.mubr.msk.f32.vlgmr.msra.gmra.mxu1 %vm1620_vm5, %v14433_v44 }
0x83f2   : > { %17339 = vmatprep.mubr.msk.f32.mxu1 %vm17809_vm0, %v17808_v1  ;;  %17338 = vmatpush3.msra.mxu1 %v13883_v62  ;;  %v15015_v62 = vld [vmem:[%s18025_s20 + $0x10] sm:$0xff] }
0x83f3   : > { %17349 = vmatprep.subr.mxu1 %v17808_v1 }
0x83f6   : > { %v17688_v48 = vpop.eup %17687 }
0x83f7   : > { %v14662_v47 = vsel %vm4078_vm13, %v17688_v48, 0.0 }
0x83f8   : > { %14663 = vadd.xlane.f32.xlu1 %v14662_v47  ;;  %v15016_v47 = vld [vmem:[%s18025_s20 + $0x18] sm:$0xff] }
0x8481   : > { %v14664_v39 = vpop.xlane.xlu1 %14663 }
0x8482   : > { %17689 = vrcp.f32 %v14664_v39  ;;  %v15014_v39 = vld [vmem:[%s18025_s20 + $0x8] sm:$0xff] }
0x848f   : > { %v17690_v40 = vpop.eup %17689 }
0x8490   : > { %v14666_v0 = vmul.f32 %v17690_v40, %v17688_v48  ;;  %v15013_v40 = vld [vmem:[%s18025_s20] sm:$0xff] }
0x84b1   : > { %v14503_v41 = vpop.f32.mrf.mxu1 }
0x84b2   : > { %17340 = vmatmul.mubr.msk.f32.vlgmr.msra.gmra.mxu1 %vm1348_vm2, %v14503_v41 }
0x84b3   : > { %17350 = vmatpush3.msk.msra.mxu1 %vm1655_vm6, %v18532_v38  ;;  %v17336_v63 = vpop.f32.mrf.mxu1  ;;  %17353 = vmatprep.mubr.msk.f32.mxu1 %vm17809_vm0, %v17808_v1  ;;  %v14345_v38 = vadd.f32 %v14344_v59, %v14271_v50  ;;  %v14817_v59 = vld [vmem:[%s20043_s17] sm:$0x1] }
0x84b4   : > { %17351 = vmatprep.subr.mxu1 %v17808_v1  ;;  %v14818_v50 = vld [vmem:[%s20044_s19] sm:$0x1] }
0x84b5   : > { %17352 = vmatpush3.msra.mxu1 %v18539_v45 }
0x84b6   : > { %17354 = vmatmul.mubr.msk.f32.vlgmr.msra.gmra.mxu1 %vm1620_vm5, %v14666_v0  ;;  %17356 = vmatprep.subr.mxu1 %v17808_v1 }
0x84b7   : > { %17358 = vmatprep.mubr.msk.f32.mxu1 %vm17809_vm0, %v17808_v1  ;;  %17357 = vmatpush3.msra.mxu1 %v13884_v14 }
0x84b8   : > { %17372 = vmatprep.subr.mxu1 %v17808_v1 }
0x8572   : > { %v14576_v3 = vpop.f32.mrf.mxu1 }
0x8573   : > { %v14580_v4 = vadd.f32 %v14576_v3, %v14345_v38  ;;  %v14996_v38 = vld [vmem:[%s20047_s25] sm:$0x1] }
0x8574   : > { %v17341_v7 = vpop.f32.mrf.mxu1 }
0x8576   : > { %v14736_v8 = vpop.f32.mrf.mxu1 }
0x8577   : > { %17359 = vmatmul.mubr.msk.f32.vlgmr.msra.gmra.mxu1 %vm1348_vm2, %v14736_v8 }
0x8578   : > { %v17355_v45 = vpop.f32.mrf.mxu1  ;;  %17388 = vmatprep.mubr.msk.f32.mxu1 %vm17809_vm0, %v17808_v1  ;;  %17373 = vmatpush3.msra.mxu1 %v14920_v23 }
0x8579   : > { %17374 = vmatprep.subr.mxu1 %v17808_v1  ;;  %v15017_v45 = vld [vmem:[%s18030_s27] sm:$0x1] }
0x857a   : > { %17375 = vmatpush3.msra.mxu1 %v14919_v29 }
0x857b   : > { %17376 = vmatprep.subr.mxu1 %v17808_v1 }
0x857c   : > { %17377 = vmatpush3.msra.mxu1 %v14918_v32 }
0x857d   : > { %17378 = vmatprep.subr.mxu1 %v17808_v1 }
0x857e   : > { %17379 = vmatpush3.msra.mxu1 %v14917_v42 }
0x857f   : > { %17380 = vmatprep.subr.mxu1 %v17808_v1 }
0x8580   : > { %17381 = vmatpush3.msra.mxu1 %v14916_v52 }
0x8581   : > { %17382 = vmatprep.subr.mxu1 %v17808_v1 }
0x8582   : > { %17383 = vmatpush3.msra.mxu1 %v14915_v34 }
0x8583   : > { %17384 = vmatprep.subr.mxu1 %v17808_v1 }
0x8584   : > { %17385 = vmatpush3.msra.mxu1 %v14914_v26 }
0x8585   : > { %17386 = vmatprep.subr.mxu1 %v17808_v1 }
0x8586   : > { %17387 = vmatpush3.msra.mxu1 %v14913_v31 }
0x8637   : > { %v14809_v15 = vpop.f32.mrf.mxu1 }
0x8638   : > { %v14813_v11 = vadd.f32 %v14809_v15, %v14580_v4  ;;  %v14997_v4 = vld [vmem:[%s18020_s12] sm:$0x1] }
0x8639   : > { %v17360_v12 = vpop.f32.mrf.mxu1 }
0x863a   : > { %v14815_v13 = vadd.f32 %v14814_v10, %v14813_v11 }
0x863c   : > { %v14816_v16 = vadd.f32 %v14815_v13, %v19771_v24  ;;  %v14835_v24 = vld [vmem:[%s20041_s5 + $0x8] sm:$0xff] }
0x863d   : > { %17366 = vmatpush3.msra.mxu0 %v14835_v24 }
0x863e   : > { %v14819_v17 = vsel %vm3229_vm9, %v14816_v16, 0.0  ;;  %17367 = vmatprep.subr.mxu0 %v17808_v1 }
0x863f   : > { %14820 = vadd.xlane.f32.xlu0 %v14819_v17  ;;  %17368 = vmatpush3.msra.mxu0 %v14834_v22 }
0x8640   : > { %17391 = vmatprep.subr.mxu0 %v17808_v1 }
0x86c8   : > { %v14821_v18 = vpop.xlane.xlu0 %14820 }
0x86c9   : > { %v14822_v19 = vmul.f32 0.03125, %v14821_v18 }
0x86cb   : > { %v14823_v20 = vsub.f32 %v14816_v16, %v14822_v19 }
0x86cd   : > { %v14824_v5 = vmul.f32 %v14823_v20, %v14823_v20 }
0x86cf   : > { %v14825_v6 = vsel %vm3229_vm9, %v14824_v5, 0.0 }
0x86d0   : > { %14826 = vadd.xlane.f32.xlu1 %v14825_v6 }
0x8759   : > { %v14827_v9 = vpop.xlane.xlu1 %14826 }
0x875a   : > { %v14828_v33 = vmul.f32 0.03125, %v14827_v9 }
0x875c   : > { %v14829_v28 = vadd.f32 1e-05, %v14828_v33 }
0x875e   : > { %17691 = vrsqrt.f32 %v14829_v28 }
0x876b   : > { %v17692_v36 = vpop.eup %17691 }
0x876c   : > { %v14831_v27 = vmul.f32 %v17692_v36, %v14823_v20 }
0x876e   : > { %v14832_v25 = vmul.f32 %v14831_v27, %v14817_v59 }
0x8770   : > { %v14833_v30 = vadd.f32 %v14832_v25, %v14818_v50 }
0x8772   : > { %17370 = vmatmul.mubr.msk.f32.vlgmr.msra.gmra.mxu0 %vm1443_vm3, %v14833_v30 }
0x8773   : > { %17399 = vmatprep.mubr.msk.f32.mxu0 %vm17809_vm0, %v17808_v1  ;;  %17392 = vmatpush3.msra.mxu0 %v15016_v47 }
0x8774   : > { %17393 = vmatprep.subr.mxu0 %v17808_v1 }
0x8775   : > { %17394 = vmatpush3.msra.mxu0 %v15015_v62 }
0x8776   : > { %17395 = vmatprep.subr.mxu0 %v17808_v1 }
0x8777   : > { %17396 = vmatpush3.msra.mxu0 %v15014_v39 }
0x8778   : > { %17397 = vmatprep.subr.mxu0 %v17808_v1 }
0x8779   : > { %17398 = vmatpush3.msra.mxu0 %v15013_v40 }
0x8832   : > { %v14908_v61 = vpop.f32.mrf.mxu0 }
0x8833   : > { %v14909_v35 = vadd.f32 %v14908_v61, %v14838_v51 }
0x8834   : > { %v17371_v53 = vpop.f32.mrf.mxu0 }
0x8835   : > { %v14912_v46 = vmax.f32 %v14909_v35, 0.0 }
0x8837   : > { %17389 = vmatmul.mubr.msk.f32.vlgmr.msra.gmra.mxu1 %vm1270_vm1, %v14912_v46 }
0x88f7   : > { %v14991_v54 = vpop.f32.mrf.mxu1 }
0x88f8   : > { %v14992_v43 = vadd.f32 %v14991_v54, %v14921_v37 }
0x88f9   : > { %v17390_v49 = vpop.f32.mrf.mxu1 }
0x88fa   : > { %v14995_v55 = vadd.f32 %v14992_v43, %v14833_v30 }
0x88fc   : > { %v14998_v56 = vsel %vm3229_vm9, %v14995_v55, 0.0 }
0x88fd   : > { %14999 = vadd.xlane.f32.xlu0 %v14998_v56 }
0x8986   : > { %v15000_v57 = vpop.xlane.xlu0 %14999 }
0x8987   : > { %v15001_v58 = vmul.f32 0.03125, %v15000_v57 }
0x8989   : > { %v15002_v60 = vsub.f32 %v14995_v55, %v15001_v58 }
0x898b   : > { %v15003_v44 = vmul.f32 %v15002_v60, %v15002_v60 }
0x898d   : > { %v15004_v48 = vsel %vm3229_vm9, %v15003_v44, 0.0 }
0x898e   : > { %15005 = vadd.xlane.f32.xlu1 %v15004_v48 }
0x8a17   : > { %v15006_v41 = vpop.xlane.xlu1 %15005 }
0x8a18   : > { %v15007_v63 = vmul.f32 0.03125, %v15006_v41 }
0x8a1a   : > { %v15008_v0 = vadd.f32 1e-05, %v15007_v63 }
0x8a1c   : > { %17693 = vrsqrt.f32 %v15008_v0 }
0x8a29   : > { %v17694_v14 = vpop.eup %17693 }
0x8a2a   : > { %v15010_v3 = vmul.f32 %v17694_v14, %v15002_v60 }
0x8a2c   : > { %v15011_v7 = vmul.f32 %v15010_v3, %v14996_v38 }
0x8a2e   : > { %v15012_v8 = vadd.f32 %v15011_v7, %v14997_v4 }
0x8a30   : > { %17400 = vmatmul.mubr.msk.f32.vlgmr.msra.gmra.mxu0 %vm1443_vm3, %v15012_v8 }
0x8af0   : > { %v15087_v15 = vpop.f32.mrf.mxu0 }
0x8af1   : > { %v15088_v10 = vadd.f32 %v15087_v15, %v15017_v45 }
0x8af2   : > { %v17401_v11 = vpop.f32.mrf.mxu0 }
0x8af3   : > { %15091 = vst [vmem:[%s18643_s29 + $0x4] sm:$0x1] %v15088_v10 }
0x8af4 PF: > { %s93_s7 = sadd.s32 1, %s17765_s7  }
0x8af5   : > { %p90_p4 = scmp.ge.s32.totalorder %s93_s7, 4  }
0x8af7   :  { %92 = sbr.rel (!%p90_p4) target bundleno = 91 (0x5b), region = 258 }

</bundles_post_ra>
